<compile_context>
chip_gen: v6e
topology: v6e:2x2x1
jax: 0.10.0
libtpu: 0.0.40
codegen_flags: <defaults>
</compile_context>

<pallas_src>
import math

import jax
import jax.numpy as jnp
from jax.experimental import pallas as pl
from jax.experimental.pallas import tpu as pltpu


_LAYER_WIDTHS = (1800, 800, 900, 800, 110, 350, 170)   # hidden widths of the module
_LANE = 128


def _round_up(n, m):
    return ((n + m - 1) // m) * m


def _gelu_erf(x):
    # torch.nn.GELU() default: exact erf formulation (VALU polynomial on TPU).
    return 0.5 * x * (1.0 + jax.lax.erf(x * (1.0 / math.sqrt(2.0))))


def _gelu_tanh(x):
    # tanh-approx GELU: the tanh lowers to the EUP slot, freeing VALU slots.
    c = math.sqrt(2.0 / math.pi)
    return 0.5 * x * (1.0 + jnp.tanh(c * (x + 0.044715 * (x * x * x))))


def _default_bf16_activations():
    """bf16 VALU/EUP exists on v6e/v7x; v5e keeps the f32 activation path."""
    try:
        kind = jax.devices()[0].device_kind.lower()
        return "v5" not in kind
    except Exception:  # pragma: no cover - be permissive off-TPU
        return True


def _choose_tb(batch, tb_max):
    tb = max(8, min(tb_max, _round_up(batch, 8)))
    # v7x megacore: once the batch is big, make sure there are >= 2 batch tiles
    # so the "parallel" grid axis can split across both TensorCores.
    if batch > 128 and _round_up(batch, tb) // tb < 2:
        tb = max(8, min(tb_max, _round_up((batch + 1) // 2, 8)))
    return tb


def _make_kernel(num_layers, gelu_fn, bf16_act):
    """Fused MLP kernel. refs = (x_in, w0, b0, w1, b1, ..., w7, b7, out)."""

    def kernel(x_ref, *rest):
        o_ref = rest[-1]
        params = rest[:-1]

        h = x_ref[...]                                   # bf16 (tb, 128)
        for e in range(num_layers):
            w = params[2 * e][...]                       # bf16 [in_pad, out_pad]
            b = params[2 * e + 1][...]                   # (1, out_pad)
            acc = jnp.dot(h, w, preferred_element_type=jnp.float32)
            if bf16_act:
                a = acc.astype(jnp.bfloat16) + b         # bf16 bias-add
            else:
                a = acc + b                              # f32 bias-add
            if e < num_layers - 1:
                a = gelu_fn(a)                           # bf16 or f32 GELU
                h = a.astype(jnp.bfloat16)
            else:
                o_ref[...] = jnp.tanh(a).astype(o_ref.dtype)

    return kernel


def noisy_generator_forward(z, x, weights, biases, *, tb_max=512,
                            use_tanh_gelu=True, bf16_activations=None):
    """Runs NoisyGenerator.forward(z, x) in one batch-tiled Pallas call.

    weights[i]: [in_i, out_i]  (transposed vs. PyTorch's [out, in]; semantics
                                identical to x @ W.T + b)
    biases[i] : [out_i]
    """
    assert tb_max % 8 == 0
    if bf16_activations is None:
        bf16_activations = _default_bf16_activations()

    num_layers = len(weights)
    batch = z.shape[0]
    nz, nx = z.shape[1], x.shape[1]
    nin = nz + nx
    out_dim = weights[-1].shape[1]
    assert weights[0].shape[0] == nin

    # ---- zero-pad all feature dims to lane-dense multiples of 128 ----------
    dims = [nin] + [w.shape[1] for w in weights]
    pdims = [_round_up(nin, _LANE)] + [_round_up(d, _LANE) for d in dims[1:-1]] + [out_dim]

    bias_dtype = jnp.bfloat16 if bf16_activations else jnp.float32
    flat_params = []
    for i, (w, b) in enumerate(zip(weights, biases)):
        wp = jnp.pad(w.astype(jnp.bfloat16),
                     ((0, pdims[i] - w.shape[0]), (0, pdims[i + 1] - w.shape[1])))
        bp = jnp.pad(b.astype(bias_dtype), (0, pdims[i + 1] - b.shape[0])).reshape(1, -1)
        flat_params += [wp, bp]

    # ---- concat(z, x) in the wrapper, pad to (batch_pad, 128) bf16 ----------
    inp = jnp.concatenate([z, x], axis=1).astype(jnp.bfloat16)

    tb = _choose_tb(batch, tb_max)
    padded = _round_up(batch, tb)
    inp = jnp.pad(inp, ((0, padded - batch), (0, pdims[0] - nin)))
    grid = (padded // tb,)

    in_specs = [pl.BlockSpec((tb, pdims[0]), lambda i: (i, 0))]
    # Untiled, single-buffered VMEM residents: no 2x pipeline copies of weights.
    in_specs += [pl.BlockSpec(memory_space=pltpu.MemorySpace.VMEM)
                 for _ in flat_params]
    # NOTE: 8-wide f32 output uses masked lane stores (vst.msk); harmless at
    # this width (a lane-dense repack only pays off for store-bound shapes).
    out_specs = pl.BlockSpec((tb, out_dim), lambda i: (i, 0))

    kernel = _make_kernel(num_layers,
                          _gelu_tanh if use_tanh_gelu else _gelu_erf,
                          bf16_activations)

    out = pl.pallas_call(
        kernel,
        out_shape=jax.ShapeDtypeStruct((padded, out_dim), jnp.float32),
        grid=grid,
        in_specs=in_specs,
        out_specs=out_specs,
        compiler_params=pltpu.CompilerParams(
            # Batch tiles are independent -> megacore split on v7x's 2 TCs.
            dimension_semantics=("parallel",),
            # Resident bf16 weights (~7.7 MiB padded, single-buffered) +
            # tb<=512 activations fit comfortably under v7x's 64 MiB VMEM;
            # same budget is plenty on v5e/v6e.
            vmem_limit_bytes=48 * 1024 * 1024,
        ),
    )(inp, *flat_params)

    return out[:batch]


def init_params(key, noise_vector_size=3, input_size=8, output_size=8):
    """Deterministic synthetic params matching the module's Linear shapes."""
    dims = [noise_vector_size + input_size, *_LAYER_WIDTHS, output_size]
    weights, biases = [], []
    for i in range(len(dims) - 1):
        key, kw, kb = jax.random.split(key, 3)
        fan_in, fan_out = dims[i], dims[i + 1]
        bound = 1.0 / math.sqrt(fan_in)
        # stored as [in, out] (transposed relative to torch's [out, in])
        weights.append(jax.random.uniform(kw, (fan_in, fan_out), jnp.float32, -bound, bound))
        biases.append(jax.random.uniform(kb, (fan_out,), jnp.float32, -bound, bound))
    return weights, biases


def reference_forward(z, x, weights, biases, *, use_tanh_gelu=True,
                      bf16_activations=True):
    """Pure-JAX reference with the same precision recipe as the kernel."""
    gelu = _gelu_tanh if use_tanh_gelu else _gelu_erf
    num_layers = len(weights)
    h = jnp.concatenate([z, x], axis=1).astype(jnp.bfloat16)
    for e, (w, b) in enumerate(zip(weights, biases)):
        acc = jnp.dot(h, w.astype(jnp.bfloat16), preferred_element_type=jnp.float32)
        if bf16_activations:
            a = acc.astype(jnp.bfloat16) + b.astype(jnp.bfloat16).reshape(1, -1)
        else:
            a = acc + b.reshape(1, -1)
        if e < num_layers - 1:
            a = gelu(a)
            h = a.astype(jnp.bfloat16)
        else:
            return jnp.tanh(a).astype(jnp.float32)


if __name__ == "__main__":
    # Module config: noise_vector_size=3, input_size=8, output_size=8.
    # Small demo: batch=40 with tb_max=16 exercises a 3-step grid + the
    # batch-padding path (40 -> 48 rows, result sliced back).
    # TODO(synk): torch.nn.GELU() default is exact erf; tanh-approx GELU is
    # used by default here (use_tanh_gelu=False restores erf parity).
    noise_vector_size, input_size, output_size = 3, 8, 8
    batch = 40

    key = jax.random.PRNGKey(0)
    key, kz, kx = jax.random.split(key, 3)
    z = jax.random.normal(kz, (batch, noise_vector_size), dtype=jnp.float32)
    x = jax.random.normal(kx, (batch, input_size), dtype=jnp.float32)
    weights, biases = init_params(key, noise_vector_size, input_size, output_size)

    bf16_act = _default_bf16_activations()
    out = noisy_generator_forward(z, x, weights, biases, tb_max=16,
                                  bf16_activations=bf16_act)
    out = jax.block_until_ready(out)

    ref = reference_forward(z, x, weights, biases, bf16_activations=bf16_act)
    assert out.shape == (batch, output_size)
    assert jnp.allclose(out, ref, atol=2e-2, rtol=2e-2), "Pallas output mismatch"

    print("KERNEL_OK")
</pallas_src>

<mosaic_0001>
module attributes {stable_mosaic.version = 11 : i64} {
  func.func @kernel(%arg0: i32, %arg1: memref<16x128xbf16, #tpu.memory_space<vmem>>, %arg2: memref<128x1920xbf16, #tpu.memory_space<vmem>>, %arg3: memref<1x1920xbf16, #tpu.memory_space<vmem>>, %arg4: memref<1920x896xbf16, #tpu.memory_space<vmem>>, %arg5: memref<1x896xbf16, #tpu.memory_space<vmem>>, %arg6: memref<896x1024xbf16, #tpu.memory_space<vmem>>, %arg7: memref<1x1024xbf16, #tpu.memory_space<vmem>>, %arg8: memref<1024x896xbf16, #tpu.memory_space<vmem>>, %arg9: memref<1x896xbf16, #tpu.memory_space<vmem>>, %arg10: memref<896x128xbf16, #tpu.memory_space<vmem>>, %arg11: memref<1x128xbf16, #tpu.memory_space<vmem>>, %arg12: memref<128x384xbf16, #tpu.memory_space<vmem>>, %arg13: memref<1x384xbf16, #tpu.memory_space<vmem>>, %arg14: memref<384x256xbf16, #tpu.memory_space<vmem>>, %arg15: memref<1x256xbf16, #tpu.memory_space<vmem>>, %arg16: memref<256x8xbf16, #tpu.memory_space<vmem>>, %arg17: memref<1x8xbf16, #tpu.memory_space<vmem>>, %arg18: memref<16x8xf32, #tpu.memory_space<vmem>>) attributes {dimension_semantics = [#tpu.dimension_semantics<parallel>], iteration_bounds = array<i64: 3>, scalar_prefetch = 0 : i64, scratch_operands = 0 : i64, tpu.core_type = #tpu.core_type<tc>, window_params = [{transform_indices = @transform_0, window_bounds = array<i64: 16, 128>}, {pipeline_mode = #tpu.pipeline_mode<synchronous>, transform_indices = @transform_1, window_bounds = array<i64: 128, 1920>}, {pipeline_mode = #tpu.pipeline_mode<synchronous>, transform_indices = @transform_2, window_bounds = array<i64: 1, 1920>}, {pipeline_mode = #tpu.pipeline_mode<synchronous>, transform_indices = @transform_3, window_bounds = array<i64: 1920, 896>}, {pipeline_mode = #tpu.pipeline_mode<synchronous>, transform_indices = @transform_4, window_bounds = array<i64: 1, 896>}, {pipeline_mode = #tpu.pipeline_mode<synchronous>, transform_indices = @transform_5, window_bounds = array<i64: 896, 1024>}, {pipeline_mode = #tpu.pipeline_mode<synchronous>, transform_indices = @transform_6, window_bounds = array<i64: 1, 1024>}, {pipeline_mode = #tpu.pipeline_mode<synchronous>, transform_indices = @transform_7, window_bounds = array<i64: 1024, 896>}, {pipeline_mode = #tpu.pipeline_mode<synchronous>, transform_indices = @transform_8, window_bounds = array<i64: 1, 896>}, {pipeline_mode = #tpu.pipeline_mode<synchronous>, transform_indices = @transform_9, window_bounds = array<i64: 896, 128>}, {pipeline_mode = #tpu.pipeline_mode<synchronous>, transform_indices = @transform_10, window_bounds = array<i64: 1, 128>}, {pipeline_mode = #tpu.pipeline_mode<synchronous>, transform_indices = @transform_11, window_bounds = array<i64: 128, 384>}, {pipeline_mode = #tpu.pipeline_mode<synchronous>, transform_indices = @transform_12, window_bounds = array<i64: 1, 384>}, {pipeline_mode = #tpu.pipeline_mode<synchronous>, transform_indices = @transform_13, window_bounds = array<i64: 384, 256>}, {pipeline_mode = #tpu.pipeline_mode<synchronous>, transform_indices = @transform_14, window_bounds = array<i64: 1, 256>}, {pipeline_mode = #tpu.pipeline_mode<synchronous>, transform_indices = @transform_15, window_bounds = array<i64: 256, 8>}, {pipeline_mode = #tpu.pipeline_mode<synchronous>, transform_indices = @transform_16, window_bounds = array<i64: 1, 8>}, {transform_indices = @transform_17, window_bounds = array<i64: 16, 8>}]} {
    %c0 = arith.constant 0 : index
    %c0_0 = arith.constant 0 : index
    %0 = vector.load %arg1[%c0, %c0_0] : memref<16x128xbf16, #tpu.memory_space<vmem>>, vector<16x128xbf16>
    %c0_1 = arith.constant 0 : index
    %c0_2 = arith.constant 0 : index
    %1 = vector.load %arg2[%c0_1, %c0_2] : memref<128x1920xbf16, #tpu.memory_space<vmem>>, vector<128x1920xbf16>
    %c0_3 = arith.constant 0 : index
    %c0_4 = arith.constant 0 : index
    %2 = vector.load %arg3[%c0_3, %c0_4] : memref<1x1920xbf16, #tpu.memory_space<vmem>>, vector<1x1920xbf16>
    %cst = arith.constant dense<0.000000e+00> : vector<16x1920xf32>
    %3 = tpu.matmul %0, %1, %cst {dimension_numbers = #tpu.dot_dimension_numbers<[1], [0], [0], [1], [0, 0, 1, 1], [], []>} : vector<16x128xbf16>, vector<128x1920xbf16>, vector<16x1920xf32> -> vector<16x1920xf32>
    %4 = arith.truncf %3 : vector<16x1920xf32> to vector<16x1920xbf16>
    %5 = vector.broadcast %2 : vector<1x1920xbf16> to vector<16x1920xbf16>
    %6 = arith.addf %4, %5 : vector<16x1920xbf16>
    %cst_5 = arith.constant 5.000000e-01 : bf16
    %7 = vector.broadcast %cst_5 : bf16 to vector<16x1920xbf16>
    %8 = arith.mulf %7, %6 : vector<16x1920xbf16>
    %9 = arith.mulf %6, %6 : vector<16x1920xbf16>
    %10 = arith.mulf %9, %6 : vector<16x1920xbf16>
    %cst_6 = arith.constant 4.467770e-02 : bf16
    %11 = vector.broadcast %cst_6 : bf16 to vector<16x1920xbf16>
    %12 = arith.mulf %11, %10 : vector<16x1920xbf16>
    %13 = arith.addf %6, %12 : vector<16x1920xbf16>
    %cst_7 = arith.constant 7.968750e-01 : bf16
    %14 = vector.broadcast %cst_7 : bf16 to vector<16x1920xbf16>
    %15 = arith.mulf %14, %13 : vector<16x1920xbf16>
    %16 = math.tanh %15 : vector<16x1920xbf16>
    %cst_8 = arith.constant 1.000000e+00 : bf16
    %17 = vector.broadcast %cst_8 : bf16 to vector<16x1920xbf16>
    %18 = arith.addf %17, %16 : vector<16x1920xbf16>
    %19 = arith.mulf %8, %18 : vector<16x1920xbf16>
    %c0_9 = arith.constant 0 : index
    %c0_10 = arith.constant 0 : index
    %20 = vector.load %arg4[%c0_9, %c0_10] : memref<1920x896xbf16, #tpu.memory_space<vmem>>, vector<1920x896xbf16>
    %c0_11 = arith.constant 0 : index
    %c0_12 = arith.constant 0 : index
    %21 = vector.load %arg5[%c0_11, %c0_12] : memref<1x896xbf16, #tpu.memory_space<vmem>>, vector<1x896xbf16>
    %cst_13 = arith.constant dense<0.000000e+00> : vector<16x896xf32>
    %22 = tpu.matmul %19, %20, %cst_13 {dimension_numbers = #tpu.dot_dimension_numbers<[1], [0], [0], [1], [0, 0, 1, 1], [], []>} : vector<16x1920xbf16>, vector<1920x896xbf16>, vector<16x896xf32> -> vector<16x896xf32>
    %23 = arith.truncf %22 : vector<16x896xf32> to vector<16x896xbf16>
    %24 = vector.broadcast %21 : vector<1x896xbf16> to vector<16x896xbf16>
    %25 = arith.addf %23, %24 : vector<16x896xbf16>
    %cst_14 = arith.constant 5.000000e-01 : bf16
    %26 = vector.broadcast %cst_14 : bf16 to vector<16x896xbf16>
    %27 = arith.mulf %26, %25 : vector<16x896xbf16>
    %28 = arith.mulf %25, %25 : vector<16x896xbf16>
    %29 = arith.mulf %28, %25 : vector<16x896xbf16>
    %cst_15 = arith.constant 4.467770e-02 : bf16
    %30 = vector.broadcast %cst_15 : bf16 to vector<16x896xbf16>
    %31 = arith.mulf %30, %29 : vector<16x896xbf16>
    %32 = arith.addf %25, %31 : vector<16x896xbf16>
    %cst_16 = arith.constant 7.968750e-01 : bf16
    %33 = vector.broadcast %cst_16 : bf16 to vector<16x896xbf16>
    %34 = arith.mulf %33, %32 : vector<16x896xbf16>
    %35 = math.tanh %34 : vector<16x896xbf16>
    %cst_17 = arith.constant 1.000000e+00 : bf16
    %36 = vector.broadcast %cst_17 : bf16 to vector<16x896xbf16>
    %37 = arith.addf %36, %35 : vector<16x896xbf16>
    %38 = arith.mulf %27, %37 : vector<16x896xbf16>
    %c0_18 = arith.constant 0 : index
    %c0_19 = arith.constant 0 : index
    %39 = vector.load %arg6[%c0_18, %c0_19] : memref<896x1024xbf16, #tpu.memory_space<vmem>>, vector<896x1024xbf16>
    %c0_20 = arith.constant 0 : index
    %c0_21 = arith.constant 0 : index
    %40 = vector.load %arg7[%c0_20, %c0_21] : memref<1x1024xbf16, #tpu.memory_space<vmem>>, vector<1x1024xbf16>
    %cst_22 = arith.constant dense<0.000000e+00> : vector<16x1024xf32>
    %41 = tpu.matmul %38, %39, %cst_22 {dimension_numbers = #tpu.dot_dimension_numbers<[1], [0], [0], [1], [0, 0, 1, 1], [], []>} : vector<16x896xbf16>, vector<896x1024xbf16>, vector<16x1024xf32> -> vector<16x1024xf32>
    %42 = arith.truncf %41 : vector<16x1024xf32> to vector<16x1024xbf16>
    %43 = vector.broadcast %40 : vector<1x1024xbf16> to vector<16x1024xbf16>
    %44 = arith.addf %42, %43 : vector<16x1024xbf16>
    %cst_23 = arith.constant 5.000000e-01 : bf16
    %45 = vector.broadcast %cst_23 : bf16 to vector<16x1024xbf16>
    %46 = arith.mulf %45, %44 : vector<16x1024xbf16>
    %47 = arith.mulf %44, %44 : vector<16x1024xbf16>
    %48 = arith.mulf %47, %44 : vector<16x1024xbf16>
    %cst_24 = arith.constant 4.467770e-02 : bf16
    %49 = vector.broadcast %cst_24 : bf16 to vector<16x1024xbf16>
    %50 = arith.mulf %49, %48 : vector<16x1024xbf16>
    %51 = arith.addf %44, %50 : vector<16x1024xbf16>
    %cst_25 = arith.constant 7.968750e-01 : bf16
    %52 = vector.broadcast %cst_25 : bf16 to vector<16x1024xbf16>
    %53 = arith.mulf %52, %51 : vector<16x1024xbf16>
    %54 = math.tanh %53 : vector<16x1024xbf16>
    %cst_26 = arith.constant 1.000000e+00 : bf16
    %55 = vector.broadcast %cst_26 : bf16 to vector<16x1024xbf16>
    %56 = arith.addf %55, %54 : vector<16x1024xbf16>
    %57 = arith.mulf %46, %56 : vector<16x1024xbf16>
    %c0_27 = arith.constant 0 : index
    %c0_28 = arith.constant 0 : index
    %58 = vector.load %arg8[%c0_27, %c0_28] : memref<1024x896xbf16, #tpu.memory_space<vmem>>, vector<1024x896xbf16>
    %c0_29 = arith.constant 0 : index
    %c0_30 = arith.constant 0 : index
    %59 = vector.load %arg9[%c0_29, %c0_30] : memref<1x896xbf16, #tpu.memory_space<vmem>>, vector<1x896xbf16>
    %cst_31 = arith.constant dense<0.000000e+00> : vector<16x896xf32>
    %60 = tpu.matmul %57, %58, %cst_31 {dimension_numbers = #tpu.dot_dimension_numbers<[1], [0], [0], [1], [0, 0, 1, 1], [], []>} : vector<16x1024xbf16>, vector<1024x896xbf16>, vector<16x896xf32> -> vector<16x896xf32>
    %61 = arith.truncf %60 : vector<16x896xf32> to vector<16x896xbf16>
    %62 = vector.broadcast %59 : vector<1x896xbf16> to vector<16x896xbf16>
    %63 = arith.addf %61, %62 : vector<16x896xbf16>
    %cst_32 = arith.constant 5.000000e-01 : bf16
    %64 = vector.broadcast %cst_32 : bf16 to vector<16x896xbf16>
    %65 = arith.mulf %64, %63 : vector<16x896xbf16>
    %66 = arith.mulf %63, %63 : vector<16x896xbf16>
    %67 = arith.mulf %66, %63 : vector<16x896xbf16>
    %cst_33 = arith.constant 4.467770e-02 : bf16
    %68 = vector.broadcast %cst_33 : bf16 to vector<16x896xbf16>
    %69 = arith.mulf %68, %67 : vector<16x896xbf16>
    %70 = arith.addf %63, %69 : vector<16x896xbf16>
    %cst_34 = arith.constant 7.968750e-01 : bf16
    %71 = vector.broadcast %cst_34 : bf16 to vector<16x896xbf16>
    %72 = arith.mulf %71, %70 : vector<16x896xbf16>
    %73 = math.tanh %72 : vector<16x896xbf16>
    %cst_35 = arith.constant 1.000000e+00 : bf16
    %74 = vector.broadcast %cst_35 : bf16 to vector<16x896xbf16>
    %75 = arith.addf %74, %73 : vector<16x896xbf16>
    %76 = arith.mulf %65, %75 : vector<16x896xbf16>
    %c0_36 = arith.constant 0 : index
    %c0_37 = arith.constant 0 : index
    %77 = vector.load %arg10[%c0_36, %c0_37] : memref<896x128xbf16, #tpu.memory_space<vmem>>, vector<896x128xbf16>
    %c0_38 = arith.constant 0 : index
    %c0_39 = arith.constant 0 : index
    %78 = vector.load %arg11[%c0_38, %c0_39] : memref<1x128xbf16, #tpu.memory_space<vmem>>, vector<1x128xbf16>
    %cst_40 = arith.constant dense<0.000000e+00> : vector<16x128xf32>
    %79 = tpu.matmul %76, %77, %cst_40 {dimension_numbers = #tpu.dot_dimension_numbers<[1], [0], [0], [1], [0, 0, 1, 1], [], []>} : vector<16x896xbf16>, vector<896x128xbf16>, vector<16x128xf32> -> vector<16x128xf32>
    %80 = arith.truncf %79 : vector<16x128xf32> to vector<16x128xbf16>
    %81 = vector.broadcast %78 : vector<1x128xbf16> to vector<16x128xbf16>
    %82 = arith.addf %80, %81 : vector<16x128xbf16>
    %cst_41 = arith.constant 5.000000e-01 : bf16
    %83 = vector.broadcast %cst_41 : bf16 to vector<16x128xbf16>
    %84 = arith.mulf %83, %82 : vector<16x128xbf16>
    %85 = arith.mulf %82, %82 : vector<16x128xbf16>
    %86 = arith.mulf %85, %82 : vector<16x128xbf16>
    %cst_42 = arith.constant 4.467770e-02 : bf16
    %87 = vector.broadcast %cst_42 : bf16 to vector<16x128xbf16>
    %88 = arith.mulf %87, %86 : vector<16x128xbf16>
    %89 = arith.addf %82, %88 : vector<16x128xbf16>
    %cst_43 = arith.constant 7.968750e-01 : bf16
    %90 = vector.broadcast %cst_43 : bf16 to vector<16x128xbf16>
    %91 = arith.mulf %90, %89 : vector<16x128xbf16>
    %92 = math.tanh %91 : vector<16x128xbf16>
    %cst_44 = arith.constant 1.000000e+00 : bf16
    %93 = vector.broadcast %cst_44 : bf16 to vector<16x128xbf16>
    %94 = arith.addf %93, %92 : vector<16x128xbf16>
    %95 = arith.mulf %84, %94 : vector<16x128xbf16>
    %c0_45 = arith.constant 0 : index
    %c0_46 = arith.constant 0 : index
    %96 = vector.load %arg12[%c0_45, %c0_46] : memref<128x384xbf16, #tpu.memory_space<vmem>>, vector<128x384xbf16>
    %c0_47 = arith.constant 0 : index
    %c0_48 = arith.constant 0 : index
    %97 = vector.load %arg13[%c0_47, %c0_48] : memref<1x384xbf16, #tpu.memory_space<vmem>>, vector<1x384xbf16>
    %cst_49 = arith.constant dense<0.000000e+00> : vector<16x384xf32>
    %98 = tpu.matmul %95, %96, %cst_49 {dimension_numbers = #tpu.dot_dimension_numbers<[1], [0], [0], [1], [0, 0, 1, 1], [], []>} : vector<16x128xbf16>, vector<128x384xbf16>, vector<16x384xf32> -> vector<16x384xf32>
    %99 = arith.truncf %98 : vector<16x384xf32> to vector<16x384xbf16>
    %100 = vector.broadcast %97 : vector<1x384xbf16> to vector<16x384xbf16>
    %101 = arith.addf %99, %100 : vector<16x384xbf16>
    %cst_50 = arith.constant 5.000000e-01 : bf16
    %102 = vector.broadcast %cst_50 : bf16 to vector<16x384xbf16>
    %103 = arith.mulf %102, %101 : vector<16x384xbf16>
    %104 = arith.mulf %101, %101 : vector<16x384xbf16>
    %105 = arith.mulf %104, %101 : vector<16x384xbf16>
    %cst_51 = arith.constant 4.467770e-02 : bf16
    %106 = vector.broadcast %cst_51 : bf16 to vector<16x384xbf16>
    %107 = arith.mulf %106, %105 : vector<16x384xbf16>
    %108 = arith.addf %101, %107 : vector<16x384xbf16>
    %cst_52 = arith.constant 7.968750e-01 : bf16
    %109 = vector.broadcast %cst_52 : bf16 to vector<16x384xbf16>
    %110 = arith.mulf %109, %108 : vector<16x384xbf16>
    %111 = math.tanh %110 : vector<16x384xbf16>
    %cst_53 = arith.constant 1.000000e+00 : bf16
    %112 = vector.broadcast %cst_53 : bf16 to vector<16x384xbf16>
    %113 = arith.addf %112, %111 : vector<16x384xbf16>
    %114 = arith.mulf %103, %113 : vector<16x384xbf16>
    %c0_54 = arith.constant 0 : index
    %c0_55 = arith.constant 0 : index
    %115 = vector.load %arg14[%c0_54, %c0_55] : memref<384x256xbf16, #tpu.memory_space<vmem>>, vector<384x256xbf16>
    %c0_56 = arith.constant 0 : index
    %c0_57 = arith.constant 0 : index
    %116 = vector.load %arg15[%c0_56, %c0_57] : memref<1x256xbf16, #tpu.memory_space<vmem>>, vector<1x256xbf16>
    %cst_58 = arith.constant dense<0.000000e+00> : vector<16x256xf32>
    %117 = tpu.matmul %114, %115, %cst_58 {dimension_numbers = #tpu.dot_dimension_numbers<[1], [0], [0], [1], [0, 0, 1, 1], [], []>} : vector<16x384xbf16>, vector<384x256xbf16>, vector<16x256xf32> -> vector<16x256xf32>
    %118 = arith.truncf %117 : vector<16x256xf32> to vector<16x256xbf16>
    %119 = vector.broadcast %116 : vector<1x256xbf16> to vector<16x256xbf16>
    %120 = arith.addf %118, %119 : vector<16x256xbf16>
    %cst_59 = arith.constant 5.000000e-01 : bf16
    %121 = vector.broadcast %cst_59 : bf16 to vector<16x256xbf16>
    %122 = arith.mulf %121, %120 : vector<16x256xbf16>
    %123 = arith.mulf %120, %120 : vector<16x256xbf16>
    %124 = arith.mulf %123, %120 : vector<16x256xbf16>
    %cst_60 = arith.constant 4.467770e-02 : bf16
    %125 = vector.broadcast %cst_60 : bf16 to vector<16x256xbf16>
    %126 = arith.mulf %125, %124 : vector<16x256xbf16>
    %127 = arith.addf %120, %126 : vector<16x256xbf16>
    %cst_61 = arith.constant 7.968750e-01 : bf16
    %128 = vector.broadcast %cst_61 : bf16 to vector<16x256xbf16>
    %129 = arith.mulf %128, %127 : vector<16x256xbf16>
    %130 = math.tanh %129 : vector<16x256xbf16>
    %cst_62 = arith.constant 1.000000e+00 : bf16
    %131 = vector.broadcast %cst_62 : bf16 to vector<16x256xbf16>
    %132 = arith.addf %131, %130 : vector<16x256xbf16>
    %133 = arith.mulf %122, %132 : vector<16x256xbf16>
    %c0_63 = arith.constant 0 : index
    %c0_64 = arith.constant 0 : index
    %134 = vector.load %arg16[%c0_63, %c0_64] : memref<256x8xbf16, #tpu.memory_space<vmem>>, vector<256x8xbf16>
    %c0_65 = arith.constant 0 : index
    %c0_66 = arith.constant 0 : index
    %135 = vector.load %arg17[%c0_65, %c0_66] : memref<1x8xbf16, #tpu.memory_space<vmem>>, vector<1x8xbf16>
    %cst_67 = arith.constant dense<0.000000e+00> : vector<16x8xf32>
    %136 = tpu.matmul %133, %134, %cst_67 {dimension_numbers = #tpu.dot_dimension_numbers<[1], [0], [0], [1], [0, 0, 1, 1], [], []>} : vector<16x256xbf16>, vector<256x8xbf16>, vector<16x8xf32> -> vector<16x8xf32>
    %137 = arith.truncf %136 : vector<16x8xf32> to vector<16x8xbf16>
    %138 = vector.broadcast %135 : vector<1x8xbf16> to vector<16x8xbf16>
    %139 = arith.addf %137, %138 : vector<16x8xbf16>
    %140 = math.tanh %139 : vector<16x8xbf16>
    %141 = arith.extf %140 : vector<16x8xbf16> to vector<16x8xf32>
    %c0_68 = arith.constant 0 : index
    %c0_69 = arith.constant 0 : index
    %142 = vector.load %arg18[%c0_68, %c0_69] : memref<16x8xf32, #tpu.memory_space<vmem>>, vector<16x8xf32>
    tpu.vector_store %arg18[%c0_68, %c0_69], %141 {strides = array<i32>} : memref<16x8xf32, #tpu.memory_space<vmem>>, vector<16x8xf32>,
    return
  }
  func.func @transform_0(%arg0: i32) -> (i32, i32) {
    %c0_i32 = arith.constant 0 : i32
    %c0_i32_0 = arith.constant 0 : i32
    return %arg0, %c0_i32 : i32, i32
  }
  func.func @transform_1(%arg0: i32) -> (i32, i32) {
    %c0_i32 = arith.constant 0 : i32
    %c0_i32_0 = arith.constant 0 : i32
    %c0_i32_1 = arith.constant 0 : i32
    return %c0_i32, %c0_i32_0 : i32, i32
  }
  func.func @transform_2(%arg0: i32) -> (i32, i32) {
    %c0_i32 = arith.constant 0 : i32
    %c0_i32_0 = arith.constant 0 : i32
    %c0_i32_1 = arith.constant 0 : i32
    return %c0_i32, %c0_i32_0 : i32, i32
  }
  func.func @transform_3(%arg0: i32) -> (i32, i32) {
    %c0_i32 = arith.constant 0 : i32
    %c0_i32_0 = arith.constant 0 : i32
    %c0_i32_1 = arith.constant 0 : i32
    return %c0_i32, %c0_i32_0 : i32, i32
  }
  func.func @transform_4(%arg0: i32) -> (i32, i32) {
    %c0_i32 = arith.constant 0 : i32
    %c0_i32_0 = arith.constant 0 : i32
    %c0_i32_1 = arith.constant 0 : i32
    return %c0_i32, %c0_i32_0 : i32, i32
  }
  func.func @transform_5(%arg0: i32) -> (i32, i32) {
    %c0_i32 = arith.constant 0 : i32
    %c0_i32_0 = arith.constant 0 : i32
    %c0_i32_1 = arith.constant 0 : i32
    return %c0_i32, %c0_i32_0 : i32, i32
  }
  func.func @transform_6(%arg0: i32) -> (i32, i32) {
    %c0_i32 = arith.constant 0 : i32
    %c0_i32_0 = arith.constant 0 : i32
    %c0_i32_1 = arith.constant 0 : i32
    return %c0_i32, %c0_i32_0 : i32, i32
  }
  func.func @transform_7(%arg0: i32) -> (i32, i32) {
    %c0_i32 = arith.constant 0 : i32
    %c0_i32_0 = arith.constant 0 : i32
    %c0_i32_1 = arith.constant 0 : i32
    return %c0_i32, %c0_i32_0 : i32, i32
  }
  func.func @transform_8(%arg0: i32) -> (i32, i32) {
    %c0_i32 = arith.constant 0 : i32
    %c0_i32_0 = arith.constant 0 : i32
    %c0_i32_1 = arith.constant 0 : i32
    return %c0_i32, %c0_i32_0 : i32, i32
  }
  func.func @transform_9(%arg0: i32) -> (i32, i32) {
    %c0_i32 = arith.constant 0 : i32
    %c0_i32_0 = arith.constant 0 : i32
    %c0_i32_1 = arith.constant 0 : i32
    return %c0_i32, %c0_i32_0 : i32, i32
  }
  func.func @transform_10(%arg0: i32) -> (i32, i32) {
    %c0_i32 = arith.constant 0 : i32
    %c0_i32_0 = arith.constant 0 : i32
    %c0_i32_1 = arith.constant 0 : i32
    return %c0_i32, %c0_i32_0 : i32, i32
  }
  func.func @transform_11(%arg0: i32) -> (i32, i32) {
    %c0_i32 = arith.constant 0 : i32
    %c0_i32_0 = arith.constant 0 : i32
    %c0_i32_1 = arith.constant 0 : i32
    return %c0_i32, %c0_i32_0 : i32, i32
  }
  func.func @transform_12(%arg0: i32) -> (i32, i32) {
    %c0_i32 = arith.constant 0 : i32
    %c0_i32_0 = arith.constant 0 : i32
    %c0_i32_1 = arith.constant 0 : i32
    return %c0_i32, %c0_i32_0 : i32, i32
  }
  func.func @transform_13(%arg0: i32) -> (i32, i32) {
    %c0_i32 = arith.constant 0 : i32
    %c0_i32_0 = arith.constant 0 : i32
    %c0_i32_1 = arith.constant 0 : i32
    return %c0_i32, %c0_i32_0 : i32, i32
  }
  func.func @transform_14(%arg0: i32) -> (i32, i32) {
    %c0_i32 = arith.constant 0 : i32
    %c0_i32_0 = arith.constant 0 : i32
    %c0_i32_1 = arith.constant 0 : i32
    return %c0_i32, %c0_i32_0 : i32, i32
  }
  func.func @transform_15(%arg0: i32) -> (i32, i32) {
    %c0_i32 = arith.constant 0 : i32
    %c0_i32_0 = arith.constant 0 : i32
    %c0_i32_1 = arith.constant 0 : i32
    return %c0_i32, %c0_i32_0 : i32, i32
  }
  func.func @transform_16(%arg0: i32) -> (i32, i32) {
    %c0_i32 = arith.constant 0 : i32
    %c0_i32_0 = arith.constant 0 : i32
    %c0_i32_1 = arith.constant 0 : i32
    return %c0_i32, %c0_i32_0 : i32, i32
  }
  func.func @transform_17(%arg0: i32) -> (i32, i32) {
    %c0_i32 = arith.constant 0 : i32
    %c0_i32_0 = arith.constant 0 : i32
    return %arg0, %c0_i32 : i32, i32
  }
}

</mosaic_0001>

<bundles_post_ra>
// kernel: tpu_custom_call.1
= control target key start
LH: loop header
LB: loop body
LE: loop exit
PB: predicated region body
PF: predicated region fallthrough
CT: control target
= control target key end

     0   :  { %s24914_s0 = inlined_call_operand.hbm [shape: bf16[48,128], index: 0, kind: input, shape index: {}]   ;;  %s24915_s1 = inlined_call_operand.hbm [shape: bf16[128,1920], index: 1, kind: input, shape index: {}]   ;;  %s24916_s2 = inlined_call_operand.hbm [shape: bf16[1,1920], index: 2, kind: input, shape index: {}]   ;;  %s24917_s3 = inlined_call_operand.hbm [shape: bf16[1920,896], index: 3, kind: input, shape index: {}]   ;;  %s24918_s4 = inlined_call_operand.hbm [shape: bf16[1,896], index: 4, kind: input, shape index: {}]   ;;  %s24919_s5 = inlined_call_operand.hbm [shape: bf16[896,1024], index: 5, kind: input, shape index: {}]   ;;  %s24920_s6 = inlined_call_operand.hbm [shape: bf16[1,1024], index: 6, kind: input, shape index: {}]   ;;  %s24921_s7 = inlined_call_operand.hbm [shape: bf16[1024,896], index: 7, kind: input, shape index: {}]   ;;  %s24922_s8 = inlined_call_operand.hbm [shape: bf16[1,896], index: 8, kind: input, shape index: {}]   ;;  %s24923_s9 = inlined_call_operand.hbm [shape: bf16[896,128], index: 9, kind: input, shape index: {}]   ;;  %s24924_s10 = inlined_call_operand.hbm [shape: bf16[1,128], index: 10, kind: input, shape index: {}]   ;;  %s24925_s11 = inlined_call_operand.hbm [shape: bf16[128,384], index: 11, kind: input, shape index: {}]   ;;  %s24926_s12 = inlined_call_operand.hbm [shape: bf16[1,384], index: 12, kind: input, shape index: {}]   ;;  %s24927_s13 = inlined_call_operand.hbm [shape: bf16[384,256], index: 13, kind: input, shape index: {}]   ;;  %s24928_s14 = inlined_call_operand.hbm [shape: bf16[1,256], index: 14, kind: input, shape index: {}]   ;;  %s24929_s15 = inlined_call_operand.vmem [shape: bf16[256,8], index: 15, kind: input, shape index: {}]   ;;  %s24930_s16 = inlined_call_operand.hbm [shape: bf16[1,8], index: 16, kind: input, shape index: {}]   ;;  %s24931_s17 = inlined_call_operand.vmem [shape: f32[48,8], index: 17, kind: output, shape index: {}]  }
   0x1   :  { %24953 = sst [smem:[#allocation44_spill]] %s24914_s0 }
   0x2   :  { %24954 = sst [smem:[#allocation45_spill]] %s24915_s1 }
   0x3   :  { %24955 = sst [smem:[#allocation46_spill]] %s24916_s2 }
   0x4   :  { %24956 = sst [smem:[#allocation47_spill]] %s24917_s3 }
   0x5   :  { %24957 = sst [smem:[#allocation48_spill]] %s24918_s4 }
   0x6   :  { %24958 = sst [smem:[#allocation49_spill]] %s24929_s15 }
   0x7   :  { %24959 = sst [smem:[#allocation50_spill]] %s24931_s17 }
   0x8   :  { %22 = vsyncpa [#allocation3], 0 }
   0x9   :  { %24 = vsyncpa [#allocation3 + $0x1], 0 }
   0xa   :  { %25 = vsyncpa [#allocation5], 0 }
   0xb   :  { %26 = vsyncpa [#allocation8], 0 }
   0xc   :  { %27 = vsyncpa [#allocation11], 0 }
   0xd   :  { %28 = vsyncpa [#allocation14], 0 }
   0xe   :  { %29 = vsyncpa [#allocation17], 0 }
   0xf   :  { %30 = vsyncpa [#allocation20], 0 }
  0x10   :  { %31 = vsyncpa [#allocation23], 0 }
  0x11   :  { %32 = vsyncpa [#allocation26], 0  ;;  %s23674_s24 = smov 0   ;;  %s23676_s25 = smov 0  }
  0x12   :  { %s23678_s26 = smov 0   ;;  %s23680_s27 = smov 0  }
  0x13 LB: > { %s23552_s28 = smov [#allocation4]   ;;  %s24933_s0 = sadd.s32 4294967295, %s23550_s27   ;;  %s23550_s27 = sphi %s23680_s27, %s25004_s27   ;;  %s23546_s26 = sphi %s23678_s26, %s25003_s26   ;;  %s23542_s25 = sphi %s23676_s25, %s25002_s25   ;;  %s23538_s24 = sphi %s23674_s24, %s25001_s24  }
  0x14   : > { %s443_s29 = sshll.u32 %s23552_s28, 4  ;;  %p18079_p0 = scmp.ge.s32.totalorder %s23550_s27, 1  ;;  %s444_s29 = int_to_ptr.vmem [resolvable:$true] %s443_s29 }
  0x15   : > { %p23698_p1 = scmp.eq.s32.totalorder %s24933_s0, 0  ;;  %p431_p2 = scmp.lt.s32.totalorder %s23550_s27, 4 }
  0x16   : > { %s23553_s19 = smov [#allocation7]   ;;  %s23554_s21 = smov [#allocation10]  }
  0x17   : > { %s24960_s30 = scalar_select %p23698_p1, 1, 0 }
  0x18   : > { %p23703_p3 = pnand %p18079_p0, %p431_p2  ;;  %s467_s1 = sshll.u32 %s23553_s19, 4  ;;  %s23715_s1 = int_to_ptr.vmem [resolvable:$true] %s467_s1 }
  0x19   : > { %24961 = sst [smem:[#allocation36_spill]] %s24960_s30  ;;  %s23717_s22 = sshll.u32 %s23554_s21, 4  ;;  %s492_s22 = int_to_ptr.vmem [resolvable:$true] %s23717_s22 }
  0x1a   : > { %s24962_s18 = scalar_select %p23703_p3, 1, 0 }
  0x1b   : > { %p20632_p4 = pneg %p23703_p3  ;;  %s23077_s28 = scalar_lea.vmem %s444_s29, 15360 }
  0x1c   : > { %24963 = sst [smem:[#allocation37_spill]] %s24962_s18  ;;  %p23078_p7 = scmp.ne.s32.totalorder %s444_s29, %s23077_s28 }
  0x1d   : > { %p23711_p5 = pnand %p20632_p4, %p23698_p1  ;;  %p23085_p10 = scmp.lt.s32.totalorder %s444_s29, %s444_s29 }
  0x1e   : > { %p23086_p11 = scmp.lt.s32.totalorder %s23077_s28, %s23077_s28 }
  0x1f   : > { %p23721_p6 = pneg %p23711_p5 }
  0x20   : > { %p23087_p12 = por %p23086_p11, %p23085_p10 }
  0x21   : > { %p23080_p8 = pnand %p23078_p7, %p23721_p6 }
  0x23   : > { %p23081_p9 = pneg %p23080_p8 }
  0x25   : > { %p23088_p13 = pnand %p23087_p12, %p23081_p9 }
  0x27   : > { %23091 = shalt.err (!%p23088_p13)
}
  0x28   : > { %s23555_s19 = smov 960   ;;  %s23556_s21 = smov 60  }
  0x29   : > { %s24966_s15 = sld [smem:[#allocation45_spill]]  ;;  %s23103_s18 = scalar_lea.vmem %s23715_s1, 107520 }
  0x2a   : > { %p23104_p0 = scmp.ne.s32.totalorder %s23715_s1, %s23103_s18  ;;  %p23111_p7 = scmp.lt.s32.totalorder %s23715_s1, %s23715_s1 }
  0x2b   : > { %p23112_p8 = scmp.lt.s32.totalorder %s23103_s18, %s23103_s18 }
  0x2c   : > { %p23106_p2 = pnand %p23104_p0, %p23721_p6 }
  0x2d   : > { %p23113_p9 = por %p23112_p8, %p23111_p7 }
  0x2e   : > { %p23107_p4 = pneg %p23106_p2 }
  0x2f   : > { %20635 = dma.hbm_to_vmem [thread:$0]  (!%p23711_p5), %s24966_s15, 15360, %s444_s29, [#allocation5], %s23555_s19, %s23555_s19, %s23556_s21  }
  0x30   : > { %p23114_p10 = pnand %p23113_p9, %p23107_p4 }
  0x32   : > { %23117 = shalt.err (!%p23114_p10)
}
  0x33   : > { %s24938_s28 = smov 448   ;;  %s24939_s30 = smov 28  }
  0x34   : > { %s24967_s3 = sld [smem:[#allocation47_spill]]  ;;  %s23129_s29 = scalar_lea.vmem %s492_s22, 57344 }
  0x35   : > { %p23130_p11 = scmp.ne.s32.totalorder %s492_s22, %s23129_s29  ;;  %p23137_p0 = scmp.lt.s32.totalorder %s492_s22, %s492_s22 }
  0x36   : > { %p23138_p2 = scmp.lt.s32.totalorder %s23129_s29, %s23129_s29 }
  0x37   : > { %p23132_p12 = pnand %p23130_p11, %p23721_p6 }
  0x38   : > { %p23139_p4 = por %p23138_p2, %p23137_p0 }
  0x39   : > { %p23133_p13 = pneg %p23132_p12 }
  0x3a   : > { %20641 = dma.hbm_to_vmem [thread:$0]  (!%p23711_p5), %s24967_s3, 107520, %s23715_s1, [#allocation8], %s24938_s28, %s24938_s28, %s24939_s30  }
  0x3b   : > { %p23140_p7 = pnand %p23139_p4, %p23133_p13 }
  0x3d   : > { %23143 = shalt.err (!%p23140_p7)
}
  0x3e   : > { %s23559_s0 = smov 512   ;;  %s23560_s18 = smov 32  }
  0x3f   : > { %20647 = dma.hbm_to_vmem [thread:$0]  (!%p23711_p5), %s24919_s5, 57344, %s492_s22, [#allocation11], %s23559_s0, %s23559_s0, %s23560_s18  }
  0x40   : > { %s23561_s1 = smov [#allocation13]   ;;  %s23562_s17 = smov [#allocation16]  }
  0x41   : > { %s515_s15 = sshll.u32 %s23561_s1, 4  ;;  %s539_s28 = sshll.u32 %s23562_s17, 4  ;;  %s516_s15 = int_to_ptr.vmem [resolvable:$true] %s515_s15  ;;  %s540_s28 = int_to_ptr.vmem [resolvable:$true] %s539_s28 }
  0x42   : > { %s23155_s30 = scalar_lea.vmem %s516_s15, 57344  ;;  %p23163_p11 = scmp.lt.s32.totalorder %s516_s15, %s516_s15 }
  0x43   : > { %p23156_p8 = scmp.ne.s32.totalorder %s516_s15, %s23155_s30  ;;  %p23164_p12 = scmp.lt.s32.totalorder %s23155_s30, %s23155_s30 }
  0x45   : > { %p23158_p9 = pnand %p23156_p8, %p23721_p6  ;;  %p23165_p13 = por %p23164_p12, %p23163_p11 }
  0x47   : > { %p23159_p10 = pneg %p23158_p9 }
  0x49   : > { %p23166_p0 = pnand %p23165_p13, %p23159_p10 }
  0x4b   : > { %23169 = shalt.err (!%p23166_p0)
}
  0x4c   : > { %s24968_s29 = smov 28   ;;  %s24969_s19 = smov 448  }
  0x4d   : > { %20653 = dma.hbm_to_vmem [thread:$0]  (!%p23711_p5), %s24921_s7, 57344, %s516_s15, [#allocation14], %s24969_s19, %s24969_s19, %s24968_s29  }
  0x4e   : > { %s23181_s18 = scalar_lea.vmem %s540_s28, 7168  ;;  %p23189_p8 = scmp.lt.s32.totalorder %s540_s28, %s540_s28 }
  0x4f   : > { %p23182_p2 = scmp.ne.s32.totalorder %s540_s28, %s23181_s18  ;;  %p23190_p9 = scmp.lt.s32.totalorder %s23181_s18, %s23181_s18 }
  0x51   : > { %p23184_p4 = pnand %p23182_p2, %p23721_p6  ;;  %p23191_p10 = por %p23190_p9, %p23189_p8 }
  0x53   : > { %p23185_p7 = pneg %p23184_p4 }
  0x55   : > { %p23192_p11 = pnand %p23191_p10, %p23185_p7 }
  0x57   : > { %23195 = shalt.err (!%p23192_p11)
}
  0x58   : > { %s24940_s30 = smov 64   ;;  %s24941_s21 = smov 4  }
  0x59   : > { %20659 = dma.hbm_to_vmem [thread:$0]  (!%p23711_p5), %s24923_s9, 7168, %s540_s28, [#allocation17], %s24940_s30, %s24940_s30, %s24941_s21  }
  0x5a   : > { %s23565_s17 = smov [#allocation19]  }
  0x5b   : > { %s563_s29 = sshll.u32 %s23565_s17, 4  ;;  %s564_s29 = int_to_ptr.vmem [resolvable:$true] %s563_s29 }
  0x5c   : > { %s23207_s19 = scalar_lea.vmem %s564_s29, 3072  ;;  %p23215_p2 = scmp.lt.s32.totalorder %s564_s29, %s564_s29 }
  0x5d   : > { %p23208_p12 = scmp.ne.s32.totalorder %s564_s29, %s23207_s19  ;;  %p23216_p4 = scmp.lt.s32.totalorder %s23207_s19, %s23207_s19 }
  0x5f   : > { %p23210_p13 = pnand %p23208_p12, %p23721_p6  ;;  %p23217_p7 = por %p23216_p4, %p23215_p2 }
  0x61   : > { %p23211_p0 = pneg %p23210_p13 }
  0x63   : > { %p23218_p8 = pnand %p23217_p7, %p23211_p0 }
  0x65   : > { %23221 = shalt.err (!%p23218_p8)
}
  0x66   : > { %s23566_s22 = smov 192   ;;  %s23567_s0 = smov 12  }
  0x67   : > { %20665 = dma.hbm_to_vmem [thread:$0]  (!%p23711_p5), %s24925_s11, 3072, %s564_s29, [#allocation20], %s23566_s22, %s23566_s22, %s23567_s0  }
  0x68   : > { %s23568_s1 = smov [#allocation22]  }
  0x69   : > { %s587_s15 = sshll.u32 %s23568_s1, 4  ;;  %s588_s15 = int_to_ptr.vmem [resolvable:$true] %s587_s15 }
  0x6a   : > { %s23233_s17 = scalar_lea.vmem %s588_s15, 6144  ;;  %p23241_p12 = scmp.lt.s32.totalorder %s588_s15, %s588_s15 }
  0x6b   : > { %p23234_p9 = scmp.ne.s32.totalorder %s588_s15, %s23233_s17  ;;  %p23242_p13 = scmp.lt.s32.totalorder %s23233_s17, %s23233_s17 }
  0x6d   : > { %p23236_p10 = pnand %p23234_p9, %p23721_p6  ;;  %p23243_p0 = por %p23242_p13, %p23241_p12 }
  0x6f   : > { %p23237_p11 = pneg %p23236_p10 }
  0x71   : > { %p23244_p2 = pnand %p23243_p0, %p23237_p11 }
  0x73   : > { %23247 = shalt.err (!%p23244_p2)
}
  0x74   : > { %s23569_s19 = smov 128   ;;  %s23570_s30 = smov 8  }
  0x75   : > { %20671 = dma.hbm_to_vmem [thread:$0]  (!%p23711_p5), %s24927_s13, 6144, %s588_s15, [#allocation23], %s23569_s19, %s23569_s19, %s23570_s30  }
  0x76   : > { %s23571_s22 = smov [#allocation6]   ;;  %s23572_s28 = smov [#allocation9]  }
  0x77   : > { %s457_s0 = sshll.u32 %s23571_s22, 4  ;;  %s481_s1 = sshll.u32 %s23572_s28, 4  ;;  %s458_s0 = int_to_ptr.vmem [resolvable:$true] %s457_s0  ;;  %s482_s1 = int_to_ptr.vmem [resolvable:$true] %s481_s1 }
  0x78   : > { %s23259_s21 = scalar_lea.vmem %s458_s0, 240  ;;  %s23266_s17 = scalar_lea.vmem %s458_s0, 256 }
  0x79   : > { %p23260_p4 = scmp.ne.s32.totalorder %s458_s0, %s23259_s21  ;;  %p23267_p9 = scmp.lt.s32.totalorder %s458_s0, %s458_s0 }
  0x7a   : > { %p23268_p10 = scmp.lt.s32.totalorder %s23266_s17, %s23259_s21 }
  0x7b   : > { %p23262_p7 = pnand %p23260_p4, %p23721_p6 }
  0x7c   : > { %p23269_p11 = por %p23268_p10, %p23267_p9 }
  0x7d   : > { %p23263_p8 = pneg %p23262_p7 }
  0x7f   : > { %p23270_p12 = pnand %p23269_p11, %p23263_p8 }
  0x81   : > { %23273 = shalt.err (!%p23270_p12)
}
  0x82   : > { %s24970_s2 = sld [smem:[#allocation46_spill]]  ;;  %s23285_s15 = scalar_lea.vmem %s482_s1, 112 }
  0x83   : > { %p23286_p13 = scmp.ne.s32.totalorder %s482_s1, %s23285_s15  ;;  %s23292_s19 = scalar_lea.vmem %s482_s1, 128 }
  0x84   : > { %p23293_p4 = scmp.lt.s32.totalorder %s482_s1, %s482_s1  ;;  %p23294_p7 = scmp.lt.s32.totalorder %s23292_s19, %s23285_s15 }
  0x85   : > { %p23288_p0 = pnand %p23286_p13, %p23721_p6 }
  0x86   : > { %p23295_p3 = por %p23294_p7, %p23293_p4 }
  0x87   : > { %p23289_p2 = pneg %p23288_p0 }
  0x88   : > { %20638 = dma.hbm_to_vmem [thread:$0]  (!%p23711_p5), %s24970_s2, 240, %s458_s0, [#allocation5]  }
  0x89   : > { %p23296_p9 = pnand %p23295_p3, %p23289_p2 }
  0x8b   : > { %23299 = shalt.err (!%p23296_p9)
}
  0x8c   : > { %s24971_s4 = sld [smem:[#allocation48_spill]]  ;;  %s23573_s22 = smov [#allocation12]  }
  0x8d   : > { %s505_s0 = sshll.u32 %s23573_s22, 4  ;;  %s23574_s28 = smov [#allocation15]   ;;  %s506_s0 = int_to_ptr.vmem [resolvable:$true] %s505_s0 }
  0x8e   : > { %s529_s17 = sshll.u32 %s23574_s28, 4  ;;  %s23311_s18 = scalar_lea.vmem %s506_s0, 128  ;;  %s530_s17 = int_to_ptr.vmem [resolvable:$true] %s529_s17 }
  0x8f   : > { %p23312_p8 = scmp.ne.s32.totalorder %s506_s0, %s23311_s18  ;;  %p23319_p12 = scmp.lt.s32.totalorder %s506_s0, %s506_s0 }
  0x90   : > { %p23320_p3 = scmp.lt.s32.totalorder %s23311_s18, %s23311_s18 }
  0x91   : > { %p23314_p10 = pnand %p23312_p8, %p23721_p6 }
  0x92   : > { %20644 = dma.hbm_to_vmem [thread:$0]  (!%p23711_p5), %s24971_s4, 112, %s482_s1, [#allocation8]  }
  0x93   : > { %p23315_p11 = pneg %p23314_p10  ;;  %p23321_p13 = por %p23320_p3, %p23319_p12 }
  0x95   : > { %p23322_p0 = pnand %p23321_p13, %p23315_p11 }
  0x97   : > { %23325 = shalt.err (!%p23322_p0)
}
  0x98   : > { %20650 = dma.hbm_to_vmem [thread:$0]  (!%p23711_p5), %s24920_s6, 128, %s506_s0, [#allocation11]  }
  0x99   : > { %s23337_s1 = scalar_lea.vmem %s530_s17, 112  ;;  %s23344_s19 = scalar_lea.vmem %s530_s17, 128 }
  0x9a   : > { %p23338_p2 = scmp.ne.s32.totalorder %s530_s17, %s23337_s1  ;;  %p23345_p9 = scmp.lt.s32.totalorder %s530_s17, %s530_s17 }
  0x9b   : > { %p23346_p8 = scmp.lt.s32.totalorder %s23344_s19, %s23337_s1 }
  0x9c   : > { %p23340_p4 = pnand %p23338_p2, %p23721_p6 }
  0x9d   : > { %p23347_p10 = por %p23346_p8, %p23345_p9 }
  0x9e   : > { %p23341_p7 = pneg %p23340_p4 }
  0xa0   : > { %p23348_p12 = pnand %p23347_p10, %p23341_p7 }
  0xa2   : > { %23351 = shalt.err (!%p23348_p12)
}
  0xa3   : > { %20656 = dma.hbm_to_vmem [thread:$0]  (!%p23711_p5), %s24922_s8, 112, %s530_s17, [#allocation14]  }
  0xa4   : > { %s23575_s22 = smov [#allocation18]   ;;  %s23576_s28 = smov [#allocation21]  }
  0xa5   : > { %s553_s0 = sshll.u32 %s23575_s22, 4  ;;  %s577_s18 = sshll.u32 %s23576_s28, 4  ;;  %s554_s0 = int_to_ptr.vmem [resolvable:$true] %s553_s0  ;;  %s578_s18 = int_to_ptr.vmem [resolvable:$true] %s577_s18 }
  0xa6   : > { %s23363_s30 = scalar_lea.vmem %s554_s0, 16  ;;  %s23370_s15 = scalar_lea.vmem %s554_s0, 32 }
  0xa7   : > { %p23364_p11 = scmp.ne.s32.totalorder %s554_s0, %s23363_s30  ;;  %p23371_p0 = scmp.lt.s32.totalorder %s554_s0, %s554_s0 }
  0xa8   : > { %p23372_p2 = scmp.lt.s32.totalorder %s23370_s15, %s23363_s30 }
  0xa9   : > { %p23366_p3 = pnand %p23364_p11, %p23721_p6 }
  0xaa   : > { %p23373_p4 = por %p23372_p2, %p23371_p0 }
  0xab   : > { %p23367_p13 = pneg %p23366_p3 }
  0xad   : > { %p23374_p7 = pnand %p23373_p4, %p23367_p13 }
  0xaf   : > { %23377 = shalt.err (!%p23374_p7)
}
  0xb0   : > { %20662 = dma.hbm_to_vmem [thread:$0]  (!%p23711_p5), %s24924_s10, 16, %s554_s0, [#allocation17]  }
  0xb1   : > { %s23389_s19 = scalar_lea.vmem %s578_s18, 48  ;;  %s23396_s21 = scalar_lea.vmem %s578_s18, 64 }
  0xb2   : > { %p23390_p9 = scmp.ne.s32.totalorder %s578_s18, %s23389_s19  ;;  %p23397_p12 = scmp.lt.s32.totalorder %s578_s18, %s578_s18 }
  0xb3   : > { %p23398_p11 = scmp.lt.s32.totalorder %s23396_s21, %s23389_s19 }
  0xb4   : > { %p23392_p8 = pnand %p23390_p9, %p23721_p6 }
  0xb5   : > { %p23399_p3 = por %p23398_p11, %p23397_p12 }
  0xb6   : > { %p23393_p10 = pneg %p23392_p8 }
  0xb8   : > { %p23400_p0 = pnand %p23399_p3, %p23393_p10 }
  0xba   : > { %23403 = shalt.err (!%p23400_p0)
}
  0xbb   : > { %20668 = dma.hbm_to_vmem [thread:$0]  (!%p23711_p5), %s24926_s12, 48, %s578_s18, [#allocation20]  }
  0xbc   : > { %s23577_s0 = smov [#allocation24]   ;;  %s23578_s30 = smov [#allocation25]  }
  0xbd   : > { %s601_s28 = sshll.u32 %s23577_s0, 4  ;;  %s615_s15 = sshll.u32 %s23578_s30, 4  ;;  %s602_s28 = int_to_ptr.vmem [resolvable:$true] %s601_s28  ;;  %s616_s15 = int_to_ptr.vmem [resolvable:$true] %s615_s15 }
  0xbe   : > { %s23415_s1 = scalar_lea.vmem %s602_s28, 32  ;;  %p23423_p7 = scmp.lt.s32.totalorder %s602_s28, %s602_s28 }
  0xbf   : > { %p23416_p13 = scmp.ne.s32.totalorder %s602_s28, %s23415_s1  ;;  %p23424_p9 = scmp.lt.s32.totalorder %s23415_s1, %s23415_s1 }
  0xc1   : > { %p23418_p2 = pnand %p23416_p13, %p23721_p6  ;;  %p23425_p8 = por %p23424_p9, %p23423_p7 }
  0xc3   : > { %p23419_p4 = pneg %p23418_p2 }
  0xc5   : > { %p23426_p10 = pnand %p23425_p8, %p23419_p4 }
  0xc7   : > { %23429 = shalt.err (!%p23426_p10)
}
  0xc8   : > { %20674 = dma.hbm_to_vmem [thread:$0]  (!%p23711_p5), %s24928_s14, 32, %s602_s28, [#allocation23]  }
  0xc9   : > { %s23441_s18 = scalar_lea.vmem %s616_s15, 16  ;;  %s23448_s21 = scalar_lea.vmem %s616_s15, 32 }
  0xca   : > { %p23442_p12 = scmp.ne.s32.totalorder %s616_s15, %s23441_s18  ;;  %p23449_p0 = scmp.lt.s32.totalorder %s616_s15, %s616_s15 }
  0xcb   : > { %p23450_p13 = scmp.lt.s32.totalorder %s23448_s21, %s23441_s18 }
  0xcc   : > { %p23444_p11 = pnand %p23442_p12, %p23721_p6 }
  0xcd   : > { %p23451_p2 = por %p23450_p13, %p23449_p0 }
  0xce   : > { %p23445_p3 = pneg %p23444_p11 }
  0xd0   : > { %p23452_p7 = pnand %p23451_p2, %p23445_p3 }
  0xd2   : > { %23455 = shalt.err (!%p23452_p7)
}
  0xd3   : > { %20677 = dma.hbm_to_vmem [thread:$0]  (!%p23711_p5), %s24930_s16, 16, %s616_s15, [#allocation26]  }
  0xd4   : > { %s23846_s0 = sadd.s32 1, %s23550_s27   ;;  %s45_s28 = sadd.s32 1, %s23546_s26 }
  0xd5   : > { %s42_s20 = ssub.s32 %s23550_s27, %s23846_s0  ;;  %p52_p4 = scmp.ne.s32.totalorder %s23546_s26, %s23542_s25 }
  0xd6   : > { %p43_p6 = scmp.eq.s32.totalorder %s42_s20, 0  ;;  %p53_p9 = scmp.eq.s32.totalorder %s23550_s27, 0 }
  0xd7   : > { %p58_p8 = scmp.ne.s32.totalorder %s23542_s25, %s23538_s24  ;;  %p20697_p11 = scmp.lt.s32.totalorder %s23550_s27, 3 }
  0xd8   : > { %s23857_s30 = scalar_select %p43_p6, %s23546_s26, %s45_s28  }
  0xd9   : > { %p54_p10 = por %p53_p9, %p52_p4  ;;  %p23861_p12 = por %p23698_p1, %p58_p8 }
  0xda   : > { %s626_s17 = sand.u32 1, %s23546_s26   ;;  %s20123_s19 = sshll.u32 %s23550_s27, 7 }
  0xdb   : > { %s24973_s1 = scalar_select %p23861_p12, 1, 0 }
  0xdc   : > { %s18096_s15 = sshll.u32 %s626_s17, 3  ;;  %s24974_s29 = sld [smem:[#allocation44_spill]] }
  0xdd   : > { %s630_s24 = scalar_lea.vmem [#allocation2], %s18096_s15  ;;  %p23875_p5 = pnand %p20697_p11, %p54_p10 }
  0xde   : > { %s637_s20 = sshll.u32 %s630_s24, 4  ;;  %s23879_s28 = scalar_lea.sflag [#allocation3], %s626_s17  ;;  %s23873_s20 = int_to_ptr.vmem [resolvable:$true] %s637_s20 }
  0xdf   : > { %p23458_p0 = pneg %p23875_p5 }
  0xe2   : > { %s23871_s22 = scalar_lea.hbm %s24974_s29, %s20123_s19  ;;  %s23461_s15 = scalar_lea.hbm %s24974_s29, 384 }
  0xe3   : > { %s23456_s2 = scalar_lea.hbm %s23871_s22, 128  ;;  %p23462_p7 = scmp.lt.s32.totalorder %s23871_s22, %s24974_s29 }
  0xe4   : > { %p23457_p3 = scmp.ne.s32.totalorder %s23871_s22, %s23456_s2  ;;  %p23463_p6 = scmp.lt.s32.totalorder %s23461_s15, %s23456_s2 }
  0xe6   : > { %p23459_p13 = pnand %p23458_p0, %p23457_p3  ;;  %p23464_p4 = por %p23463_p6, %p23462_p7 }
  0xe8   : > { %p23460_p2 = pneg %p23459_p13 }
  0xea   : > { %p23465_p9 = pnand %p23464_p4, %p23460_p2 }
  0xec   : > { %23468 = shalt.err (!%p23465_p9)
}
  0xed   : > { %s23469_s17 = scalar_lea.vmem %s23873_s20, 128  ;;  %s23579_s3 = smov [#allocation2]  }
  0xee   : > { %p23470_p8 = scmp.ne.s32.totalorder %s23873_s20, %s23469_s17  ;;  %s23474_s4 = sshll.u32 %s23579_s3, 4  ;;  %s23475_s4 = int_to_ptr.vmem [resolvable:$false] %s23474_s4 }
  0xef   : > { %s23476_s19 = scalar_lea.vmem %s23475_s4, 256  ;;  %p23477_p3 = scmp.lt.s32.totalorder %s23873_s20, %s23475_s4 }
  0xf0   : > { %p23472_p10 = pnand %p23470_p8, %p23458_p0  ;;  %p23478_p13 = scmp.lt.s32.totalorder %s23476_s19, %s23469_s17 }
  0xf2   : > { %p23473_p11 = pneg %p23472_p10  ;;  %p23479_p1 = por %p23478_p13, %p23477_p3 }
  0xf4   : > { %p23480_p12 = pnand %p23479_p1, %p23473_p11 }
  0xf6   : > { %23483 = shalt.err (!%p23480_p12)
}
  0xf7   : > { %s24976_s2 = smov 4   ;;  %s24977_s18 = smov 64  }
  0xf8   : > { %20681 = dma.hbm_to_vmem [thread:$0]  (!%p23875_p5), %s23871_s22, 128, %s23873_s20, %s23879_s28, %s24977_s18, %s24977_s18, %s24976_s2  }
  0xf9   : > { %s24978_s15 = sld [smem:[#allocation37_spill]] }
  0xff   : > { %p24979_p0 = scmp.ne.s32.totalorder %s24978_s15, 0 }
 0x101   : > { %649 = sbr.rel (%p24979_p0) target bundleno = 3657 (0xe49), region = 88 }
 0x106   : > { %s651_s3 = sand.u32 1, %s23542_s25   ;;  %p24980_p1 = scmp.ne.s32.totalorder %s24973_s1, 0 }
 0x107   : > { %s23906_s4 = sshll.u32 %s651_s3, 3  ;;  %s652_s21 = scalar_lea.sflag [#allocation3], %s651_s3 }
 0x108   : > { %s655_s24 = scalar_lea.vmem [#allocation2], %s23906_s4 }
 0x109   : > { %23501 = dma.done.wait (%p24980_p1), %s652_s21, 128  }
 0x10a   : > { %23503 = vsyncadd (%p24980_p1), %s652_s21, 4294967168  ;;  %s24981_s23 = sld [smem:[#allocation36_spill]] }
 0x110   : > { %p24982_p12 = scmp.ne.s32.totalorder %s24981_s23, 0 }
 0x112   : > { %23505 = dma.done.wait (%p24982_p12), [#allocation5], 15600  }
 0x113   : > { %23507 = vsyncadd (%p24982_p12), [#allocation5], 4294951696 }
 0x114   : > { %23509 = dma.done.wait (%p24982_p12), [#allocation8], 107632  }
 0x115   : > { %23511 = vsyncadd (%p24982_p12), [#allocation8], 4294859664 }
 0x116   : > { %23513 = dma.done.wait (%p24982_p12), [#allocation11], 57472  }
 0x117   : > { %23515 = vsyncadd (%p24982_p12), [#allocation11], 4294909824 }
 0x118   : > { %23517 = dma.done.wait (%p24982_p12), [#allocation14], 57456  }
 0x119   : > { %23519 = vsyncadd (%p24982_p12), [#allocation14], 4294909840 }
 0x11a   : > { %23521 = dma.done.wait (%p24982_p12), [#allocation17], 7184  }
 0x11b   : > { %23523 = vsyncadd (%p24982_p12), [#allocation17], 4294960112 }
 0x11c   : > { %23525 = dma.done.wait (%p24982_p12), [#allocation20], 3120  }
 0x11d   : > { %23527 = vsyncadd (%p24982_p12), [#allocation20], 4294964176 }
 0x11e   : > { %23529 = dma.done.wait (%p24982_p12), [#allocation23], 6176  }
 0x11f   : > { %23531 = vsyncadd (%p24982_p12), [#allocation23], 4294961120 }
 0x120   : > { %23533 = dma.done.wait (%p24982_p12), [#allocation26], 16  }
 0x121   : > { %23535 = vsyncadd (%p24982_p12), [#allocation26], 4294967280  ;;  %v24948_v0 = vmov 0   ;;  %v20776_v1 = vld [vmem:[#allocation4 + $0x34c] ss:$60 sps:$4 sm:$0xff]   ;;  %v23949_v34 = vld [vmem:[%s655_s24] sm:$0xff]  }
 0x122   : > { %1556 = vmatprep.mubr.bf16.mxu0 %v24948_v0  ;;  %1599 = vmatprep.mubr.bf16.mxu1 %v24948_v0  ;;  %v20778_v2 = vld [vmem:[#allocation4 + $0x354] ss:$60 sps:$4 sm:$0xff]   ;;  %v20780_v3 = vld [vmem:[#allocation4 + $0x348] ss:$60 sps:$4 sm:$0xff]   ;;  %v20784_v6 = vld [vmem:[#allocation4 + $0x2dc] ss:$60 sps:$4 sm:$0xff]  }
 0x123   : > { %1524 = vmatprep.subr.bf16.mxu0 %v20776_v1  ;;  %v20781_v4 = vld [vmem:[#allocation4 + $0x350] ss:$60 sps:$4 sm:$0xff]   ;;  %1567 = vmatprep.subr.bf16.mxu1 %v20778_v2  ;;  %v20787_v8 = vld [vmem:[#allocation4 + $0x2d8] ss:$60 sps:$4 sm:$0xff]   ;;  %v20790_v10 = vld [vmem:[#allocation4 + $0x264] ss:$60 sps:$4 sm:$0xff]  }
 0x124   : > { %v20782_v5 = vld [vmem:[#allocation4 + $0x2d4] ss:$60 sps:$4 sm:$0xff]   ;;  %1525 = vmatpush1.bf16.msra.mxu0 %v20780_v3  ;;  %1568 = vmatpush1.bf16.msra.mxu1 %v20781_v4  ;;  %v20788_v9 = vld [vmem:[#allocation4 + $0x25c] ss:$60 sps:$4 sm:$0xff]   ;;  %v20794_v13 = vld [vmem:[#allocation4 + $0x1e4] ss:$60 sps:$4 sm:$0xff]  }
 0x125   : > { %v20786_v7 = vld [vmem:[#allocation4 + $0x2d0] ss:$60 sps:$4 sm:$0xff]   ;;  %1526 = vmatprep.subr.bf16.mxu0 %v20782_v5  ;;  %1569 = vmatprep.subr.bf16.mxu1 %v20784_v6  ;;  %v20792_v11 = vld [vmem:[#allocation4 + $0x258] ss:$60 sps:$4 sm:$0xff]   ;;  %v20793_v12 = vld [vmem:[#allocation4 + $0x260] ss:$60 sps:$4 sm:$0xff]  }
 0x126   : > { %v20796_v14 = vld [vmem:[#allocation4 + $0x1ec] ss:$60 sps:$4 sm:$0xff]   ;;  %v20798_v15 = vld [vmem:[#allocation4 + $0x1e0] ss:$60 sps:$4 sm:$0xff]   ;;  %v20802_v18 = vld [vmem:[#allocation4 + $0x174] ss:$60 sps:$4 sm:$0xff]  }
 0x127   : > { %v20799_v16 = vld [vmem:[#allocation4 + $0x1e8] ss:$60 sps:$4 sm:$0xff]   ;;  %v20805_v20 = vld [vmem:[#allocation4 + $0x170] ss:$60 sps:$4 sm:$0xff]   ;;  %v20808_v22 = vld [vmem:[#allocation4 + $0xfc] ss:$60 sps:$4 sm:$0xff]  }
 0x128   : > { %1527 = vmatpush1.bf16.msra.mxu0 %v20786_v7  ;;  %1570 = vmatpush1.bf16.msra.mxu1 %v20787_v8  ;;  %v20800_v17 = vld [vmem:[#allocation4 + $0x16c] ss:$60 sps:$4 sm:$0xff]   ;;  %v20806_v21 = vld [vmem:[#allocation4 + $0xf4] ss:$60 sps:$4 sm:$0xff]   ;;  %v20812_v25 = vld [vmem:[#allocation4 + $0x7c] ss:$60 sps:$4 sm:$0xff]  }
 0x129   : > { %1528 = vmatprep.subr.bf16.mxu0 %v20788_v9  ;;  %1571 = vmatprep.subr.bf16.mxu1 %v20790_v10  ;;  %v20804_v19 = vld [vmem:[#allocation4 + $0x168] ss:$60 sps:$4 sm:$0xff]   ;;  %v20810_v23 = vld [vmem:[#allocation4 + $0xf0] ss:$60 sps:$4 sm:$0xff]   ;;  %v20811_v24 = vld [vmem:[#allocation4 + $0xf8] ss:$60 sps:$4 sm:$0xff]  }
 0x12a   : > { %v20814_v26 = vld [vmem:[#allocation4 + $0x84] ss:$60 sps:$4 sm:$0xff]   ;;  %v20816_v27 = vld [vmem:[#allocation4 + $0x78] ss:$60 sps:$4 sm:$0xff]   ;;  %v20820_v30 = vld [vmem:[#allocation4 + $0xc] ss:$60 sps:$4 sm:$0xff]  }
 0x12b   : > { %v20817_v28 = vld [vmem:[#allocation4 + $0x80] ss:$60 sps:$4 sm:$0xff]   ;;  %v20823_v32 = vld [vmem:[#allocation4 + $0x8] ss:$60 sps:$4 sm:$0xff]   ;;  %v20825_v35 = vld [vmem:[#allocation4 + $0x358] ss:$60 sps:$4 sm:$0xff]  }
 0x12c   : > { %1529 = vmatpush1.bf16.msra.mxu0 %v20792_v11  ;;  %1572 = vmatpush1.bf16.msra.mxu1 %v20793_v12  ;;  %v20818_v29 = vld [vmem:[#allocation4 + $0x4] ss:$60 sps:$4 sm:$0xff]   ;;  %v20827_v33 = vld [vmem:[#allocation4 + $0x35c] ss:$60 sps:$4 sm:$0xff]   ;;  %v20854_v40 = vld [vmem:[#allocation4 + $0x2ec] ss:$60 sps:$4 sm:$0xff]  }
 0x12d   : > { %1530 = vmatprep.subr.bf16.mxu0 %v20794_v13  ;;  %1573 = vmatprep.subr.bf16.mxu1 %v20796_v14  ;;  %v20822_v31 = vld [vmem:[#allocation4] ss:$60 sps:$4 sm:$0xff]   ;;  %v20833_v41 = vld [vmem:[#allocation4 + $0x26c] ss:$60 sps:$4 sm:$0xff]   ;;  %v20857_v43 = vld [vmem:[#allocation4 + $0x274] ss:$60 sps:$4 sm:$0xff]  }
 0x12e   : > { %v20846_v36 = vld [vmem:[#allocation4 + $0x360] ss:$60 sps:$4 sm:$0xff]   ;;  %v20852_v42 = vld [vmem:[#allocation4 + $0x2e8] ss:$60 sps:$4 sm:$0xff]   ;;  %v20836_v45 = vld [vmem:[#allocation4 + $0x1f4] ss:$60 sps:$4 sm:$0xff]  }
 0x12f   : > { %v20848_v37 = vld [vmem:[#allocation4 + $0x364] ss:$60 sps:$4 sm:$0xff]   ;;  %v20855_v46 = vld [vmem:[#allocation4 + $0x270] ss:$60 sps:$4 sm:$0xff]   ;;  %v20860_v47 = vld [vmem:[#allocation4 + $0x1fc] ss:$60 sps:$4 sm:$0xff]  }
 0x130   : > { %1531 = vmatpush1.bf16.msra.mxu0 %v20798_v15  ;;  %1574 = vmatpush1.bf16.msra.mxu1 %v20799_v16  ;;  %v20830_v38 = vld [vmem:[#allocation4 + $0x2e4] ss:$60 sps:$4 sm:$0xff]   ;;  %v20834_v48 = vld [vmem:[#allocation4 + $0x1f0] ss:$60 sps:$4 sm:$0xff]   ;;  %v20839_v49 = vld [vmem:[#allocation4 + $0x17c] ss:$60 sps:$4 sm:$0xff]  }
 0x131   : > { %1532 = vmatprep.subr.bf16.mxu0 %v20800_v17  ;;  %1575 = vmatprep.subr.bf16.mxu1 %v20802_v18  ;;  %v20828_v39 = vld [vmem:[#allocation4 + $0x2e0] ss:$60 sps:$4 sm:$0xff]   ;;  %v20831_v44 = vld [vmem:[#allocation4 + $0x268] ss:$60 sps:$4 sm:$0xff]   ;;  %v20858_v50 = vld [vmem:[#allocation4 + $0x1f8] ss:$60 sps:$4 sm:$0xff]  }
 0x132   : > { %v20863_v51 = vld [vmem:[#allocation4 + $0x184] ss:$60 sps:$4 sm:$0xff]   ;;  %v20837_v52 = vld [vmem:[#allocation4 + $0x178] ss:$60 sps:$4 sm:$0xff]   ;;  %v20866_v55 = vld [vmem:[#allocation4 + $0x10c] ss:$60 sps:$4 sm:$0xff]  }
 0x133   : > { %v20842_v53 = vld [vmem:[#allocation4 + $0x104] ss:$60 sps:$4 sm:$0xff]   ;;  %v20845_v57 = vld [vmem:[#allocation4 + $0x8c] ss:$60 sps:$4 sm:$0xff]   ;;  %v20869_v59 = vld [vmem:[#allocation4 + $0x94] ss:$60 sps:$4 sm:$0xff]  }
 0x134   : > { %1533 = vmatpush1.bf16.msra.mxu0 %v20804_v19  ;;  %1576 = vmatpush1.bf16.msra.mxu1 %v20805_v20  ;;  %v20861_v54 = vld [vmem:[#allocation4 + $0x180] ss:$60 sps:$4 sm:$0xff]   ;;  %v20864_v58 = vld [vmem:[#allocation4 + $0x108] ss:$60 sps:$4 sm:$0xff]   ;;  %v20851_v61 = vld [vmem:[#allocation4 + $0x14] ss:$60 sps:$4 sm:$0xff]  }
 0x135   : > { %1534 = vmatprep.subr.bf16.mxu0 %v20806_v21  ;;  %1577 = vmatprep.subr.bf16.mxu1 %v20808_v22  ;;  %v20840_v56 = vld [vmem:[#allocation4 + $0x100] ss:$60 sps:$4 sm:$0xff]   ;;  %v20843_v60 = vld [vmem:[#allocation4 + $0x88] ss:$60 sps:$4 sm:$0xff]   ;;  %v20867_v62 = vld [vmem:[#allocation4 + $0x90] ss:$60 sps:$4 sm:$0xff]  }
 0x136   : > { %v20872_v63 = vld [vmem:[#allocation4 + $0x1c] ss:$60 sps:$4 sm:$0xff]   ;;  %v20849_v1 = vld [vmem:[#allocation4 + $0x10] ss:$60 sps:$4 sm:$0xff]   ;;  %v20873_v5 = vld [vmem:[#allocation4 + $0x368] ss:$60 sps:$4 sm:$0xff]  }
 0x137   : > { %v20870_v2 = vld [vmem:[#allocation4 + $0x18] ss:$60 sps:$4 sm:$0xff]   ;;  %v20875_v3 = vld [vmem:[#allocation4 + $0x36c] ss:$60 sps:$4 sm:$0xff]   ;;  %v20905_v12 = vld [vmem:[#allocation4 + $0x284] ss:$60 sps:$4 sm:$0xff]  }
 0x138   : > { %1535 = vmatpush1.bf16.msra.mxu0 %v20810_v23  ;;  %1578 = vmatpush1.bf16.msra.mxu1 %v20811_v24  ;;  %v20896_v4 = vld [vmem:[#allocation4 + $0x374] ss:$60 sps:$4 sm:$0xff]   ;;  %v20902_v8 = vld [vmem:[#allocation4 + $0x2fc] ss:$60 sps:$4 sm:$0xff]   ;;  %v20884_v14 = vld [vmem:[#allocation4 + $0x204] ss:$60 sps:$4 sm:$0xff]  }
 0x139   : > { %1536 = vmatprep.subr.bf16.mxu0 %v20812_v25  ;;  %1579 = vmatprep.subr.bf16.mxu1 %v20814_v26  ;;  %v20878_v6 = vld [vmem:[#allocation4 + $0x2f4] ss:$60 sps:$4 sm:$0xff]   ;;  %v20881_v10 = vld [vmem:[#allocation4 + $0x27c] ss:$60 sps:$4 sm:$0xff]   ;;  %v20908_v16 = vld [vmem:[#allocation4 + $0x20c] ss:$60 sps:$4 sm:$0xff]  }
 0x13a   : > { %v20894_v7 = vld [vmem:[#allocation4 + $0x370] ss:$60 sps:$4 sm:$0xff]   ;;  %v20900_v11 = vld [vmem:[#allocation4 + $0x2f8] ss:$60 sps:$4 sm:$0xff]   ;;  %v20903_v15 = vld [vmem:[#allocation4 + $0x280] ss:$60 sps:$4 sm:$0xff]  }
 0x13b   : > { %v20876_v9 = vld [vmem:[#allocation4 + $0x2f0] ss:$60 sps:$4 sm:$0xff]   ;;  %v20879_v13 = vld [vmem:[#allocation4 + $0x278] ss:$60 sps:$4 sm:$0xff]   ;;  %v20882_v17 = vld [vmem:[#allocation4 + $0x200] ss:$60 sps:$4 sm:$0xff]  }
 0x13c   : > { %1537 = vmatpush1.bf16.msra.mxu0 %v20816_v27  ;;  %1580 = vmatpush1.bf16.msra.mxu1 %v20817_v28  ;;  %v20906_v18 = vld [vmem:[#allocation4 + $0x208] ss:$60 sps:$4 sm:$0xff]   ;;  %v20914_v20 = vld [vmem:[#allocation4 + $0x194] ss:$60 sps:$4 sm:$0xff]   ;;  %v20920_v24 = vld [vmem:[#allocation4 + $0x11c] ss:$60 sps:$4 sm:$0xff]  }
 0x13d   : > { %1538 = vmatprep.subr.bf16.mxu0 %v20818_v29  ;;  %1581 = vmatprep.subr.bf16.mxu1 %v20820_v30  ;;  %v20887_v19 = vld [vmem:[#allocation4 + $0x18c] ss:$60 sps:$4 sm:$0xff]   ;;  %v20890_v22 = vld [vmem:[#allocation4 + $0x114] ss:$60 sps:$4 sm:$0xff]   ;;  %v20893_v26 = vld [vmem:[#allocation4 + $0x9c] ss:$60 sps:$4 sm:$0xff]  }
 0x13e   : > { %v20885_v21 = vld [vmem:[#allocation4 + $0x188] ss:$60 sps:$4 sm:$0xff]   ;;  %v20912_v23 = vld [vmem:[#allocation4 + $0x190] ss:$60 sps:$4 sm:$0xff]   ;;  %v20918_v27 = vld [vmem:[#allocation4 + $0x118] ss:$60 sps:$4 sm:$0xff]  }
 0x13f   : > { %v20888_v25 = vld [vmem:[#allocation4 + $0x110] ss:$60 sps:$4 sm:$0xff]   ;;  %v20926_v28 = vld [vmem:[#allocation4 + $0xa4] ss:$60 sps:$4 sm:$0xff]   ;;  %v20891_v29 = vld [vmem:[#allocation4 + $0x98] ss:$60 sps:$4 sm:$0xff]  }
 0x140   : > { %1539 = vmatpush1.bf16.msra.mxu0 %v20822_v31  ;;  %1582 = vmatpush1.bf16.msra.mxu1 %v20823_v32  ;;  %v20899_v30 = vld [vmem:[#allocation4 + $0x24] ss:$60 sps:$4 sm:$0xff]   ;;  %v20932_v32 = vld [vmem:[#allocation4 + $0x2c] ss:$60 sps:$4 sm:$0xff]   ;;  %vm23582_vm0 = vmmov 0   ;;  %s24998_s20 = sld [smem:[#allocation49_spill]] }
 0x141   : > { %1610 = vmatprep.subr.bf16.mxu0 %v20827_v33  ;;  %1653 = vmatprep.subr.bf16.mxu1 %v20848_v37  ;;  %v20924_v31 = vld [vmem:[#allocation4 + $0xa0] ss:$60 sps:$4 sm:$0xff]   ;;  %v20909_v37 = vld [vmem:[#allocation4 + $0x378] ss:$60 sps:$4 sm:$0xff]   ;;  %s24999_s18 = sadd.s32 4294967295, %s23550_s27   ;;  %s25000_s24 = sld [smem:[#allocation50_spill]] }
 0x142   : > { %v20897_v33 = vld [vmem:[#allocation4 + $0x20] ss:$60 sps:$4 sm:$0xff]   ;;  %s18116_s15 = sshll.u32 %s24999_s18, 1  ;;  %vm17864_vm1 = vcmask 64512  }
 0x143   : > { %1557 = vmatmul.mubr.bf16.vlgmr.msra.gmra.mxu0 %v23949_v34  ;;  %1600 = vmatmul.mubr.bf16.vlgmr.msra.gmra.mxu1 %v23949_v34  ;;  %p768_p5 = scmp.lt.s32.totalorder %s18116_s15, 5 }
 0x144   : > { %1611 = vmatpush1.bf16.msra.mxu0 %v20825_v35  ;;  %1654 = vmatpush1.bf16.msra.mxu1 %v20846_v36  ;;  %v20930_v35 = vld [vmem:[#allocation4 + $0x28] ss:$60 sps:$4 sm:$0xff]   ;;  %v20911_v36 = vld [vmem:[#allocation4 + $0x37c] ss:$60 sps:$4 sm:$0xff]  }
 0x145   : > { %1612 = vmatprep.subr.bf16.mxu0 %v20830_v38  ;;  %1655 = vmatprep.subr.bf16.mxu1 %v20854_v40  ;;  %v20939_v38 = vld [vmem:[#allocation4 + $0x380] ss:$60 sps:$4 sm:$0xff]   ;;  %v24946_v40 = vmov 0.0   ;;  %s25006_s15 = smov (!%p768_p5, %s18116_s15), 5 }
 0x146   : > { %1642 = vmatprep.mubr.bf16.mxu0 %v24948_v0  ;;  %1685 = vmatprep.mubr.bf16.mxu1 %v24948_v0  ;;  %s18117_s3 = sshll.u32 %s25006_s15, 3 }
 0x147   : > { %s771_s23 = scalar_lea.vmem %s25000_s24, %s18117_s3 }
 0x148   : > { %1613 = vmatpush1.bf16.msra.mxu0 %v20828_v39  ;;  %1656 = vmatpush1.bf16.msra.mxu1 %v20852_v42  ;;  %v20917_v39 = vld [vmem:[#allocation4 + $0x304] ss:$60 sps:$4 sm:$0xff]  }
 0x149   : > { %1614 = vmatprep.subr.bf16.mxu0 %v20833_v41  ;;  %1657 = vmatprep.subr.bf16.mxu1 %v20857_v43  ;;  %v20915_v41 = vld [vmem:[#allocation4 + $0x300] ss:$60 sps:$4 sm:$0xff]   ;;  %v20943_v42 = vld [vmem:[#allocation4 + $0x308] ss:$60 sps:$4 sm:$0xff]  }
 0x14a   : > { %v20923_v43 = vld [vmem:[#allocation4 + $0x28c] ss:$60 sps:$4 sm:$0xff]  }
 0x14c   : > { %1615 = vmatpush1.bf16.msra.mxu0 %v20831_v44  ;;  %1658 = vmatpush1.bf16.msra.mxu1 %v20855_v46  ;;  %v20921_v44 = vld [vmem:[#allocation4 + $0x288] ss:$60 sps:$4 sm:$0xff]   ;;  %v20929_v46 = vld [vmem:[#allocation4 + $0x214] ss:$60 sps:$4 sm:$0xff]  }
 0x14d   : > { %1616 = vmatprep.subr.bf16.mxu0 %v20836_v45  ;;  %1659 = vmatprep.subr.bf16.mxu1 %v20860_v47  ;;  %v20947_v45 = vld [vmem:[#allocation4 + $0x290] ss:$60 sps:$4 sm:$0xff]  }
 0x14e   : > { %v20927_v47 = vld [vmem:[#allocation4 + $0x210] ss:$60 sps:$4 sm:$0xff]  }
 0x150   : > { %1617 = vmatpush1.bf16.msra.mxu0 %v20834_v48  ;;  %1660 = vmatpush1.bf16.msra.mxu1 %v20858_v50  ;;  %v20935_v48 = vld [vmem:[#allocation4 + $0x19c] ss:$60 sps:$4 sm:$0xff]  }
 0x151   : > { %1618 = vmatprep.subr.bf16.mxu0 %v20839_v49  ;;  %1661 = vmatprep.subr.bf16.mxu1 %v20863_v51  ;;  %v20948_v49 = vld [vmem:[#allocation4 + $0x218] ss:$60 sps:$4 sm:$0xff]   ;;  %v20938_v51 = vld [vmem:[#allocation4 + $0x124] ss:$60 sps:$4 sm:$0xff]  }
 0x152   : > { %v20933_v50 = vld [vmem:[#allocation4 + $0x198] ss:$60 sps:$4 sm:$0xff]  }
 0x154   : > { %1619 = vmatpush1.bf16.msra.mxu0 %v20837_v52  ;;  %1662 = vmatpush1.bf16.msra.mxu1 %v20861_v54  ;;  %v20949_v52 = vld [vmem:[#allocation4 + $0x1a0] ss:$60 sps:$4 sm:$0xff]   ;;  %v20942_v54 = vld [vmem:[#allocation4 + $0xac] ss:$60 sps:$4 sm:$0xff]  }
 0x155   : > { %1620 = vmatprep.subr.bf16.mxu0 %v20842_v53  ;;  %1663 = vmatprep.subr.bf16.mxu1 %v20866_v55  ;;  %v20936_v53 = vld [vmem:[#allocation4 + $0x120] ss:$60 sps:$4 sm:$0xff]   ;;  %v20950_v55 = vld [vmem:[#allocation4 + $0x128] ss:$60 sps:$4 sm:$0xff]  }
 0x158   : > { %1621 = vmatpush1.bf16.msra.mxu0 %v20840_v56  ;;  %1664 = vmatpush1.bf16.msra.mxu1 %v20864_v58  ;;  %v20940_v56 = vld [vmem:[#allocation4 + $0xa8] ss:$60 sps:$4 sm:$0xff]   ;;  %v20946_v58 = vld [vmem:[#allocation4 + $0x34] ss:$60 sps:$4 sm:$0xff]  }
 0x159   : > { %1622 = vmatprep.subr.bf16.mxu0 %v20845_v57  ;;  %1665 = vmatprep.subr.bf16.mxu1 %v20869_v59  ;;  %v20951_v57 = vld [vmem:[#allocation4 + $0xb0] ss:$60 sps:$4 sm:$0xff]  }
 0x15a   : > { %v20944_v59 = vld [vmem:[#allocation4 + $0x30] ss:$60 sps:$4 sm:$0xff]  }
 0x15c   : > { %1623 = vmatpush1.bf16.msra.mxu0 %v20843_v60  ;;  %1666 = vmatpush1.bf16.msra.mxu1 %v20867_v62  ;;  %v20952_v60 = vld [vmem:[#allocation4 + $0x38] ss:$60 sps:$4 sm:$0xff]  }
 0x15d   : > { %1624 = vmatprep.subr.bf16.mxu0 %v20851_v61  ;;  %1667 = vmatprep.subr.bf16.mxu1 %v20872_v63  ;;  %v20955_v61 = vld [vmem:[#allocation7 + $0x18c] ss:$28 sps:$4 sm:$0xff]  }
 0x15e   : > { %v20958_v62 = vld [vmem:[#allocation7 + $0x50c] ss:$28 sps:$4 sm:$0xff]  }
 0x15f   : > { %v20953_v63 = vld [vmem:[#allocation7 + $0x188] ss:$28 sps:$4 sm:$0xff]  }
 0x160   : > { %1625 = vmatpush1.bf16.msra.mxu0 %v20849_v1  ;;  %1668 = vmatpush1.bf16.msra.mxu1 %v20870_v2  ;;  %v20956_v1 = vld [vmem:[#allocation7 + $0x508] ss:$28 sps:$4 sm:$0xff]   ;;  %v20961_v2 = vld [vmem:[#allocation7 + $0x154] ss:$28 sps:$4 sm:$0xff]  }
 0x161   : > { %1696 = vmatprep.subr.bf16.mxu0 %v20875_v3  ;;  %1739 = vmatprep.subr.bf16.mxu1 %v20896_v4  ;;  %v20964_v3 = vld [vmem:[#allocation7 + $0x4d4] ss:$28 sps:$4 sm:$0xff]  }
 0x162   : > { %v20959_v4 = vld [vmem:[#allocation7 + $0x150] ss:$28 sps:$4 sm:$0xff]  }
 0x163   : > { %1643 = vmatmul.mubr.bf16.vlgmr.msra.gmra.mxu0 %v23949_v34  ;;  %1686 = vmatmul.mubr.bf16.vlgmr.msra.gmra.mxu1 %v23949_v34 }
 0x164   : > { %1697 = vmatpush1.bf16.msra.mxu0 %v20873_v5  ;;  %1740 = vmatpush1.bf16.msra.mxu1 %v20894_v7  ;;  %v20962_v5 = vld [vmem:[#allocation7 + $0x4d0] ss:$28 sps:$4 sm:$0xff]   ;;  %v20970_v7 = vld [vmem:[#allocation7 + $0x49c] ss:$28 sps:$4 sm:$0xff]  }
 0x165   : > { %1698 = vmatprep.subr.bf16.mxu0 %v20878_v6  ;;  %1741 = vmatprep.subr.bf16.mxu1 %v20902_v8  ;;  %v20967_v6 = vld [vmem:[#allocation7 + $0x11c] ss:$28 sps:$4 sm:$0xff]  }
 0x166   : > { %1728 = vmatprep.mubr.bf16.mxu0 %v24948_v0  ;;  %1771 = vmatprep.mubr.bf16.mxu1 %v24948_v0  ;;  %v20965_v8 = vld [vmem:[#allocation7 + $0x118] ss:$28 sps:$4 sm:$0xff]  }
 0x168   : > { %1699 = vmatpush1.bf16.msra.mxu0 %v20876_v9  ;;  %1742 = vmatpush1.bf16.msra.mxu1 %v20900_v11  ;;  %v20968_v9 = vld [vmem:[#allocation7 + $0x498] ss:$28 sps:$4 sm:$0xff]   ;;  %v20976_v11 = vld [vmem:[#allocation7 + $0x464] ss:$28 sps:$4 sm:$0xff]  }
 0x169   : > { %1700 = vmatprep.subr.bf16.mxu0 %v20881_v10  ;;  %1743 = vmatprep.subr.bf16.mxu1 %v20905_v12  ;;  %v20973_v10 = vld [vmem:[#allocation7 + $0xe4] ss:$28 sps:$4 sm:$0xff]  }
 0x16a   : > { %v20971_v12 = vld [vmem:[#allocation7 + $0xe0] ss:$28 sps:$4 sm:$0xff]  }
 0x16c   : > { %1701 = vmatpush1.bf16.msra.mxu0 %v20879_v13  ;;  %1744 = vmatpush1.bf16.msra.mxu1 %v20903_v15  ;;  %v20974_v13 = vld [vmem:[#allocation7 + $0x460] ss:$28 sps:$4 sm:$0xff]   ;;  %v20982_v15 = vld [vmem:[#allocation7 + $0x42c] ss:$28 sps:$4 sm:$0xff]  }
 0x16d   : > { %1702 = vmatprep.subr.bf16.mxu0 %v20884_v14  ;;  %1745 = vmatprep.subr.bf16.mxu1 %v20908_v16  ;;  %v20979_v14 = vld [vmem:[#allocation7 + $0xac] ss:$28 sps:$4 sm:$0xff]  }
 0x16e   : > { %v20980_v16 = vld [vmem:[#allocation7 + $0x428] ss:$28 sps:$4 sm:$0xff]  }
 0x170   : > { %1703 = vmatpush1.bf16.msra.mxu0 %v20882_v17  ;;  %1746 = vmatpush1.bf16.msra.mxu1 %v20906_v18  ;;  %v20985_v17 = vld [vmem:[#allocation7 + $0x74] ss:$28 sps:$4 sm:$0xff]  }
 0x171   : > { %1704 = vmatprep.subr.bf16.mxu0 %v20887_v19  ;;  %1747 = vmatprep.subr.bf16.mxu1 %v20914_v20  ;;  %v20988_v18 = vld [vmem:[#allocation7 + $0x3f4] ss:$28 sps:$4 sm:$0xff]  }
 0x172   : > { %v20983_v19 = vld [vmem:[#allocation7 + $0x70] ss:$28 sps:$4 sm:$0xff]  }
 0x173   : > { %v20986_v20 = vld [vmem:[#allocation7 + $0x3f0] ss:$28 sps:$4 sm:$0xff]  }
 0x174   : > { %1705 = vmatpush1.bf16.msra.mxu0 %v20885_v21  ;;  %1748 = vmatpush1.bf16.msra.mxu1 %v20912_v23  ;;  %v20991_v21 = vld [vmem:[#allocation7 + $0x3c] ss:$28 sps:$4 sm:$0xff]  }
 0x175   : > { %1706 = vmatprep.subr.bf16.mxu0 %v20890_v22  ;;  %1749 = vmatprep.subr.bf16.mxu1 %v20920_v24  ;;  %v20994_v22 = vld [vmem:[#allocation7 + $0x3bc] ss:$28 sps:$4 sm:$0xff]  }
 0x176   : > { %v20989_v23 = vld [vmem:[#allocation7 + $0x38] ss:$28 sps:$4 sm:$0xff]  }
 0x177   : > { %v20992_v24 = vld [vmem:[#allocation7 + $0x3b8] ss:$28 sps:$4 sm:$0xff]  }
 0x178   : > { %1707 = vmatpush1.bf16.msra.mxu0 %v20888_v25  ;;  %1750 = vmatpush1.bf16.msra.mxu1 %v20918_v27  ;;  %v20997_v25 = vld [vmem:[#allocation7 + $0x4] ss:$28 sps:$4 sm:$0xff]  }
 0x179   : > { %1708 = vmatprep.subr.bf16.mxu0 %v20893_v26  ;;  %1751 = vmatprep.subr.bf16.mxu1 %v20926_v28  ;;  %v21000_v26 = vld [vmem:[#allocation7 + $0x384] ss:$28 sps:$4 sm:$0xff]  }
 0x17a   : > { %v20995_v27 = vld [vmem:[#allocation7] ss:$28 sps:$4 sm:$0xff]  }
 0x17b   : > { %v20998_v28 = vld [vmem:[#allocation7 + $0x380] ss:$28 sps:$4 sm:$0xff]  }
 0x17c   : > { %1709 = vmatpush1.bf16.msra.mxu0 %v20891_v29  ;;  %1752 = vmatpush1.bf16.msra.mxu1 %v20924_v31  ;;  %v21003_v29 = vld [vmem:[#allocation7 + $0x34c] ss:$28 sps:$4 sm:$0xff]  }
 0x17d   : > { %1710 = vmatprep.subr.bf16.mxu0 %v20899_v30  ;;  %1753 = vmatprep.subr.bf16.mxu1 %v20932_v32  ;;  %v21006_v30 = vld [vmem:[#allocation7 + $0x6cc] ss:$28 sps:$4 sm:$0xff]  }
 0x17e   : > { %v21001_v31 = vld [vmem:[#allocation7 + $0x348] ss:$28 sps:$4 sm:$0xff]  }
 0x17f   : > { %v21004_v32 = vld [vmem:[#allocation7 + $0x6c8] ss:$28 sps:$4 sm:$0xff]  }
 0x180   : > { %1711 = vmatpush1.bf16.msra.mxu0 %v20897_v33  ;;  %1754 = vmatpush1.bf16.msra.mxu1 %v20930_v35  ;;  %v21009_v33 = vld [vmem:[#allocation7 + $0x314] ss:$28 sps:$4 sm:$0xff]  }
 0x181   : > { %1782 = vmatprep.subr.bf16.mxu0 %v20911_v36  ;;  %20490 = vmatprep.subr.bf16.mxu1 %v24946_v40  ;;  %v21012_v35 = vld [vmem:[#allocation7 + $0x694] ss:$28 sps:$4 sm:$0xff]  }
 0x182   : > { %v21007_v36 = vld [vmem:[#allocation7 + $0x310] ss:$28 sps:$4 sm:$0xff]  }
 0x183   : > { %1729 = vmatmul.mubr.bf16.vlgmr.msra.gmra.mxu0 %v23949_v34  ;;  %1772 = vmatmul.mubr.bf16.vlgmr.msra.gmra.mxu1 %v23949_v34 }
 0x184   : > { %1783 = vmatpush1.bf16.msra.mxu0 %v20909_v37  ;;  %20491 = vmatpush3.bf16.msra.mxu1 %v20939_v38  ;;  %v21010_v37 = vld [vmem:[#allocation7 + $0x690] ss:$28 sps:$4 sm:$0xff]   ;;  %v21015_v38 = vld [vmem:[#allocation7 + $0x2dc] ss:$28 sps:$4 sm:$0xff]  }
 0x185   : > { %1784 = vmatprep.subr.bf16.mxu0 %v20917_v39  ;;  %20492 = vmatprep.subr.bf16.mxu1 %v24946_v40  ;;  %v21018_v39 = vld [vmem:[#allocation7 + $0x65c] ss:$28 sps:$4 sm:$0xff]  }
 0x186   : > { %1814 = vmatprep.mubr.bf16.mxu0 %v24948_v0  ;;  %20506 = vmatprep.mubr.msk.bf16.mxu1 %vm23582_vm0, %v24946_v40 }
 0x188   : > { %1785 = vmatpush1.bf16.msra.mxu0 %v20915_v41  ;;  %20493 = vmatpush3.bf16.msra.mxu1 %v20943_v42  ;;  %v21013_v41 = vld [vmem:[#allocation7 + $0x2d8] ss:$28 sps:$4 sm:$0xff]  }
 0x189   : > { %1786 = vmatprep.subr.bf16.mxu0 %v20923_v43  ;;  %20494 = vmatprep.subr.bf16.mxu1 %v24946_v40  ;;  %v21016_v42 = vld [vmem:[#allocation7 + $0x658] ss:$28 sps:$4 sm:$0xff]   ;;  %v21021_v43 = vld [vmem:[#allocation7 + $0x2a4] ss:$28 sps:$4 sm:$0xff]  }
 0x18c   : > { %1787 = vmatpush1.bf16.msra.mxu0 %v20921_v44  ;;  %20495 = vmatpush3.bf16.msra.mxu1 %v20947_v45  ;;  %v21024_v44 = vld [vmem:[#allocation7 + $0x624] ss:$28 sps:$4 sm:$0xff]  }
 0x18d   : > { %1788 = vmatprep.subr.bf16.mxu0 %v20929_v46  ;;  %20496 = vmatprep.subr.bf16.mxu1 %v24946_v40  ;;  %v21019_v45 = vld [vmem:[#allocation7 + $0x2a0] ss:$28 sps:$4 sm:$0xff]  }
 0x18e   : > { %v21022_v46 = vld [vmem:[#allocation7 + $0x620] ss:$28 sps:$4 sm:$0xff]  }
 0x190   : > { %1789 = vmatpush1.bf16.msra.mxu0 %v20927_v47  ;;  %20497 = vmatpush3.bf16.msra.mxu1 %v20948_v49  ;;  %v21027_v47 = vld [vmem:[#allocation7 + $0x26c] ss:$28 sps:$4 sm:$0xff]  }
 0x191   : > { %1790 = vmatprep.subr.bf16.mxu0 %v20935_v48  ;;  %20498 = vmatprep.subr.bf16.mxu1 %v24946_v40  ;;  %v21030_v48 = vld [vmem:[#allocation7 + $0x5ec] ss:$28 sps:$4 sm:$0xff]  }
 0x192   : > { %v21025_v49 = vld [vmem:[#allocation7 + $0x268] ss:$28 sps:$4 sm:$0xff]  }
 0x194   : > { %1791 = vmatpush1.bf16.msra.mxu0 %v20933_v50  ;;  %20499 = vmatpush3.bf16.msra.mxu1 %v20949_v52  ;;  %v21028_v50 = vld [vmem:[#allocation7 + $0x5e8] ss:$28 sps:$4 sm:$0xff]   ;;  %v21036_v52 = vld [vmem:[#allocation7 + $0x5b4] ss:$28 sps:$4 sm:$0xff]  }
 0x195   : > { %1792 = vmatprep.subr.bf16.mxu0 %v20938_v51  ;;  %20500 = vmatprep.subr.bf16.mxu1 %v24946_v40  ;;  %v21033_v51 = vld [vmem:[#allocation7 + $0x234] ss:$28 sps:$4 sm:$0xff]  }
 0x198   : > { %1793 = vmatpush1.bf16.msra.mxu0 %v20936_v53  ;;  %20501 = vmatpush3.bf16.msra.mxu1 %v20950_v55  ;;  %v21031_v53 = vld [vmem:[#allocation7 + $0x230] ss:$28 sps:$4 sm:$0xff]   ;;  %v21039_v55 = vld [vmem:[#allocation7 + $0x1fc] ss:$28 sps:$4 sm:$0xff]  }
 0x199   : > { %1794 = vmatprep.subr.bf16.mxu0 %v20942_v54  ;;  %20502 = vmatprep.subr.bf16.mxu1 %v24946_v40  ;;  %v21034_v54 = vld [vmem:[#allocation7 + $0x5b0] ss:$28 sps:$4 sm:$0xff]  }
 0x19c   : > { %1795 = vmatpush1.bf16.msra.mxu0 %v20940_v56  ;;  %20503 = vmatpush3.bf16.msra.mxu1 %v20951_v57  ;;  %v21042_v56 = vld [vmem:[#allocation7 + $0x57c] ss:$28 sps:$4 sm:$0xff]  }
 0x19d   : > { %1796 = vmatprep.subr.bf16.mxu0 %v20946_v58  ;;  %20504 = vmatprep.subr.bf16.mxu1 %v24946_v40  ;;  %v21037_v57 = vld [vmem:[#allocation7 + $0x1f8] ss:$28 sps:$4 sm:$0xff]  }
 0x19e   : > { %v21040_v58 = vld [vmem:[#allocation7 + $0x578] ss:$28 sps:$4 sm:$0xff]  }
 0x1a0   : > { %1797 = vmatpush1.bf16.msra.mxu0 %v20944_v59  ;;  %20505 = vmatpush3.bf16.msra.mxu1 %v20952_v60  ;;  %v21045_v59 = vld [vmem:[#allocation7 + $0x1c4] ss:$28 sps:$4 sm:$0xff]  }
 0x1a1   : > { %7516 = vmatprep.subr.bf16.mxu0 %v20955_v61  ;;  %7559 = vmatprep.subr.bf16.mxu1 %v20958_v62  ;;  %v21048_v60 = vld [vmem:[#allocation7 + $0x544] ss:$28 sps:$4 sm:$0xff]  }
 0x1a2   : > { %v21043_v61 = vld [vmem:[#allocation7 + $0x1c0] ss:$28 sps:$4 sm:$0xff]  }
 0x1a3   : > { %1815 = vmatmul.mubr.bf16.vlgmr.msra.gmra.mxu0 %v23949_v34  ;;  %20507 = vmatmul.mubr.bf16.vlgmr.msra.gmra.mxu1 %v23949_v34  ;;  %v20977_v34 = vld [vmem:[#allocation7 + $0xa8] ss:$28 sps:$4 sm:$0xff]   ;;  %v21046_v62 = vld [vmem:[#allocation7 + $0x540] ss:$28 sps:$4 sm:$0xff]  }
 0x1a4   : > { %7517 = vmatpush1.bf16.msra.mxu0 %v20953_v63  ;;  %7560 = vmatpush1.bf16.msra.mxu1 %v20956_v1  ;;  %v21052_v63 = vld [vmem:[#allocation7 + $0x88c] ss:$28 sps:$4 sm:$0xff]  }
 0x1a5   : > { %7518 = vmatprep.subr.bf16.mxu0 %v20961_v2  ;;  %7561 = vmatprep.subr.bf16.mxu1 %v20964_v3  ;;  %v21055_v1 = vld [vmem:[#allocation7 + $0xc0c] ss:$28 sps:$4 sm:$0xff]   ;;  %v23583_v2 = vmov 1966171168  }
 0x1a6   : > { %v1885_v3 = vunpack.c.l.s4 %v23583_v2 }
 0x1a8   : > { %7519 = vmatpush1.bf16.msra.mxu0 %v20959_v4  ;;  %7562 = vmatpush1.bf16.msra.mxu1 %v20962_v5  ;;  %v1887_v4 = vlaneseq  ;;  %v1886_v5 = vunpack.c.0.s8 %v1885_v3 }
 0x1a9   : > { %7520 = vmatprep.subr.bf16.mxu0 %v20967_v6  ;;  %7563 = vmatprep.subr.bf16.mxu1 %v20970_v7  ;;  %v908_v7 = vld [vmem:[#allocation6] sm:$0xff] }
 0x1aa   : > { %v1888_v6 = vshrl.u32 %v1887_v4, 7 }
 0x1ac   : > { %7521 = vmatpush1.bf16.msra.mxu0 %v20965_v8  ;;  %7564 = vmatpush1.bf16.msra.mxu1 %v20968_v9  ;;  %v23974_v8 = vsub.s32 %v1886_v5, %v1888_v6 }
 0x1ad   : > { %7522 = vmatprep.subr.bf16.mxu0 %v20973_v10  ;;  %7565 = vmatprep.subr.bf16.mxu1 %v20976_v11 }
 0x1ae   : > { %v1890_v9 = vrot.slane %v908_v7, %v23974_v8 }
 0x1b0   : > { %7523 = vmatpush1.bf16.msra.mxu0 %v20971_v12  ;;  %7566 = vmatpush1.bf16.msra.mxu1 %v20974_v13  ;;  %v1898_v10 = vcombine.high %v1890_v9, %v1890_v9  ;;  %v1906_v11 = vrot.slane %v1890_v9, %v23974_v8 }
 0x1b1   : > { %7524 = vmatprep.subr.bf16.mxu0 %v20979_v14  ;;  %7567 = vmatprep.subr.bf16.mxu1 %v20982_v15 }
 0x1b2   : > { %v1920_v12 = vrot.slane %v1898_v10, %v23974_v8  ;;  %v1928_v13 = vcombine.high %v1906_v11, %v1906_v11  ;;  %v1981_v15 = vpack.i.b16 %v1906_v11, %v1906_v11 }
 0x1b4   : > { %7525 = vmatpush1.bf16.msra.mxu0 %v20977_v34  ;;  %7568 = vmatpush1.bf16.msra.mxu1 %v20980_v16  ;;  %v1930_v14 = vcombine.high %v1920_v12, %v1920_v12  ;;  %v23979_v34 = vsub.s32 0, %v1888_v6  ;;  %v1995_v16 = vpack.i.b16 %v1928_v13, %v1928_v13 }
 0x1b5   : > { %7526 = vmatprep.subr.bf16.mxu0 %v20985_v17  ;;  %7569 = vmatprep.subr.bf16.mxu1 %v20988_v18 }
 0x1b8   : > { %7527 = vmatpush1.bf16.msra.mxu0 %v20983_v19  ;;  %7570 = vmatpush1.bf16.msra.mxu1 %v20986_v20  ;;  %v1988_v19 = vpack.i.b16 %v1920_v12, %v1920_v12  ;;  %v2002_v20 = vpack.i.b16 %v1930_v14, %v1930_v14 }
 0x1b9   : > { %7528 = vmatprep.subr.bf16.mxu0 %v20991_v21  ;;  %7571 = vmatprep.subr.bf16.mxu1 %v20994_v22 }
 0x1bc   : > { %7529 = vmatpush1.bf16.msra.mxu0 %v20989_v23  ;;  %7572 = vmatpush1.bf16.msra.mxu1 %v20992_v24  ;;  %v1986_v23 = vrot.slane %v1981_v15, %v23979_v34  ;;  %v2000_v24 = vrot.slane %v1995_v16, %v23979_v34 }
 0x1bd   : > { %7530 = vmatprep.subr.bf16.mxu0 %v20997_v25  ;;  %7573 = vmatprep.subr.bf16.mxu1 %v21000_v26 }
 0x1c0   : > { %7531 = vmatpush1.bf16.msra.mxu0 %v20995_v27  ;;  %7574 = vmatpush1.bf16.msra.mxu1 %v20998_v28 }
 0x1c1   : > { %7532 = vmatprep.subr.bf16.mxu0 %v21003_v29  ;;  %7575 = vmatprep.subr.bf16.mxu1 %v21006_v30  ;;  %v1993_v29 = vrot.slane %v1988_v19, %v23979_v34  ;;  %v2007_v30 = vrot.slane %v2002_v20, %v23979_v34  ;;  %v21050_v20 = vld [vmem:[#allocation7 + $0x888] ss:$28 sps:$4 sm:$0xff]  }
 0x1c4   : > { %7533 = vmatpush2.bf16.msra.mxu0 %v21001_v31  ;;  %7576 = vmatpush2.bf16.msra.mxu1 %v21004_v32 }
 0x1c5   : > { %7534 = vmatprep.subr.bf16.mxu0 %v21009_v33  ;;  %7577 = vmatprep.subr.bf16.mxu1 %v21012_v35 }
 0x1c8   : > { %7535 = vmatpush2.bf16.msra.mxu0 %v21007_v36  ;;  %7578 = vmatpush2.bf16.msra.mxu1 %v21010_v37 }
 0x1c9   : > { %7536 = vmatprep.subr.bf16.mxu0 %v21015_v38  ;;  %7579 = vmatprep.subr.bf16.mxu1 %v21018_v39 }
 0x1cc   : > { %7537 = vmatpush2.bf16.msra.mxu0 %v21013_v41  ;;  %7580 = vmatpush2.bf16.msra.mxu1 %v21016_v42 }
 0x1cd   : > { %7538 = vmatprep.subr.bf16.mxu0 %v21021_v43  ;;  %7581 = vmatprep.subr.bf16.mxu1 %v21024_v44 }
 0x1d0   : > { %7539 = vmatpush2.bf16.msra.mxu0 %v21019_v45  ;;  %7582 = vmatpush2.bf16.msra.mxu1 %v21022_v46 }
 0x1d1   : > { %7540 = vmatprep.subr.bf16.mxu0 %v21027_v47  ;;  %7583 = vmatprep.subr.bf16.mxu1 %v21030_v48 }
 0x1d4   : > { %7541 = vmatpush2.bf16.msra.mxu0 %v21025_v49  ;;  %7584 = vmatpush2.bf16.msra.mxu1 %v21028_v50 }
 0x1d5   : > { %7542 = vmatprep.subr.bf16.mxu0 %v21033_v51  ;;  %7585 = vmatprep.subr.bf16.mxu1 %v21036_v52 }
 0x1d8   : > { %7543 = vmatpush2.bf16.msra.mxu0 %v21031_v53  ;;  %7586 = vmatpush2.bf16.msra.mxu1 %v21034_v54 }
 0x1d9   : > { %7544 = vmatprep.subr.bf16.mxu0 %v21039_v55  ;;  %7587 = vmatprep.subr.bf16.mxu1 %v21042_v56  ;;  %v1883_v55 = vcombine.high %v908_v7, %v908_v7 }
 0x1dc   : > { %7545 = vmatpush2.bf16.msra.mxu0 %v21037_v57  ;;  %7588 = vmatpush2.bf16.msra.mxu1 %v21040_v58 }
 0x1dd   : > { %7546 = vmatprep.subr.bf16.mxu0 %v21045_v59  ;;  %7589 = vmatprep.subr.bf16.mxu1 %v21048_v60 }
 0x1e0   : > { %7547 = vmatpush2.bf16.msra.mxu0 %v21043_v61  ;;  %7590 = vmatpush2.bf16.msra.mxu1 %v21046_v62  ;;  %v1897_v62 = vrot.slane %v1883_v55, %v23974_v8  ;;  %v21070_v55 = vld [vmem:[#allocation7 + $0x7e4] ss:$28 sps:$4 sm:$0xff]  }
 0x1e1   : > { %7602 = vmatprep.subr.bf16.mxu0 %v21052_v63  ;;  %7645 = vmatprep.subr.bf16.mxu1 %v21055_v1 }
 0x1e2   : > { %v1899_v63 = vcombine.high %v1897_v62, %v1897_v62 }
 0x1e4   : > { %v1927_v1 = vrot.slane %v1899_v63, %v23974_v8 }
 0x1e6   : > { %v1931_v2 = vcombine.high %v1927_v1, %v1927_v1  ;;  %v2016_v6 = vpack.i.b16 %v1927_v1, %v1927_v1 }
 0x1e8   : > { %v2030_v11 = vpack.i.b16 %v1931_v2, %v1931_v2  ;;  %v21071_v2 = vld [vmem:[#allocation7 + $0xb60] ss:$28 sps:$4 sm:$0xff]  }
 0x203   : > { %v1558_v17 = vpop.f32.mrf.mxu0  ;;  %v1601_v18 = vpop.f32.mrf.mxu1 }
 0x205   : > { %v1560_v21 = vpop.f32.mrf.mxu0  ;;  %v1603_v22 = vpop.f32.mrf.mxu1 }
 0x207   : > { %v1562_v25 = vpop.f32.mrf.mxu0  ;;  %v1605_v26 = vpop.f32.mrf.mxu1 }
 0x208   : > { %v1866_v27 = vpack.c.bf16 %v1562_v25, %v1558_v17  ;;  %v1868_v28 = vpack.c.bf16 %v1605_v26, %v1601_v18  ;;  %v21053_v25 = vld [vmem:[#allocation7 + $0xc08] ss:$28 sps:$4 sm:$0xff]   ;;  %v21058_v26 = vld [vmem:[#allocation7 + $0x854] ss:$28 sps:$4 sm:$0xff]  }
 0x209   : > { %v1564_v31 = vpop.f32.mrf.mxu0  ;;  %v1607_v32 = vpop.f32.mrf.mxu1 }
 0x20a   : > { %v23985_v33 = vadd.bf16 %v1986_v23, %v1866_v27  ;;  %v23987_v35 = vadd.bf16 %v2000_v24, %v1868_v28  ;;  %v1867_v36 = vpack.c.bf16 %v1564_v31, %v1560_v21  ;;  %v1869_v37 = vpack.c.bf16 %v1607_v32, %v1603_v22 }
 0x20b   : > { %v2021_v23 = vrot.slane %v2016_v6, %v23979_v34  ;;  %v2035_v31 = vrot.slane %v2030_v11, %v23979_v34 }
 0x20c   : > { %v2115_v38 = vmul.bf16 %v23985_v33, %v23985_v33  ;;  %v2117_v39 = vmul.bf16 %v23987_v35, %v23987_v35  ;;  %v2086_v41 = vadd.bf16 %v1993_v29, %v1867_v36  ;;  %v2088_v42 = vadd.bf16 %v2007_v30, %v1869_v37 }
 0x20d   : > { %v2100_v14 = vmul.bf16 1056980736, %v23985_v33  ;;  %v2102_v29 = vmul.bf16 1056980736, %v23987_v35 }
 0x20e   : > { %v2130_v43 = vmul.bf16 %v2115_v38, %v23985_v33  ;;  %v2132_v44 = vmul.bf16 %v2117_v39, %v23987_v35  ;;  %v2116_v45 = vmul.bf16 %v2086_v41, %v2086_v41  ;;  %v2118_v46 = vmul.bf16 %v2088_v42, %v2088_v42  ;;  %v21061_v38 = vld [vmem:[#allocation7 + $0xbd4] ss:$28 sps:$4 sm:$0xff]  }
 0x20f   : > { %v2101_v13 = vmul.bf16 1056980736, %v2086_v41  ;;  %v2103_v19 = vmul.bf16 1056980736, %v2088_v42 }
 0x210   : > { %v2145_v47 = vmul.bf16 1027030327, %v2130_v43  ;;  %v2147_v48 = vmul.bf16 1027030327, %v2132_v44  ;;  %v2131_v49 = vmul.bf16 %v2116_v45, %v2086_v41  ;;  %v2133_v50 = vmul.bf16 %v2118_v46, %v2088_v42  ;;  %v21059_v44 = vld [vmem:[#allocation7 + $0xbd0] ss:$28 sps:$4 sm:$0xff]  }
 0x211   : > { %v21064_v45 = vld [vmem:[#allocation7 + $0x81c] ss:$28 sps:$4 sm:$0xff]   ;;  %v1913_v46 = vrot.slane %v1897_v62, %v23974_v8 }
 0x212   : > { %v2160_v51 = vadd.bf16 %v2145_v47, %v23985_v33  ;;  %v2162_v52 = vadd.bf16 %v2147_v48, %v23987_v35  ;;  %v2146_v53 = vmul.bf16 1027030327, %v2131_v49  ;;  %v2148_v54 = vmul.bf16 1027030327, %v2133_v50  ;;  %v21056_v35 = vld [vmem:[#allocation7 + $0x850] ss:$28 sps:$4 sm:$0xff]  }
 0x213   : > { %v21067_v47 = vld [vmem:[#allocation7 + $0xb9c] ss:$28 sps:$4 sm:$0xff]  }
 0x214   : > { %v2175_v56 = vmul.bf16 1061961548, %v2160_v51  ;;  %v2177_v57 = vmul.bf16 1061961548, %v2162_v52  ;;  %v2161_v58 = vadd.bf16 %v2146_v53, %v2086_v41  ;;  %v2163_v59 = vadd.bf16 %v2148_v54, %v2088_v42  ;;  %v21062_v50 = vld [vmem:[#allocation7 + $0x818] ss:$28 sps:$4 sm:$0xff]  }
 0x215   : > { %v1929_v51 = vcombine.high %v1913_v46, %v1913_v46  ;;  %v21065_v54 = vld [vmem:[#allocation7 + $0xb98] ss:$28 sps:$4 sm:$0xff]  }
 0x216   : > { %22974 = vtanh.bf16 %v2175_v56  ;;  %v2176_v60 = vmul.bf16 1061961548, %v2161_v58  ;;  %v2178_v61 = vmul.bf16 1061961548, %v2163_v59  ;;  %v2009_v56 = vpack.i.b16 %v1913_v46, %v1913_v46  ;;  %v21073_v58 = vld [vmem:[#allocation7 + $0xb64] ss:$28 sps:$4 sm:$0xff]  }
 0x217   : > { %22976 = vtanh.bf16 %v2177_v57  ;;  %v21068_v57 = vld [vmem:[#allocation7 + $0x7e0] ss:$28 sps:$4 sm:$0xff]   ;;  %v2023_v62 = vpack.i.b16 %v1929_v51, %v1929_v51 }
 0x218   : > { %22978 = vtanh.bf16 %v2176_v60 }
 0x219   : > { %22980 = vtanh.bf16 %v2178_v61  ;;  %v24035_v61 = vld [vmem:[#allocation6 + $0x8] sm:$0x7f] }
 0x223   : > { %v23999_v3 = vpop.f32.mrf.mxu0  ;;  %v24001_v4 = vpop.f32.mrf.mxu1 }
 0x224   : > { %v22975_v5 = vpop.eup %22974 }
 0x225   : > { %v22977_v7 = vpop.eup %22976  ;;  %v1646_v9 = vpop.f32.mrf.mxu0  ;;  %v2205_v15 = vadd.bf16 1065369472, %v22975_v5  ;;  %v21076_v5 = vld [vmem:[#allocation7 + $0x7ac] ss:$28 sps:$4 sm:$0xff]  }
 0x226   : > { %v1689_v10 = vpop.f32.mrf.mxu1  ;;  %v22979_v12 = vpop.eup %22978  ;;  %v2207_v21 = vadd.bf16 1065369472, %v22977_v7  ;;  %v2014_v7 = vrot.slane %v2009_v56, %v23979_v34 }
 0x227   : > { %v22981_v16 = vpop.eup %22980  ;;  %v24004_v17 = vpop.f32.mrf.mxu0  ;;  %v2206_v18 = vadd.bf16 1065369472, %v22979_v12  ;;  %v24015_v36 = vmul.bf16 %v2205_v15, %v2100_v14  ;;  %v1939_v12 = vrot.slane %v24035_v61, %v23974_v8  ;;  %v2028_v14 = vrot.slane %v2023_v62, %v23979_v34  ;;  %v21082_v15 = vld [vmem:[#allocation7 + $0x774] ss:$28 sps:$4 sm:$0xff]   ;;  %v21103_v62 = vld [vmem:[#allocation7 + $0xdcc] ss:$28 sps:$4 sm:$0xff]  }
 0x228   : > { %v24006_v22 = vpop.f32.mrf.mxu1  ;;  %v2208_v24 = vadd.bf16 1065369472, %v22981_v16  ;;  %v24018_v37 = vmul.bf16 %v2207_v21, %v2102_v29  ;;  %v1870_v6 = vpack.c.bf16 %v24004_v17, %v23999_v3  ;;  %v21077_v3 = vld [vmem:[#allocation7 + $0xb28] ss:$28 sps:$4 sm:$0xff]   ;;  %v21080_v17 = vld [vmem:[#allocation7 + $0x770] ss:$28 sps:$4 sm:$0xff]  }
 0x229   : > { %v1650_v27 = vpop.f32.mrf.mxu0  ;;  %v24009_v28 = vmul.bf16 %v2206_v18, %v2101_v13  ;;  %v1872_v13 = vpack.c.bf16 %v24006_v22, %v24001_v4  ;;  %v21085_v18 = vld [vmem:[#allocation7 + $0xaf4] ss:$28 sps:$4 sm:$0xff]   ;;  %v1955_v21 = vrot.slane %v1939_v12, %v23974_v8  ;;  %v21088_v22 = vld [vmem:[#allocation7 + $0x73c] ss:$28 sps:$4 sm:$0xff]  }
 0x22a   : > { %v1693_v30 = vpop.f32.mrf.mxu1  ;;  %v1871_v32 = vpack.c.bf16 %v1650_v27, %v1646_v9  ;;  %v24013_v33 = vmul.bf16 %v2208_v24, %v2103_v19  ;;  %v21074_v9 = vld [vmem:[#allocation7 + $0x7a8] ss:$28 sps:$4 sm:$0xff]   ;;  %v24046_v16 = vadd.bf16 %v2014_v7, %v1870_v6  ;;  %v1947_v19 = vcombine.high %v1939_v12, %v1939_v12  ;;  %v21083_v4 = vld [vmem:[#allocation7 + $0xaf0] ss:$28 sps:$4 sm:$0xff]   ;;  %v21086_v24 = vld [vmem:[#allocation7 + $0x738] ss:$28 sps:$4 sm:$0xff]  }
 0x22b   : > { %7548 = vmatprep.mubr.bf16.mxu0 %v24009_v28  ;;  %v1873_v39 = vpack.c.bf16 %v1693_v30, %v1689_v10  ;;  %v21079_v10 = vld [vmem:[#allocation7 + $0xb2c] ss:$28 sps:$4 sm:$0xff]   ;;  %v1977_v27 = vcombine.high %v1955_v21, %v1955_v21 }
 0x22c   : > { %v24020_v41 = vadd.bf16 %v2021_v23, %v1871_v32  ;;  %7591 = vmatprep.mubr.bf16.mxu1 %v24013_v33  ;;  %7549 = vmatmul.mubr.bf16.vlgmr.msra.gmra.mxu0 %v24015_v36  ;;  %v2119_v23 = vmul.bf16 %v24046_v16, %v24046_v16  ;;  %v21094_v32 = vld [vmem:[#allocation7 + $0x704] ss:$28 sps:$4 sm:$0xff]  }
 0x22d   : > { %7592 = vmatmul.mubr.bf16.vlgmr.msra.gmra.mxu1 %v24018_v37  ;;  %7603 = vmatpush1.bf16.msra.mxu0 %v21050_v20  ;;  %v24025_v42 = vadd.bf16 %v2035_v31, %v1873_v39  ;;  %v24048_v20 = vadd.bf16 %v2028_v14, %v1872_v13  ;;  %v21089_v31 = vld [vmem:[#allocation7 + $0xab8] ss:$28 sps:$4 sm:$0xff]   ;;  %v2051_v46 = vpack.i.b16 %v1977_v27, %v1977_v27  ;;  %v21101_v14 = vld [vmem:[#allocation7 + $0xdc8] ss:$28 sps:$4 sm:$0xff]   ;;  %v21107_v27 = vld [vmem:[#allocation7 + $0xd90] ss:$28 sps:$4 sm:$0xff]  }
 0x22e   : > { %v2120_v43 = vmul.bf16 %v24020_v41, %v24020_v41  ;;  %7646 = vmatpush1.bf16.msra.mxu1 %v21053_v25  ;;  %7604 = vmatprep.subr.bf16.mxu0 %v21058_v26  ;;  %v21091_v25 = vld [vmem:[#allocation7 + $0xabc] ss:$28 sps:$4 sm:$0xff]   ;;  %v1969_v26 = vrot.slane %v1947_v19, %v23974_v8  ;;  %v2134_v39 = vmul.bf16 %v2119_v23, %v24046_v16  ;;  %v21109_v19 = vld [vmem:[#allocation7 + $0xd94] ss:$28 sps:$4 sm:$0xff]  }
 0x22f   : > { %7647 = vmatprep.subr.bf16.mxu1 %v21061_v38  ;;  %v2122_v48 = vmul.bf16 %v24025_v42, %v24025_v42  ;;  %v2121_v29 = vmul.bf16 %v24048_v20, %v24048_v20  ;;  %v2037_v38 = vpack.i.b16 %v1955_v21, %v1955_v21  ;;  %v2107_v56 = vmul.bf16 1056980736, %v24025_v42  ;;  %v21104_v23 = vld [vmem:[#allocation7 + $0xa10] ss:$28 sps:$4 sm:$0xff]  }
 0x230   : > { %v2135_v49 = vmul.bf16 %v2120_v43, %v24020_v41  ;;  %v1979_v30 = vcombine.high %v1969_v26, %v1969_v26  ;;  %v21097_v43 = vld [vmem:[#allocation7 + $0xa84] ss:$28 sps:$4 sm:$0xff]  }
 0x231   : > { %7605 = vmatpush1.bf16.msra.mxu0 %v21056_v35  ;;  %v2137_v52 = vmul.bf16 %v2122_v48, %v24025_v42  ;;  %v21092_v35 = vld [vmem:[#allocation7 + $0x700] ss:$28 sps:$4 sm:$0xff]   ;;  %v2136_v48 = vmul.bf16 %v2121_v29, %v24048_v20 }
 0x232   : > { %v2150_v53 = vmul.bf16 1027030327, %v2135_v49  ;;  %7648 = vmatpush1.bf16.msra.mxu1 %v21059_v44  ;;  %7606 = vmatprep.subr.bf16.mxu0 %v21064_v45  ;;  %v2105_v49 = vmul.bf16 1056980736, %v24020_v41  ;;  %v21112_v29 = vld [vmem:[#allocation7 + $0x9dc] ss:$28 sps:$4 sm:$0xff]  }
 0x233   : > { %7649 = vmatprep.subr.bf16.mxu1 %v21067_v47  ;;  %v2152_v59 = vmul.bf16 1027030327, %v2137_v52  ;;  %v2044_v47 = vpack.i.b16 %v1969_v26, %v1969_v26  ;;  %v2058_v52 = vpack.i.b16 %v1979_v30, %v1979_v30 }
 0x234   : > { %v2165_v60 = vadd.bf16 %v2150_v53, %v24020_v41 }
 0x235   : > { %7607 = vmatpush1.bf16.msra.mxu0 %v21062_v50  ;;  %v2167_v63 = vadd.bf16 %v2152_v59, %v24025_v42  ;;  %v2149_v59 = vmul.bf16 1027030327, %v2134_v39  ;;  %v2049_v7 = vrot.slane %v2044_v47, %v23979_v34  ;;  %v2063_v13 = vrot.slane %v2058_v52, %v23979_v34 }
 0x236   : > { %v2180_v1 = vmul.bf16 1061961548, %v2165_v60  ;;  %7650 = vmatpush1.bf16.msra.mxu1 %v21065_v54  ;;  %7608 = vmatprep.subr.bf16.mxu0 %v21070_v55  ;;  %v21095_v54 = vld [vmem:[#allocation7 + $0xa80] ss:$28 sps:$4 sm:$0xff]   ;;  %v21100_v55 = vld [vmem:[#allocation7 + $0xa4c] ss:$28 sps:$4 sm:$0xff]  }
 0x237   : > { %7651 = vmatprep.subr.bf16.mxu1 %v21073_v58  ;;  %v2182_v11 = vmul.bf16 1061961548, %v2167_v63  ;;  %v21098_v60 = vld [vmem:[#allocation7 + $0xa48] ss:$28 sps:$4 sm:$0xff]  }
 0x238   : > { %22982 = vtanh.bf16 %v2180_v1 }
 0x239   : > { %7609 = vmatpush1.bf16.msra.mxu0 %v21068_v57  ;;  %22984 = vtanh.bf16 %v2182_v11  ;;  %v2042_v57 = vrot.slane %v2037_v38, %v23979_v34 }
 0x23a   : > { %7652 = vmatpush1.bf16.msra.mxu1 %v21071_v2  ;;  %7610 = vmatprep.subr.bf16.mxu0 %v21076_v5  ;;  %v2056_v2 = vrot.slane %v2051_v46, %v23979_v34  ;;  %v21118_v46 = vld [vmem:[#allocation7 + $0x9a4] ss:$28 sps:$4 sm:$0xff]  }
 0x23b   : > { %7653 = vmatprep.subr.bf16.mxu1 %v21079_v10  ;;  %v2151_v10 = vmul.bf16 1027030327, %v2136_v48  ;;  %v21116_v48 = vld [vmem:[#allocation7 + $0x9a0] ss:$28 sps:$4 sm:$0xff]  }
 0x23d   : > { %7611 = vmatpush1.bf16.msra.mxu0 %v21074_v9 }
 0x23e   : > { %7654 = vmatpush1.bf16.msra.mxu1 %v21077_v3  ;;  %7612 = vmatprep.subr.bf16.mxu0 %v21082_v15  ;;  %v21106_v3 = vld [vmem:[#allocation7 + $0xa14] ss:$28 sps:$4 sm:$0xff]  }
 0x23f   : > { %7655 = vmatprep.subr.bf16.mxu1 %v21085_v18 }
 0x241   : > { %7613 = vmatpush1.bf16.msra.mxu0 %v21080_v17 }
 0x242   : > { %7656 = vmatpush1.bf16.msra.mxu1 %v21083_v4  ;;  %7614 = vmatprep.subr.bf16.mxu0 %v21088_v22  ;;  %v2164_v22 = vadd.bf16 %v2149_v59, %v24046_v16  ;;  %v21125_v59 = vld [vmem:[#allocation7 + $0xce8] ss:$28 sps:$4 sm:$0xff]  }
 0x243   : > { %7657 = vmatprep.subr.bf16.mxu1 %v21091_v25  ;;  %v1730_v44 = vpop.f32.mrf.mxu0  ;;  %v1773_v45 = vpop.f32.mrf.mxu1  ;;  %v2166_v25 = vadd.bf16 %v2151_v10, %v24048_v20 }
 0x244   : > { %v2179_v39 = vmul.bf16 1061961548, %v2164_v22 }
 0x245   : > { %7615 = vmatpush1.bf16.msra.mxu0 %v21086_v24  ;;  %v1732_v50 = vpop.f32.mrf.mxu0  ;;  %v1775_v51 = vpop.f32.mrf.mxu1 }
 0x246   : > { %v22983_v53 = vpop.eup %22982  ;;  %7658 = vmatpush1.bf16.msra.mxu1 %v21089_v31  ;;  %7616 = vmatprep.subr.bf16.mxu0 %v21094_v32  ;;  %v21110_v31 = vld [vmem:[#allocation7 + $0x9d8] ss:$28 sps:$4 sm:$0xff]   ;;  %22986 = vtanh.bf16 %v2179_v39 }
 0x247   : > { %v22985_v58 = vpop.eup %22984  ;;  %7659 = vmatprep.subr.bf16.mxu1 %v21097_v43  ;;  %v2210_v63 = vadd.bf16 1065369472, %v22983_v53  ;;  %v1734_v1 = vpop.f32.mrf.mxu0  ;;  %v21115_v32 = vld [vmem:[#allocation7 + $0xd5c] ss:$28 sps:$4 sm:$0xff]   ;;  %v2181_v43 = vmul.bf16 1061961548, %v2166_v25 }
 0x248   : > { %v1777_v41 = vpop.f32.mrf.mxu1  ;;  %v2212_v5 = vadd.bf16 1065369472, %v22985_v58  ;;  %v1874_v6 = vpack.c.bf16 %v1734_v1, %v1730_v44  ;;  %v21119_v53 = vld [vmem:[#allocation7 + $0xd20] ss:$28 sps:$4 sm:$0xff]   ;;  %v21131_v1 = vld [vmem:[#allocation7 + $0xcb0] ss:$28 sps:$4 sm:$0xff]  }
 0x249   : > { %v1876_v9 = vpack.c.bf16 %v1777_v41, %v1773_v45  ;;  %7617 = vmatpush1.bf16.msra.mxu0 %v21092_v35  ;;  %v24063_v42 = vmul.bf16 %v2210_v63, %v2105_v49  ;;  %v1736_v11 = vpop.f32.mrf.mxu0  ;;  %v21113_v45 = vld [vmem:[#allocation7 + $0xd58] ss:$28 sps:$4 sm:$0xff]   ;;  %v21121_v49 = vld [vmem:[#allocation7 + $0xd24] ss:$28 sps:$4 sm:$0xff]   ;;  %22988 = vtanh.bf16 %v2181_v43  ;;  %v2106_v25 = vmul.bf16 1056980736, %v24048_v20 }
 0x24a   : > { %v1779_v12 = vpop.f32.mrf.mxu1  ;;  %7660 = vmatpush1.bf16.msra.mxu1 %v21095_v54  ;;  %7618 = vmatprep.subr.bf16.mxu0 %v21100_v55  ;;  %v24066_v15 = vmul.bf16 %v2212_v5, %v2107_v56  ;;  %v24068_v17 = vadd.bf16 %v2042_v57, %v1874_v6  ;;  %v1875_v18 = vpack.c.bf16 %v1736_v11, %v1732_v50  ;;  %v21124_v54 = vld [vmem:[#allocation7 + $0x96c] ss:$28 sps:$4 sm:$0xff]   ;;  %v21133_v63 = vld [vmem:[#allocation7 + $0xcb4] ss:$28 sps:$4 sm:$0xff]   ;;  %v21136_v41 = vld [vmem:[#allocation7 + $0x8fc] ss:$28 sps:$4 sm:$0xff]  }
 0x24b   : > { %7661 = vmatprep.subr.bf16.mxu1 %v21103_v62  ;;  %7634 = vmatprep.mubr.bf16.mxu0 %v24063_v42  ;;  %v24071_v21 = vadd.bf16 %v2056_v2, %v1876_v9  ;;  %v1877_v4 = vpack.c.bf16 %v1779_v12, %v1775_v51  ;;  %v21122_v56 = vld [vmem:[#allocation7 + $0x968] ss:$28 sps:$4 sm:$0xff]   ;;  %v21128_v62 = vld [vmem:[#allocation7 + $0x930] ss:$28 sps:$4 sm:$0xff]   ;;  %v21134_v2 = vld [vmem:[#allocation7 + $0x8f8] ss:$28 sps:$4 sm:$0xff]  }
 0x24c   : > { %7677 = vmatprep.mubr.bf16.mxu1 %v24066_v15  ;;  %v24075_v24 = vadd.bf16 %v2049_v7, %v1875_v18  ;;  %v21127_v57 = vld [vmem:[#allocation7 + $0xcec] ss:$28 sps:$4 sm:$0xff]   ;;  %v21139_v5 = vld [vmem:[#allocation7 + $0xc7c] ss:$28 sps:$4 sm:$0xff]   ;;  %v21142_v9 = vld [vmem:[#allocation7 + $0x8c4] ss:$28 sps:$4 sm:$0xff]  }
 0x24d   : > { %7619 = vmatpush2.bf16.msra.mxu0 %v21098_v60  ;;  %v24078_v26 = vadd.bf16 %v2063_v13, %v1877_v4  ;;  %v21130_v60 = vld [vmem:[#allocation7 + $0x934] ss:$28 sps:$4 sm:$0xff]   ;;  %v21140_v11 = vld [vmem:[#allocation7 + $0x8c0] ss:$28 sps:$4 sm:$0xff]   ;;  %v2104_v18 = vmul.bf16 1056980736, %v24046_v16 }
 0x24e   : > { %7662 = vmatpush2.bf16.msra.mxu1 %v21101_v14  ;;  %7620 = vmatprep.subr.bf16.mxu0 %v21106_v3  ;;  %v2124_v30 = vmul.bf16 %v24075_v24, %v24075_v24  ;;  %v21137_v7 = vld [vmem:[#allocation7 + $0xc78] ss:$28 sps:$4 sm:$0xff]   ;;  %v21145_v12 = vld [vmem:[#allocation7 + $0xc44] ss:$28 sps:$4 sm:$0xff]   ;;  %v21148_v3 = vld [vmem:[#allocation7 + $0xf8c] ss:$28 sps:$4 sm:$0xff]  }
 0x24f   : > { %7663 = vmatprep.subr.bf16.mxu1 %v21109_v19  ;;  %v2126_v38 = vmul.bf16 %v24078_v26, %v24078_v26  ;;  %v21143_v14 = vld [vmem:[#allocation7 + $0xc40] ss:$28 sps:$4 sm:$0xff]   ;;  %v21151_v19 = vld [vmem:[#allocation7 + $0x130c] ss:$28 sps:$4 sm:$0xff]   ;;  %v2111_v16 = vmul.bf16 1056980736, %v24078_v26 }
 0x250   : > { %v2139_v35 = vmul.bf16 %v2124_v30, %v24075_v24  ;;  %v21154_v43 = vld [vmem:[#allocation7 + $0xf54] ss:$28 sps:$4 sm:$0xff]  }
 0x251   : > { %7621 = vmatpush2.bf16.msra.mxu0 %v21104_v23  ;;  %v2141_v44 = vmul.bf16 %v2126_v38, %v24078_v26 }
 0x252   : > { %7664 = vmatpush2.bf16.msra.mxu1 %v21107_v27  ;;  %7622 = vmatprep.subr.bf16.mxu0 %v21112_v29  ;;  %v2154_v47 = vmul.bf16 1027030327, %v2139_v35  ;;  %v1932_v29 = vcombine.high %v24035_v61, %v24035_v61  ;;  %v21149_v35 = vld [vmem:[#allocation7 + $0x1308] ss:$28 sps:$4 sm:$0xff]  }
 0x253   : > { %7665 = vmatprep.subr.bf16.mxu1 %v21115_v32  ;;  %v2156_v50 = vmul.bf16 1027030327, %v2141_v44  ;;  %v2109_v32 = vmul.bf16 1056980736, %v24075_v24 }
 0x254   : > { %v2169_v51 = vadd.bf16 %v2154_v47, %v24075_v24  ;;  %v22987_v6 = vpop.eup %22986 }
 0x255   : > { %7623 = vmatpush2.bf16.msra.mxu0 %v21110_v31  ;;  %v2171_v52 = vadd.bf16 %v2156_v50, %v24078_v26  ;;  %v2209_v23 = vadd.bf16 1065369472, %v22987_v6  ;;  %v21146_v31 = vld [vmem:[#allocation7 + $0xf88] ss:$28 sps:$4 sm:$0xff]   ;;  %v21157_v26 = vld [vmem:[#allocation7 + $0x12d4] ss:$28 sps:$4 sm:$0xff]  }
 0x256   : > { %7666 = vmatpush2.bf16.msra.mxu1 %v21113_v45  ;;  %7624 = vmatprep.subr.bf16.mxu0 %v21118_v46  ;;  %v2184_v55 = vmul.bf16 1061961548, %v2169_v51  ;;  %v24103_v46 = vrot.slane %v1932_v29, %v23974_v8  ;;  %v21155_v50 = vld [vmem:[#allocation7 + $0x12d0] ss:$28 sps:$4 sm:$0xff]   ;;  %v21160_v51 = vld [vmem:[#allocation7 + $0xf1c] ss:$28 sps:$4 sm:$0xff]  }
 0x257   : > { %7667 = vmatprep.subr.bf16.mxu1 %v21121_v49  ;;  %v2186_v58 = vmul.bf16 1061961548, %v2171_v52  ;;  %v22989_v10 = vpop.eup %22988  ;;  %v24100_v61 = vmul.bf16 %v2209_v23, %v2104_v18  ;;  %v21152_v49 = vld [vmem:[#allocation7 + $0xf50] ss:$28 sps:$4 sm:$0xff]   ;;  %v21187_v23 = vld [vmem:[#allocation7 + $0x11bc] ss:$28 sps:$4 sm:$0xff]  }
 0x258   : > { %22990 = vtanh.bf16 %v2184_v55  ;;  %v2211_v27 = vadd.bf16 1065369472, %v22989_v10  ;;  %v21175_v6 = vld [vmem:[#allocation7 + $0x122c] ss:$28 sps:$4 sm:$0xff]   ;;  %v21178_v10 = vld [vmem:[#allocation7 + $0xe74] ss:$28 sps:$4 sm:$0xff]  }
 0x259   : > { %7625 = vmatpush2.bf16.msra.mxu0 %v21116_v48  ;;  %22992 = vtanh.bf16 %v2186_v58  ;;  %v21166_v58 = vld [vmem:[#allocation7 + $0xee4] ss:$28 sps:$4 sm:$0xff]   ;;  %v21179_v18 = vld [vmem:[#allocation7 + $0x11f0] ss:$28 sps:$4 sm:$0xff]   ;;  %v21185_v29 = vld [vmem:[#allocation7 + $0x11b8] ss:$28 sps:$4 sm:$0xff]  }
 0x25a   : > { %7668 = vmatpush2.bf16.msra.mxu1 %v21119_v53  ;;  %7626 = vmatprep.subr.bf16.mxu0 %v21124_v54  ;;  %v24105_v24 = vmul.bf16 %v2211_v27, %v2106_v25  ;;  %v1948_v53 = vcombine.high %v24103_v46, %v24103_v46  ;;  %v21163_v54 = vld [vmem:[#allocation7 + $0x129c] ss:$28 sps:$4 sm:$0xff]   ;;  %v2123_v25 = vmul.bf16 %v24068_v17, %v24068_v17 }
 0x25b   : > { %7669 = vmatprep.subr.bf16.mxu1 %v21127_v57  ;;  %v21161_v57 = vld [vmem:[#allocation7 + $0x1298] ss:$28 sps:$4 sm:$0xff]   ;;  %v2125_v27 = vmul.bf16 %v24071_v21, %v24071_v21 }
 0x25d   : > { %7627 = vmatpush2.bf16.msra.mxu0 %v21122_v56  ;;  %v21158_v56 = vld [vmem:[#allocation7 + $0xf18] ss:$28 sps:$4 sm:$0xff]  }
 0x25e   : > { %7670 = vmatpush2.bf16.msra.mxu1 %v21125_v59  ;;  %7628 = vmatprep.subr.bf16.mxu0 %v21130_v60  ;;  %v1976_v59 = vrot.slane %v1948_v53, %v23974_v8  ;;  %v21169_v60 = vld [vmem:[#allocation7 + $0x1264] ss:$28 sps:$4 sm:$0xff]   ;;  %v21202_v53 = vld [vmem:[#allocation7 + $0x1114] ss:$28 sps:$4 sm:$0xff]  }
 0x25f   : > { %7671 = vmatprep.subr.bf16.mxu1 %v21133_v63  ;;  %v21164_v63 = vld [vmem:[#allocation7 + $0xee0] ss:$28 sps:$4 sm:$0xff]  }
 0x261   : > { %7629 = vmatpush2.bf16.msra.mxu0 %v21128_v62 }
 0x262   : > { %7672 = vmatpush2.bf16.msra.mxu1 %v21131_v1  ;;  %7630 = vmatprep.subr.bf16.mxu0 %v21136_v41  ;;  %v21167_v1 = vld [vmem:[#allocation7 + $0x1260] ss:$28 sps:$4 sm:$0xff]   ;;  %v21172_v41 = vld [vmem:[#allocation7 + $0xeac] ss:$28 sps:$4 sm:$0xff]  }
 0x263   : > { %7673 = vmatprep.subr.bf16.mxu1 %v21139_v5  ;;  %v24088_v13 = vpop.f32.mrf.mxu1  ;;  %v24109_v48 = vpop.f32.mrf.mxu0  ;;  %v21170_v5 = vld [vmem:[#allocation7 + $0xea8] ss:$28 sps:$4 sm:$0xff]  }
 0x265   : > { %7631 = vmatpush2.bf16.msra.mxu0 %v21134_v2  ;;  %v20508_v4 = vpop.f32.mrf.mxu1  ;;  %v1818_v55 = vpop.f32.mrf.mxu0  ;;  %v2072_v2 = vpack.i.b16 %v1976_v59, %v1976_v59 }
 0x266   : > { %v22991_v22 = vpop.eup %22990  ;;  %7674 = vmatpush2.bf16.msra.mxu1 %v21137_v7  ;;  %7632 = vmatprep.subr.bf16.mxu0 %v21142_v9  ;;  %v21173_v9 = vld [vmem:[#allocation7 + $0x1228] ss:$28 sps:$4 sm:$0xff]  }
 0x267   : > { %v22993_v30 = vpop.eup %22992  ;;  %7675 = vmatprep.subr.bf16.mxu1 %v21145_v12  ;;  %v2214_v38 = vadd.bf16 1065369472, %v22991_v22  ;;  %v24096_v39 = vpop.f32.mrf.mxu1  ;;  %v2077_v12 = vrot.slane %v2072_v2, %v23979_v34  ;;  %v21182_v22 = vld [vmem:[#allocation7 + $0xe38] ss:$28 sps:$4 sm:$0xff]  }
 0x268   : > { %v2216_v44 = vadd.bf16 1065369472, %v22993_v30  ;;  %v1880_v20 = vpack.c.bf16 %v24096_v39, %v24088_v13  ;;  %v24120_v62 = vpop.f32.mrf.mxu0  ;;  %v21190_v30 = vld [vmem:[#allocation7 + $0xe04] ss:$28 sps:$4 sm:$0xff]   ;;  %v21212_v2 = vld [vmem:[#allocation7 + $0x145c] ss:$28 sps:$4 sm:$0xff]  }
 0x269   : > { %7633 = vmatpush2.bf16.msra.mxu0 %v21140_v11  ;;  %v20509_v45 = vpop.f32.mrf.mxu1  ;;  %v24107_v47 = vmul.bf16 %v2214_v38, %v2109_v32  ;;  %v21188_v32 = vld [vmem:[#allocation7 + $0xe00] ss:$28 sps:$4 sm:$0xff]   ;;  %v21245_v39 = vld [vmem:[#allocation7 + $0x168c] ss:$28 sps:$4 sm:$0xff]  }
 0x26a   : > { %7676 = vmatpush2.bf16.msra.mxu1 %v21143_v14  ;;  %7688 = vmatprep.subr.bf16.mxu0 %v21148_v3  ;;  %v24112_v52 = vmul.bf16 %v2216_v44, %v2111_v16  ;;  %v1822_v7 = vpop.f32.mrf.mxu0  ;;  %v21176_v14 = vld [vmem:[#allocation7 + $0xe70] ss:$28 sps:$4 sm:$0xff]   ;;  %v21193_v38 = vld [vmem:[#allocation7 + $0x1184] ss:$28 sps:$4 sm:$0xff]   ;;  %v2138_v16 = vmul.bf16 %v2123_v25, %v24068_v17 }
 0x26b   : > { %7731 = vmatprep.subr.bf16.mxu1 %v21151_v19  ;;  %v1879_v11 = vpack.c.bf16 %v1822_v7, %v1818_v55  ;;  %v21181_v3 = vld [vmem:[#allocation7 + $0x11f4] ss:$28 sps:$4 sm:$0xff]   ;;  %v21184_v19 = vld [vmem:[#allocation7 + $0xe3c] ss:$28 sps:$4 sm:$0xff]   ;;  %v21196_v44 = vld [vmem:[#allocation7 + $0x114c] ss:$28 sps:$4 sm:$0xff]  }
 0x26c   : > { %7635 = vmatmul.mubr.bf16.vlgmr.msra.gmra.mxu0 %v24100_v61  ;;  %24983 = vst [vmem:[#allocation38_spill] sm:$0xff] %v24112_v52  ;;  %v21222_v25 = vld [vmem:[#allocation7 + $0x13e8] ss:$28 sps:$4 sm:$0xff]   ;;  %v21240_v13 = vld [vmem:[#allocation7 + $0x1340] ss:$28 sps:$4 sm:$0xff]  }
 0x26d   : > { %7678 = vmatmul.mubr.bf16.vlgmr.msra.gmra.mxu1 %v24105_v24  ;;  %7689 = vmatpush1.bf16.msra.mxu0 %v21146_v31  ;;  %v24123_v4 = vadd.bf16 %v2077_v12, %v1879_v11  ;;  %v21215_v11 = vld [vmem:[#allocation7 + $0x10a4] ss:$28 sps:$4 sm:$0xff]  }
 0x26e   : > { %7732 = vmatpush1.bf16.msra.mxu1 %v21149_v35  ;;  %7690 = vmatprep.subr.bf16.mxu0 %v21154_v43  ;;  %v2140_v35 = vmul.bf16 %v2125_v27, %v24071_v21  ;;  %v21191_v43 = vld [vmem:[#allocation7 + $0x1180] ss:$28 sps:$4 sm:$0xff]   ;;  %v21227_v27 = vld [vmem:[#allocation7 + $0x1034] ss:$28 sps:$4 sm:$0xff]  }
 0x26f   : > { %7733 = vmatprep.subr.bf16.mxu1 %v21157_v26  ;;  %7720 = vmatprep.mubr.bf16.mxu0 %v24107_v47  ;;  %v2128_v31 = vmul.bf16 %v24123_v4, %v24123_v4  ;;  %v21194_v26 = vld [vmem:[#allocation7 + $0x1148] ss:$28 sps:$4 sm:$0xff]  }
 0x270   : > { %7763 = vmatprep.mubr.bf16.mxu1 %v24112_v52 }
 0x271   : > { %7691 = vmatpush1.bf16.msra.mxu0 %v21152_v49  ;;  %v2143_v45 = vmul.bf16 %v2128_v31, %v24123_v4  ;;  %v21199_v49 = vld [vmem:[#allocation7 + $0x14cc] ss:$28 sps:$4 sm:$0xff]   ;;  %v21230_v31 = vld [vmem:[#allocation7 + $0x13b4] ss:$28 sps:$4 sm:$0xff]  }
 0x272   : > { %7734 = vmatpush1.bf16.msra.mxu1 %v21155_v50  ;;  %7692 = vmatprep.subr.bf16.mxu0 %v21160_v51  ;;  %v2153_v50 = vmul.bf16 1027030327, %v2138_v16  ;;  %v21197_v51 = vld [vmem:[#allocation7 + $0x14c8] ss:$28 sps:$4 sm:$0xff]  }
 0x273   : > { %7735 = vmatprep.subr.bf16.mxu1 %v21163_v54  ;;  %v2155_v54 = vmul.bf16 1027030327, %v2140_v35  ;;  %v2158_v55 = vmul.bf16 1027030327, %v2143_v45  ;;  %v21231_v35 = vld [vmem:[#allocation7 + $0xff8] ss:$28 sps:$4 sm:$0xff]  }
 0x274   : > { %v21234_v45 = vld [vmem:[#allocation7 + $0x1378] ss:$28 sps:$4 sm:$0xff]  }
 0x275   : > { %7693 = vmatpush1.bf16.msra.mxu0 %v21158_v56  ;;  %v21205_v56 = vld [vmem:[#allocation7 + $0x1494] ss:$28 sps:$4 sm:$0xff]   ;;  %v2170_v59 = vadd.bf16 %v2155_v54, %v24071_v21 }
 0x276   : > { %7736 = vmatpush1.bf16.msra.mxu1 %v21161_v57  ;;  %7694 = vmatprep.subr.bf16.mxu0 %v21166_v58  ;;  %v2168_v57 = vadd.bf16 %v2153_v50, %v24068_v17  ;;  %v21200_v58 = vld [vmem:[#allocation7 + $0x1110] ss:$28 sps:$4 sm:$0xff]  }
 0x277   : > { %7737 = vmatprep.subr.bf16.mxu1 %v21169_v60  ;;  %v21203_v60 = vld [vmem:[#allocation7 + $0x1490] ss:$28 sps:$4 sm:$0xff]   ;;  %v2185_v7 = vmul.bf16 1061961548, %v2170_v59 }
 0x279   : > { %7695 = vmatpush1.bf16.msra.mxu0 %v21164_v63  ;;  %v2173_v63 = vadd.bf16 %v2158_v55, %v24123_v4  ;;  %v21248_v55 = vld [vmem:[#allocation7 + $0x1a0c] ss:$28 sps:$4 sm:$0xff]  }
 0x27a   : > { %7738 = vmatpush1.bf16.msra.mxu1 %v21167_v1  ;;  %7696 = vmatprep.subr.bf16.mxu0 %v21172_v41  ;;  %v21209_v1 = vld [vmem:[#allocation7 + $0x10dc] ss:$28 sps:$4 sm:$0xff]  }
 0x27b   : > { %7739 = vmatprep.subr.bf16.mxu1 %v21175_v6  ;;  %v21207_v41 = vld [vmem:[#allocation7 + $0x10d8] ss:$28 sps:$4 sm:$0xff]   ;;  %v24139_v6 = vrot.slane %v24103_v46, %v23974_v8  ;;  %v21216_v46 = vld [vmem:[#allocation7 + $0x1420] ss:$28 sps:$4 sm:$0xff]  }
 0x27d   : > { %7697 = vmatpush1.bf16.msra.mxu0 %v21170_v5  ;;  %v2183_v5 = vmul.bf16 1061961548, %v2168_v57  ;;  %v1978_v12 = vcombine.high %v24139_v6, %v24139_v6 }
 0x27e   : > { %7740 = vmatpush1.bf16.msra.mxu1 %v21173_v9  ;;  %7698 = vmatprep.subr.bf16.mxu0 %v21178_v10  ;;  %v2188_v9 = vmul.bf16 1061961548, %v2173_v63  ;;  %v21210_v10 = vld [vmem:[#allocation7 + $0x1458] ss:$28 sps:$4 sm:$0xff]   ;;  %v2113_v63 = vmul.bf16 1056980736, %v24123_v4 }
 0x27f   : > { %7741 = vmatprep.subr.bf16.mxu1 %v21181_v3  ;;  %v21218_v3 = vld [vmem:[#allocation7 + $0x1424] ss:$28 sps:$4 sm:$0xff]   ;;  %22994 = vtanh.bf16 %v2183_v5  ;;  %v21257_v4 = vld [vmem:[#allocation7 + $0x161c] ss:$28 sps:$4 sm:$0xff]  }
 0x280   : > { %22996 = vtanh.bf16 %v2185_v7 }
 0x281   : > { %7699 = vmatpush1.bf16.msra.mxu0 %v21176_v14  ;;  %v21213_v14 = vld [vmem:[#allocation7 + $0x10a0] ss:$28 sps:$4 sm:$0xff]   ;;  %22998 = vtanh.bf16 %v2188_v9  ;;  %v21249_v9 = vld [vmem:[#allocation7 + $0x1650] ss:$28 sps:$4 sm:$0xff]  }
 0x282   : > { %7742 = vmatpush1.bf16.msra.mxu1 %v21179_v18  ;;  %7700 = vmatprep.subr.bf16.mxu0 %v21184_v19  ;;  %v21221_v18 = vld [vmem:[#allocation7 + $0x106c] ss:$28 sps:$4 sm:$0xff]   ;;  %v2079_v19 = vpack.i.b16 %v1978_v12, %v1978_v12 }
 0x283   : > { %7743 = vmatprep.subr.bf16.mxu1 %v21187_v23  ;;  %v21224_v23 = vld [vmem:[#allocation7 + $0x13ec] ss:$28 sps:$4 sm:$0xff]  }
 0x285   : > { %7701 = vmatpush1.bf16.msra.mxu0 %v21182_v22  ;;  %v21219_v22 = vld [vmem:[#allocation7 + $0x1068] ss:$28 sps:$4 sm:$0xff]  }
 0x286   : > { %7744 = vmatpush1.bf16.msra.mxu1 %v21185_v29  ;;  %7702 = vmatprep.subr.bf16.mxu0 %v21190_v30  ;;  %v2084_v29 = vrot.slane %v2079_v19, %v23979_v34  ;;  %v21225_v30 = vld [vmem:[#allocation7 + $0x1030] ss:$28 sps:$4 sm:$0xff]  }
 0x287   : > { %7745 = vmatprep.subr.bf16.mxu1 %v21193_v38  ;;  %v21233_v38 = vld [vmem:[#allocation7 + $0xffc] ss:$28 sps:$4 sm:$0xff]  }
 0x288   : > { %v24147_v16 = vadd.bf16 %v2084_v29, %v1880_v20  ;;  %v2108_v20 = vmul.bf16 1056980736, %v24068_v17  ;;  %v21269_v29 = vld [vmem:[#allocation7 + $0x15ac] ss:$28 sps:$4 sm:$0xff]  }
 0x289   : > { %7703 = vmatpush1.bf16.msra.mxu0 %v21188_v32  ;;  %v21228_v32 = vld [vmem:[#allocation7 + $0x13b0] ss:$28 sps:$4 sm:$0xff]  }
 0x28a   : > { %7746 = vmatpush1.bf16.msra.mxu1 %v21191_v43  ;;  %7704 = vmatprep.subr.bf16.mxu0 %v21196_v44  ;;  %v21236_v43 = vld [vmem:[#allocation7 + $0x137c] ss:$28 sps:$4 sm:$0xff]  }
 0x28b   : > { %7747 = vmatprep.subr.bf16.mxu1 %v21199_v49  ;;  %v21239_v49 = vld [vmem:[#allocation7 + $0xfc4] ss:$28 sps:$4 sm:$0xff]  }
 0x28d   : > { %7705 = vmatpush2.bf16.msra.mxu0 %v21194_v26  ;;  %v22995_v44 = vpop.eup %22994  ;;  %v2129_v26 = vmul.bf16 %v24147_v16, %v24147_v16 }
 0x28e   : > { %7748 = vmatpush2.bf16.msra.mxu1 %v21197_v51  ;;  %7706 = vmatprep.subr.bf16.mxu0 %v21202_v53  ;;  %v22997_v50 = vpop.eup %22996  ;;  %v21237_v51 = vld [vmem:[#allocation7 + $0xfc0] ss:$28 sps:$4 sm:$0xff]   ;;  %v2213_v57 = vadd.bf16 1065369472, %v22995_v44  ;;  %v21278_v44 = vld [vmem:[#allocation7 + $0x18f4] ss:$28 sps:$4 sm:$0xff]  }
 0x28f   : > { %7749 = vmatprep.subr.bf16.mxu1 %v21205_v56  ;;  %v21242_v53 = vld [vmem:[#allocation7 + $0x1344] ss:$28 sps:$4 sm:$0xff]   ;;  %v22999_v54 = vpop.eup %22998  ;;  %v2144_v56 = vmul.bf16 %v2129_v26, %v24147_v16  ;;  %v2215_v59 = vadd.bf16 1065369472, %v22997_v50  ;;  %v21276_v26 = vld [vmem:[#allocation7 + $0x18f0] ss:$28 sps:$4 sm:$0xff]  }
 0x290   : > { %v24155_v17 = vmul.bf16 %v2213_v57, %v2108_v20  ;;  %v21279_v50 = vld [vmem:[#allocation7 + $0x1538] ss:$28 sps:$4 sm:$0xff]   ;;  %v21288_v20 = vld [vmem:[#allocation7 + $0x1880] ss:$28 sps:$4 sm:$0xff]  }
 0x291   : > { %7707 = vmatpush2.bf16.msra.mxu0 %v21200_v58  ;;  %v2110_v58 = vmul.bf16 1056980736, %v24071_v21  ;;  %v2159_v5 = vmul.bf16 1027030327, %v2144_v56  ;;  %v21293_v56 = vld [vmem:[#allocation7 + $0x184c] ss:$28 sps:$4 sm:$0xff]  }
 0x292   : > { %7750 = vmatpush2.bf16.msra.mxu1 %v21203_v60  ;;  %7708 = vmatprep.subr.bf16.mxu0 %v21209_v1  ;;  %v21243_v60 = vld [vmem:[#allocation7 + $0x1688] ss:$28 sps:$4 sm:$0xff]   ;;  %v2218_v1 = vadd.bf16 1065369472, %v22999_v54  ;;  %v21285_v54 = vld [vmem:[#allocation7 + $0x1500] ss:$28 sps:$4 sm:$0xff]  }
 0x293   : > { %7751 = vmatprep.subr.bf16.mxu1 %v21212_v2  ;;  %v21251_v2 = vld [vmem:[#allocation7 + $0x1654] ss:$28 sps:$4 sm:$0xff]   ;;  %v24157_v7 = vmul.bf16 %v2215_v59, %v2110_v58  ;;  %v2174_v12 = vadd.bf16 %v2159_v5, %v24147_v16  ;;  %v21291_v58 = vld [vmem:[#allocation7 + $0x1848] ss:$28 sps:$4 sm:$0xff]   ;;  %v2114_v59 = vmul.bf16 1056980736, %v24147_v16 }
 0x294   : > { %v24159_v21 = vmul.bf16 %v2218_v1, %v2113_v63  ;;  %v21296_v57 = vld [vmem:[#allocation7 + $0x194] ss:$28 sps:$4 sm:$0xff]   ;;  %v21302_v5 = vld [vmem:[#allocation7 + $0x15c] ss:$28 sps:$4 sm:$0xff]  }
 0x295   : > { %7709 = vmatpush2.bf16.msra.mxu0 %v21207_v41  ;;  %v21246_v41 = vld [vmem:[#allocation7 + $0x1a08] ss:$28 sps:$4 sm:$0xff]   ;;  %24984 = vst [vmem:[#allocation39_spill] sm:$0xff] %v24157_v7  ;;  %v2189_v19 = vmul.bf16 1061961548, %v2174_v12 }
 0x296   : > { %7752 = vmatpush2.bf16.msra.mxu1 %v21210_v10  ;;  %7710 = vmatprep.subr.bf16.mxu0 %v21215_v11  ;;  %v21254_v10 = vld [vmem:[#allocation7 + $0x19d4] ss:$28 sps:$4 sm:$0xff]   ;;  %v21308_v12 = vld [vmem:[#allocation7 + $0x124] ss:$28 sps:$4 sm:$0xff]  }
 0x297   : > { %7753 = vmatprep.subr.bf16.mxu1 %v21218_v3  ;;  %v21252_v11 = vld [vmem:[#allocation7 + $0x19d0] ss:$28 sps:$4 sm:$0xff]   ;;  %v21260_v3 = vld [vmem:[#allocation7 + $0x199c] ss:$28 sps:$4 sm:$0xff]   ;;  %23000 = vtanh.bf16 %v2189_v19 }
 0x298   : > { %v21294_v63 = vld [vmem:[#allocation7 + $0x190] ss:$28 sps:$4 sm:$0xff]   ;;  %v21300_v16 = vld [vmem:[#allocation7 + $0x158] ss:$28 sps:$4 sm:$0xff]  }
 0x299   : > { %7711 = vmatpush2.bf16.msra.mxu0 %v21213_v14  ;;  %v21255_v14 = vld [vmem:[#allocation7 + $0x1618] ss:$28 sps:$4 sm:$0xff]   ;;  %v21314_v19 = vld [vmem:[#allocation7 + $0xec] ss:$28 sps:$4 sm:$0xff]  }
 0x29a   : > { %7754 = vmatpush2.bf16.msra.mxu1 %v21216_v46  ;;  %7712 = vmatprep.subr.bf16.mxu0 %v21221_v18  ;;  %v21258_v46 = vld [vmem:[#allocation7 + $0x1998] ss:$28 sps:$4 sm:$0xff]   ;;  %v21263_v18 = vld [vmem:[#allocation7 + $0x15e4] ss:$28 sps:$4 sm:$0xff]  }
 0x29b   : > { %7755 = vmatprep.subr.bf16.mxu1 %v21224_v23  ;;  %v21261_v23 = vld [vmem:[#allocation7 + $0x15e0] ss:$28 sps:$4 sm:$0xff]  }
 0x29d   : > { %7713 = vmatpush2.bf16.msra.mxu0 %v21219_v22  ;;  %v21266_v22 = vld [vmem:[#allocation7 + $0x1964] ss:$28 sps:$4 sm:$0xff]  }
 0x29e   : > { %7756 = vmatpush2.bf16.msra.mxu1 %v21222_v25  ;;  %7714 = vmatprep.subr.bf16.mxu0 %v21227_v27  ;;  %v2065_v25 = vpack.i.b16 %v24139_v6, %v24139_v6  ;;  %v21264_v27 = vld [vmem:[#allocation7 + $0x1960] ss:$28 sps:$4 sm:$0xff]   ;;  %v21273_v6 = vld [vmem:[#allocation7 + $0x1570] ss:$28 sps:$4 sm:$0xff]  }
 0x29f   : > { %7757 = vmatprep.subr.bf16.mxu1 %v21230_v31  ;;  %v21272_v31 = vld [vmem:[#allocation7 + $0x192c] ss:$28 sps:$4 sm:$0xff]  }
 0x2a1   : > { %7715 = vmatpush2.bf16.msra.mxu0 %v21225_v30  ;;  %v21267_v30 = vld [vmem:[#allocation7 + $0x15a8] ss:$28 sps:$4 sm:$0xff]  }
 0x2a2   : > { %7758 = vmatpush2.bf16.msra.mxu1 %v21228_v32  ;;  %7716 = vmatprep.subr.bf16.mxu0 %v21233_v38  ;;  %v1878_v32 = vpack.c.bf16 %v24120_v62, %v24109_v48  ;;  %v2070_v38 = vrot.slane %v2065_v25, %v23979_v34  ;;  %v21284_v48 = vld [vmem:[#allocation7 + $0x18bc] ss:$28 sps:$4 sm:$0xff]   ;;  %v21315_v25 = vld [vmem:[#allocation7 + $0x1768] ss:$28 sps:$4 sm:$0xff]  }
 0x2a3   : > { %7759 = vmatprep.subr.bf16.mxu1 %v21236_v43  ;;  %v21275_v43 = vld [vmem:[#allocation7 + $0x1574] ss:$28 sps:$4 sm:$0xff]  }
 0x2a5   : > { %7717 = vmatpush2.bf16.msra.mxu0 %v21231_v35  ;;  %v21270_v35 = vld [vmem:[#allocation7 + $0x1928] ss:$28 sps:$4 sm:$0xff]  }
 0x2a6   : > { %7760 = vmatpush2.bf16.msra.mxu1 %v21234_v45  ;;  %7718 = vmatprep.subr.bf16.mxu0 %v21239_v49  ;;  %v24171_v45 = vadd.bf16 %v2070_v38, %v1878_v32  ;;  %v21281_v49 = vld [vmem:[#allocation7 + $0x153c] ss:$28 sps:$4 sm:$0xff]  }
 0x2a7   : > { %7761 = vmatprep.subr.bf16.mxu1 %v21242_v53  ;;  %v21287_v53 = vld [vmem:[#allocation7 + $0x1504] ss:$28 sps:$4 sm:$0xff]   ;;  %v21326_v32 = vld [vmem:[#allocation7 + $0x7c] ss:$28 sps:$4 sm:$0xff]  }
 0x2a8   : > { %v2127_v62 = vmul.bf16 %v24171_v45, %v24171_v45  ;;  %v21324_v38 = vld [vmem:[#allocation7 + $0x78] ss:$28 sps:$4 sm:$0xff]  }
 0x2a9   : > { %7719 = vmatpush2.bf16.msra.mxu0 %v21237_v51  ;;  %v21282_v51 = vld [vmem:[#allocation7 + $0x18b8] ss:$28 sps:$4 sm:$0xff]  }
 0x2aa   : > { %7762 = vmatpush2.bf16.msra.mxu1 %v21240_v13  ;;  %7774 = vmatprep.subr.bf16.mxu0 %v21245_v39  ;;  %v21290_v13 = vld [vmem:[#allocation7 + $0x1884] ss:$28 sps:$4 sm:$0xff]   ;;  %v23001_v39 = vpop.eup %23000 }
 0x2ab   : > { %7817 = vmatprep.subr.bf16.mxu1 %v21248_v55  ;;  %v2142_v55 = vmul.bf16 %v2127_v62, %v24171_v45  ;;  %v21336_v62 = vld [vmem:[#allocation7 + $0x8] ss:$28 sps:$4 sm:$0xff]  }
 0x2ac   : > { %7721 = vmatmul.mubr.bf16.vlgmr.msra.gmra.mxu0 %v24155_v17 }
 0x2ad   : > { %7764 = vmatmul.mubr.bf16.vlgmr.msra.gmra.mxu1 %v24157_v7  ;;  %7775 = vmatpush1.bf16.msra.mxu0 %v21243_v60  ;;  %v2219_v60 = vadd.bf16 1065369472, %v23001_v39  ;;  %v2157_v1 = vmul.bf16 1027030327, %v2142_v55  ;;  %v21342_v39 = vld [vmem:[#allocation7 + $0x510] ss:$28 sps:$4 sm:$0xff]  }
 0x2ae   : > { %7818 = vmatpush1.bf16.msra.mxu1 %v21246_v41  ;;  %7776 = vmatprep.subr.bf16.mxu0 %v21251_v2  ;;  %v21299_v2 = vld [vmem:[#allocation7 + $0x1814] ss:$28 sps:$4 sm:$0xff]   ;;  %v21350_v55 = vld [vmem:[#allocation7 + $0x4dc] ss:$28 sps:$4 sm:$0xff]  }
 0x2af   : > { %7819 = vmatprep.subr.bf16.mxu1 %v21254_v10  ;;  %7806 = vmatprep.mubr.bf16.mxu0 %v24159_v21  ;;  %v24177_v41 = vmul.bf16 %v2219_v60, %v2114_v59  ;;  %v2172_v10 = vadd.bf16 %v2157_v1, %v24171_v45  ;;  %v21345_v59 = vld [vmem:[#allocation7 + $0x318] ss:$28 sps:$4 sm:$0xff]  }
 0x2b0   : > { %7849 = vmatprep.mubr.bf16.mxu1 %v24948_v0  ;;  %v21348_v60 = vld [vmem:[#allocation7 + $0x4d8] ss:$28 sps:$4 sm:$0xff]  }
 0x2b1   : > { %7777 = vmatpush1.bf16.msra.mxu0 %v21249_v9  ;;  %v21297_v9 = vld [vmem:[#allocation7 + $0x1810] ss:$28 sps:$4 sm:$0xff]  }
 0x2b2   : > { %7820 = vmatpush1.bf16.msra.mxu1 %v21252_v11  ;;  %7778 = vmatprep.subr.bf16.mxu0 %v21257_v4  ;;  %v21305_v11 = vld [vmem:[#allocation7 + $0x17dc] ss:$28 sps:$4 sm:$0xff]  }
 0x2b3   : > { %7821 = vmatprep.subr.bf16.mxu1 %v21260_v3  ;;  %v21303_v4 = vld [vmem:[#allocation7 + $0x17d8] ss:$28 sps:$4 sm:$0xff]   ;;  %v21306_v3 = vld [vmem:[#allocation7 + $0x120] ss:$28 sps:$4 sm:$0xff]  }
 0x2b5   : > { %7779 = vmatpush1.bf16.msra.mxu0 %v21255_v14  ;;  %v2187_v14 = vmul.bf16 1061961548, %v2172_v10 }
 0x2b6   : > { %7822 = vmatpush1.bf16.msra.mxu1 %v21258_v46  ;;  %7780 = vmatprep.subr.bf16.mxu0 %v21263_v18  ;;  %v21311_v46 = vld [vmem:[#allocation7 + $0x17a4] ss:$28 sps:$4 sm:$0xff]  }
 0x2b7   : > { %7823 = vmatprep.subr.bf16.mxu1 %v21266_v22  ;;  %v21309_v18 = vld [vmem:[#allocation7 + $0x17a0] ss:$28 sps:$4 sm:$0xff]   ;;  %23002 = vtanh.bf16 %v2187_v14  ;;  %v21312_v22 = vld [vmem:[#allocation7 + $0xe8] ss:$28 sps:$4 sm:$0xff]  }
 0x2b9   : > { %7781 = vmatpush1.bf16.msra.mxu0 %v21261_v23  ;;  %v21317_v23 = vld [vmem:[#allocation7 + $0x176c] ss:$28 sps:$4 sm:$0xff]  }
 0x2ba   : > { %7824 = vmatpush1.bf16.msra.mxu1 %v21264_v27  ;;  %7782 = vmatprep.subr.bf16.mxu0 %v21269_v29  ;;  %v21320_v27 = vld [vmem:[#allocation7 + $0xb4] ss:$28 sps:$4 sm:$0xff]  }
 0x2bb   : > { %7825 = vmatprep.subr.bf16.mxu1 %v21272_v31  ;;  %v21318_v29 = vld [vmem:[#allocation7 + $0xb0] ss:$28 sps:$4 sm:$0xff]  }
 0x2bc   : > { %v21321_v31 = vld [vmem:[#allocation7 + $0x1730] ss:$28 sps:$4 sm:$0xff]  }
 0x2bd   : > { %7783 = vmatpush1.bf16.msra.mxu0 %v21267_v30  ;;  %v21323_v30 = vld [vmem:[#allocation7 + $0x1734] ss:$28 sps:$4 sm:$0xff]  }
 0x2be   : > { %7826 = vmatpush1.bf16.msra.mxu1 %v21270_v35  ;;  %7784 = vmatprep.subr.bf16.mxu0 %v21275_v43  ;;  %v21329_v35 = vld [vmem:[#allocation7 + $0x16fc] ss:$28 sps:$4 sm:$0xff]  }
 0x2bf   : > { %7827 = vmatprep.subr.bf16.mxu1 %v21278_v44  ;;  %v21327_v43 = vld [vmem:[#allocation7 + $0x16f8] ss:$28 sps:$4 sm:$0xff]   ;;  %v21330_v44 = vld [vmem:[#allocation7 + $0x40] ss:$28 sps:$4 sm:$0xff]  }
 0x2c1   : > { %7785 = vmatpush1.bf16.msra.mxu0 %v21273_v6  ;;  %v21332_v6 = vld [vmem:[#allocation7 + $0x44] ss:$28 sps:$4 sm:$0xff]  }
 0x2c2   : > { %7828 = vmatpush1.bf16.msra.mxu1 %v21276_v26  ;;  %7786 = vmatprep.subr.bf16.mxu0 %v21281_v49  ;;  %v21335_v26 = vld [vmem:[#allocation7 + $0x16c4] ss:$28 sps:$4 sm:$0xff]  }
 0x2c3   : > { %7829 = vmatprep.subr.bf16.mxu1 %v21284_v48  ;;  %v21338_v48 = vld [vmem:[#allocation7 + $0xc] ss:$28 sps:$4 sm:$0xff]  }
 0x2c5   : > { %7787 = vmatpush1.bf16.msra.mxu0 %v21279_v50  ;;  %v23003_v49 = vpop.eup %23002  ;;  %v21333_v50 = vld [vmem:[#allocation7 + $0x16c0] ss:$28 sps:$4 sm:$0xff]  }
 0x2c6   : > { %7830 = vmatpush1.bf16.msra.mxu1 %v21282_v51  ;;  %7788 = vmatprep.subr.bf16.mxu0 %v21287_v53  ;;  %v21341_v51 = vld [vmem:[#allocation7 + $0x354] ss:$28 sps:$4 sm:$0xff]   ;;  %v2112_v53 = vmul.bf16 1056980736, %v24171_v45 }
 0x2c7   : > { %7831 = vmatprep.subr.bf16.mxu1 %v21290_v13  ;;  %v21344_v13 = vld [vmem:[#allocation7 + $0x514] ss:$28 sps:$4 sm:$0xff]  }
 0x2c9   : > { %7789 = vmatpush1.bf16.msra.mxu0 %v21285_v54  ;;  %v2217_v54 = vadd.bf16 1065369472, %v23003_v49  ;;  %v21381_v49 = vld [vmem:[#allocation7 + $0x1c8] ss:$28 sps:$4 sm:$0xff]  }
 0x2ca   : > { %7832 = vmatpush1.bf16.msra.mxu1 %v21288_v20  ;;  %7790 = vmatprep.subr.bf16.mxu0 %v21293_v56  ;;  %v21339_v20 = vld [vmem:[#allocation7 + $0x350] ss:$28 sps:$4 sm:$0xff]  }
 0x2cb   : > { %7860 = vmatprep.subr.bf16.mxu1 %v21296_v57  ;;  %v24183_v56 = vmul.bf16 %v2217_v54, %v2112_v53  ;;  %v21347_v57 = vld [vmem:[#allocation7 + $0x31c] ss:$28 sps:$4 sm:$0xff]  }
 0x2cc   : > { %v21393_v53 = vld [vmem:[#allocation7 + $0x698] ss:$28 sps:$4 sm:$0xff]  }
 0x2cd   : > { %7850 = vmatmul.mubr.bf16.vlgmr.msra.gmra.mxu1 %v24177_v41  ;;  %7791 = vmatpush2.bf16.msra.mxu0 %v21291_v58  ;;  %v21395_v54 = vld [vmem:[#allocation7 + $0x69c] ss:$28 sps:$4 sm:$0xff]  }
 0x2ce   : > { %7861 = vmatpush1.bf16.msra.mxu1 %v21294_v63  ;;  %7892 = vmatprep.mubr.bf16.mxu1 %v24009_v28  ;;  %v21356_v63 = vld [vmem:[#allocation7 + $0x4a4] ss:$28 sps:$4 sm:$0xff]  }
 0x2cf   : > { %7792 = vmatprep.subr.bf16.mxu0 %v21299_v2  ;;  %7862 = vmatprep.subr.bf16.mxu1 %v21302_v5 }
 0x2d1   : > { %7793 = vmatpush2.bf16.msra.mxu0 %v21297_v9  ;;  %v21353_v9 = vld [vmem:[#allocation7 + $0x2e4] ss:$28 sps:$4 sm:$0xff]  }
 0x2d2   : > { %7863 = vmatpush1.bf16.msra.mxu1 %v21300_v16  ;;  %7794 = vmatprep.subr.bf16.mxu0 %v21305_v11  ;;  %v21351_v16 = vld [vmem:[#allocation7 + $0x2e0] ss:$28 sps:$4 sm:$0xff]  }
 0x2d3   : > { %7864 = vmatprep.subr.bf16.mxu1 %v21308_v12  ;;  %v21354_v11 = vld [vmem:[#allocation7 + $0x4a0] ss:$28 sps:$4 sm:$0xff]  }
 0x2d5   : > { %7795 = vmatpush2.bf16.msra.mxu0 %v21303_v4  ;;  %v21362_v4 = vld [vmem:[#allocation7 + $0x46c] ss:$28 sps:$4 sm:$0xff]  }
 0x2d6   : > { %7865 = vmatpush1.bf16.msra.mxu1 %v21306_v3  ;;  %7796 = vmatprep.subr.bf16.mxu0 %v21311_v46  ;;  %v21359_v3 = vld [vmem:[#allocation7 + $0x2ac] ss:$28 sps:$4 sm:$0xff]  }
 0x2d7   : > { %7866 = vmatprep.subr.bf16.mxu1 %v21314_v19  ;;  %v21360_v46 = vld [vmem:[#allocation7 + $0x468] ss:$28 sps:$4 sm:$0xff]   ;;  %v21368_v19 = vld [vmem:[#allocation7 + $0x434] ss:$28 sps:$4 sm:$0xff]  }
 0x2d9   : > { %7797 = vmatpush2.bf16.msra.mxu0 %v21309_v18  ;;  %v21357_v18 = vld [vmem:[#allocation7 + $0x2a8] ss:$28 sps:$4 sm:$0xff]  }
 0x2da   : > { %7867 = vmatpush1.bf16.msra.mxu1 %v21312_v22  ;;  %7798 = vmatprep.subr.bf16.mxu0 %v21317_v23  ;;  %v21365_v22 = vld [vmem:[#allocation7 + $0x274] ss:$28 sps:$4 sm:$0xff]  }
 0x2db   : > { %7868 = vmatprep.subr.bf16.mxu1 %v21320_v27  ;;  %v21366_v23 = vld [vmem:[#allocation7 + $0x430] ss:$28 sps:$4 sm:$0xff]   ;;  %v21374_v27 = vld [vmem:[#allocation7 + $0x3fc] ss:$28 sps:$4 sm:$0xff]  }
 0x2dd   : > { %7799 = vmatpush2.bf16.msra.mxu0 %v21315_v25  ;;  %v21363_v25 = vld [vmem:[#allocation7 + $0x270] ss:$28 sps:$4 sm:$0xff]  }
 0x2de   : > { %7869 = vmatpush1.bf16.msra.mxu1 %v21318_v29  ;;  %7800 = vmatprep.subr.bf16.mxu0 %v21323_v30  ;;  %v21371_v29 = vld [vmem:[#allocation7 + $0x23c] ss:$28 sps:$4 sm:$0xff]  }
 0x2df   : > { %7870 = vmatprep.subr.bf16.mxu1 %v21326_v32  ;;  %v21372_v30 = vld [vmem:[#allocation7 + $0x3f8] ss:$28 sps:$4 sm:$0xff]   ;;  %v21380_v32 = vld [vmem:[#allocation7 + $0x3c4] ss:$28 sps:$4 sm:$0xff]  }
 0x2e1   : > { %7801 = vmatpush2.bf16.msra.mxu0 %v21321_v31  ;;  %v21369_v31 = vld [vmem:[#allocation7 + $0x238] ss:$28 sps:$4 sm:$0xff]  }
 0x2e2   : > { %7871 = vmatpush1.bf16.msra.mxu1 %v21324_v38  ;;  %7802 = vmatprep.subr.bf16.mxu0 %v21329_v35  ;;  %v21377_v38 = vld [vmem:[#allocation7 + $0x204] ss:$28 sps:$4 sm:$0xff]  }
 0x2e3   : > { %7872 = vmatprep.subr.bf16.mxu1 %v21332_v6  ;;  %v21378_v35 = vld [vmem:[#allocation7 + $0x3c0] ss:$28 sps:$4 sm:$0xff]   ;;  %v21386_v6 = vld [vmem:[#allocation7 + $0x38c] ss:$28 sps:$4 sm:$0xff]  }
 0x2e5   : > { %7803 = vmatpush2.bf16.msra.mxu0 %v21327_v43  ;;  %v21375_v43 = vld [vmem:[#allocation7 + $0x200] ss:$28 sps:$4 sm:$0xff]  }
 0x2e6   : > { %7873 = vmatpush1.bf16.msra.mxu1 %v21330_v44  ;;  %7804 = vmatprep.subr.bf16.mxu0 %v21335_v26  ;;  %v21383_v44 = vld [vmem:[#allocation7 + $0x1cc] ss:$28 sps:$4 sm:$0xff]  }
 0x2e7   : > { %7874 = vmatprep.subr.bf16.mxu1 %v21338_v48  ;;  %v21384_v26 = vld [vmem:[#allocation7 + $0x388] ss:$28 sps:$4 sm:$0xff]   ;;  %v21387_v48 = vld [vmem:[#allocation7 + $0x6d0] ss:$28 sps:$4 sm:$0xff]  }
 0x2e9   : > { %7805 = vmatpush2.bf16.msra.mxu0 %v21333_v50  ;;  %v21389_v50 = vld [vmem:[#allocation7 + $0x6d4] ss:$28 sps:$4 sm:$0xff]  }
 0x2ea   : > { %7875 = vmatpush1.bf16.msra.mxu1 %v21336_v62  ;;  %7903 = vmatprep.subr.bf16.mxu0 %v21344_v13  ;;  %v21392_v62 = vld [vmem:[#allocation7 + $0x894] ss:$28 sps:$4 sm:$0xff]   ;;  %v21398_v13 = vld [vmem:[#allocation7 + $0x85c] ss:$28 sps:$4 sm:$0xff]  }
 0x2eb   : > { %7876 = vmatprep.subr.bf16.mxu1 %v21341_v51  ;;  %v21390_v51 = vld [vmem:[#allocation7 + $0x890] ss:$28 sps:$4 sm:$0xff]  }
 0x2ec   : > { %7807 = vmatmul.mubr.bf16.vlgmr.msra.gmra.mxu0 %v24183_v56  ;;  %v7550_v58 = vpop.f32.mrf.mxu0 }
 0x2ed   : > { %v7593_v45 = vpop.f32.mrf.mxu1  ;;  %7904 = vmatpush1.bf16.msra.mxu0 %v21342_v39  ;;  %7935 = vmatprep.mubr.bf16.mxu0 %v24013_v33  ;;  %v21396_v39 = vld [vmem:[#allocation7 + $0x858] ss:$28 sps:$4 sm:$0xff]  }
 0x2ee   : > { %v24187_v1 = vadd.f32 %v7593_v45, %v7550_v58  ;;  %7877 = vmatpush2.bf16.msra.mxu1 %v21339_v20  ;;  %v24189_v2 = vpop.f32.mrf.mxu0  ;;  %7905 = vmatprep.subr.bf16.mxu0 %v21350_v55  ;;  %v21401_v20 = vld [vmem:[#allocation7 + $0x664] ss:$28 sps:$4 sm:$0xff]  }
 0x2ef   : > { %v24191_v5 = vpop.f32.mrf.mxu1  ;;  %7878 = vmatprep.subr.bf16.mxu1 %v21347_v57  ;;  %v21399_v55 = vld [vmem:[#allocation7 + $0x660] ss:$28 sps:$4 sm:$0xff]   ;;  %v21408_v45 = vld [vmem:[#allocation7 + $0x7e8] ss:$28 sps:$4 sm:$0xff]  }
 0x2f0   : > { %v7554_v10 = vpop.f32.mrf.mxu0  ;;  %v21404_v57 = vld [vmem:[#allocation7 + $0x824] ss:$28 sps:$4 sm:$0xff]  }
 0x2f1   : > { %v7597_v12 = vpop.f32.mrf.mxu1  ;;  %7906 = vmatpush1.bf16.msra.mxu0 %v21348_v60  ;;  %v21402_v58 = vld [vmem:[#allocation7 + $0x820] ss:$28 sps:$4 sm:$0xff]   ;;  %v21410_v60 = vld [vmem:[#allocation7 + $0x7ec] ss:$28 sps:$4 sm:$0xff]  }
 0x2f2   : > { %v24193_v14 = vadd.f32 %v7597_v12, %v7554_v10  ;;  %7879 = vmatpush2.bf16.msra.mxu1 %v21345_v59  ;;  %7907 = vmatprep.subr.bf16.mxu0 %v21356_v63  ;;  %v21407_v59 = vld [vmem:[#allocation7 + $0x62c] ss:$28 sps:$4 sm:$0xff]   ;;  %v21417_v12 = vld [vmem:[#allocation7 + $0x5b8] ss:$28 sps:$4 sm:$0xff]  }
 0x2f3   : > { %7880 = vmatprep.subr.bf16.mxu1 %v21353_v9  ;;  %v21405_v63 = vld [vmem:[#allocation7 + $0x628] ss:$28 sps:$4 sm:$0xff]   ;;  %v21413_v9 = vld [vmem:[#allocation7 + $0x5f4] ss:$28 sps:$4 sm:$0xff]  }
 0x2f4   : > { %v21411_v10 = vld [vmem:[#allocation7 + $0x5f0] ss:$28 sps:$4 sm:$0xff]  }
 0x2f5   : > { %7908 = vmatpush1.bf16.msra.mxu0 %v21354_v11  ;;  %v21414_v11 = vld [vmem:[#allocation7 + $0x7b0] ss:$28 sps:$4 sm:$0xff]  }
 0x2f6   : > { %7881 = vmatpush2.bf16.msra.mxu1 %v21351_v16  ;;  %7909 = vmatprep.subr.bf16.mxu0 %v21362_v4  ;;  %v21416_v16 = vld [vmem:[#allocation7 + $0x7b4] ss:$28 sps:$4 sm:$0xff]   ;;  %v21419_v4 = vld [vmem:[#allocation7 + $0x5bc] ss:$28 sps:$4 sm:$0xff]  }
 0x2f7   : > { %7882 = vmatprep.subr.bf16.mxu1 %v21359_v3  ;;  %v21422_v3 = vld [vmem:[#allocation7 + $0x77c] ss:$28 sps:$4 sm:$0xff]  }
 0x2f9   : > { %7910 = vmatpush1.bf16.msra.mxu0 %v21360_v46  ;;  %v21420_v46 = vld [vmem:[#allocation7 + $0x778] ss:$28 sps:$4 sm:$0xff]  }
 0x2fa   : > { %7883 = vmatpush2.bf16.msra.mxu1 %v21357_v18  ;;  %7911 = vmatprep.subr.bf16.mxu0 %v21368_v19  ;;  %v21425_v18 = vld [vmem:[#allocation7 + $0x584] ss:$28 sps:$4 sm:$0xff]  }
 0x2fb   : > { %7884 = vmatprep.subr.bf16.mxu1 %v21365_v22  ;;  %v21423_v19 = vld [vmem:[#allocation7 + $0x580] ss:$28 sps:$4 sm:$0xff]  }
 0x2fc   : > { %v21428_v22 = vld [vmem:[#allocation7 + $0x744] ss:$28 sps:$4 sm:$0xff]  }
 0x2fd   : > { %7912 = vmatpush1.bf16.msra.mxu0 %v21366_v23  ;;  %v21426_v23 = vld [vmem:[#allocation7 + $0x740] ss:$28 sps:$4 sm:$0xff]  }
 0x2fe   : > { %7885 = vmatpush2.bf16.msra.mxu1 %v21363_v25  ;;  %7913 = vmatprep.subr.bf16.mxu0 %v21374_v27  ;;  %v21431_v25 = vld [vmem:[#allocation7 + $0x54c] ss:$28 sps:$4 sm:$0xff]  }
 0x2ff   : > { %7886 = vmatprep.subr.bf16.mxu1 %v21371_v29  ;;  %v21429_v27 = vld [vmem:[#allocation7 + $0x548] ss:$28 sps:$4 sm:$0xff]  }
 0x300   : > { %v21434_v29 = vld [vmem:[#allocation7 + $0x70c] ss:$28 sps:$4 sm:$0xff]  }
 0x301   : > { %7914 = vmatpush1.bf16.msra.mxu0 %v21372_v30  ;;  %v21432_v30 = vld [vmem:[#allocation7 + $0x708] ss:$28 sps:$4 sm:$0xff]  }
 0x302   : > { %7887 = vmatpush2.bf16.msra.mxu1 %v21369_v31  ;;  %7915 = vmatprep.subr.bf16.mxu0 %v21380_v32  ;;  %v21437_v31 = vld [vmem:[#allocation7 + $0xa54] ss:$28 sps:$4 sm:$0xff]  }
 0x303   : > { %7888 = vmatprep.subr.bf16.mxu1 %v21377_v38  ;;  %v21440_v32 = vld [vmem:[#allocation7 + $0xc14] ss:$28 sps:$4 sm:$0xff]  }
 0x304   : > { %v21438_v38 = vld [vmem:[#allocation7 + $0xc10] ss:$28 sps:$4 sm:$0xff]  }
 0x305   : > { %7916 = vmatpush1.bf16.msra.mxu0 %v21378_v35  ;;  %v21435_v35 = vld [vmem:[#allocation7 + $0xa50] ss:$28 sps:$4 sm:$0xff]  }
 0x306   : > { %7889 = vmatpush2.bf16.msra.mxu1 %v21375_v43  ;;  %7917 = vmatprep.subr.bf16.mxu0 %v21386_v6  ;;  %v21446_v43 = vld [vmem:[#allocation7 + $0xbdc] ss:$28 sps:$4 sm:$0xff]   ;;  %v24197_v6 = vpop.f32.mrf.mxu0 }
 0x307   : > { %7890 = vmatprep.subr.bf16.mxu1 %v21383_v44  ;;  %v24199_v44 = vpop.f32.mrf.mxu1 }
 0x309   : > { %7918 = vmatpush1.bf16.msra.mxu0 %v21384_v26  ;;  %v21443_v26 = vld [vmem:[#allocation7 + $0xa1c] ss:$28 sps:$4 sm:$0xff]  }
 0x30a   : > { %7891 = vmatpush2.bf16.msra.mxu1 %v21381_v49  ;;  %7919 = vmatprep.subr.bf16.mxu0 %v21389_v50  ;;  %v21441_v50 = vld [vmem:[#allocation7 + $0xa18] ss:$28 sps:$4 sm:$0xff]  }
 0x30b   : > { %7946 = vmatprep.subr.bf16.mxu1 %v21392_v62  ;;  %v21452_v62 = vld [vmem:[#allocation7 + $0xba4] ss:$28 sps:$4 sm:$0xff]  }
 0x30d   : > { %7893 = vmatmul.mubr.bf16.vlgmr.msra.gmra.mxu1 %v24015_v36  ;;  %7920 = vmatpush2.bf16.msra.mxu0 %v21387_v48  ;;  %v21444_v48 = vld [vmem:[#allocation7 + $0xbd8] ss:$28 sps:$4 sm:$0xff]  }
 0x30e   : > { %7947 = vmatpush1.bf16.msra.mxu1 %v21390_v51  ;;  %7978 = vmatprep.mubr.bf16.mxu1 %v24063_v42 }
 0x30f   : > { %7921 = vmatprep.subr.bf16.mxu0 %v21395_v54  ;;  %7948 = vmatprep.subr.bf16.mxu1 %v21398_v13 }
 0x311   : > { %7922 = vmatpush2.bf16.msra.mxu0 %v21393_v53 }
 0x312   : > { %7949 = vmatpush1.bf16.msra.mxu1 %v21396_v39  ;;  %7923 = vmatprep.subr.bf16.mxu0 %v21401_v20  ;;  %v21449_v20 = vld [vmem:[#allocation7 + $0x9e4] ss:$28 sps:$4 sm:$0xff]  }
 0x313   : > { %7950 = vmatprep.subr.bf16.mxu1 %v21404_v57  ;;  %v21447_v57 = vld [vmem:[#allocation7 + $0x9e0] ss:$28 sps:$4 sm:$0xff]  }
 0x315   : > { %7924 = vmatpush2.bf16.msra.mxu0 %v21399_v55 }
 0x316   : > { %7951 = vmatpush1.bf16.msra.mxu1 %v21402_v58  ;;  %7925 = vmatprep.subr.bf16.mxu0 %v21407_v59  ;;  %v21450_v58 = vld [vmem:[#allocation7 + $0xba0] ss:$28 sps:$4 sm:$0xff]   ;;  %v21458_v59 = vld [vmem:[#allocation7 + $0xb6c] ss:$28 sps:$4 sm:$0xff]  }
 0x317   : > { %7952 = vmatprep.subr.bf16.mxu1 %v21410_v60 }
 0x319   : > { %7926 = vmatpush2.bf16.msra.mxu0 %v21405_v63 }
 0x31a   : > { %7953 = vmatpush1.bf16.msra.mxu1 %v21408_v45  ;;  %7927 = vmatprep.subr.bf16.mxu0 %v21413_v9  ;;  %v21455_v45 = vld [vmem:[#allocation7 + $0x9ac] ss:$28 sps:$4 sm:$0xff]  }
 0x31b   : > { %7954 = vmatprep.subr.bf16.mxu1 %v21416_v16  ;;  %v21453_v9 = vld [vmem:[#allocation7 + $0x9a8] ss:$28 sps:$4 sm:$0xff]   ;;  %v21464_v16 = vld [vmem:[#allocation7 + $0xb34] ss:$28 sps:$4 sm:$0xff]  }
 0x31d   : > { %7928 = vmatpush2.bf16.msra.mxu0 %v21411_v10  ;;  %v21456_v10 = vld [vmem:[#allocation7 + $0xb68] ss:$28 sps:$4 sm:$0xff]  }
 0x31e   : > { %7955 = vmatpush1.bf16.msra.mxu1 %v21414_v11  ;;  %7929 = vmatprep.subr.bf16.mxu0 %v21419_v4  ;;  %v21461_v11 = vld [vmem:[#allocation7 + $0x974] ss:$28 sps:$4 sm:$0xff]  }
 0x31f   : > { %7956 = vmatprep.subr.bf16.mxu1 %v21422_v3  ;;  %v21459_v4 = vld [vmem:[#allocation7 + $0x970] ss:$28 sps:$4 sm:$0xff]   ;;  %v21470_v3 = vld [vmem:[#allocation7 + $0xafc] ss:$28 sps:$4 sm:$0xff]  }
 0x321   : > { %7930 = vmatpush2.bf16.msra.mxu0 %v21417_v12  ;;  %v21462_v12 = vld [vmem:[#allocation7 + $0xb30] ss:$28 sps:$4 sm:$0xff]  }
 0x322   : > { %7957 = vmatpush1.bf16.msra.mxu1 %v21420_v46  ;;  %7931 = vmatprep.subr.bf16.mxu0 %v21425_v18  ;;  %v21468_v46 = vld [vmem:[#allocation7 + $0xaf8] ss:$28 sps:$4 sm:$0xff]  }
 0x323   : > { %7958 = vmatprep.subr.bf16.mxu1 %v21428_v22  ;;  %v21465_v18 = vld [vmem:[#allocation7 + $0x938] ss:$28 sps:$4 sm:$0xff]   ;;  %v21473_v22 = vld [vmem:[#allocation7 + $0x904] ss:$28 sps:$4 sm:$0xff]  }
 0x325   : > { %7932 = vmatpush2.bf16.msra.mxu0 %v21423_v19  ;;  %v21476_v19 = vld [vmem:[#allocation7 + $0xac4] ss:$28 sps:$4 sm:$0xff]  }
 0x326   : > { %7959 = vmatpush1.bf16.msra.mxu1 %v21426_v23  ;;  %7933 = vmatprep.subr.bf16.mxu0 %v21431_v25  ;;  %v21474_v23 = vld [vmem:[#allocation7 + $0xac0] ss:$28 sps:$4 sm:$0xff]  }
 0x327   : > { %7960 = vmatprep.subr.bf16.mxu1 %v21434_v29  ;;  %v21471_v25 = vld [vmem:[#allocation7 + $0x900] ss:$28 sps:$4 sm:$0xff]   ;;  %v21479_v29 = vld [vmem:[#allocation7 + $0x8cc] ss:$28 sps:$4 sm:$0xff]  }
 0x329   : > { %7934 = vmatpush2.bf16.msra.mxu0 %v21429_v27  ;;  %v21482_v27 = vld [vmem:[#allocation7 + $0xa8c] ss:$28 sps:$4 sm:$0xff]  }
 0x32a   : > { %7961 = vmatpush1.bf16.msra.mxu1 %v21432_v30  ;;  %7989 = vmatprep.subr.bf16.mxu0 %v21440_v32  ;;  %v21480_v30 = vld [vmem:[#allocation7 + $0xa88] ss:$28 sps:$4 sm:$0xff]   ;;  %v21485_v32 = vld [vmem:[#allocation7 + $0xdd4] ss:$28 sps:$4 sm:$0xff]  }
 0x32b   : > { %7962 = vmatprep.subr.bf16.mxu1 %v21437_v31  ;;  %v21477_v31 = vld [vmem:[#allocation7 + $0x8c8] ss:$28 sps:$4 sm:$0xff]  }
 0x32c   : > { %v7636_v49 = vpop.f32.mrf.mxu0  ;;  %7936 = vmatmul.mubr.bf16.vlgmr.msra.gmra.mxu0 %v24018_v37 }
 0x32d   : > { %v7637_v51 = vadd.f32 %v7636_v49, %v24187_v1  ;;  %v7679_v53 = vpop.f32.mrf.mxu1  ;;  %7990 = vmatpush1.bf16.msra.mxu0 %v21438_v38  ;;  %8021 = vmatprep.mubr.bf16.mxu0 %v24066_v15  ;;  %v21483_v38 = vld [vmem:[#allocation7 + $0xdd0] ss:$28 sps:$4 sm:$0xff]   ;;  %v21491_v49 = vld [vmem:[#allocation7 + $0xd9c] ss:$28 sps:$4 sm:$0xff]  }
 0x32e   : > { %7963 = vmatpush2.bf16.msra.mxu1 %v21435_v35  ;;  %v24204_v54 = vpop.f32.mrf.mxu0  ;;  %7991 = vmatprep.subr.bf16.mxu0 %v21446_v43  ;;  %v21488_v35 = vld [vmem:[#allocation7 + $0xf94] ss:$28 sps:$4 sm:$0xff]  }
 0x32f   : > { %v24206_v13 = vadd.f32 %v7679_v53, %v7637_v51  ;;  %v24208_v39 = vpop.f32.mrf.mxu1  ;;  %7964 = vmatprep.subr.bf16.mxu1 %v21443_v26  ;;  %v21486_v43 = vld [vmem:[#allocation7 + $0xf90] ss:$28 sps:$4 sm:$0xff]   ;;  %v21489_v26 = vld [vmem:[#allocation7 + $0xd98] ss:$28 sps:$4 sm:$0xff]   ;;  %v21500_v51 = vld [vmem:[#allocation7 + $0xf24] ss:$28 sps:$4 sm:$0xff]  }
 0x330   : > { %v7640_v55 = vpop.f32.mrf.mxu0  ;;  %v21495_v53 = vld [vmem:[#allocation7 + $0xd60] ss:$28 sps:$4 sm:$0xff]  }
 0x331   : > { %v7641_v1 = vadd.f32 %v7640_v55, %v24193_v14  ;;  %7992 = vmatpush1.bf16.msra.mxu0 %v21444_v48  ;;  %v7683_v60 = vpop.f32.mrf.mxu1  ;;  %v21467_v14 = vld [vmem:[#allocation7 + $0x93c] ss:$28 sps:$4 sm:$0xff]   ;;  %v21503_v55 = vld [vmem:[#allocation7 + $0xd2c] ss:$28 sps:$4 sm:$0xff]  }
 0x332   : > { %7965 = vmatpush2.bf16.msra.mxu1 %v21441_v50  ;;  %7993 = vmatprep.subr.bf16.mxu0 %v21452_v62  ;;  %v21494_v50 = vld [vmem:[#allocation7 + $0xf5c] ss:$28 sps:$4 sm:$0xff]   ;;  %v21497_v62 = vld [vmem:[#allocation7 + $0xd64] ss:$28 sps:$4 sm:$0xff]  }
 0x333   : > { %v24211_v63 = vadd.f32 %v7683_v60, %v7641_v1  ;;  %7966 = vmatprep.subr.bf16.mxu1 %v21449_v20  ;;  %v21492_v48 = vld [vmem:[#allocation7 + $0xf58] ss:$28 sps:$4 sm:$0xff]   ;;  %v21498_v20 = vld [vmem:[#allocation7 + $0xf20] ss:$28 sps:$4 sm:$0xff]   ;;  %v21507_v60 = vld [vmem:[#allocation7 + $0xcf0] ss:$28 sps:$4 sm:$0xff]  }
 0x334   : > { %v21509_v1 = vld [vmem:[#allocation7 + $0xcf4] ss:$28 sps:$4 sm:$0xff]  }
 0x335   : > { %7994 = vmatpush1.bf16.msra.mxu0 %v21450_v58  ;;  %v21501_v58 = vld [vmem:[#allocation7 + $0xd28] ss:$28 sps:$4 sm:$0xff]  }
 0x336   : > { %7967 = vmatpush2.bf16.msra.mxu1 %v21447_v57  ;;  %7995 = vmatprep.subr.bf16.mxu0 %v21458_v59  ;;  %v21506_v57 = vld [vmem:[#allocation7 + $0xeec] ss:$28 sps:$4 sm:$0xff]  }
 0x337   : > { %7968 = vmatprep.subr.bf16.mxu1 %v21455_v45  ;;  %v21504_v59 = vld [vmem:[#allocation7 + $0xee8] ss:$28 sps:$4 sm:$0xff]   ;;  %v21512_v45 = vld [vmem:[#allocation7 + $0xeb4] ss:$28 sps:$4 sm:$0xff]  }
 0x339   : > { %7996 = vmatpush1.bf16.msra.mxu0 %v21456_v10  ;;  %v21515_v10 = vld [vmem:[#allocation7 + $0xcbc] ss:$28 sps:$4 sm:$0xff]  }
 0x33a   : > { %7969 = vmatpush2.bf16.msra.mxu1 %v21453_v9  ;;  %7997 = vmatprep.subr.bf16.mxu0 %v21464_v16  ;;  %v21510_v9 = vld [vmem:[#allocation7 + $0xeb0] ss:$28 sps:$4 sm:$0xff]   ;;  %v21513_v16 = vld [vmem:[#allocation7 + $0xcb8] ss:$28 sps:$4 sm:$0xff]  }
 0x33b   : > { %7970 = vmatprep.subr.bf16.mxu1 %v21461_v11  ;;  %v21518_v11 = vld [vmem:[#allocation7 + $0xe7c] ss:$28 sps:$4 sm:$0xff]  }
 0x33d   : > { %7998 = vmatpush1.bf16.msra.mxu0 %v21462_v12  ;;  %v21521_v12 = vld [vmem:[#allocation7 + $0xc84] ss:$28 sps:$4 sm:$0xff]  }
 0x33e   : > { %7971 = vmatpush2.bf16.msra.mxu1 %v21459_v4  ;;  %7999 = vmatprep.subr.bf16.mxu0 %v21470_v3  ;;  %v21516_v4 = vld [vmem:[#allocation7 + $0xe78] ss:$28 sps:$4 sm:$0xff]   ;;  %v21519_v3 = vld [vmem:[#allocation7 + $0xc80] ss:$28 sps:$4 sm:$0xff]  }
 0x33f   : > { %7972 = vmatprep.subr.bf16.mxu1 %v21467_v14  ;;  %v21524_v14 = vld [vmem:[#allocation7 + $0xe44] ss:$28 sps:$4 sm:$0xff]  }
 0x341   : > { %8000 = vmatpush1.bf16.msra.mxu0 %v21468_v46  ;;  %v21522_v46 = vld [vmem:[#allocation7 + $0xe40] ss:$28 sps:$4 sm:$0xff]  }
 0x342   : > { %7973 = vmatpush2.bf16.msra.mxu1 %v21465_v18  ;;  %8001 = vmatprep.subr.bf16.mxu0 %v21476_v19  ;;  %v21527_v18 = vld [vmem:[#allocation7 + $0xc4c] ss:$28 sps:$4 sm:$0xff]  }
 0x343   : > { %7974 = vmatprep.subr.bf16.mxu1 %v21473_v22  ;;  %v21525_v19 = vld [vmem:[#allocation7 + $0xc48] ss:$28 sps:$4 sm:$0xff]  }
 0x344   : > { %v21530_v22 = vld [vmem:[#allocation7 + $0xe0c] ss:$28 sps:$4 sm:$0xff]  }
 0x345   : > { %8002 = vmatpush1.bf16.msra.mxu0 %v21474_v23  ;;  %v21528_v23 = vld [vmem:[#allocation7 + $0xe08] ss:$28 sps:$4 sm:$0xff]  }
 0x346   : > { %7975 = vmatpush2.bf16.msra.mxu1 %v21471_v25  ;;  %8003 = vmatprep.subr.bf16.mxu0 %v21482_v27  ;;  %v21533_v25 = vld [vmem:[#allocation7 + $0x1154] ss:$28 sps:$4 sm:$0xff]  }
 0x347   : > { %7976 = vmatprep.subr.bf16.mxu1 %v21479_v29  ;;  %v21536_v27 = vld [vmem:[#allocation7 + $0x1314] ss:$28 sps:$4 sm:$0xff]  }
 0x348   : > { %v21534_v29 = vld [vmem:[#allocation7 + $0x1310] ss:$28 sps:$4 sm:$0xff]  }
 0x349   : > { %8004 = vmatpush1.bf16.msra.mxu0 %v21480_v30  ;;  %v21531_v30 = vld [vmem:[#allocation7 + $0x1150] ss:$28 sps:$4 sm:$0xff]  }
 0x34a   : > { %7977 = vmatpush2.bf16.msra.mxu1 %v21477_v31  ;;  %8005 = vmatprep.subr.bf16.mxu0 %v21485_v32  ;;  %v21542_v31 = vld [vmem:[#allocation7 + $0x12dc] ss:$28 sps:$4 sm:$0xff]  }
 0x34b   : > { %8032 = vmatprep.subr.bf16.mxu1 %v21488_v35  ;;  %v21539_v32 = vld [vmem:[#allocation7 + $0x111c] ss:$28 sps:$4 sm:$0xff]   ;;  %v24217_v35 = vpop.f32.mrf.mxu1 }
 0x34d   : > { %7979 = vmatmul.mubr.bf16.vlgmr.msra.gmra.mxu1 %v24100_v61  ;;  %8006 = vmatpush2.bf16.msra.mxu0 %v21483_v38  ;;  %v24215_v38 = vpop.f32.mrf.mxu0 }
 0x34e   : > { %8033 = vmatpush1.bf16.msra.mxu1 %v21486_v43  ;;  %8064 = vmatprep.mubr.bf16.mxu1 %v24107_v47 }
 0x34f   : > { %8007 = vmatprep.subr.bf16.mxu0 %v21491_v49  ;;  %8034 = vmatprep.subr.bf16.mxu1 %v21494_v50  ;;  %v21540_v49 = vld [vmem:[#allocation7 + $0x12d8] ss:$28 sps:$4 sm:$0xff]  }
 0x351   : > { %8008 = vmatpush2.bf16.msra.mxu0 %v21489_v26  ;;  %v21537_v26 = vld [vmem:[#allocation7 + $0x1118] ss:$28 sps:$4 sm:$0xff]  }
 0x352   : > { %8035 = vmatpush1.bf16.msra.mxu1 %v21492_v48  ;;  %8009 = vmatprep.subr.bf16.mxu0 %v21497_v62  ;;  %v21545_v62 = vld [vmem:[#allocation7 + $0x10e4] ss:$28 sps:$4 sm:$0xff]  }
 0x353   : > { %8036 = vmatprep.subr.bf16.mxu1 %v21500_v51  ;;  %v21548_v51 = vld [vmem:[#allocation7 + $0x12a4] ss:$28 sps:$4 sm:$0xff]  }
 0x355   : > { %8010 = vmatpush2.bf16.msra.mxu0 %v21495_v53 }
 0x356   : > { %8037 = vmatpush1.bf16.msra.mxu1 %v21498_v20  ;;  %8011 = vmatprep.subr.bf16.mxu0 %v21503_v55 }
 0x357   : > { %8038 = vmatprep.subr.bf16.mxu1 %v21506_v57 }
 0x359   : > { %8012 = vmatpush2.bf16.msra.mxu0 %v21501_v58  ;;  %v21543_v58 = vld [vmem:[#allocation7 + $0x10e0] ss:$28 sps:$4 sm:$0xff]  }
 0x35a   : > { %8039 = vmatpush1.bf16.msra.mxu1 %v21504_v59  ;;  %8013 = vmatprep.subr.bf16.mxu0 %v21509_v1  ;;  %v21554_v1 = vld [vmem:[#allocation7 + $0x126c] ss:$28 sps:$4 sm:$0xff]  }
 0x35b   : > { %8040 = vmatprep.subr.bf16.mxu1 %v21512_v45 }
 0x35d   : > { %8014 = vmatpush2.bf16.msra.mxu0 %v21507_v60 }
 0x35e   : > { %8041 = vmatpush1.bf16.msra.mxu1 %v21510_v9  ;;  %8015 = vmatprep.subr.bf16.mxu0 %v21515_v10  ;;  %v21551_v9 = vld [vmem:[#allocation7 + $0x10ac] ss:$28 sps:$4 sm:$0xff]  }
 0x35f   : > { %8042 = vmatprep.subr.bf16.mxu1 %v21518_v11  ;;  %v21552_v10 = vld [vmem:[#allocation7 + $0x1268] ss:$28 sps:$4 sm:$0xff]   ;;  %v21557_v11 = vld [vmem:[#allocation7 + $0x1074] ss:$28 sps:$4 sm:$0xff]  }
 0x361   : > { %8016 = vmatpush2.bf16.msra.mxu0 %v21513_v16  ;;  %v21549_v16 = vld [vmem:[#allocation7 + $0x10a8] ss:$28 sps:$4 sm:$0xff]  }
 0x362   : > { %8043 = vmatpush1.bf16.msra.mxu1 %v21516_v4  ;;  %8017 = vmatprep.subr.bf16.mxu0 %v21521_v12  ;;  %v21560_v4 = vld [vmem:[#allocation7 + $0x1234] ss:$28 sps:$4 sm:$0xff]  }
 0x363   : > { %8044 = vmatprep.subr.bf16.mxu1 %v21524_v14  ;;  %v21558_v12 = vld [vmem:[#allocation7 + $0x1230] ss:$28 sps:$4 sm:$0xff]   ;;  %v21566_v14 = vld [vmem:[#allocation7 + $0x11fc] ss:$28 sps:$4 sm:$0xff]  }
 0x365   : > { %8018 = vmatpush2.bf16.msra.mxu0 %v21519_v3  ;;  %v21563_v3 = vld [vmem:[#allocation7 + $0x103c] ss:$28 sps:$4 sm:$0xff]  }
 0x366   : > { %8045 = vmatpush1.bf16.msra.mxu1 %v21522_v46  ;;  %8019 = vmatprep.subr.bf16.mxu0 %v21527_v18  ;;  %v21564_v46 = vld [vmem:[#allocation7 + $0x11f8] ss:$28 sps:$4 sm:$0xff]  }
 0x367   : > { %8046 = vmatprep.subr.bf16.mxu1 %v21530_v22  ;;  %v21561_v18 = vld [vmem:[#allocation7 + $0x1038] ss:$28 sps:$4 sm:$0xff]   ;;  %v21572_v22 = vld [vmem:[#allocation7 + $0x11c4] ss:$28 sps:$4 sm:$0xff]  }
 0x369   : > { %8020 = vmatpush2.bf16.msra.mxu0 %v21525_v19  ;;  %v21569_v19 = vld [vmem:[#allocation7 + $0x1004] ss:$28 sps:$4 sm:$0xff]  }
 0x36a   : > { %8047 = vmatpush1.bf16.msra.mxu1 %v21528_v23  ;;  %8075 = vmatprep.subr.bf16.mxu0 %v21536_v27  ;;  %v21570_v23 = vld [vmem:[#allocation7 + $0x11c0] ss:$28 sps:$4 sm:$0xff]   ;;  %v21575_v27 = vld [vmem:[#allocation7 + $0xfcc] ss:$28 sps:$4 sm:$0xff]  }
 0x36b   : > { %8048 = vmatprep.subr.bf16.mxu1 %v21533_v25  ;;  %v21567_v25 = vld [vmem:[#allocation7 + $0x1000] ss:$28 sps:$4 sm:$0xff]  }
 0x36c   : > { %v7722_v43 = vpop.f32.mrf.mxu0  ;;  %8022 = vmatmul.mubr.bf16.vlgmr.msra.gmra.mxu0 %v24105_v24 }
 0x36d   : > { %v7723_v50 = vadd.f32 %v7722_v43, %v24206_v13  ;;  %v7765_v48 = vpop.f32.mrf.mxu1  ;;  %8076 = vmatpush1.bf16.msra.mxu0 %v21534_v29  ;;  %8107 = vmatprep.mubr.bf16.mxu0 %v24112_v52  ;;  %v21546_v13 = vld [vmem:[#allocation7 + $0x12a0] ss:$28 sps:$4 sm:$0xff]   ;;  %v21578_v29 = vld [vmem:[#allocation7 + $0x118c] ss:$28 sps:$4 sm:$0xff]   ;;  %v21584_v43 = vld [vmem:[#allocation7 + $0x1694] ss:$28 sps:$4 sm:$0xff]  }
 0x36e   : > { %8049 = vmatpush2.bf16.msra.mxu1 %v21531_v30  ;;  %v24222_v53 = vpop.f32.mrf.mxu0  ;;  %8077 = vmatprep.subr.bf16.mxu0 %v21542_v31  ;;  %v21576_v30 = vld [vmem:[#allocation7 + $0x1188] ss:$28 sps:$4 sm:$0xff]  }
 0x36f   : > { %v24224_v20 = vadd.f32 %v7765_v48, %v7723_v50  ;;  %v24226_v55 = vpop.f32.mrf.mxu1  ;;  %8050 = vmatprep.subr.bf16.mxu1 %v21539_v32  ;;  %v21573_v31 = vld [vmem:[#allocation7 + $0xfc8] ss:$28 sps:$4 sm:$0xff]   ;;  %v21581_v32 = vld [vmem:[#allocation7 + $0x14d4] ss:$28 sps:$4 sm:$0xff]   ;;  %v21587_v50 = vld [vmem:[#allocation7 + $0x149c] ss:$28 sps:$4 sm:$0xff]  }
 0x370   : > { %v7726_v57 = vpop.f32.mrf.mxu0  ;;  %v21590_v48 = vld [vmem:[#allocation7 + $0x165c] ss:$28 sps:$4 sm:$0xff]  }
 0x371   : > { %v7727_v59 = vadd.f32 %v7726_v57, %v24211_v63  ;;  %8078 = vmatpush1.bf16.msra.mxu0 %v21540_v49  ;;  %v7769_v60 = vpop.f32.mrf.mxu1  ;;  %v21555_v63 = vld [vmem:[#allocation7 + $0x1070] ss:$28 sps:$4 sm:$0xff]   ;;  %v21593_v57 = vld [vmem:[#allocation7 + $0x1464] ss:$28 sps:$4 sm:$0xff]  }
 0x372   : > { %8051 = vmatpush2.bf16.msra.mxu1 %v21537_v26  ;;  %8079 = vmatprep.subr.bf16.mxu0 %v21548_v51  ;;  %v21579_v26 = vld [vmem:[#allocation7 + $0x14d0] ss:$28 sps:$4 sm:$0xff]   ;;  %v21588_v51 = vld [vmem:[#allocation7 + $0x1658] ss:$28 sps:$4 sm:$0xff]  }
 0x373   : > { %v24229_v45 = vadd.f32 %v7769_v60, %v7727_v59  ;;  %8052 = vmatprep.subr.bf16.mxu1 %v21545_v62  ;;  %v21582_v49 = vld [vmem:[#allocation7 + $0x1690] ss:$28 sps:$4 sm:$0xff]   ;;  %v21585_v62 = vld [vmem:[#allocation7 + $0x1498] ss:$28 sps:$4 sm:$0xff]   ;;  %v21591_v59 = vld [vmem:[#allocation7 + $0x1460] ss:$28 sps:$4 sm:$0xff]  }
 0x374   : > { %v21602_v60 = vld [vmem:[#allocation7 + $0x15ec] ss:$28 sps:$4 sm:$0xff]  }
 0x375   : > { %8080 = vmatpush1.bf16.msra.mxu0 %v21546_v13  ;;  %v21594_v13 = vld [vmem:[#allocation7 + $0x1620] ss:$28 sps:$4 sm:$0xff]  }
 0x376   : > { %8053 = vmatpush2.bf16.msra.mxu1 %v21543_v58  ;;  %8081 = vmatprep.subr.bf16.mxu0 %v21554_v1  ;;  %v21596_v58 = vld [vmem:[#allocation7 + $0x1624] ss:$28 sps:$4 sm:$0xff]   ;;  %v21599_v1 = vld [vmem:[#allocation7 + $0x142c] ss:$28 sps:$4 sm:$0xff]  }
 0x377   : > { %8054 = vmatprep.subr.bf16.mxu1 %v21551_v9  ;;  %v21597_v9 = vld [vmem:[#allocation7 + $0x1428] ss:$28 sps:$4 sm:$0xff]  }
 0x379   : > { %8082 = vmatpush1.bf16.msra.mxu0 %v21552_v10  ;;  %v21600_v10 = vld [vmem:[#allocation7 + $0x15e8] ss:$28 sps:$4 sm:$0xff]  }
 0x37a   : > { %8055 = vmatpush2.bf16.msra.mxu1 %v21549_v16  ;;  %8083 = vmatprep.subr.bf16.mxu0 %v21560_v4  ;;  %v21605_v16 = vld [vmem:[#allocation7 + $0x13f4] ss:$28 sps:$4 sm:$0xff]  }
 0x37b   : > { %8056 = vmatprep.subr.bf16.mxu1 %v21557_v11  ;;  %v21603_v11 = vld [vmem:[#allocation7 + $0x13f0] ss:$28 sps:$4 sm:$0xff]  }
 0x37c   : > { %v21608_v4 = vld [vmem:[#allocation7 + $0x15b4] ss:$28 sps:$4 sm:$0xff]  }
 0x37d   : > { %8084 = vmatpush1.bf16.msra.mxu0 %v21558_v12  ;;  %v21606_v12 = vld [vmem:[#allocation7 + $0x15b0] ss:$28 sps:$4 sm:$0xff]  }
 0x37e   : > { %8057 = vmatpush2.bf16.msra.mxu1 %v21555_v63  ;;  %8085 = vmatprep.subr.bf16.mxu0 %v21566_v14  ;;  %v21611_v63 = vld [vmem:[#allocation7 + $0x13bc] ss:$28 sps:$4 sm:$0xff]  }
 0x37f   : > { %8058 = vmatprep.subr.bf16.mxu1 %v21563_v3  ;;  %v21609_v3 = vld [vmem:[#allocation7 + $0x13b8] ss:$28 sps:$4 sm:$0xff]  }
 0x380   : > { %v21614_v14 = vld [vmem:[#allocation7 + $0x157c] ss:$28 sps:$4 sm:$0xff]  }
 0x381   : > { %8086 = vmatpush1.bf16.msra.mxu0 %v21564_v46  ;;  %v21612_v46 = vld [vmem:[#allocation7 + $0x1578] ss:$28 sps:$4 sm:$0xff]  }
 0x382   : > { %8059 = vmatpush2.bf16.msra.mxu1 %v21561_v18  ;;  %8087 = vmatprep.subr.bf16.mxu0 %v21572_v22  ;;  %v21617_v18 = vld [vmem:[#allocation7 + $0x1384] ss:$28 sps:$4 sm:$0xff]  }
 0x383   : > { %8060 = vmatprep.subr.bf16.mxu1 %v21569_v19  ;;  %v21615_v19 = vld [vmem:[#allocation7 + $0x1380] ss:$28 sps:$4 sm:$0xff]  }
 0x384   : > { %v21620_v22 = vld [vmem:[#allocation7 + $0x1544] ss:$28 sps:$4 sm:$0xff]  }
 0x385   : > { %8088 = vmatpush1.bf16.msra.mxu0 %v21570_v23  ;;  %v21618_v23 = vld [vmem:[#allocation7 + $0x1540] ss:$28 sps:$4 sm:$0xff]  }
 0x386   : > { %8061 = vmatpush2.bf16.msra.mxu1 %v21567_v25  ;;  %8089 = vmatprep.subr.bf16.mxu0 %v21578_v29  ;;  %v21623_v25 = vld [vmem:[#allocation7 + $0x134c] ss:$28 sps:$4 sm:$0xff]  }
 0x387   : > { %8062 = vmatprep.subr.bf16.mxu1 %v21575_v27  ;;  %v21626_v27 = vld [vmem:[#allocation7 + $0x150c] ss:$28 sps:$4 sm:$0xff]  }
 0x388   : > { %v21621_v29 = vld [vmem:[#allocation7 + $0x1348] ss:$28 sps:$4 sm:$0xff]  }
 0x389   : > { %8090 = vmatpush1.bf16.msra.mxu0 %v21576_v30  ;;  %v24233_v30 = vld.sshfl [vmem:[#allocation9] sm:$0x7f pattern:$0x75316420] }
 0x38a   : > { %8063 = vmatpush2.bf16.msra.mxu1 %v21573_v31  ;;  %8091 = vmatprep.subr.bf16.mxu0 %v21581_v32  ;;  %v21624_v31 = vld [vmem:[#allocation7 + $0x1508] ss:$28 sps:$4 sm:$0xff]   ;;  %v21629_v32 = vld [vmem:[#allocation7 + $0x1854] ss:$28 sps:$4 sm:$0xff]  }
 0x38b   : > { %8118 = vmatprep.subr.bf16.mxu1 %v21584_v43  ;;  %v21632_v43 = vld [vmem:[#allocation7 + $0x1a14] ss:$28 sps:$4 sm:$0xff]  }
 0x38d   : > { %8065 = vmatmul.mubr.bf16.vlgmr.msra.gmra.mxu1 %v24155_v17  ;;  %8092 = vmatpush2.bf16.msra.mxu0 %v21579_v26  ;;  %v21630_v26 = vld [vmem:[#allocation7 + $0x1a10] ss:$28 sps:$4 sm:$0xff]  }
 0x38e   : > { %8119 = vmatpush1.bf16.msra.mxu1 %v21582_v49  ;;  %8150 = vmatprep.mubr.bf16.mxu1 %v24159_v21  ;;  %v24235_v49 = vpop.f32.mrf.mxu1 }
 0x38f   : > { %8093 = vmatprep.subr.bf16.mxu0 %v21587_v50  ;;  %8120 = vmatprep.subr.bf16.mxu1 %v21590_v48  ;;  %v21627_v50 = vld [vmem:[#allocation7 + $0x1850] ss:$28 sps:$4 sm:$0xff]   ;;  %v21638_v48 = vld [vmem:[#allocation7 + $0x19dc] ss:$28 sps:$4 sm:$0xff]  }
 0x391   : > { %8094 = vmatpush2.bf16.msra.mxu0 %v21585_v62  ;;  %v21635_v62 = vld [vmem:[#allocation7 + $0x181c] ss:$28 sps:$4 sm:$0xff]  }
 0x392   : > { %8121 = vmatpush1.bf16.msra.mxu1 %v21588_v51  ;;  %8095 = vmatprep.subr.bf16.mxu0 %v21593_v57  ;;  %v24237_v51 = vpop.f32.mrf.mxu0  ;;  %v7851_v57 = vpop.f32.mrf.mxu1 }
 0x393   : > { %8122 = vmatprep.subr.bf16.mxu1 %v21596_v58  ;;  %v24241_v58 = vrot.slane %v24233_v30, %v23974_v8 }
 0x395   : > { %8096 = vmatpush2.bf16.msra.mxu0 %v21591_v59 }
 0x396   : > { %8123 = vmatpush1.bf16.msra.mxu1 %v21594_v13  ;;  %8097 = vmatprep.subr.bf16.mxu0 %v21599_v1  ;;  %v21633_v13 = vld [vmem:[#allocation7 + $0x1818] ss:$28 sps:$4 sm:$0xff]  }
 0x397   : > { %8124 = vmatprep.subr.bf16.mxu1 %v21602_v60  ;;  %v21636_v1 = vld [vmem:[#allocation7 + $0x19d8] ss:$28 sps:$4 sm:$0xff]  }
 0x399   : > { %8098 = vmatpush2.bf16.msra.mxu0 %v21597_v9  ;;  %v21641_v9 = vld [vmem:[#allocation7 + $0x17e4] ss:$28 sps:$4 sm:$0xff]  }
 0x39a   : > { %8125 = vmatpush1.bf16.msra.mxu1 %v21600_v10  ;;  %8099 = vmatprep.subr.bf16.mxu0 %v21605_v16  ;;  %v21644_v10 = vld [vmem:[#allocation7 + $0x19a4] ss:$28 sps:$4 sm:$0xff]   ;;  %v24246_v16 = vpop.f32.mrf.mxu1 }
 0x39b   : > { %8126 = vmatprep.subr.bf16.mxu1 %v21608_v4 }
 0x39d   : > { %8100 = vmatpush2.bf16.msra.mxu0 %v21603_v11 }
 0x39e   : > { %8127 = vmatpush1.bf16.msra.mxu1 %v21606_v12  ;;  %8101 = vmatprep.subr.bf16.mxu0 %v21611_v63  ;;  %v8933_v12 = vpack.i.b16 %v24241_v58, %v24241_v58 }
 0x39f   : > { %8128 = vmatprep.subr.bf16.mxu1 %v21614_v14  ;;  %v21642_v14 = vld [vmem:[#allocation7 + $0x19a0] ss:$28 sps:$4 sm:$0xff]  }
 0x3a1   : > { %8102 = vmatpush2.bf16.msra.mxu0 %v21609_v3  ;;  %v21639_v3 = vld [vmem:[#allocation7 + $0x17e0] ss:$28 sps:$4 sm:$0xff]  }
 0x3a2   : > { %8129 = vmatpush1.bf16.msra.mxu1 %v21612_v46  ;;  %8103 = vmatprep.subr.bf16.mxu0 %v21617_v18  ;;  %v21650_v46 = vld [vmem:[#allocation7 + $0x196c] ss:$28 sps:$4 sm:$0xff]   ;;  %v7855_v18 = vpop.f32.mrf.mxu1 }
 0x3a3   : > { %8130 = vmatprep.subr.bf16.mxu1 %v21620_v22  ;;  %v8938_v22 = vrot.slane %v8933_v12, %v23979_v34  ;;  %v21669_v12 = vld [vmem:[#allocation7 + $0x16c8] ss:$28 sps:$4 sm:$0xff]  }
 0x3a5   : > { %8104 = vmatpush2.bf16.msra.mxu0 %v21615_v19 }
 0x3a6   : > { %8131 = vmatpush1.bf16.msra.mxu1 %v21618_v23  ;;  %8105 = vmatprep.subr.bf16.mxu0 %v21623_v25  ;;  %v21647_v23 = vld [vmem:[#allocation7 + $0x17ac] ss:$28 sps:$4 sm:$0xff]  }
 0x3a7   : > { %8132 = vmatprep.subr.bf16.mxu1 %v21626_v27  ;;  %v21648_v25 = vld [vmem:[#allocation7 + $0x1968] ss:$28 sps:$4 sm:$0xff]  }
 0x3a9   : > { %8106 = vmatpush2.bf16.msra.mxu0 %v21621_v29  ;;  %v21645_v29 = vld [vmem:[#allocation7 + $0x17a8] ss:$28 sps:$4 sm:$0xff]  }
 0x3aa   : > { %8133 = vmatpush1.bf16.msra.mxu1 %v21624_v31  ;;  %8161 = vmatprep.subr.bf16.mxu0 %v21632_v43  ;;  %v21653_v31 = vld [vmem:[#allocation7 + $0x1774] ss:$28 sps:$4 sm:$0xff]  }
 0x3ab   : > { %8134 = vmatprep.subr.bf16.mxu1 %v21629_v32  ;;  %v21656_v32 = vld [vmem:[#allocation7 + $0x1934] ss:$28 sps:$4 sm:$0xff]  }
 0x3ac   : > { %v7808_v59 = vpop.f32.mrf.mxu0  ;;  %8108 = vmatmul.mubr.bf16.vlgmr.msra.gmra.mxu0 %v24157_v7  ;;  %v21654_v43 = vld [vmem:[#allocation7 + $0x1930] ss:$28 sps:$4 sm:$0xff]  }
 0x3ad   : > { %v7809_v60 = vadd.f32 %v7808_v59, %v24224_v20  ;;  %8162 = vmatpush1.bf16.msra.mxu0 %v21630_v26  ;;  %8193 = vmatprep.mubr.bf16.mxu0 %v24948_v0  ;;  %v21651_v26 = vld [vmem:[#allocation7 + $0x1770] ss:$28 sps:$4 sm:$0xff]   ;;  %v21665_v59 = vld [vmem:[#allocation7 + $0x1704] ss:$28 sps:$4 sm:$0xff]  }
 0x3ae   : > { %8135 = vmatpush2.bf16.msra.mxu1 %v21627_v50  ;;  %v24248_v11 = vpop.f32.mrf.mxu0  ;;  %8163 = vmatprep.subr.bf16.mxu0 %v21638_v48  ;;  %v21659_v50 = vld [vmem:[#allocation7 + $0x173c] ss:$28 sps:$4 sm:$0xff]  }
 0x3af   : > { %v7852_v4 = vadd.f32 %v7851_v57, %v7809_v60  ;;  %8136 = vmatprep.subr.bf16.mxu1 %v21635_v62  ;;  %v21662_v48 = vld [vmem:[#allocation7 + $0x18fc] ss:$28 sps:$4 sm:$0xff]  }
 0x3b0   : > { %v7812_v63 = vpop.f32.mrf.mxu0  ;;  %v21660_v62 = vld [vmem:[#allocation7 + $0x18f8] ss:$28 sps:$4 sm:$0xff]   ;;  %v21663_v60 = vld [vmem:[#allocation7 + $0x1700] ss:$28 sps:$4 sm:$0xff]  }
 0x3b1   : > { %v7813_v20 = vadd.f32 %v7812_v63, %v24229_v45  ;;  %8164 = vmatpush1.bf16.msra.mxu0 %v21636_v1  ;;  %v21657_v57 = vld [vmem:[#allocation7 + $0x1738] ss:$28 sps:$4 sm:$0xff]   ;;  %v21666_v1 = vld [vmem:[#allocation7 + $0x18c0] ss:$28 sps:$4 sm:$0xff]  }
 0x3b2   : > { %8137 = vmatpush2.bf16.msra.mxu1 %v21633_v13  ;;  %8165 = vmatprep.subr.bf16.mxu0 %v21644_v10  ;;  %v21668_v13 = vld [vmem:[#allocation7 + $0x18c4] ss:$28 sps:$4 sm:$0xff]   ;;  %v21674_v10 = vld [vmem:[#allocation7 + $0x188c] ss:$28 sps:$4 sm:$0xff]   ;;  %v21677_v63 = vld [vmem:[#allocation7 + $0x19c] ss:$28 sps:$4 sm:$0xff]  }
 0x3b3   : > { %v7856_v19 = vadd.f32 %v7855_v18, %v7813_v20  ;;  %8138 = vmatprep.subr.bf16.mxu1 %v21641_v9  ;;  %v21671_v9 = vld [vmem:[#allocation7 + $0x16cc] ss:$28 sps:$4 sm:$0xff]   ;;  %v21675_v20 = vld [vmem:[#allocation7 + $0x198] ss:$28 sps:$4 sm:$0xff]   ;;  %v21686_v18 = vld [vmem:[#allocation7 + $0x4e4] ss:$28 sps:$4 sm:$0xff]  }
 0x3b5   : > { %v8876_v27 = vpack.c.bf16 %v7856_v19, %v7852_v4  ;;  %8166 = vmatpush1.bf16.msra.mxu0 %v21642_v14  ;;  %v21672_v4 = vld [vmem:[#allocation7 + $0x1888] ss:$28 sps:$4 sm:$0xff]   ;;  %v21678_v14 = vld [vmem:[#allocation7 + $0x518] ss:$28 sps:$4 sm:$0xff]   ;;  %v21681_v19 = vld [vmem:[#allocation7 + $0x160] ss:$28 sps:$4 sm:$0xff]  }
 0x3b6   : > { %8139 = vmatpush2.bf16.msra.mxu1 %v21639_v3  ;;  %8167 = vmatprep.subr.bf16.mxu0 %v21650_v46  ;;  %v21680_v3 = vld [vmem:[#allocation7 + $0x51c] ss:$28 sps:$4 sm:$0xff]   ;;  %v21683_v46 = vld [vmem:[#allocation7 + $0x164] ss:$28 sps:$4 sm:$0xff]  }
 0x3b7   : > { %v24254_v45 = vadd.bf16 %v8938_v22, %v8876_v27  ;;  %8140 = vmatprep.subr.bf16.mxu1 %v21647_v23  ;;  %v21684_v22 = vld [vmem:[#allocation7 + $0x4e0] ss:$28 sps:$4 sm:$0xff]   ;;  %v21689_v23 = vld [vmem:[#allocation7 + $0x12c] ss:$28 sps:$4 sm:$0xff]  }
 0x3b8   : > { %v21687_v27 = vld [vmem:[#allocation7 + $0x128] ss:$28 sps:$4 sm:$0xff]  }
 0x3b9   : > { %24985 = vst [vmem:[#allocation40_spill] sm:$0xff] %v24254_v45  ;;  %8168 = vmatpush1.bf16.msra.mxu0 %v21648_v25  ;;  %v21692_v25 = vld [vmem:[#allocation7 + $0x4ac] ss:$28 sps:$4 sm:$0xff]  }
 0x3ba   : > { %8141 = vmatpush2.bf16.msra.mxu1 %v21645_v29  ;;  %8169 = vmatprep.subr.bf16.mxu0 %v21656_v32  ;;  %v21690_v29 = vld [vmem:[#allocation7 + $0x4a8] ss:$28 sps:$4 sm:$0xff]   ;;  %v21698_v32 = vld [vmem:[#allocation7 + $0x474] ss:$28 sps:$4 sm:$0xff]  }
 0x3bb   : > { %8142 = vmatprep.subr.bf16.mxu1 %v21653_v31  ;;  %v21695_v31 = vld [vmem:[#allocation7 + $0xf4] ss:$28 sps:$4 sm:$0xff]  }
 0x3bd   : > { %8170 = vmatpush1.bf16.msra.mxu0 %v21654_v43  ;;  %v21693_v43 = vld [vmem:[#allocation7 + $0xf0] ss:$28 sps:$4 sm:$0xff]  }
 0x3be   : > { %8143 = vmatpush2.bf16.msra.mxu1 %v21651_v26  ;;  %8171 = vmatprep.subr.bf16.mxu0 %v21662_v48  ;;  %v21696_v26 = vld [vmem:[#allocation7 + $0x470] ss:$28 sps:$4 sm:$0xff]   ;;  %v21699_v48 = vld [vmem:[#allocation7 + $0xb8] ss:$28 sps:$4 sm:$0xff]  }
 0x3bf   : > { %8144 = vmatprep.subr.bf16.mxu1 %v21659_v50  ;;  %v21701_v50 = vld [vmem:[#allocation7 + $0xbc] ss:$28 sps:$4 sm:$0xff]  }
 0x3c1   : > { %8172 = vmatpush1.bf16.msra.mxu0 %v21660_v62  ;;  %v21704_v62 = vld [vmem:[#allocation7 + $0x43c] ss:$28 sps:$4 sm:$0xff]  }
 0x3c2   : > { %8145 = vmatpush2.bf16.msra.mxu1 %v21657_v57  ;;  %8173 = vmatprep.subr.bf16.mxu0 %v21668_v13  ;;  %v21702_v57 = vld [vmem:[#allocation7 + $0x438] ss:$28 sps:$4 sm:$0xff]   ;;  %v21705_v13 = vld [vmem:[#allocation7 + $0x80] ss:$28 sps:$4 sm:$0xff]  }
 0x3c3   : > { %8146 = vmatprep.subr.bf16.mxu1 %v21665_v59  ;;  %v21707_v59 = vld [vmem:[#allocation7 + $0x84] ss:$28 sps:$4 sm:$0xff]  }
 0x3c5   : > { %8174 = vmatpush1.bf16.msra.mxu0 %v21666_v1  ;;  %v21710_v1 = vld [vmem:[#allocation7 + $0x404] ss:$28 sps:$4 sm:$0xff]  }
 0x3c6   : > { %8147 = vmatpush2.bf16.msra.mxu1 %v21663_v60  ;;  %8175 = vmatprep.subr.bf16.mxu0 %v21674_v10  ;;  %v21708_v60 = vld [vmem:[#allocation7 + $0x400] ss:$28 sps:$4 sm:$0xff]   ;;  %v21711_v10 = vld [vmem:[#allocation7 + $0x48] ss:$28 sps:$4 sm:$0xff]  }
 0x3c7   : > { %8148 = vmatprep.subr.bf16.mxu1 %v21671_v9  ;;  %v21713_v9 = vld [vmem:[#allocation7 + $0x4c] ss:$28 sps:$4 sm:$0xff]  }
 0x3c9   : > { %8176 = vmatpush1.bf16.msra.mxu0 %v21672_v4  ;;  %v21716_v4 = vld [vmem:[#allocation7 + $0x3cc] ss:$28 sps:$4 sm:$0xff]  }
 0x3ca   : > { %8149 = vmatpush2.bf16.msra.mxu1 %v21669_v12  ;;  %8204 = vmatprep.subr.bf16.mxu0 %v21677_v63  ;;  %v21714_v12 = vld [vmem:[#allocation7 + $0x3c8] ss:$28 sps:$4 sm:$0xff]   ;;  %v21719_v63 = vld [vmem:[#allocation7 + $0x14] ss:$28 sps:$4 sm:$0xff]  }
 0x3cb   : > { %8247 = vmatprep.subr.bf16.mxu1 %v21680_v3  ;;  %v21717_v3 = vld [vmem:[#allocation7 + $0x10] ss:$28 sps:$4 sm:$0xff]  }
 0x3cc   : > { %8194 = vmatmul.mubr.bf16.vlgmr.msra.gmra.mxu0 %v24177_v41 }
 0x3cd   : > { %8151 = vmatmul.mubr.bf16.vlgmr.msra.gmra.mxu1 %v24183_v56  ;;  %8205 = vmatpush1.bf16.msra.mxu0 %v21675_v20  ;;  %v21722_v20 = vld [vmem:[#allocation7 + $0x394] ss:$28 sps:$4 sm:$0xff]  }
 0x3ce   : > { %8236 = vmatprep.mubr.bf16.mxu0 %v24009_v28  ;;  %8248 = vmatpush1.bf16.msra.mxu1 %v21678_v14  ;;  %v24260_v14 = vpop.f32.mrf.mxu1 }
 0x3cf   : > { %8279 = vmatprep.mubr.bf16.mxu1 %v24013_v33  ;;  %8206 = vmatprep.subr.bf16.mxu0 %v21683_v46  ;;  %v21720_v46 = vld [vmem:[#allocation7 + $0x390] ss:$28 sps:$4 sm:$0xff]  }
 0x3d0   : > { %8249 = vmatprep.subr.bf16.mxu1 %v21686_v18  ;;  %v21725_v18 = vld [vmem:[#allocation7 + $0x35c] ss:$28 sps:$4 sm:$0xff]  }
 0x3d1   : > { %8207 = vmatpush1.bf16.msra.mxu0 %v21681_v19  ;;  %v21728_v19 = vld [vmem:[#allocation7 + $0x6dc] ss:$28 sps:$4 sm:$0xff]  }
 0x3d2   : > { %8250 = vmatpush1.bf16.msra.mxu1 %v21684_v22  ;;  %8208 = vmatprep.subr.bf16.mxu0 %v21689_v23  ;;  %v21723_v22 = vld [vmem:[#allocation7 + $0x358] ss:$28 sps:$4 sm:$0xff]   ;;  %v7894_v23 = vpop.f32.mrf.mxu1 }
 0x3d3   : > { %8251 = vmatprep.subr.bf16.mxu1 %v21692_v25  ;;  %v21726_v25 = vld [vmem:[#allocation7 + $0x6d8] ss:$28 sps:$4 sm:$0xff]  }
 0x3d5   : > { %8209 = vmatpush1.bf16.msra.mxu0 %v21687_v27  ;;  %v21731_v27 = vld [vmem:[#allocation7 + $0x324] ss:$28 sps:$4 sm:$0xff]  }
 0x3d6   : > { %8252 = vmatpush1.bf16.msra.mxu1 %v21690_v29  ;;  %8210 = vmatprep.subr.bf16.mxu0 %v21695_v31  ;;  %v21734_v29 = vld [vmem:[#allocation7 + $0x6a4] ss:$28 sps:$4 sm:$0xff]   ;;  %v24262_v31 = vpop.f32.mrf.mxu0 }
 0x3d7   : > { %8253 = vmatprep.subr.bf16.mxu1 %v21698_v32  ;;  %v24264_v32 = vpop.f32.mrf.mxu1 }
 0x3d9   : > { %8211 = vmatpush1.bf16.msra.mxu0 %v21693_v43 }
 0x3da   : > { %8254 = vmatpush1.bf16.msra.mxu1 %v21696_v26  ;;  %8212 = vmatprep.subr.bf16.mxu0 %v21701_v50  ;;  %v21729_v26 = vld [vmem:[#allocation7 + $0x320] ss:$28 sps:$4 sm:$0xff]  }
 0x3db   : > { %8255 = vmatprep.subr.bf16.mxu1 %v21704_v62  ;;  %v21732_v50 = vld [vmem:[#allocation7 + $0x6a0] ss:$28 sps:$4 sm:$0xff]   ;;  %v21737_v62 = vld [vmem:[#allocation7 + $0x2ec] ss:$28 sps:$4 sm:$0xff]  }
 0x3dd   : > { %8213 = vmatpush1.bf16.msra.mxu0 %v21699_v48 }
 0x3de   : > { %8256 = vmatpush1.bf16.msra.mxu1 %v21702_v57  ;;  %8214 = vmatprep.subr.bf16.mxu0 %v21707_v59  ;;  %v21740_v57 = vld [vmem:[#allocation7 + $0x66c] ss:$28 sps:$4 sm:$0xff]  }
 0x3df   : > { %8257 = vmatprep.subr.bf16.mxu1 %v21710_v1 }
 0x3e1   : > { %8215 = vmatpush1.bf16.msra.mxu0 %v21705_v13  ;;  %v7898_v13 = vpop.f32.mrf.mxu1 }
 0x3e2   : > { %8258 = vmatpush1.bf16.msra.mxu1 %v21708_v60  ;;  %8216 = vmatprep.subr.bf16.mxu0 %v21713_v9  ;;  %v21735_v60 = vld [vmem:[#allocation7 + $0x2e8] ss:$28 sps:$4 sm:$0xff]  }
 0x3e3   : > { %8259 = vmatprep.subr.bf16.mxu1 %v21716_v4  ;;  %v21743_v4 = vld [vmem:[#allocation7 + $0x2b4] ss:$28 sps:$4 sm:$0xff]  }
 0x3e5   : > { %8217 = vmatpush1.bf16.msra.mxu0 %v21711_v10  ;;  %v21738_v10 = vld [vmem:[#allocation7 + $0x668] ss:$28 sps:$4 sm:$0xff]  }
 0x3e6   : > { %8260 = vmatpush1.bf16.msra.mxu1 %v21714_v12  ;;  %8218 = vmatprep.subr.bf16.mxu0 %v21719_v63  ;;  %v21746_v12 = vld [vmem:[#allocation7 + $0x634] ss:$28 sps:$4 sm:$0xff]  }
 0x3e7   : > { %8261 = vmatprep.subr.bf16.mxu1 %v21722_v20  ;;  %v21741_v63 = vld [vmem:[#allocation7 + $0x2b0] ss:$28 sps:$4 sm:$0xff]   ;;  %v21749_v20 = vld [vmem:[#allocation7 + $0x27c] ss:$28 sps:$4 sm:$0xff]  }
 0x3e9   : > { %8219 = vmatpush1.bf16.msra.mxu0 %v21717_v3  ;;  %v21744_v3 = vld [vmem:[#allocation7 + $0x630] ss:$28 sps:$4 sm:$0xff]  }
 0x3ea   : > { %8262 = vmatpush1.bf16.msra.mxu1 %v21720_v46  ;;  %8220 = vmatprep.subr.bf16.mxu0 %v21725_v18  ;;  %v21747_v46 = vld [vmem:[#allocation7 + $0x278] ss:$28 sps:$4 sm:$0xff]  }
 0x3eb   : > { %8263 = vmatprep.subr.bf16.mxu1 %v21728_v19  ;;  %v21752_v18 = vld [vmem:[#allocation7 + $0x5fc] ss:$28 sps:$4 sm:$0xff]  }
 0x3ec   : > { %v7937_v43 = vpop.f32.mrf.mxu0  ;;  %v21750_v19 = vld [vmem:[#allocation7 + $0x5f8] ss:$28 sps:$4 sm:$0xff]  }
 0x3ed   : > { %v24266_v48 = vadd.f32 %v7937_v43, %v7894_v23  ;;  %8221 = vmatpush2.bf16.msra.mxu0 %v21723_v22  ;;  %v21755_v22 = vld [vmem:[#allocation7 + $0x244] ss:$28 sps:$4 sm:$0xff]  }
 0x3ee   : > { %8264 = vmatpush2.bf16.msra.mxu1 %v21726_v25  ;;  %v24268_v59 = vpop.f32.mrf.mxu0  ;;  %8222 = vmatprep.subr.bf16.mxu0 %v21731_v27  ;;  %v21753_v23 = vld [vmem:[#allocation7 + $0x240] ss:$28 sps:$4 sm:$0xff]   ;;  %v21759_v43 = vld [vmem:[#allocation7 + $0x208] ss:$28 sps:$4 sm:$0xff]  }
 0x3ef   : > { %8265 = vmatprep.subr.bf16.mxu1 %v21734_v29  ;;  %v21758_v25 = vld [vmem:[#allocation7 + $0x5c4] ss:$28 sps:$4 sm:$0xff]   ;;  %v21761_v29 = vld [vmem:[#allocation7 + $0x20c] ss:$28 sps:$4 sm:$0xff]  }
 0x3f0   : > { %v7941_v1 = vpop.f32.mrf.mxu0  ;;  %v21756_v27 = vld [vmem:[#allocation7 + $0x5c0] ss:$28 sps:$4 sm:$0xff]  }
 0x3f1   : > { %v24270_v9 = vadd.f32 %v7941_v1, %v7898_v13  ;;  %8223 = vmatpush2.bf16.msra.mxu0 %v21729_v26  ;;  %v21764_v26 = vld [vmem:[#allocation7 + $0x58c] ss:$28 sps:$4 sm:$0xff]   ;;  %v21770_v13 = vld [vmem:[#allocation7 + $0x554] ss:$28 sps:$4 sm:$0xff]  }
 0x3f2   : > { %8266 = vmatpush2.bf16.msra.mxu1 %v21732_v50  ;;  %8224 = vmatprep.subr.bf16.mxu0 %v21737_v62  ;;  %v21762_v50 = vld [vmem:[#allocation7 + $0x588] ss:$28 sps:$4 sm:$0xff]   ;;  %v21767_v62 = vld [vmem:[#allocation7 + $0x1d4] ss:$28 sps:$4 sm:$0xff]  }
 0x3f3   : > { %8267 = vmatprep.subr.bf16.mxu1 %v21740_v57  ;;  %v21765_v57 = vld [vmem:[#allocation7 + $0x1d0] ss:$28 sps:$4 sm:$0xff]  }
 0x3f4   : > { %v21768_v1 = vld [vmem:[#allocation7 + $0x550] ss:$28 sps:$4 sm:$0xff]  }
 0x3f5   : > { %8225 = vmatpush2.bf16.msra.mxu0 %v21735_v60  ;;  %v21773_v60 = vld [vmem:[#allocation7 + $0x89c] ss:$28 sps:$4 sm:$0xff]  }
 0x3f6   : > { %8268 = vmatpush2.bf16.msra.mxu1 %v21738_v10  ;;  %8226 = vmatprep.subr.bf16.mxu0 %v21743_v4  ;;  %v21776_v10 = vld [vmem:[#allocation7 + $0xc1c] ss:$28 sps:$4 sm:$0xff]  }
 0x3f7   : > { %8269 = vmatprep.subr.bf16.mxu1 %v21746_v12  ;;  %v21771_v4 = vld [vmem:[#allocation7 + $0x898] ss:$28 sps:$4 sm:$0xff]  }
 0x3f8   : > { %v21774_v12 = vld [vmem:[#allocation7 + $0xc18] ss:$28 sps:$4 sm:$0xff]  }
 0x3f9   : > { %8227 = vmatpush2.bf16.msra.mxu0 %v21741_v63  ;;  %v21779_v63 = vld [vmem:[#allocation7 + $0x864] ss:$28 sps:$4 sm:$0xff]  }
 0x3fa   : > { %8270 = vmatpush2.bf16.msra.mxu1 %v21744_v3  ;;  %8228 = vmatprep.subr.bf16.mxu0 %v21749_v20  ;;  %v21782_v3 = vld [vmem:[#allocation7 + $0xbe4] ss:$28 sps:$4 sm:$0xff]   ;;  %v24272_v20 = vpop.f32.mrf.mxu1 }
 0x3fb   : > { %8271 = vmatprep.subr.bf16.mxu1 %v21752_v18  ;;  %v21780_v18 = vld [vmem:[#allocation7 + $0xbe0] ss:$28 sps:$4 sm:$0xff]  }
 0x3fd   : > { %8229 = vmatpush2.bf16.msra.mxu0 %v21747_v46  ;;  %v21777_v46 = vld [vmem:[#allocation7 + $0x860] ss:$28 sps:$4 sm:$0xff]  }
 0x3fe   : > { %8272 = vmatpush2.bf16.msra.mxu1 %v21750_v19  ;;  %8230 = vmatprep.subr.bf16.mxu0 %v21755_v22  ;;  %v21785_v22 = vld [vmem:[#allocation7 + $0x82c] ss:$28 sps:$4 sm:$0xff]  }
 0x3ff   : > { %8273 = vmatprep.subr.bf16.mxu1 %v21758_v25 }
 0x401   : > { %8231 = vmatpush2.bf16.msra.mxu0 %v21753_v23  ;;  %v21788_v23 = vld [vmem:[#allocation7 + $0xbac] ss:$28 sps:$4 sm:$0xff]  }
 0x402   : > { %8274 = vmatpush2.bf16.msra.mxu1 %v21756_v27  ;;  %8232 = vmatprep.subr.bf16.mxu0 %v21761_v29  ;;  %v21783_v29 = vld [vmem:[#allocation7 + $0x828] ss:$28 sps:$4 sm:$0xff]  }
 0x403   : > { %8275 = vmatprep.subr.bf16.mxu1 %v21764_v26 }
 0x405   : > { %8233 = vmatpush2.bf16.msra.mxu0 %v21759_v43  ;;  %v21786_v43 = vld [vmem:[#allocation7 + $0xba8] ss:$28 sps:$4 sm:$0xff]  }
 0x406   : > { %8276 = vmatpush2.bf16.msra.mxu1 %v21762_v50  ;;  %8234 = vmatprep.subr.bf16.mxu0 %v21767_v62  ;;  %v21791_v50 = vld [vmem:[#allocation7 + $0x7f4] ss:$28 sps:$4 sm:$0xff]  }
 0x407   : > { %8277 = vmatprep.subr.bf16.mxu1 %v21770_v13  ;;  %v21794_v62 = vld [vmem:[#allocation7 + $0xb74] ss:$28 sps:$4 sm:$0xff]  }
 0x408   : > { %v21792_v13 = vld [vmem:[#allocation7 + $0xb70] ss:$28 sps:$4 sm:$0xff]  }
 0x409   : > { %8235 = vmatpush2.bf16.msra.mxu0 %v21765_v57 }
 0x40a   : > { %8278 = vmatpush2.bf16.msra.mxu1 %v21768_v1  ;;  %8290 = vmatprep.subr.bf16.mxu0 %v21773_v60  ;;  %v21797_v1 = vld [vmem:[#allocation7 + $0x7bc] ss:$28 sps:$4 sm:$0xff]  }
 0x40b   : > { %8333 = vmatprep.subr.bf16.mxu1 %v21776_v10  ;;  %v21800_v60 = vld [vmem:[#allocation7 + $0xb3c] ss:$28 sps:$4 sm:$0xff]  }
 0x40c   : > { %8237 = vmatmul.mubr.bf16.vlgmr.msra.gmra.mxu0 %v24015_v36  ;;  %v21795_v10 = vld [vmem:[#allocation7 + $0x7b8] ss:$28 sps:$4 sm:$0xff]  }
 0x40d   : > { %v7980_v19 = vpop.f32.mrf.mxu1  ;;  %8280 = vmatmul.mubr.bf16.vlgmr.msra.gmra.mxu1 %v24018_v37  ;;  %8291 = vmatpush1.bf16.msra.mxu0 %v21771_v4  ;;  %v21798_v4 = vld [vmem:[#allocation7 + $0xb38] ss:$28 sps:$4 sm:$0xff]  }
 0x40e   : > { %v24277_v25 = vadd.f32 %v7980_v19, %v24266_v48  ;;  %8322 = vmatprep.mubr.bf16.mxu0 %v24063_v42  ;;  %8334 = vmatpush1.bf16.msra.mxu1 %v21774_v12  ;;  %v21789_v48 = vld [vmem:[#allocation7 + $0x7f0] ss:$28 sps:$4 sm:$0xff]   ;;  %v21803_v12 = vld [vmem:[#allocation7 + $0x784] ss:$28 sps:$4 sm:$0xff]  }
 0x40f   : > { %8365 = vmatprep.mubr.bf16.mxu1 %v24066_v15  ;;  %v24281_v27 = vpop.f32.mrf.mxu1  ;;  %8292 = vmatprep.subr.bf16.mxu0 %v21779_v63  ;;  %v21806_v63 = vld [vmem:[#allocation7 + $0xb04] ss:$28 sps:$4 sm:$0xff]  }
 0x410   : > { %8335 = vmatprep.subr.bf16.mxu1 %v21782_v3  ;;  %v21804_v3 = vld [vmem:[#allocation7 + $0xb00] ss:$28 sps:$4 sm:$0xff]   ;;  %v21807_v19 = vld [vmem:[#allocation7 + $0x748] ss:$28 sps:$4 sm:$0xff]  }
 0x411   : > { %v7984_v26 = vpop.f32.mrf.mxu1  ;;  %8293 = vmatpush1.bf16.msra.mxu0 %v21777_v46  ;;  %v21809_v46 = vld [vmem:[#allocation7 + $0x74c] ss:$28 sps:$4 sm:$0xff]  }
 0x412   : > { %v24284_v57 = vadd.f32 %v7984_v26, %v24270_v9  ;;  %8336 = vmatpush1.bf16.msra.mxu1 %v21780_v18  ;;  %8294 = vmatprep.subr.bf16.mxu0 %v21785_v22  ;;  %v21801_v9 = vld [vmem:[#allocation7 + $0x780] ss:$28 sps:$4 sm:$0xff]   ;;  %v21812_v18 = vld [vmem:[#allocation7 + $0xacc] ss:$28 sps:$4 sm:$0xff]  }
 0x413   : > { %8337 = vmatprep.subr.bf16.mxu1 %v21788_v23  ;;  %v21810_v22 = vld [vmem:[#allocation7 + $0xac8] ss:$28 sps:$4 sm:$0xff]   ;;  %v21815_v23 = vld [vmem:[#allocation7 + $0x714] ss:$28 sps:$4 sm:$0xff]  }
 0x414   : > { %v21816_v26 = vld [vmem:[#allocation7 + $0xa90] ss:$28 sps:$4 sm:$0xff]  }
 0x415   : > { %8295 = vmatpush1.bf16.msra.mxu0 %v21783_v29  ;;  %v21813_v29 = vld [vmem:[#allocation7 + $0x710] ss:$28 sps:$4 sm:$0xff]  }
 0x416   : > { %8338 = vmatpush1.bf16.msra.mxu1 %v21786_v43  ;;  %8296 = vmatprep.subr.bf16.mxu0 %v21791_v50  ;;  %v21818_v43 = vld [vmem:[#allocation7 + $0xa94] ss:$28 sps:$4 sm:$0xff]   ;;  %v21821_v50 = vld [vmem:[#allocation7 + $0xa5c] ss:$28 sps:$4 sm:$0xff]  }
 0x417   : > { %8339 = vmatprep.subr.bf16.mxu1 %v21794_v62  ;;  %v21824_v62 = vld [vmem:[#allocation7 + $0xddc] ss:$28 sps:$4 sm:$0xff]  }
 0x419   : > { %8297 = vmatpush1.bf16.msra.mxu0 %v21789_v48  ;;  %v21819_v48 = vld [vmem:[#allocation7 + $0xa58] ss:$28 sps:$4 sm:$0xff]  }
 0x41a   : > { %8340 = vmatpush1.bf16.msra.mxu1 %v21792_v13  ;;  %8298 = vmatprep.subr.bf16.mxu0 %v21797_v1  ;;  %v21822_v13 = vld [vmem:[#allocation7 + $0xdd8] ss:$28 sps:$4 sm:$0xff]   ;;  %v24286_v1 = vpop.f32.mrf.mxu0 }
 0x41b   : > { %8341 = vmatprep.subr.bf16.mxu1 %v21800_v60  ;;  %v21827_v60 = vld [vmem:[#allocation7 + $0xa24] ss:$28 sps:$4 sm:$0xff]  }
 0x41d   : > { %8299 = vmatpush1.bf16.msra.mxu0 %v21795_v10  ;;  %v21830_v10 = vld [vmem:[#allocation7 + $0xda4] ss:$28 sps:$4 sm:$0xff]  }
 0x41e   : > { %8342 = vmatpush1.bf16.msra.mxu1 %v21798_v4  ;;  %8300 = vmatprep.subr.bf16.mxu0 %v21803_v12 }
 0x41f   : > { %8343 = vmatprep.subr.bf16.mxu1 %v21806_v63  ;;  %v21825_v63 = vld [vmem:[#allocation7 + $0xa20] ss:$28 sps:$4 sm:$0xff]  }
 0x421   : > { %8301 = vmatpush1.bf16.msra.mxu0 %v21801_v9 }
 0x422   : > { %8344 = vmatpush1.bf16.msra.mxu1 %v21804_v3  ;;  %8302 = vmatprep.subr.bf16.mxu0 %v21809_v46  ;;  %v21828_v3 = vld [vmem:[#allocation7 + $0xda0] ss:$28 sps:$4 sm:$0xff]   ;;  %v21833_v46 = vld [vmem:[#allocation7 + $0x9ec] ss:$28 sps:$4 sm:$0xff]  }
 0x423   : > { %8345 = vmatprep.subr.bf16.mxu1 %v21812_v18  ;;  %v21836_v18 = vld [vmem:[#allocation7 + $0xd6c] ss:$28 sps:$4 sm:$0xff]  }
 0x425   : > { %8303 = vmatpush1.bf16.msra.mxu0 %v21807_v19 }
 0x426   : > { %8346 = vmatpush1.bf16.msra.mxu1 %v21810_v22  ;;  %8304 = vmatprep.subr.bf16.mxu0 %v21815_v23  ;;  %v21831_v23 = vld [vmem:[#allocation7 + $0x9e8] ss:$28 sps:$4 sm:$0xff]  }
 0x427   : > { %8347 = vmatprep.subr.bf16.mxu1 %v21818_v43  ;;  %v21842_v43 = vld [vmem:[#allocation7 + $0xd34] ss:$28 sps:$4 sm:$0xff]  }
 0x429   : > { %8305 = vmatpush1.bf16.msra.mxu0 %v21813_v29  ;;  %v21839_v29 = vld [vmem:[#allocation7 + $0x9b4] ss:$28 sps:$4 sm:$0xff]  }
 0x42a   : > { %8348 = vmatpush1.bf16.msra.mxu1 %v21816_v26  ;;  %8306 = vmatprep.subr.bf16.mxu0 %v21821_v50  ;;  %v21837_v26 = vld [vmem:[#allocation7 + $0x9b0] ss:$28 sps:$4 sm:$0xff]  }
 0x42b   : > { %8349 = vmatprep.subr.bf16.mxu1 %v21824_v62  ;;  %v21840_v50 = vld [vmem:[#allocation7 + $0xd30] ss:$28 sps:$4 sm:$0xff]   ;;  %v21845_v62 = vld [vmem:[#allocation7 + $0x97c] ss:$28 sps:$4 sm:$0xff]  }
 0x42c   : > { %v8023_v4 = vpop.f32.mrf.mxu0 }
 0x42d   : > { %v24289_v12 = vadd.f32 %v8023_v4, %v24277_v25  ;;  %8307 = vmatpush2.bf16.msra.mxu0 %v21819_v48  ;;  %v21834_v25 = vld [vmem:[#allocation7 + $0xd68] ss:$28 sps:$4 sm:$0xff]   ;;  %v21848_v48 = vld [vmem:[#allocation7 + $0xcfc] ss:$28 sps:$4 sm:$0xff]  }
 0x42e   : > { %8350 = vmatpush2.bf16.msra.mxu1 %v21822_v13  ;;  %v24291_v9 = vpop.f32.mrf.mxu0  ;;  %8308 = vmatprep.subr.bf16.mxu0 %v21827_v60  ;;  %v21843_v13 = vld [vmem:[#allocation7 + $0x978] ss:$28 sps:$4 sm:$0xff]   ;;  %v21851_v60 = vld [vmem:[#allocation7 + $0x944] ss:$28 sps:$4 sm:$0xff]  }
 0x42f   : > { %8351 = vmatprep.subr.bf16.mxu1 %v21830_v10  ;;  %v21854_v10 = vld [vmem:[#allocation7 + $0xcc4] ss:$28 sps:$4 sm:$0xff]  }
 0x430   : > { %v8027_v19 = vpop.f32.mrf.mxu0  ;;  %v21849_v4 = vld [vmem:[#allocation7 + $0x940] ss:$28 sps:$4 sm:$0xff]  }
 0x431   : > { %v24294_v22 = vadd.f32 %v8027_v19, %v24284_v57  ;;  %8309 = vmatpush2.bf16.msra.mxu0 %v21825_v63  ;;  %v21846_v57 = vld [vmem:[#allocation7 + $0xcf8] ss:$28 sps:$4 sm:$0xff]   ;;  %v21852_v63 = vld [vmem:[#allocation7 + $0xcc0] ss:$28 sps:$4 sm:$0xff]   ;;  %v21858_v19 = vld [vmem:[#allocation7 + $0xc88] ss:$28 sps:$4 sm:$0xff]  }
 0x432   : > { %8352 = vmatpush2.bf16.msra.mxu1 %v21828_v3  ;;  %8310 = vmatprep.subr.bf16.mxu0 %v21833_v46  ;;  %v21857_v3 = vld [vmem:[#allocation7 + $0x90c] ss:$28 sps:$4 sm:$0xff]  }
 0x433   : > { %8353 = vmatprep.subr.bf16.mxu1 %v21836_v18  ;;  %v21860_v46 = vld [vmem:[#allocation7 + $0xc8c] ss:$28 sps:$4 sm:$0xff]  }
 0x434   : > { %v21855_v18 = vld [vmem:[#allocation7 + $0x908] ss:$28 sps:$4 sm:$0xff]  }
 0x435   : > { %8311 = vmatpush2.bf16.msra.mxu0 %v21831_v23  ;;  %v21863_v23 = vld [vmem:[#allocation7 + $0x8d4] ss:$28 sps:$4 sm:$0xff]  }
 0x436   : > { %8354 = vmatpush2.bf16.msra.mxu1 %v21834_v25  ;;  %8312 = vmatprep.subr.bf16.mxu0 %v21839_v29  ;;  %v21866_v25 = vld [vmem:[#allocation7 + $0xc54] ss:$28 sps:$4 sm:$0xff]  }
 0x437   : > { %8355 = vmatprep.subr.bf16.mxu1 %v21842_v43  ;;  %v21861_v29 = vld [vmem:[#allocation7 + $0x8d0] ss:$28 sps:$4 sm:$0xff]  }
 0x438   : > { %v21864_v43 = vld [vmem:[#allocation7 + $0xc50] ss:$28 sps:$4 sm:$0xff]  }
 0x439   : > { %8313 = vmatpush2.bf16.msra.mxu0 %v21837_v26  ;;  %v21869_v26 = vld [vmem:[#allocation7 + $0xf9c] ss:$28 sps:$4 sm:$0xff]  }
 0x43a   : > { %8356 = vmatpush2.bf16.msra.mxu1 %v21840_v50  ;;  %8314 = vmatprep.subr.bf16.mxu0 %v21845_v62  ;;  %v21872_v50 = vld [vmem:[#allocation7 + $0x131c] ss:$28 sps:$4 sm:$0xff]  }
 0x43b   : > { %8357 = vmatprep.subr.bf16.mxu1 %v21848_v48  ;;  %v21867_v62 = vld [vmem:[#allocation7 + $0xf98] ss:$28 sps:$4 sm:$0xff]  }
 0x43c   : > { %v21870_v48 = vld [vmem:[#allocation7 + $0x1318] ss:$28 sps:$4 sm:$0xff]  }
 0x43d   : > { %8315 = vmatpush2.bf16.msra.mxu0 %v21843_v13  ;;  %v21875_v13 = vld [vmem:[#allocation7 + $0xf64] ss:$28 sps:$4 sm:$0xff]  }
 0x43e   : > { %8358 = vmatpush2.bf16.msra.mxu1 %v21846_v57  ;;  %8316 = vmatprep.subr.bf16.mxu0 %v21851_v60  ;;  %v21878_v57 = vld [vmem:[#allocation7 + $0x12e4] ss:$28 sps:$4 sm:$0xff]   ;;  %v24296_v60 = vpop.f32.mrf.mxu1 }
 0x43f   : > { %8359 = vmatprep.subr.bf16.mxu1 %v21854_v10  ;;  %v21873_v10 = vld [vmem:[#allocation7 + $0xf60] ss:$28 sps:$4 sm:$0xff]  }
 0x441   : > { %8317 = vmatpush2.bf16.msra.mxu0 %v21849_v4  ;;  %v21876_v4 = vld [vmem:[#allocation7 + $0x12e0] ss:$28 sps:$4 sm:$0xff]  }
 0x442   : > { %8360 = vmatpush2.bf16.msra.mxu1 %v21852_v63  ;;  %8318 = vmatprep.subr.bf16.mxu0 %v21857_v3  ;;  %v21881_v3 = vld [vmem:[#allocation7 + $0xf2c] ss:$28 sps:$4 sm:$0xff]  }
 0x443   : > { %8361 = vmatprep.subr.bf16.mxu1 %v21860_v46  ;;  %v21884_v46 = vld [vmem:[#allocation7 + $0x12ac] ss:$28 sps:$4 sm:$0xff]  }
 0x445   : > { %8319 = vmatpush2.bf16.msra.mxu0 %v21855_v18 }
 0x446   : > { %8362 = vmatpush2.bf16.msra.mxu1 %v21858_v19  ;;  %8320 = vmatprep.subr.bf16.mxu0 %v21863_v23  ;;  %v21879_v23 = vld [vmem:[#allocation7 + $0xf28] ss:$28 sps:$4 sm:$0xff]  }
 0x447   : > { %8363 = vmatprep.subr.bf16.mxu1 %v21866_v25  ;;  %v21882_v25 = vld [vmem:[#allocation7 + $0x12a8] ss:$28 sps:$4 sm:$0xff]  }
 0x449   : > { %8321 = vmatpush2.bf16.msra.mxu0 %v21861_v29 }
 0x44a   : > { %8364 = vmatpush2.bf16.msra.mxu1 %v21864_v43  ;;  %8376 = vmatprep.subr.bf16.mxu0 %v21869_v26  ;;  %v21887_v43 = vld [vmem:[#allocation7 + $0xef4] ss:$28 sps:$4 sm:$0xff]  }
 0x44b   : > { %8419 = vmatprep.subr.bf16.mxu1 %v21872_v50  ;;  %v21890_v26 = vld [vmem:[#allocation7 + $0x1274] ss:$28 sps:$4 sm:$0xff]  }
 0x44c   : > { %8323 = vmatmul.mubr.bf16.vlgmr.msra.gmra.mxu0 %v24100_v61 }
 0x44d   : > { %v8066_v63 = vpop.f32.mrf.mxu1  ;;  %8366 = vmatmul.mubr.bf16.vlgmr.msra.gmra.mxu1 %v24105_v24  ;;  %8377 = vmatpush1.bf16.msra.mxu0 %v21867_v62  ;;  %v21888_v62 = vld [vmem:[#allocation7 + $0x1270] ss:$28 sps:$4 sm:$0xff]  }
 0x44e   : > { %v24301_v18 = vadd.f32 %v8066_v63, %v24289_v12  ;;  %8408 = vmatprep.mubr.bf16.mxu0 %v24107_v47  ;;  %8420 = vmatpush1.bf16.msra.mxu1 %v21870_v48  ;;  %v21885_v12 = vld [vmem:[#allocation7 + $0xef0] ss:$28 sps:$4 sm:$0xff]   ;;  %v21893_v48 = vld [vmem:[#allocation7 + $0xebc] ss:$28 sps:$4 sm:$0xff]   ;;  %v21899_v63 = vld [vmem:[#allocation7 + $0xe84] ss:$28 sps:$4 sm:$0xff]  }
 0x44f   : > { %8451 = vmatprep.mubr.bf16.mxu1 %v24112_v52  ;;  %v24305_v19 = vpop.f32.mrf.mxu1  ;;  %8378 = vmatprep.subr.bf16.mxu0 %v21875_v13  ;;  %v21896_v13 = vld [vmem:[#allocation7 + $0x123c] ss:$28 sps:$4 sm:$0xff]   ;;  %v21986_v52 = vld [vmem:[#allocation7 + $0x1974] ss:$28 sps:$4 sm:$0xff]  }
 0x450   : > { %24986 = vst [vmem:[#allocation41_spill] sm:$0xff] %v24305_v19  ;;  %8421 = vmatprep.subr.bf16.mxu1 %v21878_v57  ;;  %v21891_v57 = vld [vmem:[#allocation7 + $0xeb8] ss:$28 sps:$4 sm:$0xff]   ;;  %v24989_v19 = vmov 0  }
 0x451   : > { %v8070_v29 = vpop.f32.mrf.mxu1  ;;  %8379 = vmatpush1.bf16.msra.mxu0 %v21873_v10  ;;  %v21894_v10 = vld [vmem:[#allocation7 + $0x1238] ss:$28 sps:$4 sm:$0xff]  }
 0x452   : > { %v24308_v50 = vadd.f32 %v8070_v29, %v24294_v22  ;;  %8422 = vmatpush1.bf16.msra.mxu1 %v21876_v4  ;;  %8380 = vmatprep.subr.bf16.mxu0 %v21881_v3  ;;  %v21902_v22 = vld [vmem:[#allocation7 + $0x1204] ss:$28 sps:$4 sm:$0xff]  }
 0x453   : > { %8423 = vmatprep.subr.bf16.mxu1 %v21884_v46  ;;  %v21897_v4 = vld [vmem:[#allocation7 + $0xe80] ss:$28 sps:$4 sm:$0xff]   ;;  %v21905_v46 = vld [vmem:[#allocation7 + $0xe4c] ss:$28 sps:$4 sm:$0xff]  }
 0x454   : > { %v21900_v3 = vld [vmem:[#allocation7 + $0x1200] ss:$28 sps:$4 sm:$0xff]   ;;  %v21906_v29 = vld [vmem:[#allocation7 + $0x11c8] ss:$28 sps:$4 sm:$0xff]  }
 0x455   : > { %8381 = vmatpush1.bf16.msra.mxu0 %v21879_v23  ;;  %v21908_v23 = vld [vmem:[#allocation7 + $0x11cc] ss:$28 sps:$4 sm:$0xff]  }
 0x456   : > { %8424 = vmatpush1.bf16.msra.mxu1 %v21882_v25  ;;  %8382 = vmatprep.subr.bf16.mxu0 %v21887_v43  ;;  %v21903_v25 = vld [vmem:[#allocation7 + $0xe48] ss:$28 sps:$4 sm:$0xff]   ;;  %v21911_v43 = vld [vmem:[#allocation7 + $0xe14] ss:$28 sps:$4 sm:$0xff]  }
 0x457   : > { %8425 = vmatprep.subr.bf16.mxu1 %v21890_v26  ;;  %v21909_v26 = vld [vmem:[#allocation7 + $0xe10] ss:$28 sps:$4 sm:$0xff]  }
 0x459   : > { %8383 = vmatpush1.bf16.msra.mxu0 %v21885_v12  ;;  %v21914_v12 = vld [vmem:[#allocation7 + $0x1194] ss:$28 sps:$4 sm:$0xff]  }
 0x45a   : > { %8426 = vmatpush1.bf16.msra.mxu1 %v21888_v62  ;;  %8384 = vmatprep.subr.bf16.mxu0 %v21893_v48  ;;  %v21912_v62 = vld [vmem:[#allocation7 + $0x1190] ss:$28 sps:$4 sm:$0xff]   ;;  %v21917_v48 = vld [vmem:[#allocation7 + $0x115c] ss:$28 sps:$4 sm:$0xff]  }
 0x45b   : > { %8427 = vmatprep.subr.bf16.mxu1 %v21896_v13  ;;  %v21920_v13 = vld [vmem:[#allocation7 + $0x14dc] ss:$28 sps:$4 sm:$0xff]  }
 0x45d   : > { %8385 = vmatpush1.bf16.msra.mxu0 %v21891_v57  ;;  %v21915_v57 = vld [vmem:[#allocation7 + $0x1158] ss:$28 sps:$4 sm:$0xff]  }
 0x45e   : > { %8428 = vmatpush1.bf16.msra.mxu1 %v21894_v10  ;;  %8386 = vmatprep.subr.bf16.mxu0 %v21899_v63  ;;  %v21918_v10 = vld [vmem:[#allocation7 + $0x14d8] ss:$28 sps:$4 sm:$0xff]   ;;  %v21923_v63 = vld [vmem:[#allocation7 + $0x1124] ss:$28 sps:$4 sm:$0xff]  }
 0x45f   : > { %8429 = vmatprep.subr.bf16.mxu1 %v21902_v22  ;;  %v21926_v22 = vld [vmem:[#allocation7 + $0x14a4] ss:$28 sps:$4 sm:$0xff]  }
 0x461   : > { %8387 = vmatpush1.bf16.msra.mxu0 %v21897_v4  ;;  %v24310_v4 = vpop.f32.mrf.mxu0 }
 0x462   : > { %8430 = vmatpush1.bf16.msra.mxu1 %v21900_v3  ;;  %8388 = vmatprep.subr.bf16.mxu0 %v21905_v46  ;;  %v21921_v46 = vld [vmem:[#allocation7 + $0x1120] ss:$28 sps:$4 sm:$0xff]  }
 0x463   : > { %8431 = vmatprep.subr.bf16.mxu1 %v21908_v23 }
 0x465   : > { %8389 = vmatpush1.bf16.msra.mxu0 %v21903_v25  ;;  %v21924_v25 = vld [vmem:[#allocation7 + $0x14a0] ss:$28 sps:$4 sm:$0xff]  }
 0x466   : > { %8432 = vmatpush1.bf16.msra.mxu1 %v21906_v29  ;;  %8390 = vmatprep.subr.bf16.mxu0 %v21911_v43  ;;  %v21929_v29 = vld [vmem:[#allocation7 + $0x10ec] ss:$28 sps:$4 sm:$0xff]  }
 0x467   : > { %8433 = vmatprep.subr.bf16.mxu1 %v21914_v12 }
 0x469   : > { %8391 = vmatpush1.bf16.msra.mxu0 %v21909_v26  ;;  %v21932_v26 = vld [vmem:[#allocation7 + $0x146c] ss:$28 sps:$4 sm:$0xff]  }
 0x46a   : > { %8434 = vmatpush1.bf16.msra.mxu1 %v21912_v62  ;;  %8392 = vmatprep.subr.bf16.mxu0 %v21917_v48  ;;  %v21927_v62 = vld [vmem:[#allocation7 + $0x10e8] ss:$28 sps:$4 sm:$0xff]  }
 0x46b   : > { %8435 = vmatprep.subr.bf16.mxu1 %v21920_v13  ;;  %v21930_v48 = vld [vmem:[#allocation7 + $0x1468] ss:$28 sps:$4 sm:$0xff]   ;;  %v21938_v13 = vld [vmem:[#allocation7 + $0x1434] ss:$28 sps:$4 sm:$0xff]  }
 0x46c   : > { %v8109_v3 = vpop.f32.mrf.mxu0 }
 0x46d   : > { %v24313_v23 = vadd.f32 %v8109_v3, %v24301_v18  ;;  %8393 = vmatpush2.bf16.msra.mxu0 %v21915_v57  ;;  %v21935_v18 = vld [vmem:[#allocation7 + $0x10b4] ss:$28 sps:$4 sm:$0xff]  }
 0x46e   : > { %8436 = vmatpush2.bf16.msra.mxu1 %v21918_v10  ;;  %v24315_v43 = vpop.f32.mrf.mxu0  ;;  %8394 = vmatprep.subr.bf16.mxu0 %v21923_v63  ;;  %v21933_v57 = vld [vmem:[#allocation7 + $0x10b0] ss:$28 sps:$4 sm:$0xff]   ;;  %v21941_v63 = vld [vmem:[#allocation7 + $0x107c] ss:$28 sps:$4 sm:$0xff]  }
 0x46f   : > { %24987 = vst [vmem:[#allocation42_spill] sm:$0xff] %v24315_v43  ;;  %8437 = vmatprep.subr.bf16.mxu1 %v21926_v22  ;;  %v21936_v10 = vld [vmem:[#allocation7 + $0x1430] ss:$28 sps:$4 sm:$0xff]   ;;  %v21944_v22 = vld [vmem:[#allocation7 + $0x13fc] ss:$28 sps:$4 sm:$0xff]  }
 0x470   : > { %v8113_v12 = vpop.f32.mrf.mxu0  ;;  %v21939_v3 = vld [vmem:[#allocation7 + $0x1078] ss:$28 sps:$4 sm:$0xff]   ;;  %v21975_v43 = vld [vmem:[#allocation7 + $0x1628] ss:$28 sps:$4 sm:$0xff]  }
 0x471   : > { %v24318_v40 = vadd.f32 %v8113_v12, %v24308_v50  ;;  %8395 = vmatpush2.bf16.msra.mxu0 %v21921_v46  ;;  %v21942_v50 = vld [vmem:[#allocation7 + $0x13f8] ss:$28 sps:$4 sm:$0xff]   ;;  %v21947_v46 = vld [vmem:[#allocation7 + $0x1044] ss:$28 sps:$4 sm:$0xff]   ;;  %v21953_v12 = vld [vmem:[#allocation7 + $0x100c] ss:$28 sps:$4 sm:$0xff]  }
 0x472   : > { %8438 = vmatpush2.bf16.msra.mxu1 %v21924_v25  ;;  %8396 = vmatprep.subr.bf16.mxu0 %v21929_v29  ;;  %v21950_v25 = vld [vmem:[#allocation7 + $0x13c4] ss:$28 sps:$4 sm:$0xff]   ;;  %v24320_v0 = vpop.f32.mrf.mxu0 }
 0x473   : > { %8439 = vmatprep.subr.bf16.mxu1 %v21932_v26  ;;  %v21945_v29 = vld [vmem:[#allocation7 + $0x1040] ss:$28 sps:$4 sm:$0xff]   ;;  %24988 = vst [vmem:[#allocation43_spill] sm:$0xff] %v24320_v0  ;;  %v21978_v0 = vld [vmem:[#allocation7 + $0x19a8] ss:$28 sps:$4 sm:$0xff]  }
 0x474   : > { %v21948_v26 = vld [vmem:[#allocation7 + $0x13c0] ss:$28 sps:$4 sm:$0xff]  }
 0x475   : > { %8397 = vmatpush2.bf16.msra.mxu0 %v21927_v62  ;;  %v21956_v62 = vld [vmem:[#allocation7 + $0x138c] ss:$28 sps:$4 sm:$0xff]  }
 0x476   : > { %8440 = vmatpush2.bf16.msra.mxu1 %v21930_v48  ;;  %8398 = vmatprep.subr.bf16.mxu0 %v21935_v18  ;;  %v21951_v48 = vld [vmem:[#allocation7 + $0x1008] ss:$28 sps:$4 sm:$0xff]  }
 0x477   : > { %8441 = vmatprep.subr.bf16.mxu1 %v21938_v13  ;;  %v21954_v18 = vld [vmem:[#allocation7 + $0x1388] ss:$28 sps:$4 sm:$0xff]   ;;  %v21959_v13 = vld [vmem:[#allocation7 + $0xfd4] ss:$28 sps:$4 sm:$0xff]  }
 0x479   : > { %8399 = vmatpush2.bf16.msra.mxu0 %v21933_v57  ;;  %v21957_v57 = vld [vmem:[#allocation7 + $0xfd0] ss:$28 sps:$4 sm:$0xff]  }
 0x47a   : > { %8442 = vmatpush2.bf16.msra.mxu1 %v21936_v10  ;;  %8400 = vmatprep.subr.bf16.mxu0 %v21941_v63  ;;  %v21962_v10 = vld [vmem:[#allocation7 + $0x1354] ss:$28 sps:$4 sm:$0xff]  }
 0x47b   : > { %8443 = vmatprep.subr.bf16.mxu1 %v21944_v22  ;;  %v21960_v63 = vld [vmem:[#allocation7 + $0x1350] ss:$28 sps:$4 sm:$0xff]   ;;  %v21965_v22 = vld [vmem:[#allocation7 + $0x169c] ss:$28 sps:$4 sm:$0xff]  }
 0x47d   : > { %8401 = vmatpush2.bf16.msra.mxu0 %v21939_v3  ;;  %v21968_v3 = vld [vmem:[#allocation7 + $0x1a1c] ss:$28 sps:$4 sm:$0xff]  }
 0x47e   : > { %8444 = vmatpush2.bf16.msra.mxu1 %v21942_v50  ;;  %8402 = vmatprep.subr.bf16.mxu0 %v21947_v46  ;;  %v21963_v50 = vld [vmem:[#allocation7 + $0x1698] ss:$28 sps:$4 sm:$0xff]  }
 0x47f   : > { %8445 = vmatprep.subr.bf16.mxu1 %v21950_v25  ;;  %v21966_v46 = vld [vmem:[#allocation7 + $0x1a18] ss:$28 sps:$4 sm:$0xff]   ;;  %v21971_v25 = vld [vmem:[#allocation7 + $0x1664] ss:$28 sps:$4 sm:$0xff]  }
 0x481   : > { %8403 = vmatpush2.bf16.msra.mxu0 %v21945_v29  ;;  %v21974_v29 = vld [vmem:[#allocation7 + $0x19e4] ss:$28 sps:$4 sm:$0xff]  }
 0x482   : > { %8446 = vmatpush2.bf16.msra.mxu1 %v21948_v26  ;;  %8404 = vmatprep.subr.bf16.mxu0 %v21953_v12  ;;  %v24322_v26 = vpop.f32.mrf.mxu1 }
 0x483   : > { %8447 = vmatprep.subr.bf16.mxu1 %v21956_v62  ;;  %v8929_v62 = vcombine.high %v24241_v58, %v24241_v58 }
 0x485   : > { %8405 = vmatpush2.bf16.msra.mxu0 %v21951_v48  ;;  %v21969_v48 = vld [vmem:[#allocation7 + $0x1660] ss:$28 sps:$4 sm:$0xff]   ;;  %v8947_v45 = vpack.i.b16 %v8929_v62, %v8929_v62  ;;  %v21984_v62 = vld [vmem:[#allocation7 + $0x1970] ss:$28 sps:$4 sm:$0xff]  }
 0x486   : > { %8448 = vmatpush2.bf16.msra.mxu1 %v21954_v18  ;;  %8406 = vmatprep.subr.bf16.mxu0 %v21959_v13  ;;  %v21972_v18 = vld [vmem:[#allocation7 + $0x19e0] ss:$28 sps:$4 sm:$0xff]  }
 0x487   : > { %8449 = vmatprep.subr.bf16.mxu1 %v21962_v10  ;;  %v21980_v10 = vld [vmem:[#allocation7 + $0x19ac] ss:$28 sps:$4 sm:$0xff]  }
 0x489   : > { %8407 = vmatpush2.bf16.msra.mxu0 %v21957_v57  ;;  %v21977_v57 = vld [vmem:[#allocation7 + $0x162c] ss:$28 sps:$4 sm:$0xff]  }
 0x48a   : > { %8450 = vmatpush2.bf16.msra.mxu1 %v21960_v63  ;;  %8462 = vmatprep.subr.bf16.mxu0 %v21965_v22 }
 0x48b   : > { %8505 = vmatprep.subr.bf16.mxu1 %v21968_v3 }
 0x48c   : > { %v8195_v12 = vpop.f32.mrf.mxu0  ;;  %8409 = vmatmul.mubr.bf16.vlgmr.msra.gmra.mxu0 %v24155_v17 }
 0x48d   : > { %v8152_v13 = vpop.f32.mrf.mxu1  ;;  %8452 = vmatmul.mubr.bf16.vlgmr.msra.gmra.mxu1 %v24157_v7  ;;  %8463 = vmatpush1.bf16.msra.mxu0 %v21963_v50  ;;  %v21983_v7 = vld [vmem:[#allocation7 + $0x15f4] ss:$28 sps:$4 sm:$0xff]  }
 0x48e   : > { %v8153_v63 = vadd.f32 %v8152_v13, %v24313_v23  ;;  %8494 = vmatprep.mubr.bf16.mxu0 %v24159_v21  ;;  %8506 = vmatpush1.bf16.msra.mxu1 %v21966_v46  ;;  %v24332_v3 = vpop.f32.mrf.mxu0 }
 0x48f   : > { %v24330_v22 = vpop.f32.mrf.mxu1  ;;  %8464 = vmatprep.subr.bf16.mxu0 %v21971_v25  ;;  %8507 = vmatprep.subr.bf16.mxu1 %v21974_v29  ;;  %v8952_v25 = vrot.slane %v8947_v45, %v23979_v34  ;;  %v21981_v29 = vld [vmem:[#allocation7 + $0x15f0] ss:$28 sps:$4 sm:$0xff]   ;;  %v21993_v45 = vld [vmem:[#allocation7 + $0x1580] ss:$28 sps:$4 sm:$0xff]  }
 0x490   : > { %v8196_v58 = vadd.f32 %v8195_v12, %v8153_v63  ;;  %8537 = vmatprep.mubr.bf16.mxu1 %v24989_v19  ;;  %v8199_v46 = vpop.f32.mrf.mxu0  ;;  %v21989_v63 = vld [vmem:[#allocation7 + $0x15bc] ss:$28 sps:$4 sm:$0xff]  }
 0x491   : > { %v8156_v50 = vpop.f32.mrf.mxu1  ;;  %8465 = vmatpush1.bf16.msra.mxu0 %v21969_v48  ;;  %v21992_v48 = vld [vmem:[#allocation7 + $0x193c] ss:$28 sps:$4 sm:$0xff]  }
 0x492   : > { %v8157_v23 = vadd.f32 %v8156_v50, %v24318_v40  ;;  %8508 = vmatpush1.bf16.msra.mxu1 %v21972_v18  ;;  %8466 = vmatprep.subr.bf16.mxu0 %v21977_v57  ;;  %v21987_v40 = vld [vmem:[#allocation7 + $0x15b8] ss:$28 sps:$4 sm:$0xff]   ;;  %v21995_v57 = vld [vmem:[#allocation7 + $0x1584] ss:$28 sps:$4 sm:$0xff]  }
 0x493   : > { %8509 = vmatprep.subr.bf16.mxu1 %v21980_v10  ;;  %v21990_v18 = vld [vmem:[#allocation7 + $0x1938] ss:$28 sps:$4 sm:$0xff]   ;;  %v21998_v10 = vld [vmem:[#allocation7 + $0x1904] ss:$28 sps:$4 sm:$0xff]  }
 0x494   : > { %v8200_v13 = vadd.f32 %v8199_v46, %v8157_v23  ;;  %v22007_v50 = vld [vmem:[#allocation7 + $0x1514] ss:$28 sps:$4 sm:$0xff]  }
 0x495   : > { %8467 = vmatpush1.bf16.msra.mxu0 %v21975_v43  ;;  %v22004_v43 = vld [vmem:[#allocation7 + $0x18cc] ss:$28 sps:$4 sm:$0xff]   ;;  %v22010_v23 = vld [vmem:[#allocation7 + $0x1894] ss:$28 sps:$4 sm:$0xff]  }
 0x496   : > { %v8878_v12 = vpack.c.bf16 %v8200_v13, %v8196_v58  ;;  %8510 = vmatpush1.bf16.msra.mxu1 %v21978_v0  ;;  %8468 = vmatprep.subr.bf16.mxu0 %v21983_v7  ;;  %v21996_v0 = vld [vmem:[#allocation7 + $0x1900] ss:$28 sps:$4 sm:$0xff]   ;;  %v22001_v7 = vld [vmem:[#allocation7 + $0x154c] ss:$28 sps:$4 sm:$0xff]  }
 0x497   : > { %8511 = vmatprep.subr.bf16.mxu1 %v21986_v52  ;;  %v21999_v52 = vld [vmem:[#allocation7 + $0x1548] ss:$28 sps:$4 sm:$0xff]   ;;  %v22005_v46 = vld [vmem:[#allocation7 + $0x1510] ss:$28 sps:$4 sm:$0xff]  }
 0x498   : > { %v24337_v19 = vadd.bf16 %v8952_v25, %v8878_v12  ;;  %v22002_v58 = vld [vmem:[#allocation7 + $0x18c8] ss:$28 sps:$4 sm:$0xff]   ;;  %v22008_v13 = vld [vmem:[#allocation7 + $0x1890] ss:$28 sps:$4 sm:$0xff]   ;;  %v22013_v25 = vld [vmem:[#allocation7 + $0x185c] ss:$28 sps:$4 sm:$0xff]  }
 0x499   : > { %8469 = vmatpush1.bf16.msra.mxu0 %v21981_v29  ;;  %v22011_v29 = vld [vmem:[#allocation7 + $0x1858] ss:$28 sps:$4 sm:$0xff]   ;;  %v22014_v12 = vld [vmem:[#allocation7 + $0x360] ss:$28 sps:$4 sm:$0xff]  }
 0x49a   : > { %8512 = vmatpush1.bf16.msra.mxu1 %v21984_v62  ;;  %8470 = vmatprep.subr.bf16.mxu0 %v21989_v63  ;;  %v22015_v62 = vld [vmem:[#allocation7 + $0x1a0] ss:$28 sps:$4 sm:$0xff]  }
 0x49b   : > { %8513 = vmatprep.subr.bf16.mxu1 %v21992_v48  ;;  %v22016_v63 = vld [vmem:[#allocation7 + $0x1820] ss:$28 sps:$4 sm:$0xff]  }
 0x49c   : > { %v22018_v48 = vld [vmem:[#allocation7 + $0x1824] ss:$28 sps:$4 sm:$0xff]  }
 0x49d   : > { %8471 = vmatpush1.bf16.msra.mxu0 %v21987_v40  ;;  %v22019_v40 = vld [vmem:[#allocation7 + $0x328] ss:$28 sps:$4 sm:$0xff]  }
 0x49e   : > { %8514 = vmatpush1.bf16.msra.mxu1 %v21990_v18  ;;  %8472 = vmatprep.subr.bf16.mxu0 %v21995_v57  ;;  %v22020_v18 = vld [vmem:[#allocation7 + $0x168] ss:$28 sps:$4 sm:$0xff]  }
 0x49f   : > { %8515 = vmatprep.subr.bf16.mxu1 %v21998_v10  ;;  %v22023_v57 = vld [vmem:[#allocation7 + $0x17ec] ss:$28 sps:$4 sm:$0xff]  }
 0x4a0   : > { %v22021_v10 = vld [vmem:[#allocation7 + $0x17e8] ss:$28 sps:$4 sm:$0xff]  }
 0x4a1   : > { %8473 = vmatpush1.bf16.msra.mxu0 %v21993_v45  ;;  %v22024_v45 = vld [vmem:[#allocation7 + $0x2f0] ss:$28 sps:$4 sm:$0xff]  }
 0x4a2   : > { %8516 = vmatpush1.bf16.msra.mxu1 %v21996_v0  ;;  %8474 = vmatprep.subr.bf16.mxu0 %v22001_v7  ;;  %v22025_v0 = vld [vmem:[#allocation7 + $0x130] ss:$28 sps:$4 sm:$0xff]  }
 0x4a3   : > { %8517 = vmatprep.subr.bf16.mxu1 %v22004_v43  ;;  %v22028_v7 = vld [vmem:[#allocation7 + $0x17b4] ss:$28 sps:$4 sm:$0xff]  }
 0x4a4   : > { %v22029_v43 = vld [vmem:[#allocation7 + $0x2b8] ss:$28 sps:$4 sm:$0xff]  }
 0x4a5   : > { %8475 = vmatpush1.bf16.msra.mxu0 %v21999_v52  ;;  %v22026_v52 = vld [vmem:[#allocation7 + $0x17b0] ss:$28 sps:$4 sm:$0xff]  }
 0x4a6   : > { %8518 = vmatpush1.bf16.msra.mxu1 %v22002_v58  ;;  %8476 = vmatprep.subr.bf16.mxu0 %v22007_v50  ;;  %v22030_v58 = vld [vmem:[#allocation7 + $0xf8] ss:$28 sps:$4 sm:$0xff]  }
 0x4a7   : > { %8519 = vmatprep.subr.bf16.mxu1 %v22010_v23  ;;  %v22033_v50 = vld [vmem:[#allocation7 + $0x177c] ss:$28 sps:$4 sm:$0xff]  }
 0x4a8   : > { %v22031_v23 = vld [vmem:[#allocation7 + $0x1778] ss:$28 sps:$4 sm:$0xff]  }
 0x4a9   : > { %8477 = vmatpush1.bf16.msra.mxu0 %v22005_v46  ;;  %v22035_v46 = vld [vmem:[#allocation7 + $0xc0] ss:$28 sps:$4 sm:$0xff]  }
 0x4aa   : > { %8520 = vmatpush1.bf16.msra.mxu1 %v22008_v13  ;;  %8478 = vmatprep.subr.bf16.mxu0 %v22013_v25  ;;  %v22038_v13 = vld [vmem:[#allocation7 + $0x1744] ss:$28 sps:$4 sm:$0xff]  }
 0x4ab   : > { %20133 = vmatprep.subr.bf16.mxu1 %v22014_v12  ;;  %v22036_v25 = vld [vmem:[#allocation7 + $0x1740] ss:$28 sps:$4 sm:$0xff]   ;;  %v22040_v12 = vld [vmem:[#allocation7 + $0x88] ss:$28 sps:$4 sm:$0xff]  }
 0x4ad   : > { %8538 = vmatmul.mubr.bf16.vlgmr.msra.gmra.mxu1 %v24177_v41  ;;  %8479 = vmatpush2.bf16.msra.mxu0 %v22011_v29  ;;  %v22039_v29 = vld [vmem:[#allocation7 + $0x248] ss:$28 sps:$4 sm:$0xff]  }
 0x4ae   : > { %20134 = vmatpush3.bf16.msra.mxu1 %v22015_v62  ;;  %8580 = vmatprep.mubr.bf16.mxu1 %v24009_v28  ;;  %v22034_v28 = vld [vmem:[#allocation7 + $0x280] ss:$28 sps:$4 sm:$0xff]   ;;  %v22043_v62 = vld [vmem:[#allocation7 + $0x170c] ss:$28 sps:$4 sm:$0xff]  }
 0x4af   : > { %8480 = vmatprep.subr.bf16.mxu0 %v22018_v48  ;;  %20135 = vmatprep.subr.bf16.mxu1 %v22019_v40  ;;  %v22044_v48 = vld [vmem:[#allocation7 + $0x210] ss:$28 sps:$4 sm:$0xff]  }
 0x4b0   : > { %v22045_v40 = vld [vmem:[#allocation7 + $0x50] ss:$28 sps:$4 sm:$0xff]  }
 0x4b1   : > { %8481 = vmatpush2.bf16.msra.mxu0 %v22016_v63  ;;  %v22041_v63 = vld [vmem:[#allocation7 + $0x1708] ss:$28 sps:$4 sm:$0xff]  }
 0x4b2   : > { %20136 = vmatpush3.bf16.msra.mxu1 %v22020_v18  ;;  %8482 = vmatprep.subr.bf16.mxu0 %v22023_v57  ;;  %v22048_v18 = vld [vmem:[#allocation7 + $0x16d4] ss:$28 sps:$4 sm:$0xff]  }
 0x4b3   : > { %20137 = vmatprep.subr.bf16.mxu1 %v22024_v45  ;;  %v22046_v57 = vld [vmem:[#allocation7 + $0x16d0] ss:$28 sps:$4 sm:$0xff]   ;;  %v22050_v45 = vld [vmem:[#allocation7 + $0x18] ss:$28 sps:$4 sm:$0xff]  }
 0x4b5   : > { %8483 = vmatpush2.bf16.msra.mxu0 %v22021_v10  ;;  %v22049_v10 = vld [vmem:[#allocation7 + $0x1d8] ss:$28 sps:$4 sm:$0xff]  }
 0x4b6   : > { %20138 = vmatpush3.bf16.msra.mxu1 %v22025_v0  ;;  %8484 = vmatprep.subr.bf16.mxu0 %v22028_v7  ;;  %v22051_v0 = vld [vmem:[#allocation7 + $0x6e0] ss:$28 sps:$4 sm:$0xff]  }
 0x4b7   : > { %20139 = vmatprep.subr.bf16.mxu1 %v22029_v43  ;;  %v22052_v7 = vld [vmem:[#allocation7 + $0xa60] ss:$28 sps:$4 sm:$0xff]  }
 0x4b8   : > { %v22053_v43 = vld [vmem:[#allocation7 + $0x520] ss:$28 sps:$4 sm:$0xff]  }
 0x4b9   : > { %8485 = vmatpush2.bf16.msra.mxu0 %v22026_v52  ;;  %v22054_v52 = vld [vmem:[#allocation7 + $0x8a0] ss:$28 sps:$4 sm:$0xff]  }
 0x4ba   : > { %20140 = vmatpush3.bf16.msra.mxu1 %v22030_v58  ;;  %8486 = vmatprep.subr.bf16.mxu0 %v22033_v50  ;;  %v22055_v58 = vld [vmem:[#allocation7 + $0x6a8] ss:$28 sps:$4 sm:$0xff]  }
 0x4bb   : > { %20141 = vmatprep.subr.bf16.mxu1 %v22034_v28  ;;  %v22056_v50 = vld [vmem:[#allocation7 + $0xa28] ss:$28 sps:$4 sm:$0xff]  }
 0x4bc   : > { %v22058_v28 = vld [vmem:[#allocation7 + $0x868] ss:$28 sps:$4 sm:$0xff]  }
 0x4bd   : > { %8487 = vmatpush2.bf16.msra.mxu0 %v22031_v23  ;;  %v22057_v23 = vld [vmem:[#allocation7 + $0x4e8] ss:$28 sps:$4 sm:$0xff]  }
 0x4be   : > { %20142 = vmatpush3.bf16.msra.mxu1 %v22035_v46  ;;  %8488 = vmatprep.subr.bf16.mxu0 %v22038_v13  ;;  %v22059_v46 = vld [vmem:[#allocation7 + $0x670] ss:$28 sps:$4 sm:$0xff]  }
 0x4bf   : > { %20143 = vmatprep.subr.bf16.mxu1 %v22039_v29  ;;  %v22060_v13 = vld [vmem:[#allocation7 + $0x9f0] ss:$28 sps:$4 sm:$0xff]  }
 0x4c0   : > { %v22062_v29 = vld [vmem:[#allocation7 + $0x830] ss:$28 sps:$4 sm:$0xff]  }
 0x4c1   : > { %8489 = vmatpush2.bf16.msra.mxu0 %v22036_v25  ;;  %v22061_v25 = vld [vmem:[#allocation7 + $0x4b0] ss:$28 sps:$4 sm:$0xff]  }
 0x4c2   : > { %20144 = vmatpush3.bf16.msra.mxu1 %v22040_v12  ;;  %8490 = vmatprep.subr.bf16.mxu0 %v22043_v62  ;;  %v22063_v12 = vld [vmem:[#allocation7 + $0x638] ss:$28 sps:$4 sm:$0xff]  }
 0x4c3   : > { %20145 = vmatprep.subr.bf16.mxu1 %v22044_v48  ;;  %v22064_v62 = vld [vmem:[#allocation7 + $0x9b8] ss:$28 sps:$4 sm:$0xff]   ;;  %v22068_v48 = vld [vmem:[#allocation7 + $0x980] ss:$28 sps:$4 sm:$0xff]  }
 0x4c5   : > { %8491 = vmatpush2.bf16.msra.mxu0 %v22041_v63  ;;  %v22065_v63 = vld [vmem:[#allocation7 + $0x478] ss:$28 sps:$4 sm:$0xff]  }
 0x4c6   : > { %20146 = vmatpush3.bf16.msra.mxu1 %v22045_v40  ;;  %8492 = vmatprep.subr.bf16.mxu0 %v22048_v18  ;;  %v22070_v40 = vld [vmem:[#allocation7 + $0x7c0] ss:$28 sps:$4 sm:$0xff]   ;;  %v22071_v18 = vld [vmem:[#allocation7 + $0x5c8] ss:$28 sps:$4 sm:$0xff]  }
 0x4c7   : > { %20147 = vmatprep.subr.bf16.mxu1 %v22049_v10  ;;  %v22073_v10 = vld [vmem:[#allocation7 + $0x408] ss:$28 sps:$4 sm:$0xff]  }
 0x4c9   : > { %8493 = vmatpush2.bf16.msra.mxu0 %v22046_v57  ;;  %v22072_v57 = vld [vmem:[#allocation7 + $0x948] ss:$28 sps:$4 sm:$0xff]  }
 0x4ca   : > { %20148 = vmatpush3.bf16.msra.mxu1 %v22050_v45  ;;  %20155 = vmatprep.subr.bf16.mxu0 %v22051_v0  ;;  %v22074_v45 = vld [vmem:[#allocation7 + $0x788] ss:$28 sps:$4 sm:$0xff]   ;;  %v22075_v0 = vld [vmem:[#allocation7 + $0x590] ss:$28 sps:$4 sm:$0xff]  }
 0x4cb   : > { %20177 = vmatprep.subr.bf16.mxu1 %v22052_v7  ;;  %v22076_v7 = vld [vmem:[#allocation7 + $0x910] ss:$28 sps:$4 sm:$0xff]  }
 0x4cc   : > { %8495 = vmatmul.mubr.bf16.vlgmr.msra.gmra.mxu0 %v24183_v56 }
 0x4cd   : > { %8581 = vmatmul.mubr.bf16.vlgmr.msra.gmra.mxu1 %v24015_v36  ;;  %20156 = vmatpush3.bf16.msra.mxu0 %v22053_v43  ;;  %v22066_v36 = vld [vmem:[#allocation7 + $0x7f8] ss:$28 sps:$4 sm:$0xff]   ;;  %v22077_v43 = vld [vmem:[#allocation7 + $0x3d0] ss:$28 sps:$4 sm:$0xff]  }
 0x4ce   : > { %8621 = vmatprep.mubr.bf16.mxu0 %v24013_v33  ;;  %20178 = vmatpush3.bf16.msra.mxu1 %v22054_v52  ;;  %v22067_v33 = vld [vmem:[#allocation7 + $0x600] ss:$28 sps:$4 sm:$0xff]   ;;  %v22078_v52 = vld [vmem:[#allocation7 + $0x750] ss:$28 sps:$4 sm:$0xff]  }
 0x4cf   : > { %8662 = vmatprep.mubr.bf16.mxu1 %v24063_v42  ;;  %20157 = vmatprep.subr.bf16.mxu0 %v22055_v58  ;;  %v22069_v42 = vld [vmem:[#allocation7 + $0x440] ss:$28 sps:$4 sm:$0xff]   ;;  %v22079_v58 = vld [vmem:[#allocation7 + $0x558] ss:$28 sps:$4 sm:$0xff]  }
 0x4d0   : > { %20179 = vmatprep.subr.bf16.mxu1 %v22056_v50  ;;  %v22080_v50 = vld [vmem:[#allocation7 + $0x8d8] ss:$28 sps:$4 sm:$0xff]  }
 0x4d1   : > { %20158 = vmatpush3.bf16.msra.mxu0 %v22057_v23  ;;  %v7600_v23 = vadd.f32 %v24199_v44, %v24197_v6  ;;  %v22086_v6 = vld [vmem:[#allocation7 + $0xfa0] ss:$28 sps:$4 sm:$0xff]  }
 0x4d2   : > { %20180 = vmatpush3.bf16.msra.mxu1 %v22058_v28  ;;  %20159 = vmatprep.subr.bf16.mxu0 %v22059_v46  ;;  %v22081_v28 = vld [vmem:[#allocation7 + $0x398] ss:$28 sps:$4 sm:$0xff]  }
 0x4d3   : > { %20181 = vmatprep.subr.bf16.mxu1 %v22060_v13  ;;  %v22082_v46 = vld [vmem:[#allocation7 + $0x718] ss:$28 sps:$4 sm:$0xff]   ;;  %v22083_v13 = vld [vmem:[#allocation7 + $0xde0] ss:$28 sps:$4 sm:$0xff]  }
 0x4d5   : > { %20160 = vmatpush3.bf16.msra.mxu0 %v22061_v25  ;;  %v7596_v25 = vadd.f32 %v24191_v5, %v24189_v2 }
 0x4d6   : > { %20182 = vmatpush3.bf16.msra.mxu1 %v22062_v29  ;;  %20161 = vmatprep.subr.bf16.mxu0 %v22063_v12  ;;  %v7643_v29 = vadd.f32 %v24215_v38, %v7600_v23  ;;  %v22084_v12 = vld [vmem:[#allocation7 + $0x1160] ss:$28 sps:$4 sm:$0xff]   ;;  %v22090_v38 = vld [vmem:[#allocation7 + $0xf68] ss:$28 sps:$4 sm:$0xff]  }
 0x4d7   : > { %20183 = vmatprep.subr.bf16.mxu1 %v22064_v62  ;;  %v7639_v62 = vadd.f32 %v24204_v54, %v7596_v25  ;;  %v22089_v54 = vld [vmem:[#allocation7 + $0xbe8] ss:$28 sps:$4 sm:$0xff]   ;;  %v22110_v25 = vld [vmem:[#allocation7 + $0xe50] ss:$28 sps:$4 sm:$0xff]  }
 0x4d8   : > { %v7686_v44 = vadd.f32 %v24217_v35, %v7643_v29  ;;  %v22106_v23 = vld [vmem:[#allocation7 + $0xe88] ss:$28 sps:$4 sm:$0xff]   ;;  %v22111_v29 = vld [vmem:[#allocation7 + $0xc58] ss:$28 sps:$4 sm:$0xff]  }
 0x4d9   : > { %20162 = vmatpush3.bf16.msra.mxu0 %v22065_v63  ;;  %v22085_v63 = vld [vmem:[#allocation7 + $0xc20] ss:$28 sps:$4 sm:$0xff]   ;;  %v7682_v2 = vadd.f32 %v24208_v39, %v7639_v62  ;;  %v22112_v62 = vld [vmem:[#allocation7 + $0xfd8] ss:$28 sps:$4 sm:$0xff]  }
 0x4da   : > { %20184 = vmatpush3.bf16.msra.mxu1 %v22066_v36  ;;  %20163 = vmatprep.subr.bf16.mxu0 %v22067_v33  ;;  %v22087_v36 = vld [vmem:[#allocation7 + $0xda8] ss:$28 sps:$4 sm:$0xff]   ;;  %v7729_v5 = vadd.f32 %v24237_v51, %v7686_v44  ;;  %v22095_v51 = vld [vmem:[#allocation7 + $0xd38] ss:$28 sps:$4 sm:$0xff]   ;;  %v22115_v44 = vld [vmem:[#allocation7 + $0x14e0] ss:$28 sps:$4 sm:$0xff]  }
 0x4db   : > { %20185 = vmatprep.subr.bf16.mxu1 %v22068_v48  ;;  %v22088_v33 = vld [vmem:[#allocation7 + $0x1128] ss:$28 sps:$4 sm:$0xff]   ;;  %v22091_v48 = vld [vmem:[#allocation7 + $0xd70] ss:$28 sps:$4 sm:$0xff]   ;;  %v7725_v35 = vadd.f32 %v24222_v53, %v7682_v2  ;;  %v7944_v2 = vadd.f32 %v24286_v1, %v24272_v20 }
 0x4dc   : > { %v7772_v39 = vadd.f32 %v24235_v49, %v7729_v5  ;;  %v22098_v49 = vld [vmem:[#allocation7 + $0xef8] ss:$28 sps:$4 sm:$0xff]   ;;  %v22117_v5 = vld [vmem:[#allocation7 + $0x1320] ss:$28 sps:$4 sm:$0xff]   ;;  %v22120_v20 = vld [vmem:[#allocation7 + $0x1828] ss:$28 sps:$4 sm:$0xff]  }
 0x4dd   : > { %20164 = vmatpush3.bf16.msra.mxu0 %v22069_v42  ;;  %v8899_v42 = vcombine.high %v24233_v30, %v24233_v30  ;;  %v22121_v1 = vld [vmem:[#allocation7 + $0x12e8] ss:$28 sps:$4 sm:$0xff]  }
 0x4de   : > { %20186 = vmatpush3.bf16.msra.mxu1 %v22070_v40  ;;  %20165 = vmatprep.subr.bf16.mxu0 %v22071_v18  ;;  %v7768_v40 = vadd.f32 %v24226_v55, %v7725_v35  ;;  %v7815_v53 = vadd.f32 %v24262_v31, %v7772_v39  ;;  %v22100_v31 = vld [vmem:[#allocation7 + $0x1080] ss:$28 sps:$4 sm:$0xff]   ;;  %v22119_v35 = vld [vmem:[#allocation7 + $0x14a8] ss:$28 sps:$4 sm:$0xff]  }
 0x4df   : > { %20187 = vmatprep.subr.bf16.mxu1 %v22072_v57  ;;  %v24365_v18 = vrot.slane %v8899_v42, %v23974_v8  ;;  %v22097_v57 = vld [vmem:[#allocation7 + $0xb78] ss:$28 sps:$4 sm:$0xff]  }
 0x4e0   : > { %v7811_v30 = vadd.f32 %v24248_v11, %v7768_v40  ;;  %v22102_v11 = vld [vmem:[#allocation7 + $0xec0] ss:$28 sps:$4 sm:$0xff]   ;;  %v24992_v40 = vld [vmem:[#allocation43_spill] sm:$0xff] }
 0x4e1   : > { %20166 = vmatpush3.bf16.msra.mxu0 %v22073_v10  ;;  %v22099_v10 = vld [vmem:[#allocation7 + $0xd00] ss:$28 sps:$4 sm:$0xff]   ;;  %v8940_v55 = vpack.i.b16 %v24365_v18, %v24365_v18 }
 0x4e2   : > { %20188 = vmatpush3.bf16.msra.mxu1 %v22074_v45  ;;  %20167 = vmatprep.subr.bf16.mxu0 %v22075_v0  ;;  %v7858_v45 = vadd.f32 %v24260_v14, %v7815_v53  ;;  %v7854_v0 = vadd.f32 %v24246_v16, %v7811_v30  ;;  %v22105_v14 = vld [vmem:[#allocation7 + $0xb08] ss:$28 sps:$4 sm:$0xff]   ;;  %v22108_v16 = vld [vmem:[#allocation7 + $0x1010] ss:$28 sps:$4 sm:$0xff]  }
 0x4e3   : > { %20189 = vmatprep.subr.bf16.mxu1 %v22076_v7  ;;  %v22101_v7 = vld [vmem:[#allocation7 + $0xb40] ss:$28 sps:$4 sm:$0xff]  }
 0x4e5   : > { %20168 = vmatpush3.bf16.msra.mxu0 %v22077_v43  ;;  %v22103_v43 = vld [vmem:[#allocation7 + $0xcc8] ss:$28 sps:$4 sm:$0xff]  }
 0x4e6   : > { %20190 = vmatpush3.bf16.msra.mxu1 %v22078_v52  ;;  %20169 = vmatprep.subr.bf16.mxu0 %v22079_v58  ;;  %v8877_v52 = vpack.c.bf16 %v7858_v45, %v7854_v0  ;;  %v8945_v58 = vrot.slane %v8940_v55, %v23979_v34  ;;  %v22129_v0 = vld [vmem:[#allocation7 + $0x1278] ss:$28 sps:$4 sm:$0xff]  }
 0x4e7   : > { %20191 = vmatprep.subr.bf16.mxu1 %v22080_v50  ;;  %v22104_v50 = vld [vmem:[#allocation7 + $0x1048] ss:$28 sps:$4 sm:$0xff]  }
 0x4e9   : > { %20170 = vmatpush3.bf16.msra.mxu0 %v22081_v28  ;;  %v22107_v28 = vld [vmem:[#allocation7 + $0xc90] ss:$28 sps:$4 sm:$0xff]  }
 0x4ea   : > { %20192 = vmatpush3.bf16.msra.mxu1 %v22082_v46  ;;  %20199 = vmatprep.subr.bf16.mxu0 %v22083_v13  ;;  %v24373_v46 = vadd.bf16 %v8945_v58, %v8877_v52  ;;  %v22109_v13 = vld [vmem:[#allocation7 + $0xad0] ss:$28 sps:$4 sm:$0xff]   ;;  %v22131_v52 = vld [vmem:[#allocation7 + $0x1400] ss:$28 sps:$4 sm:$0xff]  }
 0x4eb   : > { %20221 = vmatprep.subr.bf16.mxu1 %v22084_v12 }
 0x4ec   : > { %8622 = vmatmul.mubr.bf16.vlgmr.msra.gmra.mxu0 %v24018_v37  ;;  %v22092_v37 = vld [vmem:[#allocation7 + $0x10f0] ss:$28 sps:$4 sm:$0xff]   ;;  %v8996_v12 = vmul.bf16 %v24373_v46, %v24373_v46 }
 0x4ed   : > { %8663 = vmatmul.mubr.bf16.vlgmr.msra.gmra.mxu1 %v24100_v61  ;;  %20200 = vmatpush3.bf16.msra.mxu0 %v22085_v63  ;;  %v22093_v61 = vld [vmem:[#allocation7 + $0xbb0] ss:$28 sps:$4 sm:$0xff]   ;;  %v22113_v63 = vld [vmem:[#allocation7 + $0xa98] ss:$28 sps:$4 sm:$0xff]  }
 0x4ee   : > { %8703 = vmatprep.mubr.bf16.mxu0 %v24066_v15  ;;  %20222 = vmatpush3.bf16.msra.mxu1 %v22086_v6  ;;  %v22094_v15 = vld [vmem:[#allocation7 + $0xf30] ss:$28 sps:$4 sm:$0xff]   ;;  %v22114_v6 = vld [vmem:[#allocation7 + $0xe18] ss:$28 sps:$4 sm:$0xff]  }
 0x4ef   : > { %8744 = vmatprep.mubr.bf16.mxu1 %v24107_v47  ;;  %20201 = vmatprep.subr.bf16.mxu0 %v22087_v36  ;;  %v22096_v47 = vld [vmem:[#allocation7 + $0x10b8] ss:$28 sps:$4 sm:$0xff]   ;;  %v9003_v36 = vmul.bf16 %v8996_v12, %v24373_v46  ;;  %v22139_v12 = vld [vmem:[#allocation7 + $0x1390] ss:$28 sps:$4 sm:$0xff]  }
 0x4f0   : > { %20223 = vmatprep.subr.bf16.mxu1 %v22088_v33  ;;  %v22116_v33 = vld [vmem:[#allocation7 + $0x1860] ss:$28 sps:$4 sm:$0xff]  }
 0x4f1   : > { %20202 = vmatpush3.bf16.msra.mxu0 %v22089_v54  ;;  %v7940_v54 = vadd.f32 %v24268_v59, %v24264_v32  ;;  %v9010_v42 = vmul.bf16 1027030327, %v9003_v36  ;;  %v22144_v36 = vld [vmem:[#allocation7 + $0x16d8] ss:$28 sps:$4 sm:$0xff]  }
 0x4f2   : > { %20224 = vmatpush3.bf16.msra.mxu1 %v22090_v38  ;;  %20203 = vmatprep.subr.bf16.mxu0 %v22091_v48  ;;  %v7987_v38 = vadd.f32 %v24296_v60, %v7944_v2  ;;  %v22118_v48 = vld [vmem:[#allocation7 + $0x16a0] ss:$28 sps:$4 sm:$0xff]   ;;  %v9111_v2 = vld [vmem:[#allocation10 + $0x1e0] sm:$0xff] }
 0x4f3   : > { %20225 = vmatprep.subr.bf16.mxu1 %v22092_v37  ;;  %v7983_v37 = vadd.f32 %v24281_v27, %v7940_v54  ;;  %v24990_v60 = vld [vmem:[#allocation38_spill] sm:$0xff]  ;;  %v22124_v27 = vld [vmem:[#allocation7 + $0x17f0] ss:$28 sps:$4 sm:$0xff]   ;;  %v22145_v54 = vld [vmem:[#allocation7 + $0x1198] ss:$28 sps:$4 sm:$0xff]  }
 0x4f4   : > { %v8030_v39 = vadd.f32 %v24310_v4, %v7987_v38  ;;  %v24991_v4 = vld [vmem:[#allocation41_spill] sm:$0xff] }
 0x4f5   : > { %20204 = vmatpush3.bf16.msra.mxu0 %v22093_v61  ;;  %v8026_v32 = vadd.f32 %v24291_v9, %v7983_v37  ;;  %v22122_v61 = vld [vmem:[#allocation7 + $0x1668] ss:$28 sps:$4 sm:$0xff]   ;;  %v22125_v9 = vld [vmem:[#allocation7 + $0x12b0] ss:$28 sps:$4 sm:$0xff]  }
 0x4f6   : > { %20226 = vmatpush3.bf16.msra.mxu1 %v22094_v15  ;;  %20205 = vmatprep.subr.bf16.mxu0 %v22095_v51  ;;  %v8073_v59 = vadd.f32 %v24322_v26, %v8030_v39  ;;  %v22123_v15 = vld [vmem:[#allocation7 + $0x1470] ss:$28 sps:$4 sm:$0xff]   ;;  %v8158_v51 = vpop.f32.mrf.mxu1  ;;  %v24993_v26 = vld [vmem:[#allocation42_spill] sm:$0xff] }
 0x4f7   : > { %20227 = vmatprep.subr.bf16.mxu1 %v22096_v47  ;;  %v9099_v37 = vld [vmem:[#allocation10 + $0x180] sm:$0xff] }
 0x4f8   : > { %v8116_v53 = vadd.f32 %v24992_v40, %v8073_v59  ;;  %v9103_v39 = vld [vmem:[#allocation10 + $0x1a0] sm:$0xff] }
 0x4f9   : > { %20206 = vmatpush3.bf16.msra.mxu0 %v22097_v57  ;;  %v8931_v57 = vcombine.high %v24365_v18, %v24365_v18  ;;  %v22132_v18 = vld [vmem:[#allocation7 + $0x1780] ss:$28 sps:$4 sm:$0xff]   ;;  %v19127_v40 = vcombine.low %v9099_v37, %v9103_v39 }
 0x4fa   : > { %20228 = vmatpush3.bf16.msra.mxu1 %v22098_v49  ;;  %20207 = vmatprep.subr.bf16.mxu0 %v22099_v10  ;;  %v8159_v30 = vadd.f32 %v8158_v51, %v8116_v53  ;;  %v22127_v49 = vld [vmem:[#allocation7 + $0x1438] ss:$28 sps:$4 sm:$0xff]   ;;  %v9083_v53 = vld [vmem:[#allocation10 + $0x100] sm:$0xff] }
 0x4fb   : > { %20229 = vmatprep.subr.bf16.mxu1 %v22100_v31  ;;  %v22128_v10 = vld [vmem:[#allocation7 + $0x17b8] ss:$28 sps:$4 sm:$0xff]   ;;  %v8201_v31 = vpop.f32.mrf.mxu0 }
 0x4fd   : > { %20208 = vmatpush3.bf16.msra.mxu0 %v22101_v7  ;;  %v8202_v7 = vadd.f32 %v8201_v31, %v8159_v30  ;;  %v9071_v31 = vld [vmem:[#allocation10 + $0xa0] sm:$0xff] }
 0x4fe   : > { %20230 = vmatpush3.bf16.msra.mxu1 %v22102_v11  ;;  %20209 = vmatprep.subr.bf16.mxu0 %v22103_v43  ;;  %v8954_v11 = vpack.i.b16 %v8931_v57, %v8931_v57  ;;  %v22130_v43 = vld [vmem:[#allocation7 + $0x15f8] ss:$28 sps:$4 sm:$0xff]   ;;  %v9075_v57 = vld [vmem:[#allocation10 + $0xc0] sm:$0xff] }
 0x4ff   : > { %20231 = vmatprep.subr.bf16.mxu1 %v22104_v50  ;;  %v22133_v50 = vld [vmem:[#allocation7 + $0x1240] ss:$28 sps:$4 sm:$0xff]  }
 0x501   : > { %20210 = vmatpush3.bf16.msra.mxu0 %v22105_v14 }
 0x502   : > { %20232 = vmatpush3.bf16.msra.mxu1 %v22106_v23  ;;  %20211 = vmatprep.subr.bf16.mxu0 %v22107_v28  ;;  %v8959_v23 = vrot.slane %v8954_v11, %v23979_v34  ;;  %v22135_v28 = vld [vmem:[#allocation7 + $0x13c8] ss:$28 sps:$4 sm:$0xff]  }
 0x503   : > { %20233 = vmatprep.subr.bf16.mxu1 %v22108_v16  ;;  %v22136_v16 = vld [vmem:[#allocation7 + $0x1748] ss:$28 sps:$4 sm:$0xff]  }
 0x505   : > { %20212 = vmatpush3.bf16.msra.mxu0 %v22109_v13  ;;  %v22137_v13 = vld [vmem:[#allocation7 + $0x1208] ss:$28 sps:$4 sm:$0xff]  }
 0x506   : > { %20234 = vmatpush3.bf16.msra.mxu1 %v22110_v25  ;;  %20213 = vmatprep.subr.bf16.mxu0 %v22111_v29  ;;  %v22138_v29 = vld [vmem:[#allocation7 + $0x1588] ss:$28 sps:$4 sm:$0xff]  }
 0x507   : > { %20235 = vmatprep.subr.bf16.mxu1 %v22112_v62  ;;  %v22141_v62 = vld [vmem:[#allocation7 + $0x11d0] ss:$28 sps:$4 sm:$0xff]  }
 0x509   : > { %20214 = vmatpush3.bf16.msra.mxu0 %v22113_v63 }
 0x50a   : > { %20236 = vmatpush3.bf16.msra.mxu1 %v22114_v6  ;;  %20243 = vmatprep.subr.bf16.mxu0 %v22115_v44  ;;  %v22142_v6 = vld [vmem:[#allocation7 + $0x1550] ss:$28 sps:$4 sm:$0xff]   ;;  %v22143_v44 = vld [vmem:[#allocation7 + $0x1358] ss:$28 sps:$4 sm:$0xff]  }
 0x50b   : > { %20265 = vmatprep.subr.bf16.mxu1 %v22116_v33  ;;  %v9107_v33 = vld [vmem:[#allocation10 + $0x1c0] sm:$0xff] }
 0x50c   : > { %8704 = vmatmul.mubr.bf16.vlgmr.msra.gmra.mxu0 %v24105_v24  ;;  %v9017_v24 = vadd.bf16 %v9010_v42, %v24373_v46  ;;  %v19135_v59 = vcombine.low %v9107_v33, %v9111_v2 }
 0x50d   : > { %8745 = vmatmul.mubr.bf16.vlgmr.msra.gmra.mxu1 %v24155_v17  ;;  %20244 = vmatpush3.bf16.msra.mxu0 %v22117_v5  ;;  %v8069_v17 = vadd.f32 %v24991_v4, %v8026_v32  ;;  %v24994_v32 = vmov 0.0   ;;  %v22148_v4 = vld [vmem:[#allocation7 + $0x19e8] ss:$28 sps:$4 sm:$0xff]  }
 0x50e   : > { %8785 = vmatprep.mubr.bf16.mxu0 %v24990_v60  ;;  %20266 = vmatpush3.bf16.msra.mxu1 %v22118_v48  ;;  %v9024_v45 = vmul.bf16 1061961548, %v9017_v24  ;;  %v22146_v48 = vld [vmem:[#allocation7 + $0x1518] ss:$28 sps:$4 sm:$0xff]   ;;  %v8989_v60 = vmul.bf16 1056980736, %v24373_v46 }
 0x50f   : > { %8826 = vmatprep.mubr.bf16.mxu1 %v24159_v21  ;;  %20245 = vmatprep.subr.bf16.mxu0 %v22119_v35  ;;  %v8112_v47 = vadd.f32 %v24993_v26, %v8069_v17  ;;  %v22126_v21 = vld [vmem:[#allocation7 + $0x1630] ss:$28 sps:$4 sm:$0xff]   ;;  %v19136_v35 = vcombine.high %v9107_v33, %v9111_v2 }
 0x510   : > { %20267 = vmatprep.subr.bf16.mxu1 %v22120_v20  ;;  %23004 = vtanh.bf16 %v9024_v45  ;;  %v22147_v20 = vld [vmem:[#allocation7 + $0x1a20] ss:$28 sps:$4 sm:$0xff]   ;;  %v9095_v24 = vld [vmem:[#allocation10 + $0x160] sm:$0xff] }
 0x511   : > { %20246 = vmatpush3.bf16.msra.mxu0 %v22121_v1  ;;  %v8155_v55 = vadd.f32 %v24330_v22, %v8112_v47  ;;  %v22134_v22 = vld [vmem:[#allocation7 + $0x15c0] ss:$28 sps:$4 sm:$0xff]   ;;  %v22149_v26 = vld [vmem:[#allocation7 + $0x19b0] ss:$28 sps:$4 sm:$0xff]  }
 0x512   : > { %20268 = vmatpush3.bf16.msra.mxu1 %v22122_v61  ;;  %20247 = vmatprep.subr.bf16.mxu0 %v22123_v15  ;;  %v19128_v61 = vcombine.high %v9099_v37, %v9103_v39  ;;  %v24995_v15 = vld [vmem:[#allocation39_spill] sm:$0xff] }
 0x513   : > { %20269 = vmatprep.subr.bf16.mxu1 %v22124_v27  ;;  %v8198_v58 = vadd.f32 %v24332_v3, %v8155_v55  ;;  %v22140_v3 = vld [vmem:[#allocation7 + $0x1710] ss:$28 sps:$4 sm:$0xff]  }
 0x514   : > { %v9091_v27 = vld [vmem:[#allocation10 + $0x140] sm:$0xff] }
 0x515   : > { %20248 = vmatpush3.bf16.msra.mxu0 %v22125_v9  ;;  %v8879_v14 = vpack.c.bf16 %v8202_v7, %v8198_v58  ;;  %v19120_v46 = vcombine.high %v9091_v27, %v9095_v24  ;;  %v9087_v9 = vld [vmem:[#allocation10 + $0x120] sm:$0xff] }
 0x516   : > { %20270 = vmatpush3.bf16.msra.mxu1 %v22126_v21  ;;  %20249 = vmatprep.subr.bf16.mxu0 %v22127_v49  ;;  %v19112_v30 = vcombine.high %v9083_v53, %v9087_v9  ;;  %v9079_v21 = vld [vmem:[#allocation10 + $0xe0] sm:$0xff]  ;;  %v22150_v49 = vld [vmem:[#allocation7 + $0x1978] ss:$28 sps:$4 sm:$0xff]  }
 0x517   : > { %20271 = vmatprep.subr.bf16.mxu1 %v22128_v10  ;;  %v24400_v25 = vadd.bf16 %v8959_v23, %v8879_v14  ;;  %v19111_v10 = vcombine.low %v9083_v53, %v9087_v9  ;;  %v19104_v45 = vcombine.high %v9075_v57, %v9079_v21  ;;  %v9067_v55 = vld [vmem:[#allocation10 + $0x80] sm:$0xff]  ;;  %v19103_v7 = vcombine.low %v9075_v57, %v9079_v21 }
 0x518   : > { %v19096_v11 = vcombine.high %v9067_v55, %v9071_v31  ;;  %v19095_v58 = vcombine.low %v9067_v55, %v9071_v31  ;;  %v9051_v14 = vld [vmem:[#allocation10] sm:$0xff] }
 0x519   : > { %20250 = vmatpush3.bf16.msra.mxu0 %v22129_v0  ;;  %v8998_v63 = vmul.bf16 %v24400_v25, %v24400_v25  ;;  %v22151_v0 = vld [vmem:[#allocation7 + $0x1940] ss:$28 sps:$4 sm:$0xff]   ;;  %v9055_v23 = vld [vmem:[#allocation10 + $0x20] sm:$0xff]  ;;  %v8991_v39 = vmul.bf16 1056980736, %v24400_v25 }
 0x51a   : > { %20272 = vmatpush3.bf16.msra.mxu1 %v22130_v43  ;;  %20251 = vmatprep.subr.bf16.mxu0 %v22131_v52  ;;  %v9059_v43 = vld [vmem:[#allocation10 + $0x40] sm:$0xff]  ;;  %v19079_v33 = vcombine.low %v9051_v14, %v9055_v23 }
 0x51b   : > { %20273 = vmatprep.subr.bf16.mxu1 %v22132_v18  ;;  %v9005_v38 = vmul.bf16 %v8998_v63, %v24400_v25  ;;  %v9063_v52 = vld [vmem:[#allocation10 + $0x60] sm:$0xff] }
 0x51c   : > { %v22152_v18 = vld [vmem:[#allocation7 + $0x1908] ss:$28 sps:$4 sm:$0xff]  }
 0x51d   : > { %20252 = vmatpush3.bf16.msra.mxu0 %v22133_v50  ;;  %v9012_v1 = vmul.bf16 1027030327, %v9005_v38  ;;  %v19088_v50 = vcombine.high %v9059_v43, %v9063_v52  ;;  %v9171_v63 = vld [vmem:[#allocation10 + $0x3c0] sm:$0xff] }
 0x51e   : > { %20274 = vmatpush3.bf16.msra.mxu1 %v22134_v22  ;;  %20253 = vmatprep.subr.bf16.mxu0 %v22135_v28  ;;  %v23005_v5 = vpop.eup %23004  ;;  %v22153_v22 = vld [vmem:[#allocation7 + $0x18d0] ss:$28 sps:$4 sm:$0xff]  }
 0x51f   : > { %20275 = vmatprep.subr.bf16.mxu1 %v22136_v16  ;;  %v9038_v42 = vadd.bf16 1065369472, %v23005_v5  ;;  %v9019_v17 = vadd.bf16 %v9012_v1, %v24400_v25  ;;  %v24996_v28 = vld [vmem:[#allocation40_spill] sm:$0xff]  ;;  %v9227_v38 = vld [vmem:[#allocation10 + $0x580] sm:$0xff] }
 0x520   : > { %v8995_v16 = vmul.bf16 %v24996_v28, %v24996_v28  ;;  %v9211_v9 = vld [vmem:[#allocation10 + $0x500] sm:$0xff] }
 0x521   : > { %20254 = vmatpush3.bf16.msra.mxu0 %v22137_v13  ;;  %v24408_v51 = vmul.bf16 %v9038_v42, %v8989_v60  ;;  %v9026_v47 = vmul.bf16 1061961548, %v9019_v17  ;;  %v19087_v13 = vcombine.low %v9059_v43, %v9063_v52  ;;  %v9167_v42 = vld [vmem:[#allocation10 + $0x3a0] sm:$0xff] }
 0x522   : > { %20276 = vmatpush3.bf16.msra.mxu1 %v22138_v29  ;;  %20255 = vmatprep.subr.bf16.mxu0 %v22139_v12  ;;  %v19080_v29 = vcombine.high %v9051_v14, %v9055_v23  ;;  %v9235_v12 = vld [vmem:[#allocation10 + $0x5c0] sm:$0xff] }
 0x523   : > { %20277 = vmatprep.subr.bf16.mxu1 %v22140_v3  ;;  %23006 = vtanh.bf16 %v9026_v47  ;;  %v9239_v3 = vld [vmem:[#allocation10 + $0x5e0] sm:$0xff] }
 0x524   : > { %v19264_v2 = vcombine.high %v9235_v12, %v9239_v3  ;;  %v19263_v37 = vcombine.low %v9235_v12, %v9239_v3  ;;  %v9151_v47 = vld [vmem:[#allocation10 + $0x320] sm:$0xff] }
 0x525   : > { %20256 = vmatpush3.bf16.msra.mxu0 %v22141_v62  ;;  %v9139_v55 = vld [vmem:[#allocation10 + $0x2c0] sm:$0xff] }
 0x526   : > { %20278 = vmatpush3.bf16.msra.mxu1 %v22142_v6  ;;  %20257 = vmatprep.subr.bf16.mxu0 %v22143_v44  ;;  %v9175_v6 = vld [vmem:[#allocation10 + $0x3e0] sm:$0xff]  ;;  %v22154_v44 = vld [vmem:[#allocation7 + $0x1898] ss:$28 sps:$4 sm:$0xff]  }
 0x527   : > { %20279 = vmatprep.subr.bf16.mxu1 %v22144_v36  ;;  %v9002_v36 = vmul.bf16 %v8995_v16, %v24996_v28  ;;  %v19200_v5 = vcombine.high %v9171_v63, %v9175_v6  ;;  %v19199_v1 = vcombine.low %v9171_v63, %v9175_v6  ;;  %v9143_v31 = vld [vmem:[#allocation10 + $0x2e0] sm:$0xff]  ;;  %v24431_v63 = vpop.f32.mrf.mxu1 }
 0x528   : > { %v19168_v43 = vcombine.high %v9139_v55, %v9143_v31  ;;  %v9195_v52 = vld [vmem:[#allocation10 + $0x480] sm:$0xff]  ;;  %v19167_v23 = vcombine.low %v9139_v55, %v9143_v31 }
 0x529   : > { %20258 = vmatpush3.bf16.msra.mxu0 %v22145_v54  ;;  %v9123_v12 = vld [vmem:[#allocation10 + $0x240] sm:$0xff] }
 0x52a   : > { %20280 = vmatpush3.bf16.msra.mxu1 %v22146_v48  ;;  %20510 = vmatprep.subr.bf16.mxu0 %v24994_v32  ;;  %v9231_v48 = vld [vmem:[#allocation10 + $0x5a0] sm:$0xff] }
 0x52b   : > { %11740 = vmatprep.subr.bf16.mxu1 %v19136_v35  ;;  %v9163_v35 = vld [vmem:[#allocation10 + $0x380] sm:$0xff]  ;;  %v19255_v17 = vcombine.low %v9227_v38, %v9231_v48 }
 0x52c   : > { %8786 = vmatmul.mubr.bf16.vlgmr.msra.gmra.mxu0 %v24995_v15  ;;  %v9219_v15 = vld [vmem:[#allocation10 + $0x540] sm:$0xff]  ;;  %v19191_v25 = vcombine.low %v9163_v35, %v9167_v42 }
 0x52d   : > { %8827 = vmatmul.mubr.bf16.vlgmr.msra.gmra.mxu1 %v24183_v56  ;;  %20511 = vmatpush3.bf16.msra.mxu0 %v22147_v20  ;;  %v19119_v56 = vcombine.low %v9091_v27, %v9095_v24  ;;  %v9009_v20 = vmul.bf16 1027030327, %v9002_v36  ;;  %v9223_v27 = vld [vmem:[#allocation10 + $0x560] sm:$0xff] }
 0x52e   : > { %11741 = vmatpush1.bf16.msra.mxu1 %v19135_v59  ;;  %11772 = vmatprep.mubr.bf16.mxu1 %v24408_v51  ;;  %v19256_v59 = vcombine.high %v9227_v38, %v9231_v48  ;;  %v9155_v24 = vld [vmem:[#allocation10 + $0x340] sm:$0xff]  ;;  %v8997_v38 = vmul.bf16 %v24337_v19, %v24337_v19 }
 0x52f   : > { %20512 = vmatprep.subr.bf16.mxu0 %v24994_v32  ;;  %11742 = vmatprep.subr.bf16.mxu1 %v19128_v61  ;;  %v19192_v61 = vcombine.high %v9163_v35, %v9167_v42  ;;  %v9127_v3 = vld [vmem:[#allocation10 + $0x260] sm:$0xff]  ;;  %v24435_v35 = vpop.f32.mrf.mxu0  ;;  %v24437_v42 = vpop.f32.mrf.mxu1 }
 0x530   : > { %20526 = vmatprep.mubr.msk.bf16.mxu0 %vm23582_vm0, %v24994_v32  ;;  %v19152_v36 = vcombine.high %v9123_v12, %v9127_v3 }
 0x531   : > { %20513 = vmatpush3.bf16.msra.mxu0 %v22148_v4  ;;  %v23007_v62 = vpop.eup %23006  ;;  %v9159_v4 = vld [vmem:[#allocation10 + $0x360] sm:$0xff] }
 0x532   : > { %11743 = vmatpush1.bf16.msra.mxu1 %v19127_v40  ;;  %20514 = vmatprep.subr.bf16.mxu0 %v24994_v32  ;;  %v9040_v54 = vadd.bf16 1065369472, %v23007_v62  ;;  %v19248_v40 = vcombine.high %v9219_v15, %v9223_v27  ;;  %v19184_v53 = vcombine.high %v9155_v24, %v9159_v4 }
 0x533   : > { %11744 = vmatprep.subr.bf16.mxu1 %v19120_v46  ;;  %v9016_v46 = vadd.bf16 %v9009_v20, %v24996_v28 }
 0x534   : > { %v24426_v60 = vmul.bf16 %v9040_v54, %v8991_v39  ;;  %v9119_v54 = vld [vmem:[#allocation10 + $0x220] sm:$0xff] }
 0x535   : > { %20515 = vmatpush3.bf16.msra.mxu0 %v22149_v26  ;;  %v9215_v26 = vld [vmem:[#allocation10 + $0x520] sm:$0xff]  ;;  %v9023_v21 = vmul.bf16 1061961548, %v9016_v46 }
 0x536   : > { %11745 = vmatpush1.bf16.msra.mxu1 %v19119_v56  ;;  %20516 = vmatprep.subr.bf16.mxu0 %v24994_v32  ;;  %v9147_v56 = vld [vmem:[#allocation10 + $0x300] sm:$0xff]  ;;  %v19240_v57 = vcombine.high %v9211_v9, %v9215_v26 }
 0x537   : > { %11746 = vmatprep.subr.bf16.mxu1 %v19112_v30  ;;  %v19183_v30 = vcombine.low %v9155_v24, %v9159_v4  ;;  %23008 = vtanh.bf16 %v9023_v21  ;;  %v9004_v24 = vmul.bf16 %v8997_v38, %v24337_v19 }
 0x539   : > { %20517 = vmatpush3.bf16.msra.mxu0 %v22150_v49  ;;  %v19176_v49 = vcombine.high %v9147_v56, %v9151_v47 }
 0x53a   : > { %11747 = vmatpush1.bf16.msra.mxu1 %v19111_v10  ;;  %20518 = vmatprep.subr.bf16.mxu0 %v24994_v32  ;;  %v9203_v10 = vld [vmem:[#allocation10 + $0x4c0] sm:$0xff] }
 0x53b   : > { %11748 = vmatprep.subr.bf16.mxu1 %v19104_v45  ;;  %v9207_v45 = vld [vmem:[#allocation10 + $0x4e0] sm:$0xff] }
 0x53c   : > { %v19231_v14 = vcombine.low %v9203_v10, %v9207_v45 }
 0x53d   : > { %20519 = vmatpush3.bf16.msra.mxu0 %v22151_v0  ;;  %v19239_v0 = vcombine.low %v9211_v9, %v9215_v26  ;;  %v9291_v9 = vld [vmem:[#allocation10 + $0x780] sm:$0xff] }
 0x53e   : > { %11749 = vmatpush1.bf16.msra.mxu1 %v19103_v7  ;;  %20520 = vmatprep.subr.bf16.mxu0 %v24994_v32  ;;  %v19175_v7 = vcombine.low %v9147_v56, %v9151_v47  ;;  %v9295_v26 = vld [vmem:[#allocation10 + $0x7a0] sm:$0xff] }
 0x53f   : > { %11750 = vmatprep.subr.bf16.mxu1 %v19096_v11  ;;  %v19232_v11 = vcombine.high %v9203_v10, %v9207_v45  ;;  %v9355_v47 = vld [vmem:[#allocation10 + $0x980] sm:$0xff]  ;;  %v19320_v45 = vcombine.high %v9291_v9, %v9295_v26 }
 0x541   : > { %20521 = vmatpush3.bf16.msra.mxu0 %v22152_v18  ;;  %v9199_v18 = vld [vmem:[#allocation10 + $0x4a0] sm:$0xff] }
 0x542   : > { %11751 = vmatpush1.bf16.msra.mxu1 %v19095_v58  ;;  %20522 = vmatprep.subr.bf16.mxu0 %v24994_v32  ;;  %v9131_v58 = vld [vmem:[#allocation10 + $0x280] sm:$0xff]  ;;  %v19223_v62 = vcombine.low %v9195_v52, %v9199_v18 }
 0x543   : > { %11752 = vmatprep.subr.bf16.mxu1 %v19088_v50  ;;  %v9135_v50 = vld [vmem:[#allocation10 + $0x2a0] sm:$0xff] }
 0x544   : > { %v19160_v16 = vcombine.high %v9131_v58, %v9135_v50  ;;  %v19159_v6 = vcombine.low %v9131_v58, %v9135_v50  ;;  %v19319_v58 = vcombine.low %v9291_v9, %v9295_v26 }
 0x545   : > { %20523 = vmatpush3.bf16.msra.mxu0 %v22153_v22  ;;  %v19224_v22 = vcombine.high %v9195_v52, %v9199_v18  ;;  %v9347_v52 = vld [vmem:[#allocation10 + $0x940] sm:$0xff] }
 0x546   : > { %11753 = vmatpush1.bf16.msra.mxu1 %v19087_v13  ;;  %20524 = vmatprep.subr.bf16.mxu0 %v24994_v32  ;;  %v9187_v13 = vld [vmem:[#allocation10 + $0x440] sm:$0xff] }
 0x547   : > { %11754 = vmatprep.subr.bf16.mxu1 %v19080_v29  ;;  %v9191_v29 = vld [vmem:[#allocation10 + $0x460] sm:$0xff] }
 0x548   : > { %v19215_v48 = vcombine.low %v9187_v13, %v9191_v29  ;;  %v9351_v18 = vld [vmem:[#allocation10 + $0x960] sm:$0xff] }
 0x549   : > { %20525 = vmatpush3.bf16.msra.mxu0 %v22154_v44  ;;  %v19216_v44 = vcombine.high %v9187_v13, %v9191_v29  ;;  %v19376_v13 = vcombine.high %v9347_v52, %v9351_v18 }
 0x54a   : > { %11755 = vmatpush1.bf16.msra.mxu1 %v19079_v33  ;;  %11783 = vmatprep.subr.bf16.mxu0 %v19264_v2  ;;  %v9179_v33 = vld [vmem:[#allocation10 + $0x400] sm:$0xff] }
 0x54b   : > { %11756 = vmatprep.subr.bf16.mxu1 %v19200_v5  ;;  %v9183_v2 = vld [vmem:[#allocation10 + $0x420] sm:$0xff] }
 0x54c   : > { %20527 = vmatmul.mubr.bf16.vlgmr.msra.gmra.mxu0 %v24177_v41  ;;  %v19247_v41 = vcombine.low %v9219_v15, %v9223_v27  ;;  %v9115_v5 = vld [vmem:[#allocation10 + $0x200] sm:$0xff]  ;;  %v19208_v39 = vcombine.high %v9179_v33, %v9183_v2  ;;  %v19207_v4 = vcombine.low %v9179_v33, %v9183_v2  ;;  %v19375_v33 = vcombine.low %v9347_v52, %v9351_v18 }
 0x54d   : > { %11784 = vmatpush1.bf16.msra.mxu0 %v19263_v37  ;;  %11815 = vmatprep.mubr.bf16.mxu0 %v24426_v60  ;;  %v19151_v37 = vcombine.low %v9123_v12, %v9127_v3  ;;  %v19144_v20 = vcombine.high %v9115_v5, %v9119_v54  ;;  %v9363_v15 = vld [vmem:[#allocation10 + $0x9c0] sm:$0xff] }
 0x54e   : > { %11757 = vmatpush2.bf16.msra.mxu1 %v19199_v1  ;;  %11785 = vmatprep.subr.bf16.mxu0 %v19256_v59  ;;  %v9299_v1 = vld [vmem:[#allocation10 + $0x7c0] sm:$0xff] }
 0x54f   : > { %11758 = vmatprep.subr.bf16.mxu1 %v19192_v61  ;;  %v9303_v59 = vld [vmem:[#allocation10 + $0x7e0] sm:$0xff]  ;;  %v23009_v61 = vpop.eup %23008 }
 0x550   : > { %v9367_v27 = vld [vmem:[#allocation10 + $0x9e0] sm:$0xff]  ;;  %v19328_v46 = vcombine.high %v9299_v1, %v9303_v59  ;;  %v19327_v21 = vcombine.low %v9299_v1, %v9303_v59 }
 0x551   : > { %11786 = vmatpush1.bf16.msra.mxu0 %v19255_v17  ;;  %v24440_v17 = vpop.f32.mrf.mxu0  ;;  %v19392_v56 = vcombine.high %v9363_v15, %v9367_v27  ;;  %v19391_v55 = vcombine.low %v9363_v15, %v9367_v27  ;;  %v9339_v3 = vld [vmem:[#allocation10 + $0x900] sm:$0xff] }
 0x552   : > { %11759 = vmatpush2.bf16.msra.mxu1 %v19191_v25  ;;  %11787 = vmatprep.subr.bf16.mxu0 %v19248_v40  ;;  %v24442_v25 = vpop.f32.mrf.mxu1  ;;  %v19143_v40 = vcombine.low %v9115_v5, %v9119_v54  ;;  %v9267_v2 = vld [vmem:[#allocation10 + $0x6c0] sm:$0xff] }
 0x553   : > { %11760 = vmatprep.subr.bf16.mxu1 %v19184_v53  ;;  %v9037_v53 = vadd.bf16 1065369472, %v23009_v61  ;;  %v9271_v5 = vld [vmem:[#allocation10 + $0x6e0] sm:$0xff] }
 0x554   : > { %v24447_v10 = vpop.f32.mrf.mxu1  ;;  %v19296_v1 = vcombine.high %v9267_v2, %v9271_v5  ;;  %v9259_v61 = vld [vmem:[#allocation10 + $0x680] sm:$0xff] }
 0x555   : > { %11788 = vmatpush1.bf16.msra.mxu0 %v19247_v41  ;;  %v9359_v41 = vld [vmem:[#allocation10 + $0x9a0] sm:$0xff] }
 0x556   : > { %11761 = vmatpush2.bf16.msra.mxu1 %v19183_v30  ;;  %11789 = vmatprep.subr.bf16.mxu0 %v19240_v57  ;;  %v9011_v30 = vmul.bf16 1027030327, %v9004_v24  ;;  %v8988_v57 = vmul.bf16 1056980736, %v24996_v28  ;;  %v9263_v15 = vld [vmem:[#allocation10 + $0x6a0] sm:$0xff] }
 0x557   : > { %11762 = vmatprep.subr.bf16.mxu1 %v19176_v49  ;;  %v24445_v49 = vpop.f32.mrf.mxu0  ;;  %v19288_v26 = vcombine.high %v9259_v61, %v9263_v15  ;;  %v9243_v18 = vld [vmem:[#allocation10 + $0x600] sm:$0xff] }
 0x558   : > { %v24449_v31 = vmul.bf16 %v9037_v53, %v8988_v57  ;;  %v9018_v28 = vadd.bf16 %v9011_v30, %v24337_v19  ;;  %v19295_v53 = vcombine.low %v9267_v2, %v9271_v5  ;;  %v8284_v2 = vadd.f32 %v24437_v42, %v24440_v17 }
 0x559   : > { %11790 = vmatpush1.bf16.msra.mxu0 %v19239_v0  ;;  %v9283_v0 = vld [vmem:[#allocation10 + $0x740] sm:$0xff]  ;;  %v24455_v50 = vpop.f32.mrf.mxu0  ;;  %v8286_v5 = vadd.f32 %v24442_v25, %v24445_v49 }
 0x55a   : > { %11763 = vmatpush2.bf16.msra.mxu1 %v19175_v7  ;;  %11791 = vmatprep.subr.bf16.mxu0 %v19232_v11  ;;  %v9287_v7 = vld [vmem:[#allocation10 + $0x760] sm:$0xff]  ;;  %v19384_v11 = vcombine.high %v9355_v47, %v9359_v41 }
 0x55b   : > { %11764 = vmatprep.subr.bf16.mxu1 %v19168_v43  ;;  %v24451_v43 = vpop.f32.mrf.mxu1  ;;  %v24457_v29 = vpop.f32.mrf.mxu0 }
 0x55d   : > { %11792 = vmatpush1.bf16.msra.mxu0 %v19231_v14  ;;  %v19312_v14 = vcombine.high %v9283_v0, %v9287_v7  ;;  %v24459_v12 = vpop.f32.mrf.mxu1  ;;  %v24461_v38 = vpop.f32.mrf.mxu0 }
 0x55e   : > { %11765 = vmatpush2.bf16.msra.mxu1 %v19167_v23  ;;  %11793 = vmatprep.subr.bf16.mxu0 %v19224_v22  ;;  %v19383_v23 = vcombine.low %v9355_v47, %v9359_v41  ;;  %v9275_v22 = vld [vmem:[#allocation10 + $0x700] sm:$0xff] }
 0x55f   : > { %11766 = vmatprep.subr.bf16.mxu1 %v19160_v16  ;;  %v9279_v16 = vld [vmem:[#allocation10 + $0x720] sm:$0xff]  ;;  %v8328_v24 = vpop.f32.mrf.mxu0 }
 0x560   : > { %v9251_v47 = vld [vmem:[#allocation10 + $0x640] sm:$0xff] }
 0x561   : > { %11794 = vmatpush1.bf16.msra.mxu0 %v19223_v62  ;;  %v9343_v62 = vld [vmem:[#allocation10 + $0x920] sm:$0xff]  ;;  %v8330_v57 = vpop.f32.mrf.mxu0 }
 0x562   : > { %11767 = vmatpush2.bf16.msra.mxu1 %v19159_v6  ;;  %11795 = vmatprep.subr.bf16.mxu0 %v19216_v44  ;;  %v9025_v6 = vmul.bf16 1061961548, %v9018_v28  ;;  %v19311_v44 = vcombine.low %v9283_v0, %v9287_v7  ;;  %v19368_v54 = vcombine.high %v9339_v3, %v9343_v62  ;;  %v19367_v59 = vcombine.low %v9339_v3, %v9343_v62  ;;  %v9255_v41 = vld [vmem:[#allocation10 + $0x660] sm:$0xff] }
 0x563   : > { %11768 = vmatprep.subr.bf16.mxu1 %v19152_v36  ;;  %v19304_v36 = vcombine.high %v9275_v22, %v9279_v16  ;;  %v8410_v0 = vpop.f32.mrf.mxu0  ;;  %v9247_v28 = vld [vmem:[#allocation10 + $0x620] sm:$0xff] }
 0x564   : > { %23010 = vtanh.bf16 %v9025_v6 }
 0x565   : > { %11796 = vmatpush1.bf16.msra.mxu0 %v19215_v48  ;;  %v24463_v48 = vpop.f32.mrf.mxu1  ;;  %v8412_v62 = vpop.f32.mrf.mxu0 }
 0x566   : > { %11769 = vmatpush2.bf16.msra.mxu1 %v19151_v37  ;;  %11797 = vmatprep.subr.bf16.mxu0 %v19208_v39  ;;  %v9331_v37 = vld [vmem:[#allocation10 + $0x8c0] sm:$0xff] }
 0x567   : > { %11770 = vmatprep.subr.bf16.mxu1 %v19144_v20  ;;  %v9335_v39 = vld [vmem:[#allocation10 + $0x8e0] sm:$0xff]  ;;  %v19303_v20 = vcombine.low %v9275_v22, %v9279_v16  ;;  %v8282_v22 = vadd.f32 %v24431_v63, %v24435_v35  ;;  %v19279_v16 = vcombine.low %v9251_v47, %v9255_v41  ;;  %v8288_v35 = vadd.f32 %v24447_v10, %v24455_v50  ;;  %v8414_v42 = vpop.f32.mrf.mxu0 }
 0x568   : > { %v19360_v27 = vcombine.high %v9331_v37, %v9335_v39 }
 0x569   : > { %11798 = vmatpush1.bf16.msra.mxu0 %v19207_v4  ;;  %v24465_v4 = vpop.f32.mrf.mxu1 }
 0x56a   : > { %11771 = vmatpush2.bf16.msra.mxu1 %v19143_v40  ;;  %11799 = vmatprep.subr.bf16.mxu0 %v19328_v46  ;;  %v9323_v40 = vld [vmem:[#allocation10 + $0x880] sm:$0xff] }
 0x56b   : > { %11826 = vmatprep.subr.bf16.mxu1 %v19392_v56  ;;  %v9327_v46 = vld [vmem:[#allocation10 + $0x8a0] sm:$0xff]  ;;  %v24467_v9 = vpop.f32.mrf.mxu1  ;;  %v19359_v56 = vcombine.low %v9331_v37, %v9335_v39 }
 0x56c   : > { %v19352_v30 = vcombine.high %v9323_v40, %v9327_v46  ;;  %v19351_v52 = vcombine.low %v9323_v40, %v9327_v46  ;;  %v9427_v37 = vld [vmem:[#allocation10 + $0xbc0] sm:$0xff] }
 0x56d   : > { %11773 = vmatmul.mubr.bf16.vlgmr.msra.gmra.mxu1 %v24449_v31  ;;  %11800 = vmatpush2.bf16.msra.mxu0 %v19327_v21  ;;  %v9315_v21 = vld [vmem:[#allocation10 + $0x840] sm:$0xff]  ;;  %v24469_v7 = vpop.f32.mrf.mxu1 }
 0x56e   : > { %11801 = vmatprep.subr.bf16.mxu0 %v19320_v45  ;;  %11827 = vmatpush1.bf16.msra.mxu1 %v19391_v55  ;;  %v9319_v45 = vld [vmem:[#allocation10 + $0x860] sm:$0xff]  ;;  %v19287_v55 = vcombine.low %v9259_v61, %v9263_v15  ;;  %v8331_v15 = vadd.f32 %v8330_v57, %v8288_v35 }
 0x56f   : > { %11828 = vmatprep.subr.bf16.mxu1 %v19384_v11  ;;  %v19280_v11 = vcombine.high %v9251_v47, %v9255_v41  ;;  %v8457_v6 = vpop.f32.mrf.mxu1  ;;  %v9431_v39 = vld [vmem:[#allocation10 + $0xbe0] sm:$0xff] }
 0x570   : > { %v19456_v10 = vcombine.high %v9427_v37, %v9431_v39  ;;  %v19455_v41 = vcombine.low %v9427_v37, %v9431_v39  ;;  %v9491_v37 = vld [vmem:[#allocation10 + $0xdc0] sm:$0xff] }
 0x571   : > { %11802 = vmatpush2.bf16.msra.mxu0 %v19319_v58  ;;  %v19344_v58 = vcombine.high %v9315_v21, %v9319_v45  ;;  %v8459_v17 = vpop.f32.mrf.mxu1 }
 0x572   : > { %11803 = vmatprep.subr.bf16.mxu0 %v19312_v14  ;;  %11829 = vmatpush1.bf16.msra.mxu1 %v19383_v23  ;;  %v9307_v14 = vld [vmem:[#allocation10 + $0x800] sm:$0xff] }
 0x573   : > { %11830 = vmatprep.subr.bf16.mxu1 %v19376_v13  ;;  %v9311_v23 = vld [vmem:[#allocation10 + $0x820] sm:$0xff]  ;;  %v23062_v13 = vld [vmem:[#allocation9] sm:$0x7f]  ;;  %v8539_v50 = vpop.f32.mrf.mxu1 }
 0x574   : > { %v8884_v3 = vcombine.high %v23062_v13, %v23062_v13  ;;  %v19336_v63 = vcombine.high %v9307_v14, %v9311_v23  ;;  %v19335_v49 = vcombine.low %v9307_v14, %v9311_v23  ;;  %v9403_v13 = vld [vmem:[#allocation10 + $0xb00] sm:$0xff] }
 0x575   : > { %11804 = vmatpush2.bf16.msra.mxu0 %v19311_v44  ;;  %v19272_v44 = vcombine.high %v9243_v18, %v9247_v28 }
 0x576   : > { %11805 = vmatprep.subr.bf16.mxu0 %v19304_v36  ;;  %11831 = vmatpush1.bf16.msra.mxu1 %v19375_v33  ;;  %v19343_v36 = vcombine.low %v9315_v21, %v9319_v45  ;;  %v23011_v33 = vpop.eup %23010  ;;  %v8898_v61 = vrot.slane %v8884_v3, %v23974_v8  ;;  %v9407_v3 = vld [vmem:[#allocation10 + $0xb20] sm:$0xff] }
 0x577   : > { %11832 = vmatprep.subr.bf16.mxu1 %v19368_v54  ;;  %v8325_v54 = vadd.f32 %v24457_v29, %v8282_v22  ;;  %v9039_v25 = vadd.bf16 1065369472, %v23011_v33  ;;  %v19432_v35 = vcombine.high %v9403_v13, %v9407_v3 }
 0x579   : > { %11806 = vmatpush2.bf16.msra.mxu0 %v19303_v20  ;;  %v8327_v20 = vadd.f32 %v24461_v38, %v8284_v2  ;;  %v8368_v29 = vadd.f32 %v24451_v43, %v8325_v54  ;;  %v9419_v38 = vld [vmem:[#allocation10 + $0xb80] sm:$0xff]  ;;  %v24489_v43 = vrot.slane %v8898_v61, %v23974_v8 }
 0x57a   : > { %11807 = vmatprep.subr.bf16.mxu0 %v19296_v1  ;;  %11833 = vmatpush1.bf16.msra.mxu1 %v19367_v59  ;;  %v8329_v1 = vadd.f32 %v8328_v24, %v8286_v5  ;;  %v19271_v59 = vcombine.low %v9243_v18, %v9247_v28  ;;  %v9423_v24 = vld [vmem:[#allocation10 + $0xba0] sm:$0xff]  ;;  %v24997_v18 = vmov 0  }
 0x57b   : > { %11834 = vmatprep.subr.bf16.mxu1 %v19360_v27  ;;  %v8990_v27 = vmul.bf16 1056980736, %v24337_v19  ;;  %v8370_v40 = vadd.f32 %v24459_v12, %v8327_v20  ;;  %v19448_v21 = vcombine.high %v9419_v38, %v9423_v24  ;;  %v8541_v12 = vpop.f32.mrf.mxu1 }
 0x57c   : > { %v8372_v46 = vadd.f32 %v24463_v48, %v8329_v1  ;;  %v9411_v48 = vld [vmem:[#allocation10 + $0xb40] sm:$0xff] }
 0x57d   : > { %11808 = vmatpush2.bf16.msra.mxu0 %v19295_v53  ;;  %v8411_v53 = vadd.f32 %v8410_v0, %v8368_v29  ;;  %v24486_v47 = vmul.bf16 %v9039_v25, %v8990_v27  ;;  %v8413_v19 = vadd.f32 %v8412_v62, %v8370_v40  ;;  %v9483_v27 = vld [vmem:[#allocation10 + $0xd80] sm:$0xff] }
 0x57e   : > { %11809 = vmatprep.subr.bf16.mxu0 %v19288_v26  ;;  %11835 = vmatpush1.bf16.msra.mxu1 %v19359_v56  ;;  %v8900_v26 = vcombine.high %v8898_v61, %v8898_v61  ;;  %v8416_v56 = vpop.f32.mrf.mxu0  ;;  %v8415_v57 = vadd.f32 %v8414_v42, %v8372_v46  ;;  %v9395_v61 = vld [vmem:[#allocation10 + $0xac0] sm:$0xff] }
 0x57f   : > { %11836 = vmatprep.subr.bf16.mxu1 %v19352_v30  ;;  %v8374_v30 = vadd.f32 %v24465_v4, %v8331_v15  ;;  %v8454_v0 = vadd.f32 %v24467_v9, %v8411_v53  ;;  %v8961_v4 = vpack.i.b16 %v24489_v43, %v24489_v43  ;;  %v8456_v14 = vadd.f32 %v24469_v7, %v8413_v19  ;;  %v8543_v9 = vpop.f32.mrf.mxu1  ;;  %v9495_v7 = vld [vmem:[#allocation10 + $0xde0] sm:$0xff] }
 0x580   : > { %v8458_v23 = vadd.f32 %v8457_v6, %v8415_v57  ;;  %v19520_v1 = vcombine.high %v9491_v37, %v9495_v7  ;;  %v9399_v42 = vld [vmem:[#allocation10 + $0xae0] sm:$0xff] }
 0x581   : > { %11810 = vmatpush2.bf16.msra.mxu0 %v19287_v55  ;;  %v9415_v55 = vld [vmem:[#allocation10 + $0xb60] sm:$0xff]  ;;  %v8966_v5 = vrot.slane %v8961_v4, %v23979_v34  ;;  %v19424_v40 = vcombine.high %v9395_v61, %v9399_v42  ;;  %v19423_v19 = vcombine.low %v9395_v61, %v9399_v42 }
 0x582   : > { %11811 = vmatprep.subr.bf16.mxu0 %v19280_v11  ;;  %11837 = vmatpush1.bf16.msra.mxu1 %v19351_v52  ;;  %v8417_v11 = vadd.f32 %v8416_v56, %v8374_v30  ;;  %v8928_v52 = vrot.slane %v8900_v26, %v23974_v8  ;;  %v9387_v53 = vld [vmem:[#allocation10 + $0xa80] sm:$0xff] }
 0x583   : > { %11838 = vmatprep.subr.bf16.mxu1 %v19344_v58  ;;  %v19447_v58 = vcombine.low %v9419_v38, %v9423_v24  ;;  %v9487_v38 = vld [vmem:[#allocation10 + $0xda0] sm:$0xff] }
 0x584   : > { %v8968_v2 = vpack.i.b16 %v8928_v52, %v8928_v52  ;;  %v19512_v46 = vcombine.high %v9483_v27, %v9487_v38  ;;  %v9391_v26 = vld [vmem:[#allocation10 + $0xaa0] sm:$0xff]  ;;  %v19511_v56 = vcombine.low %v9483_v27, %v9487_v38 }
 0x585   : > { %11812 = vmatpush2.bf16.msra.mxu0 %v19279_v16  ;;  %v19440_v16 = vcombine.high %v9411_v48, %v9415_v55  ;;  %v9475_v57 = vld [vmem:[#allocation10 + $0xd40] sm:$0xff] }
 0x586   : > { %11813 = vmatprep.subr.bf16.mxu0 %v19272_v44  ;;  %11839 = vmatpush1.bf16.msra.mxu1 %v19343_v36  ;;  %v8460_v44 = vadd.f32 %v8459_v17, %v8417_v11  ;;  %v19519_v17 = vcombine.low %v9491_v37, %v9495_v7  ;;  %v8973_v15 = vrot.slane %v8968_v2, %v23979_v34  ;;  %v9443_v61 = vld [vmem:[#allocation10 + $0xc40] sm:$0xff] }
 0x587   : > { %11840 = vmatprep.subr.bf16.mxu1 %v19336_v63  ;;  %v19439_v63 = vcombine.low %v9411_v48, %v9415_v55  ;;  %v19416_v48 = vcombine.high %v9387_v53, %v9391_v26  ;;  %v9379_v55 = vld [vmem:[#allocation10 + $0xa40] sm:$0xff] }
 0x588   : > { %v9447_v42 = vld [vmem:[#allocation10 + $0xc60] sm:$0xff] }
 0x589   : > { %11814 = vmatpush2.bf16.msra.mxu0 %v19271_v59  ;;  %v8545_v59 = vpop.f32.mrf.mxu1  ;;  %v9439_v27 = vld [vmem:[#allocation10 + $0xc20] sm:$0xff] }
 0x58a   : > { %11841 = vmatpush1.bf16.msra.mxu1 %v19335_v49  ;;  %11869 = vmatprep.subr.bf16.mxu0 %v19520_v1 }
 0x58b   : > { %11842 = vmatprep.subr.bf16.mxu1 %v19456_v10  ;;  %v19431_v10 = vcombine.low %v9403_v13, %v9407_v3 }
 0x58c   : > { %v8496_v45 = vpop.f32.mrf.mxu0  ;;  %11816 = vmatmul.mubr.bf16.vlgmr.msra.gmra.mxu0 %v24486_v47 }
 0x58d   : > { %11901 = vmatprep.mubr.bf16.mxu0 %v24997_v18  ;;  %v8497_v22 = vadd.f32 %v8496_v45, %v8454_v0  ;;  %11870 = vmatpush1.bf16.msra.mxu0 %v19519_v17  ;;  %v9383_v0 = vld [vmem:[#allocation10 + $0xa60] sm:$0xff] }
 0x58e   : > { %v8498_v28 = vpop.f32.mrf.mxu0  ;;  %11843 = vmatpush2.bf16.msra.mxu1 %v19455_v41  ;;  %11871 = vmatprep.subr.bf16.mxu0 %v19512_v46  ;;  %v19407_v37 = vcombine.low %v9379_v55, %v9383_v0  ;;  %v24513_v46 = vld [vmem:[#allocation10 + $0x1c8] sm:$0xff] }
 0x58f   : > { %11844 = vmatprep.subr.bf16.mxu1 %v19448_v21  ;;  %v8499_v36 = vadd.f32 %v8498_v28, %v8456_v14  ;;  %v8540_v6 = vadd.f32 %v8539_v50, %v8497_v22  ;;  %v9479_v21 = vld [vmem:[#allocation10 + $0xd60] sm:$0xff]  ;;  %v19408_v14 = vcombine.high %v9379_v55, %v9383_v0 }
 0x590   : > { %v8500_v62 = vpop.f32.mrf.mxu0  ;;  %v19504_v11 = vcombine.high %v9475_v57, %v9479_v21  ;;  %v19503_v52 = vcombine.low %v9475_v57, %v9479_v21  ;;  %v9471_v22 = vld [vmem:[#allocation10 + $0xd20] sm:$0xff] }
 0x591   : > { %v8501_v33 = vadd.f32 %v8500_v62, %v8458_v23  ;;  %v8542_v25 = vadd.f32 %v8541_v12, %v8499_v36  ;;  %11872 = vmatpush1.bf16.msra.mxu0 %v19511_v56  ;;  %v9467_v23 = vld [vmem:[#allocation10 + $0xd00] sm:$0xff] }
 0x592   : > { %v8502_v54 = vpop.f32.mrf.mxu0  ;;  %11845 = vmatpush2.bf16.msra.mxu1 %v19447_v58  ;;  %11873 = vmatprep.subr.bf16.mxu0 %v19504_v11  ;;  %v19415_v58 = vcombine.low %v9387_v53, %v9391_v26  ;;  %v19495_v3 = vcombine.low %v9467_v23, %v9471_v22  ;;  %v9459_v62 = vld [vmem:[#allocation10 + $0xcc0] sm:$0xff]  ;;  %v24515_v53 = vld [vmem:[#allocation10 + $0x1e8] sm:$0xff] }
 0x593   : > { %v8544_v39 = vadd.f32 %v8543_v9, %v8501_v33  ;;  %v8503_v20 = vadd.f32 %v8502_v54, %v8460_v44  ;;  %11846 = vmatprep.subr.bf16.mxu1 %v19440_v16  ;;  %v19496_v9 = vcombine.high %v9467_v23, %v9471_v22  ;;  %v9463_v44 = vld [vmem:[#allocation10 + $0xce0] sm:$0xff] }
 0x594   : > { %v9371_v36 = vld [vmem:[#allocation10 + $0xa00] sm:$0xff]  ;;  %v19488_v2 = vcombine.high %v9459_v62, %v9463_v44  ;;  %v19487_v7 = vcombine.low %v9459_v62, %v9463_v44  ;;  %v9196_v62 = vld [vmem:[#allocation10 + $0x488] sm:$0xff] }
 0x595   : > { %v8880_v49 = vpack.c.bf16 %v8544_v39, %v8540_v6  ;;  %v8546_v29 = vadd.f32 %v8545_v59, %v8503_v20  ;;  %11874 = vmatpush1.bf16.msra.mxu0 %v19503_v52  ;;  %v9375_v33 = vld [vmem:[#allocation10 + $0xa20] sm:$0xff]  ;;  %v9236_v20 = vld [vmem:[#allocation10 + $0x5c8] sm:$0xff] }
 0x596   : > { %11847 = vmatpush2.bf16.msra.mxu1 %v19439_v63  ;;  %11875 = vmatprep.subr.bf16.mxu0 %v19496_v9  ;;  %v19400_v6 = vcombine.high %v9371_v36, %v9375_v33  ;;  %v9240_v59 = vld [vmem:[#allocation10 + $0x5e8] sm:$0xff]  ;;  %v19399_v17 = vcombine.low %v9371_v36, %v9375_v33 }
 0x597   : > { %v24501_v50 = vadd.bf16 %v8966_v5, %v8880_v49  ;;  %v8881_v24 = vpack.c.bf16 %v8546_v29, %v8542_v25  ;;  %11848 = vmatprep.subr.bf16.mxu1 %v19432_v35  ;;  %v9451_v5 = vld [vmem:[#allocation10 + $0xc80] sm:$0xff]  ;;  %v19266_v49 = vcombine.high %v9236_v20, %v9240_v59  ;;  %v19472_v29 = vcombine.high %v9443_v61, %v9447_v42  ;;  %v9200_v44 = vld [vmem:[#allocation10 + $0x4a8] sm:$0xff] }
 0x598   : > { %v9455_v35 = vld [vmem:[#allocation10 + $0xca0] sm:$0xff]  ;;  %v19265_v0 = vcombine.low %v9236_v20, %v9240_v59  ;;  %v19226_v33 = vcombine.high %v9196_v62, %v9200_v44  ;;  %v9304_v20 = vld [vmem:[#allocation10 + $0x7e8] sm:$0xff] }
 0x599   : > { %v8999_v41 = vmul.bf16 %v24501_v50, %v24501_v50  ;;  %v24505_v30 = vadd.bf16 %v8973_v15, %v8881_v24  ;;  %11876 = vmatpush1.bf16.msra.mxu0 %v19495_v3  ;;  %v19480_v1 = vcombine.high %v9451_v5, %v9455_v35  ;;  %v19479_v25 = vcombine.low %v9451_v5, %v9455_v35  ;;  %v9192_v5 = vld [vmem:[#allocation10 + $0x468] sm:$0xff] }
 0x59a   : > { %11849 = vmatpush2.bf16.msra.mxu1 %v19431_v10  ;;  %11877 = vmatprep.subr.bf16.mxu0 %v19488_v2  ;;  %v19471_v15 = vcombine.low %v9443_v61, %v9447_v42  ;;  %v9435_v10 = vld [vmem:[#allocation10 + $0xc00] sm:$0xff]  ;;  %v9188_v2 = vld [vmem:[#allocation10 + $0x448] sm:$0xff]  ;;  %v24530_v61 = vpop.f32.mrf.mxu1 }
 0x59b   : > { %v9006_v12 = vmul.bf16 %v8999_v41, %v24501_v50  ;;  %v9000_v45 = vmul.bf16 %v24505_v30, %v24505_v30  ;;  %11850 = vmatprep.subr.bf16.mxu1 %v19424_v40  ;;  %v19463_v38 = vcombine.low %v9435_v10, %v9439_v27  ;;  %v19464_v24 = vcombine.high %v9435_v10, %v9439_v27  ;;  %v9180_v35 = vld [vmem:[#allocation10 + $0x408] sm:$0xff] }
 0x59c   : > { %v19137_v41 = vcombine.low %v24513_v46, %v24515_v53  ;;  %v8993_v57 = vmul.bf16 1056980736, %v24505_v30  ;;  %v9292_v42 = vld [vmem:[#allocation10 + $0x788] sm:$0xff] }
 0x59d   : > { %v9013_v28 = vmul.bf16 1027030327, %v9006_v12  ;;  %v9007_v4 = vmul.bf16 %v9000_v45, %v24505_v30  ;;  %11878 = vmatpush1.bf16.msra.mxu0 %v19487_v7  ;;  %v9228_v12 = vld [vmem:[#allocation10 + $0x588] sm:$0xff]  ;;  %v19217_v7 = vcombine.low %v9188_v2, %v9192_v5 }
 0x59e   : > { %11851 = vmatpush2.bf16.msra.mxu1 %v19423_v19  ;;  %11879 = vmatprep.subr.bf16.mxu0 %v19480_v1  ;;  %v19138_v19 = vcombine.high %v24513_v46, %v24515_v53  ;;  %v9232_v45 = vld [vmem:[#allocation10 + $0x5a8] sm:$0xff] }
 0x59f   : > { %v9014_v16 = vmul.bf16 1027030327, %v9007_v4  ;;  %11852 = vmatprep.subr.bf16.mxu1 %v19416_v48  ;;  %v9020_v13 = vadd.bf16 %v9013_v28, %v24501_v50  ;;  %v8992_v48 = vmul.bf16 1056980736, %v24501_v50  ;;  %v19258_v52 = vcombine.high %v9228_v12, %v9232_v45  ;;  %v9220_v28 = vld [vmem:[#allocation10 + $0x548] sm:$0xff] }
 0x5a0   : > { %v9224_v4 = vld [vmem:[#allocation10 + $0x568] sm:$0xff] }
 0x5a1   : > { %v9021_v54 = vadd.bf16 %v9014_v16, %v24505_v30  ;;  %v9027_v63 = vmul.bf16 1061961548, %v9020_v13  ;;  %11880 = vmatpush1.bf16.msra.mxu0 %v19479_v25  ;;  %v19257_v30 = vcombine.low %v9228_v12, %v9232_v45  ;;  %v9212_v50 = vld [vmem:[#allocation10 + $0x508] sm:$0xff]  ;;  %v19249_v23 = vcombine.low %v9220_v28, %v9224_v4 }
 0x5a2   : > { %11853 = vmatpush2.bf16.msra.mxu1 %v19415_v58  ;;  %11881 = vmatprep.subr.bf16.mxu0 %v19472_v29  ;;  %v19250_v58 = vcombine.high %v9220_v28, %v9224_v4  ;;  %v9204_v16 = vld [vmem:[#allocation10 + $0x4c8] sm:$0xff]  ;;  %v24532_v29 = vpop.f32.mrf.mxu1 }
 0x5a3   : > { %11854 = vmatprep.subr.bf16.mxu1 %v19408_v14  ;;  %v9028_v39 = vmul.bf16 1061961548, %v9021_v54  ;;  %23012 = vtanh.bf16 %v9027_v63  ;;  %v9216_v14 = vld [vmem:[#allocation10 + $0x528] sm:$0xff]  ;;  %v19225_v54 = vcombine.low %v9196_v62, %v9200_v44  ;;  %v19218_v63 = vcombine.high %v9188_v2, %v9192_v5 }
 0x5a4   : > { %v19242_v22 = vcombine.high %v9212_v50, %v9216_v14  ;;  %v9208_v13 = vld [vmem:[#allocation10 + $0x4e8] sm:$0xff]  ;;  %v19241_v3 = vcombine.low %v9212_v50, %v9216_v14 }
 0x5a5   : > { %23014 = vtanh.bf16 %v9028_v39  ;;  %11882 = vmatpush1.bf16.msra.mxu0 %v19471_v15  ;;  %v19234_v9 = vcombine.high %v9204_v16, %v9208_v13  ;;  %v19233_v36 = vcombine.low %v9204_v16, %v9208_v13  ;;  %v9300_v39 = vld [vmem:[#allocation10 + $0x7c8] sm:$0xff] }
 0x5a6   : > { %11855 = vmatpush2.bf16.msra.mxu1 %v19407_v37  ;;  %11883 = vmatprep.subr.bf16.mxu0 %v19464_v24  ;;  %v9184_v37 = vld [vmem:[#allocation10 + $0x428] sm:$0xff]  ;;  %v19330_v59 = vcombine.high %v9300_v39, %v9304_v20  ;;  %v19329_v25 = vcombine.low %v9300_v39, %v9304_v20  ;;  %v24534_v24 = vpop.f32.mrf.mxu1 }
 0x5a7   : > { %11856 = vmatprep.subr.bf16.mxu1 %v19400_v6  ;;  %v19210_v6 = vcombine.high %v9180_v35, %v9184_v37  ;;  %v19209_v1 = vcombine.low %v9180_v35, %v9184_v37  ;;  %v9284_v15 = vld [vmem:[#allocation10 + $0x748] sm:$0xff] }
 0x5a8   : > { %v9288_v10 = vld [vmem:[#allocation10 + $0x768] sm:$0xff] }
 0x5a9   : > { %11884 = vmatpush1.bf16.msra.mxu0 %v19463_v38  ;;  %v19314_v38 = vcombine.high %v9284_v15, %v9288_v10  ;;  %v9268_v45 = vld [vmem:[#allocation10 + $0x6c8] sm:$0xff] }
 0x5aa   : > { %11857 = vmatpush2.bf16.msra.mxu1 %v19399_v17  ;;  %11912 = vmatprep.subr.bf16.mxu0 %v19138_v19  ;;  %v9296_v17 = vld [vmem:[#allocation10 + $0x7a8] sm:$0xff]  ;;  %v19313_v19 = vcombine.low %v9284_v15, %v9288_v10 }
 0x5ab   : > { %11955 = vmatprep.subr.bf16.mxu1 %v19266_v49  ;;  %v19322_v49 = vcombine.high %v9292_v42, %v9296_v17  ;;  %v19321_v27 = vcombine.low %v9292_v42, %v9296_v17  ;;  %v9252_v16 = vld [vmem:[#allocation10 + $0x648] sm:$0xff] }
 0x5ac   : > { %v9256_v13 = vld [vmem:[#allocation10 + $0x668] sm:$0xff] }
 0x5ad   : > { %v19282_v44 = vcombine.high %v9252_v16, %v9256_v13  ;;  %v9492_v37 = vld [vmem:[#allocation10 + $0xdc8] sm:$0xff] }
 0x5ae   : > { %v9488_v42 = vld [vmem:[#allocation10 + $0xda8] sm:$0xff] }
 0x5b1   : > { %v23013_v40 = vpop.eup %23012 }
 0x5b2   : > { %v9041_v56 = vadd.bf16 1065369472, %v23013_v40  ;;  %v24536_v40 = vpop.f32.mrf.mxu0 }
 0x5b3   : > { %v23015_v26 = vpop.eup %23014 }
 0x5b4   : > { %v9042_v21 = vadd.bf16 1065369472, %v23015_v26  ;;  %v24525_v11 = vmul.bf16 %v9041_v56, %v8992_v48  ;;  %v9276_v26 = vld [vmem:[#allocation10 + $0x708] sm:$0xff]  ;;  %v20172_v12 = vpop.f32.mrf.mxu0 }
 0x5b5   : > { %v9280_v56 = vld [vmem:[#allocation10 + $0x728] sm:$0xff] }
 0x5b6   : > { %v24523_v55 = vmul.bf16 %v9042_v21, %v8993_v57  ;;  %v19306_v57 = vcombine.high %v9276_v26, %v9280_v56  ;;  %v24538_v21 = vpop.f32.mrf.mxu1  ;;  %v9272_v48 = vld [vmem:[#allocation10 + $0x6e8] sm:$0xff]  ;;  %v20174_v4 = vpop.f32.mrf.mxu0 }
 0x5b7   : > { %v19298_v28 = vcombine.high %v9268_v45, %v9272_v48  ;;  %v19297_v14 = vcombine.low %v9268_v45, %v9272_v48 }
 0x5b8   : > { %11858 = vmatprep.mubr.bf16.mxu1 %v24523_v55 }
 0x5b9   : > { %11859 = vmatmul.mubr.bf16.vlgmr.msra.gmra.mxu1 %v24525_v11 }
 0x5ba   : > { %11956 = vmatpush1.bf16.msra.mxu1 %v19265_v0  ;;  %11987 = vmatprep.mubr.bf16.mxu1 %v24426_v60  ;;  %v24540_v0 = vpop.f32.mrf.mxu1 }
 0x5bb   : > { %11957 = vmatprep.subr.bf16.mxu1 %v19258_v52  ;;  %v19305_v52 = vcombine.low %v9276_v26, %v9280_v56  ;;  %v20173_v56 = vadd.f32 %v20172_v12, %v24536_v40 }
 0x5bc   : > { %v24542_v50 = vpop.f32.mrf.mxu1 }
 0x5be   : > { %11958 = vmatpush1.bf16.msra.mxu1 %v19257_v30  ;;  %v9260_v30 = vld [vmem:[#allocation10 + $0x688] sm:$0xff] }
 0x5bf   : > { %11959 = vmatprep.subr.bf16.mxu1 %v19250_v58  ;;  %v9264_v58 = vld [vmem:[#allocation10 + $0x6a8] sm:$0xff] }
 0x5c0   : > { %v19289_v62 = vcombine.low %v9260_v30, %v9264_v58 }
 0x5c2   : > { %11960 = vmatpush1.bf16.msra.mxu1 %v19249_v23  ;;  %v19290_v23 = vcombine.high %v9260_v30, %v9264_v58  ;;  %v20151_v30 = vadd.f32 %v24532_v29, %v24530_v61  ;;  %v20154_v58 = vadd.f32 %v24538_v21, %v24534_v24 }
 0x5c3   : > { %11961 = vmatprep.subr.bf16.mxu1 %v19242_v22  ;;  %v20175_v22 = vpop.f32.mrf.mxu0 }
 0x5c6   : > { %11962 = vmatpush1.bf16.msra.mxu1 %v19241_v3  ;;  %v20196_v3 = vpop.f32.mrf.mxu1 }
 0x5c7   : > { %11963 = vmatprep.subr.bf16.mxu1 %v19234_v9 }
 0x5c8   : > { %v20197_v2 = vpop.f32.mrf.mxu1 }
 0x5ca   : > { %11964 = vmatpush1.bf16.msra.mxu1 %v19233_v36  ;;  %v9244_v36 = vld [vmem:[#allocation10 + $0x608] sm:$0xff] }
 0x5cb   : > { %11965 = vmatprep.subr.bf16.mxu1 %v19226_v33  ;;  %v9248_v33 = vld [vmem:[#allocation10 + $0x628] sm:$0xff] }
 0x5cc   : > { %v20215_v9 = vpop.f32.mrf.mxu0  ;;  %v19273_v39 = vcombine.low %v9244_v36, %v9248_v33 }
 0x5cd   : > { %v24544_v35 = vpop.f32.mrf.mxu1 }
 0x5ce   : > { %11966 = vmatpush1.bf16.msra.mxu1 %v19225_v54  ;;  %v20216_v5 = vpop.f32.mrf.mxu0  ;;  %v19281_v54 = vcombine.low %v9252_v16, %v9256_v13  ;;  %v8624_v16 = vadd.f32 %v20173_v56, %v20151_v30 }
 0x5cf   : > { %11967 = vmatprep.subr.bf16.mxu1 %v19218_v63  ;;  %v19274_v63 = vcombine.high %v9244_v36, %v9248_v33  ;;  %v20217_v36 = vadd.f32 %v20216_v5, %v20215_v9  ;;  %v9448_v5 = vld [vmem:[#allocation10 + $0xc68] sm:$0xff] }
 0x5d2   : > { %11968 = vmatpush1.bf16.msra.mxu1 %v19217_v7  ;;  %v9496_v7 = vld [vmem:[#allocation10 + $0xde8] sm:$0xff] }
 0x5d3   : > { %11969 = vmatprep.subr.bf16.mxu1 %v19210_v6  ;;  %v20218_v6 = vpop.f32.mrf.mxu0  ;;  %v19522_v20 = vcombine.high %v9492_v37, %v9496_v7 }
 0x5d5   : > { %v20219_v17 = vpop.f32.mrf.mxu0 }
 0x5d6   : > { %11970 = vmatpush1.bf16.msra.mxu1 %v19209_v1  ;;  %v20238_v1 = vpop.f32.mrf.mxu1  ;;  %v20220_v33 = vadd.f32 %v20219_v17, %v20218_v6 }
 0x5d7   : > { %11971 = vmatprep.subr.bf16.mxu1 %v19330_v59  ;;  %v9484_v59 = vld [vmem:[#allocation10 + $0xd88] sm:$0xff] }
 0x5d8   : > { %v20240_v15 = vpop.f32.mrf.mxu1  ;;  %v19513_v26 = vcombine.low %v9484_v59, %v9488_v42 }
 0x5da   : > { %11972 = vmatpush2.bf16.msra.mxu1 %v19329_v25  ;;  %v19521_v25 = vcombine.low %v9492_v37, %v9496_v7  ;;  %v20241_v45 = vpop.f32.mrf.mxu1  ;;  %v9456_v37 = vld [vmem:[#allocation10 + $0xca8] sm:$0xff] }
 0x5db   : > { %11973 = vmatprep.subr.bf16.mxu1 %v19322_v49  ;;  %v19514_v49 = vcombine.high %v9484_v59, %v9488_v42 }
 0x5de   : > { %11974 = vmatpush2.bf16.msra.mxu1 %v19321_v27  ;;  %v9476_v27 = vld [vmem:[#allocation10 + $0xd48] sm:$0xff] }
 0x5df   : > { %11975 = vmatprep.subr.bf16.mxu1 %v19314_v38  ;;  %v9480_v38 = vld [vmem:[#allocation10 + $0xd68] sm:$0xff] }
 0x5e2   : > { %11976 = vmatpush2.bf16.msra.mxu1 %v19313_v19  ;;  %v20176_v19 = vadd.f32 %v20175_v22, %v20174_v4  ;;  %v9460_v4 = vld [vmem:[#allocation10 + $0xcc8] sm:$0xff] }
 0x5e3   : > { %11977 = vmatprep.subr.bf16.mxu1 %v19306_v57  ;;  %v19506_v57 = vcombine.high %v9476_v27, %v9480_v38  ;;  %v9464_v22 = vld [vmem:[#allocation10 + $0xce8] sm:$0xff] }
 0x5e4   : > { %v8627_v13 = vadd.f32 %v20176_v19, %v20154_v58  ;;  %v19489_v42 = vcombine.low %v9460_v4, %v9464_v22 }
 0x5e6   : > { %11978 = vmatpush2.bf16.msra.mxu1 %v19305_v52  ;;  %v9468_v52 = vld [vmem:[#allocation10 + $0xd08] sm:$0xff] }
 0x5e7   : > { %11979 = vmatprep.subr.bf16.mxu1 %v19298_v28  ;;  %v9472_v28 = vld [vmem:[#allocation10 + $0xd28] sm:$0xff] }
 0x5e8   : > { %v19498_v40 = vcombine.high %v9468_v52, %v9472_v28  ;;  %v19497_v29 = vcombine.low %v9468_v52, %v9472_v28 }
 0x5ea   : > { %11980 = vmatpush2.bf16.msra.mxu1 %v19297_v14 }
 0x5eb   : > { %11981 = vmatprep.subr.bf16.mxu1 %v19290_v23  ;;  %v19505_v23 = vcombine.low %v9476_v27, %v9480_v38 }
 0x5ec   : > { %v20259_v10 = vpop.f32.mrf.mxu0 }
 0x5ed   : > { %v20281_v14 = vpop.f32.mrf.mxu1 }
 0x5ee   : > { %11982 = vmatpush2.bf16.msra.mxu1 %v19289_v62  ;;  %v20260_v48 = vpop.f32.mrf.mxu0  ;;  %v20195_v62 = vadd.f32 %v24542_v50, %v24540_v0  ;;  %v20239_v0 = vadd.f32 %v20238_v1, %v24544_v35  ;;  %v20242_v50 = vadd.f32 %v20241_v45, %v20240_v15  ;;  %v9436_v35 = vld [vmem:[#allocation10 + $0xc08] sm:$0xff] }
 0x5ef   : > { %11983 = vmatprep.subr.bf16.mxu1 %v19282_v44  ;;  %v20198_v44 = vadd.f32 %v20197_v2, %v20196_v3  ;;  %v20282_v61 = vpop.f32.mrf.mxu1  ;;  %v20261_v3 = vadd.f32 %v20260_v48, %v20259_v10  ;;  %v9444_v2 = vld [vmem:[#allocation10 + $0xc48] sm:$0xff] }
 0x5f0   : > { %v20262_v12 = vpop.f32.mrf.mxu0  ;;  %v8665_v24 = vadd.f32 %v20195_v62, %v8624_v16  ;;  %v19474_v19 = vcombine.high %v9444_v2, %v9448_v5  ;;  %v9440_v1 = vld [vmem:[#allocation10 + $0xc28] sm:$0xff]  ;;  %v20283_v15 = vadd.f32 %v20282_v61, %v20281_v14  ;;  %v19473_v52 = vcombine.low %v9444_v2, %v9448_v5  ;;  %v9113_v16 = vld [vmem:[#allocation10 + $0x1f0] sm:$0xff] }
 0x5f1   : > { %v8668_v21 = vadd.f32 %v20198_v44, %v8627_v13  ;;  %v20284_v59 = vpop.f32.mrf.mxu1  ;;  %v9097_v2 = vld [vmem:[#allocation10 + $0x170] sm:$0xff] }
 0x5f2   : > { %11984 = vmatpush2.bf16.msra.mxu1 %v19281_v54  ;;  %v19490_v54 = vcombine.high %v9460_v4, %v9464_v22  ;;  %v20263_v7 = vpop.f32.mrf.mxu0  ;;  %v19465_v22 = vcombine.low %v9436_v35, %v9440_v1 }
 0x5f3   : > { %11985 = vmatprep.subr.bf16.mxu1 %v19274_v63  ;;  %v9452_v63 = vld [vmem:[#allocation10 + $0xc88] sm:$0xff]  ;;  %v20264_v9 = vadd.f32 %v20263_v7, %v20262_v12  ;;  %v20285_v27 = vpop.f32.mrf.mxu1 }
 0x5f4   : > { %v19481_v38 = vcombine.low %v9452_v63, %v9456_v37  ;;  %v20286_v10 = vadd.f32 %v20285_v27, %v20284_v59  ;;  %v9084_v27 = vld [vmem:[#allocation10 + $0x108] sm:$0xff] }
 0x5f6   : > { %11986 = vmatpush2.bf16.msra.mxu1 %v19273_v39  ;;  %v8706_v39 = vadd.f32 %v20217_v36, %v8665_v24 }
 0x5f7   : > { %12041 = vmatprep.subr.bf16.mxu1 %v19522_v20  ;;  %v8709_v20 = vadd.f32 %v20220_v33, %v8668_v21 }
 0x5f8   : > { %v8747_v6 = vadd.f32 %v20239_v0, %v8706_v39  ;;  %v9101_v39 = vld [vmem:[#allocation10 + $0x190] sm:$0xff] }
 0x5f9   : > { %11988 = vmatmul.mubr.bf16.vlgmr.msra.gmra.mxu1 %v24486_v47  ;;  %v8750_v17 = vadd.f32 %v20242_v50, %v8709_v20  ;;  %v9105_v20 = vld [vmem:[#allocation10 + $0x1b0] sm:$0xff] }
 0x5fa   : > { %12042 = vmatpush1.bf16.msra.mxu1 %v19521_v25  ;;  %12073 = vmatprep.mubr.bf16.mxu1 %v24997_v18  ;;  %v19482_v25 = vcombine.high %v9452_v63, %v9456_v37  ;;  %v9104_v63 = vld [vmem:[#allocation10 + $0x1a8] sm:$0xff]  ;;  %v19132_v50 = vcombine.high %v9101_v39, %v9105_v20 }
 0x5fb   : > { %12043 = vmatprep.subr.bf16.mxu1 %v19514_v49  ;;  %v8930_v49 = vcombine.high %v24489_v43, %v24489_v43  ;;  %v8791_v56 = vadd.f32 %v20264_v9, %v8750_v17  ;;  %v19466_v43 = vcombine.high %v9436_v35, %v9440_v1  ;;  %v9093_v9 = vld [vmem:[#allocation10 + $0x150] sm:$0xff]  ;;  %v9080_v35 = vld [vmem:[#allocation10 + $0xe8] sm:$0xff] }
 0x5fc   : > { %v19123_v46 = vcombine.low %v9093_v9, %v9097_v2  ;;  %v9077_v1 = vld [vmem:[#allocation10 + $0xd0] sm:$0xff] }
 0x5fd   : > { %v8975_v45 = vpack.i.b16 %v8930_v49, %v8930_v49  ;;  %v8832_v30 = vadd.f32 %v20286_v10, %v8791_v56  ;;  %v19124_v49 = vcombine.high %v9093_v9, %v9097_v2  ;;  %v9089_v56 = vld [vmem:[#allocation10 + $0x130] sm:$0xff] }
 0x5fe   : > { %12044 = vmatpush1.bf16.msra.mxu1 %v19513_v26  ;;  %v8788_v26 = vadd.f32 %v20261_v3, %v8747_v6  ;;  %v9096_v3 = vld [vmem:[#allocation10 + $0x168] sm:$0xff]  ;;  %v19131_v6 = vcombine.low %v9101_v39, %v9105_v20 }
 0x5ff   : > { %12045 = vmatprep.subr.bf16.mxu1 %v19506_v57  ;;  %v8980_v12 = vrot.slane %v8975_v45, %v23979_v34  ;;  %v9172_v39 = vld [vmem:[#allocation10 + $0x3c8] sm:$0xff] }
 0x600   : > { %v8829_v28 = vadd.f32 %v20283_v15, %v8788_v26  ;;  %v9085_v26 = vld [vmem:[#allocation10 + $0x110] sm:$0xff]  ;;  %v9176_v20 = vld [vmem:[#allocation10 + $0x3e8] sm:$0xff] }
 0x601   : > { %v9081_v15 = vld [vmem:[#allocation10 + $0xf0] sm:$0xff]  ;;  %v19115_v45 = vcombine.low %v9085_v26, %v9089_v56 }
 0x602   : > { %12046 = vmatpush1.bf16.msra.mxu1 %v19505_v23  ;;  %v9109_v23 = vld [vmem:[#allocation10 + $0x1d0] sm:$0xff] }
 0x603   : > { %12047 = vmatprep.subr.bf16.mxu1 %v19498_v40  ;;  %v19140_v62 = vcombine.high %v9109_v23, %v9113_v16  ;;  %v19139_v59 = vcombine.low %v9109_v23, %v9113_v16  ;;  %v19107_v16 = vcombine.low %v9077_v1, %v9081_v15 }
 0x606   : > { %12048 = vmatpush1.bf16.msra.mxu1 %v19497_v29 }
 0x607   : > { %12049 = vmatprep.subr.bf16.mxu1 %v19490_v54  ;;  %v9100_v54 = vld [vmem:[#allocation10 + $0x188] sm:$0xff] }
 0x608   : > { %v19130_v0 = vcombine.high %v9100_v54, %v9104_v63  ;;  %v19129_v5 = vcombine.low %v9100_v54, %v9104_v63 }
 0x60a   : > { %12050 = vmatpush1.bf16.msra.mxu1 %v19489_v42 }
 0x60b   : > { %12051 = vmatprep.subr.bf16.mxu1 %v19482_v25  ;;  %v9092_v25 = vld [vmem:[#allocation10 + $0x148] sm:$0xff] }
 0x60c   : > { %v8869_v57 = vpop.f32.mrf.mxu0  ;;  %v19122_v17 = vcombine.high %v9092_v25, %v9096_v3 }
 0x60d   : > { %v8870_v13 = vadd.f32 %v8869_v57, %v8829_v28  ;;  %v9076_v57 = vld [vmem:[#allocation10 + $0xc8] sm:$0xff] }
 0x60e   : > { %v20528_v48 = vpop.f32.mrf.mxu0  ;;  %12052 = vmatpush1.bf16.msra.mxu1 %v19481_v38  ;;  %v9088_v38 = vld [vmem:[#allocation10 + $0x128] sm:$0xff]  ;;  %v19105_v23 = vcombine.low %v9076_v57, %v9080_v35 }
 0x60f   : > { %12053 = vmatprep.subr.bf16.mxu1 %v19474_v19  ;;  %v19121_v19 = vcombine.low %v9092_v25, %v9096_v3  ;;  %v19114_v53 = vcombine.high %v9084_v27, %v9088_v38  ;;  %v19113_v10 = vcombine.low %v9084_v27, %v9088_v38  ;;  %v19106_v48 = vcombine.high %v9076_v57, %v9080_v35  ;;  %v9068_v28 = vld [vmem:[#allocation10 + $0x88] sm:$0xff]  ;;  %v9177_v25 = vld [vmem:[#allocation10 + $0x3f0] sm:$0xff] }
 0x610   : > { %v8872_v58 = vpop.f32.mrf.mxu0  ;;  %v9165_v27 = vld [vmem:[#allocation10 + $0x390] sm:$0xff] }
 0x611   : > { %v8873_v40 = vadd.f32 %v8872_v58, %v8832_v30  ;;  %v9072_v30 = vld [vmem:[#allocation10 + $0xa8] sm:$0xff]  ;;  %v9073_v58 = vld [vmem:[#allocation10 + $0xb0] sm:$0xff] }
 0x612   : > { %v20529_v4 = vpop.f32.mrf.mxu0  ;;  %12054 = vmatpush1.bf16.msra.mxu1 %v19473_v52  ;;  %v19108_v52 = vcombine.high %v9077_v1, %v9081_v15  ;;  %v9169_v38 = vld [vmem:[#allocation10 + $0x3b0] sm:$0xff] }
 0x613   : > { %v8882_v14 = vpack.c.bf16 %v8873_v40, %v8870_v13  ;;  %12055 = vmatprep.subr.bf16.mxu1 %v19466_v43  ;;  %v9069_v43 = vld [vmem:[#allocation10 + $0x90] sm:$0xff]  ;;  %v19098_v13 = vcombine.high %v9068_v28, %v9072_v30  ;;  %v9064_v4 = vld [vmem:[#allocation10 + $0x68] sm:$0xff]  ;;  %v19195_v15 = vcombine.low %v9165_v27, %v9169_v38 }
 0x614   : > { %v19100_v40 = vcombine.high %v9069_v43, %v9073_v58  ;;  %v9157_v57 = vld [vmem:[#allocation10 + $0x350] sm:$0xff] }
 0x615   : > { %v8987_v44 = vadd.bf16 %v8980_v12, %v8882_v14  ;;  %v9060_v12 = vld [vmem:[#allocation10 + $0x48] sm:$0xff]  ;;  %v9065_v14 = vld [vmem:[#allocation10 + $0x70] sm:$0xff] }
 0x616   : > { %12056 = vmatpush1.bf16.msra.mxu1 %v19465_v22  ;;  %v9061_v22 = vld [vmem:[#allocation10 + $0x50] sm:$0xff]  ;;  %v19089_v54 = vcombine.low %v9060_v12, %v9064_v4 }
 0x617   : > { %v9001_v36 = vmul.bf16 %v8987_v44, %v8987_v44  ;;  %12084 = vmatprep.subr.bf16.mxu1 %v19140_v62  ;;  %v8994_v37 = vmul.bf16 1056980736, %v8987_v44  ;;  %v19097_v62 = vcombine.low %v9068_v28, %v9072_v30  ;;  %v19091_v63 = vcombine.low %v9061_v22, %v9065_v14  ;;  %v9161_v35 = vld [vmem:[#allocation10 + $0x370] sm:$0xff] }
 0x618   : > { %v9149_v28 = vld [vmem:[#allocation10 + $0x310] sm:$0xff] }
 0x619   : > { %v9008_v33 = vmul.bf16 %v9001_v36, %v8987_v44  ;;  %v19090_v36 = vcombine.high %v9060_v12, %v9064_v4  ;;  %v9153_v30 = vld [vmem:[#allocation10 + $0x330] sm:$0xff] }
 0x61a   : > { %v9141_v12 = vld [vmem:[#allocation10 + $0x2d0] sm:$0xff] }
 0x61b   : > { %v9015_v61 = vmul.bf16 1027030327, %v9008_v33  ;;  %v19092_v33 = vcombine.high %v9061_v22, %v9065_v14  ;;  %v9145_v4 = vld [vmem:[#allocation10 + $0x2f0] sm:$0xff]  ;;  %v19179_v14 = vcombine.low %v9149_v28, %v9153_v30 }
 0x61d   : > { %v9022_v29 = vadd.bf16 %v9015_v61, %v8987_v44  ;;  %v19099_v44 = vcombine.low %v9069_v43, %v9073_v58  ;;  %v9052_v61 = vld [vmem:[#allocation10 + $0x8] sm:$0xff]  ;;  %v19187_v58 = vcombine.low %v9157_v57, %v9161_v35 }
 0x61f   : > { %v9029_v24 = vmul.bf16 1061961548, %v9022_v29  ;;  %v9056_v29 = vld [vmem:[#allocation10 + $0x28] sm:$0xff] }
 0x620   : > { %v19081_v9 = vcombine.low %v9052_v61, %v9056_v29 }
 0x621   : > { %23016 = vtanh.bf16 %v9029_v24  ;;  %v9053_v24 = vld [vmem:[#allocation10 + $0x10] sm:$0xff] }
 0x62f   : > { %v23017_v21 = vpop.eup %23016 }
 0x630   : > { %v9043_v7 = vadd.bf16 1065369472, %v23017_v21  ;;  %v9057_v21 = vld [vmem:[#allocation10 + $0x30] sm:$0xff] }
 0x631   : > { %v19083_v2 = vcombine.low %v9053_v24, %v9057_v21 }
 0x632   : > { %v24559_v42 = vmul.bf16 %v9043_v7, %v8994_v37  ;;  %v19082_v37 = vcombine.high %v9052_v61, %v9056_v29  ;;  %v19084_v7 = vcombine.high %v9053_v24, %v9057_v21  ;;  %v9133_v61 = vld [vmem:[#allocation10 + $0x290] sm:$0xff]  ;;  %v19171_v21 = vcombine.low %v9141_v12, %v9145_v4 }
 0x633   : > { %v9137_v29 = vld [vmem:[#allocation10 + $0x2b0] sm:$0xff] }
 0x634   : > { %11902 = vmatmul.mubr.bf16.vlgmr.msra.gmra.mxu0 %v24559_v42  ;;  %12074 = vmatmul.mubr.bf16.vlgmr.msra.gmra.mxu1 %v24559_v42 }
 0x635   : > { %11913 = vmatpush1.bf16.msra.mxu0 %v19137_v41  ;;  %12085 = vmatpush1.bf16.msra.mxu1 %v19139_v59  ;;  %v19116_v41 = vcombine.high %v9085_v26, %v9089_v56  ;;  %v9173_v59 = vld [vmem:[#allocation10 + $0x3d0] sm:$0xff]  ;;  %v19201_v26 = vcombine.low %v9172_v39, %v9176_v20 }
 0x636   : > { %11944 = vmatprep.mubr.bf16.mxu0 %v24408_v51  ;;  %12116 = vmatprep.mubr.bf16.mxu1 %v24408_v51  ;;  %v19203_v56 = vcombine.low %v9173_v59, %v9177_v25 }
 0x637   : > { %11914 = vmatprep.subr.bf16.mxu0 %v19130_v0  ;;  %12086 = vmatprep.subr.bf16.mxu1 %v19132_v50  ;;  %v11774_v0 = vpop.f32.mrf.mxu1 }
 0x639   : > { %11915 = vmatpush1.bf16.msra.mxu0 %v19129_v5  ;;  %12087 = vmatpush1.bf16.msra.mxu1 %v19131_v6  ;;  %v19202_v5 = vcombine.high %v9172_v39, %v9176_v20  ;;  %v19204_v6 = vcombine.high %v9173_v59, %v9177_v25  ;;  %v9125_v39 = vld [vmem:[#allocation10 + $0x250] sm:$0xff]  ;;  %v19163_v25 = vcombine.low %v9133_v61, %v9137_v29 }
 0x63a   : > { %11916 = vmatprep.subr.bf16.mxu0 %v19122_v17  ;;  %12088 = vmatprep.subr.bf16.mxu1 %v19124_v49  ;;  %v9164_v17 = vld [vmem:[#allocation10 + $0x388] sm:$0xff]  ;;  %v9129_v20 = vld [vmem:[#allocation10 + $0x270] sm:$0xff] }
 0x63b   : > { %v9168_v49 = vld [vmem:[#allocation10 + $0x3a8] sm:$0xff] }
 0x63c   : > { %v19193_v1 = vcombine.low %v9164_v17, %v9168_v49 }
 0x63d   : > { %11917 = vmatpush1.bf16.msra.mxu0 %v19121_v19  ;;  %12089 = vmatpush1.bf16.msra.mxu1 %v19123_v46  ;;  %v19194_v19 = vcombine.high %v9164_v17, %v9168_v49  ;;  %v19196_v46 = vcombine.high %v9165_v27, %v9169_v38  ;;  %v19155_v49 = vcombine.low %v9125_v39, %v9129_v20 }
 0x63e   : > { %11918 = vmatprep.subr.bf16.mxu0 %v19114_v53  ;;  %12090 = vmatprep.subr.bf16.mxu1 %v19116_v41  ;;  %v9156_v53 = vld [vmem:[#allocation10 + $0x348] sm:$0xff] }
 0x63f   : > { %v9160_v41 = vld [vmem:[#allocation10 + $0x368] sm:$0xff] }
 0x640   : > { %v19185_v43 = vcombine.low %v9156_v53, %v9160_v41 }
 0x641   : > { %11919 = vmatpush1.bf16.msra.mxu0 %v19113_v10  ;;  %12091 = vmatpush1.bf16.msra.mxu1 %v19115_v45  ;;  %v19186_v10 = vcombine.high %v9156_v53, %v9160_v41  ;;  %v19188_v45 = vcombine.high %v9157_v57, %v9161_v35 }
 0x642   : > { %11920 = vmatprep.subr.bf16.mxu0 %v19106_v48  ;;  %12092 = vmatprep.subr.bf16.mxu1 %v19108_v52  ;;  %v9148_v48 = vld [vmem:[#allocation10 + $0x308] sm:$0xff] }
 0x643   : > { %v9152_v52 = vld [vmem:[#allocation10 + $0x328] sm:$0xff] }
 0x644   : > { %v19177_v22 = vcombine.low %v9148_v48, %v9152_v52 }
 0x645   : > { %11921 = vmatpush1.bf16.msra.mxu0 %v19105_v23  ;;  %12093 = vmatpush1.bf16.msra.mxu1 %v19107_v16  ;;  %v19178_v23 = vcombine.high %v9148_v48, %v9152_v52  ;;  %v19180_v16 = vcombine.high %v9149_v28, %v9153_v30 }
 0x646   : > { %11922 = vmatprep.subr.bf16.mxu0 %v19098_v13  ;;  %12094 = vmatprep.subr.bf16.mxu1 %v19100_v40  ;;  %v9140_v13 = vld [vmem:[#allocation10 + $0x2c8] sm:$0xff] }
 0x647   : > { %v9144_v40 = vld [vmem:[#allocation10 + $0x2e8] sm:$0xff] }
 0x648   : > { %v19169_v24 = vcombine.low %v9140_v13, %v9144_v40 }
 0x649   : > { %11923 = vmatpush1.bf16.msra.mxu0 %v19097_v62  ;;  %12095 = vmatpush1.bf16.msra.mxu1 %v19099_v44  ;;  %v19170_v62 = vcombine.high %v9140_v13, %v9144_v40  ;;  %v19172_v44 = vcombine.high %v9141_v12, %v9145_v4 }
 0x64a   : > { %11924 = vmatprep.subr.bf16.mxu0 %v19090_v36  ;;  %12096 = vmatprep.subr.bf16.mxu1 %v19092_v33  ;;  %v9132_v36 = vld [vmem:[#allocation10 + $0x288] sm:$0xff] }
 0x64b   : > { %v9136_v33 = vld [vmem:[#allocation10 + $0x2a8] sm:$0xff] }
 0x64c   : > { %v11817_v50 = vpop.f32.mrf.mxu0  ;;  %v19161_v59 = vcombine.low %v9132_v36, %v9136_v33 }
 0x64d   : > { %v24568_v3 = vadd.f32 %v11817_v50, %v11774_v0  ;;  %11925 = vmatpush1.bf16.msra.mxu0 %v19089_v54  ;;  %12097 = vmatpush1.bf16.msra.mxu1 %v19091_v63  ;;  %v19162_v54 = vcombine.high %v9132_v36, %v9136_v33  ;;  %v19164_v63 = vcombine.high %v9133_v61, %v9137_v29 }
 0x64e   : > { %11926 = vmatprep.subr.bf16.mxu0 %v19082_v37  ;;  %12098 = vmatprep.subr.bf16.mxu1 %v19084_v7  ;;  %v9124_v37 = vld [vmem:[#allocation10 + $0x248] sm:$0xff]  ;;  %v19156_v50 = vcombine.high %v9125_v39, %v9129_v20 }
 0x64f   : > { %v9128_v7 = vld [vmem:[#allocation10 + $0x268] sm:$0xff] }
 0x650   : > { %v19154_v0 = vcombine.high %v9124_v37, %v9128_v7  ;;  %v19153_v17 = vcombine.low %v9124_v37, %v9128_v7 }
 0x651   : > { %11927 = vmatpush1.bf16.msra.mxu0 %v19081_v9  ;;  %12099 = vmatpush1.bf16.msra.mxu1 %v19083_v2  ;;  %v9116_v9 = vld [vmem:[#allocation10 + $0x208] sm:$0xff] }
 0x652   : > { %11928 = vmatprep.subr.bf16.mxu0 %v19202_v5  ;;  %12100 = vmatprep.subr.bf16.mxu1 %v19204_v6  ;;  %v9120_v2 = vld [vmem:[#allocation10 + $0x228] sm:$0xff]  ;;  %v9117_v5 = vld [vmem:[#allocation10 + $0x210] sm:$0xff] }
 0x653   : > { %v9121_v6 = vld [vmem:[#allocation10 + $0x230] sm:$0xff]  ;;  %v19146_v27 = vcombine.high %v9116_v9, %v9120_v2  ;;  %v19145_v53 = vcombine.low %v9116_v9, %v9120_v2 }
 0x654   : > { %v19148_v38 = vcombine.high %v9117_v5, %v9121_v6  ;;  %v19147_v41 = vcombine.low %v9117_v5, %v9121_v6 }
 0x655   : > { %11929 = vmatpush2.bf16.msra.mxu0 %v19201_v26  ;;  %12101 = vmatpush2.bf16.msra.mxu1 %v19203_v56  ;;  %v9364_v26 = vld [vmem:[#allocation10 + $0x9c8] sm:$0xff] }
 0x656   : > { %11930 = vmatprep.subr.bf16.mxu0 %v19194_v19  ;;  %12102 = vmatprep.subr.bf16.mxu1 %v19196_v46  ;;  %v9368_v56 = vld [vmem:[#allocation10 + $0x9e8] sm:$0xff]  ;;  %v9365_v19 = vld [vmem:[#allocation10 + $0x9d0] sm:$0xff] }
 0x657   : > { %v9369_v46 = vld [vmem:[#allocation10 + $0x9f0] sm:$0xff]  ;;  %v19394_v57 = vcombine.high %v9364_v26, %v9368_v56  ;;  %v19393_v48 = vcombine.low %v9364_v26, %v9368_v56 }
 0x658   : > { %v19396_v35 = vcombine.high %v9365_v19, %v9369_v46  ;;  %v19395_v52 = vcombine.low %v9365_v19, %v9369_v46 }
 0x659   : > { %11931 = vmatpush2.bf16.msra.mxu0 %v19193_v1  ;;  %12103 = vmatpush2.bf16.msra.mxu1 %v19195_v15  ;;  %v9356_v1 = vld [vmem:[#allocation10 + $0x988] sm:$0xff] }
 0x65a   : > { %11932 = vmatprep.subr.bf16.mxu0 %v19186_v10  ;;  %12104 = vmatprep.subr.bf16.mxu1 %v19188_v45  ;;  %v9360_v15 = vld [vmem:[#allocation10 + $0x9a8] sm:$0xff]  ;;  %v9357_v10 = vld [vmem:[#allocation10 + $0x990] sm:$0xff] }
 0x65b   : > { %v9361_v45 = vld [vmem:[#allocation10 + $0x9b0] sm:$0xff]  ;;  %v19386_v28 = vcombine.high %v9356_v1, %v9360_v15  ;;  %v19385_v13 = vcombine.low %v9356_v1, %v9360_v15 }
 0x65c   : > { %v19388_v30 = vcombine.high %v9357_v10, %v9361_v45  ;;  %v19387_v40 = vcombine.low %v9357_v10, %v9361_v45 }
 0x65d   : > { %11933 = vmatpush2.bf16.msra.mxu0 %v19185_v43  ;;  %12105 = vmatpush2.bf16.msra.mxu1 %v19187_v58  ;;  %v9348_v43 = vld [vmem:[#allocation10 + $0x948] sm:$0xff] }
 0x65e   : > { %11934 = vmatprep.subr.bf16.mxu0 %v19178_v23  ;;  %12106 = vmatprep.subr.bf16.mxu1 %v19180_v16  ;;  %v9352_v58 = vld [vmem:[#allocation10 + $0x968] sm:$0xff]  ;;  %v9349_v23 = vld [vmem:[#allocation10 + $0x950] sm:$0xff] }
 0x65f   : > { %v9353_v16 = vld [vmem:[#allocation10 + $0x970] sm:$0xff]  ;;  %v19378_v12 = vcombine.high %v9348_v43, %v9352_v58  ;;  %v19377_v36 = vcombine.low %v9348_v43, %v9352_v58 }
 0x660   : > { %v19380_v4 = vcombine.high %v9349_v23, %v9353_v16  ;;  %v19379_v33 = vcombine.low %v9349_v23, %v9353_v16 }
 0x661   : > { %11935 = vmatpush2.bf16.msra.mxu0 %v19177_v22  ;;  %12107 = vmatpush2.bf16.msra.mxu1 %v19179_v14  ;;  %v9340_v22 = vld [vmem:[#allocation10 + $0x908] sm:$0xff] }
 0x662   : > { %11936 = vmatprep.subr.bf16.mxu0 %v19170_v62  ;;  %12108 = vmatprep.subr.bf16.mxu1 %v19172_v44  ;;  %v9344_v14 = vld [vmem:[#allocation10 + $0x928] sm:$0xff]  ;;  %v9341_v62 = vld [vmem:[#allocation10 + $0x910] sm:$0xff] }
 0x663   : > { %v9345_v44 = vld [vmem:[#allocation10 + $0x930] sm:$0xff]  ;;  %v19370_v61 = vcombine.high %v9340_v22, %v9344_v14  ;;  %v19369_v37 = vcombine.low %v9340_v22, %v9344_v14 }
 0x664   : > { %v19372_v29 = vcombine.high %v9341_v62, %v9345_v44  ;;  %v19371_v7 = vcombine.low %v9341_v62, %v9345_v44 }
 0x665   : > { %11937 = vmatpush2.bf16.msra.mxu0 %v19169_v24  ;;  %12109 = vmatpush2.bf16.msra.mxu1 %v19171_v21  ;;  %v9332_v24 = vld [vmem:[#allocation10 + $0x8c8] sm:$0xff] }
 0x666   : > { %11938 = vmatprep.subr.bf16.mxu0 %v19162_v54  ;;  %12110 = vmatprep.subr.bf16.mxu1 %v19164_v63  ;;  %v9336_v21 = vld [vmem:[#allocation10 + $0x8e8] sm:$0xff]  ;;  %v9333_v54 = vld [vmem:[#allocation10 + $0x8d0] sm:$0xff] }
 0x667   : > { %v9337_v63 = vld [vmem:[#allocation10 + $0x8f0] sm:$0xff]  ;;  %v19362_v39 = vcombine.high %v9332_v24, %v9336_v21  ;;  %v19361_v9 = vcombine.low %v9332_v24, %v9336_v21 }
 0x668   : > { %v19364_v20 = vcombine.high %v9333_v54, %v9337_v63  ;;  %v19363_v2 = vcombine.low %v9333_v54, %v9337_v63 }
 0x669   : > { %11939 = vmatpush2.bf16.msra.mxu0 %v19161_v59  ;;  %12111 = vmatpush2.bf16.msra.mxu1 %v19163_v25  ;;  %v9324_v59 = vld [vmem:[#allocation10 + $0x888] sm:$0xff] }
 0x66a   : > { %11940 = vmatprep.subr.bf16.mxu0 %v19154_v0  ;;  %12112 = vmatprep.subr.bf16.mxu1 %v19156_v50  ;;  %v9328_v25 = vld [vmem:[#allocation10 + $0x8a8] sm:$0xff]  ;;  %v9325_v0 = vld [vmem:[#allocation10 + $0x890] sm:$0xff] }
 0x66b   : > { %v9329_v50 = vld [vmem:[#allocation10 + $0x8b0] sm:$0xff]  ;;  %v19354_v5 = vcombine.high %v9324_v59, %v9328_v25  ;;  %v19353_v26 = vcombine.low %v9324_v59, %v9328_v25 }
 0x66c   : > { %v19356_v6 = vcombine.high %v9325_v0, %v9329_v50  ;;  %v19355_v56 = vcombine.low %v9325_v0, %v9329_v50 }
 0x66d   : > { %11941 = vmatpush2.bf16.msra.mxu0 %v19153_v17  ;;  %12113 = vmatpush2.bf16.msra.mxu1 %v19155_v49  ;;  %v9316_v17 = vld [vmem:[#allocation10 + $0x848] sm:$0xff] }
 0x66e   : > { %11942 = vmatprep.subr.bf16.mxu0 %v19146_v27  ;;  %12114 = vmatprep.subr.bf16.mxu1 %v19148_v38  ;;  %v9320_v49 = vld [vmem:[#allocation10 + $0x868] sm:$0xff]  ;;  %v9317_v27 = vld [vmem:[#allocation10 + $0x850] sm:$0xff] }
 0x66f   : > { %v9321_v38 = vld [vmem:[#allocation10 + $0x870] sm:$0xff]  ;;  %v19346_v19 = vcombine.high %v9316_v17, %v9320_v49  ;;  %v19345_v1 = vcombine.low %v9316_v17, %v9320_v49 }
 0x670   : > { %v19348_v46 = vcombine.high %v9317_v27, %v9321_v38  ;;  %v19347_v15 = vcombine.low %v9317_v27, %v9321_v38 }
 0x671   : > { %11943 = vmatpush2.bf16.msra.mxu0 %v19145_v53  ;;  %12115 = vmatpush2.bf16.msra.mxu1 %v19147_v41  ;;  %v9308_v53 = vld [vmem:[#allocation10 + $0x808] sm:$0xff] }
 0x672   : > { %11998 = vmatprep.subr.bf16.mxu0 %v19394_v57  ;;  %12170 = vmatprep.subr.bf16.mxu1 %v19396_v35  ;;  %v9312_v41 = vld [vmem:[#allocation10 + $0x828] sm:$0xff]  ;;  %v9309_v57 = vld [vmem:[#allocation10 + $0x810] sm:$0xff] }
 0x673   : > { %v9313_v35 = vld [vmem:[#allocation10 + $0x830] sm:$0xff]  ;;  %v19338_v10 = vcombine.high %v9308_v53, %v9312_v41  ;;  %v19337_v43 = vcombine.low %v9308_v53, %v9312_v41 }
 0x674   : > { %11945 = vmatmul.mubr.bf16.vlgmr.msra.gmra.mxu0 %v24449_v31  ;;  %12117 = vmatmul.mubr.bf16.vlgmr.msra.gmra.mxu1 %v24449_v31  ;;  %v19340_v45 = vcombine.high %v9309_v57, %v9313_v35  ;;  %v19339_v58 = vcombine.low %v9309_v57, %v9313_v35 }
 0x675   : > { %11999 = vmatpush1.bf16.msra.mxu0 %v19393_v48  ;;  %12030 = vmatprep.mubr.bf16.mxu0 %v24523_v55  ;;  %v9428_v48 = vld [vmem:[#allocation10 + $0xbc8] sm:$0xff] }
 0x676   : > { %12171 = vmatpush1.bf16.msra.mxu1 %v19395_v52  ;;  %12202 = vmatprep.mubr.bf16.mxu1 %v24523_v55  ;;  %v9432_v52 = vld [vmem:[#allocation10 + $0xbe8] sm:$0xff] }
 0x677   : > { %12000 = vmatprep.subr.bf16.mxu0 %v19386_v28  ;;  %12172 = vmatprep.subr.bf16.mxu1 %v19388_v30  ;;  %v9429_v28 = vld [vmem:[#allocation10 + $0xbd0] sm:$0xff]  ;;  %v19458_v23 = vcombine.high %v9428_v48, %v9432_v52  ;;  %v19457_v22 = vcombine.low %v9428_v48, %v9432_v52 }
 0x678   : > { %v9433_v30 = vld [vmem:[#allocation10 + $0xbf0] sm:$0xff] }
 0x679   : > { %12001 = vmatpush1.bf16.msra.mxu0 %v19385_v13  ;;  %v19460_v16 = vcombine.high %v9429_v28, %v9433_v30  ;;  %v9420_v13 = vld [vmem:[#allocation10 + $0xb88] sm:$0xff]  ;;  %v19459_v14 = vcombine.low %v9429_v28, %v9433_v30 }
 0x67a   : > { %12173 = vmatpush1.bf16.msra.mxu1 %v19387_v40  ;;  %12002 = vmatprep.subr.bf16.mxu0 %v19378_v12  ;;  %v9424_v40 = vld [vmem:[#allocation10 + $0xba8] sm:$0xff]  ;;  %v9421_v12 = vld [vmem:[#allocation10 + $0xb90] sm:$0xff] }
 0x67b   : > { %12174 = vmatprep.subr.bf16.mxu1 %v19380_v4  ;;  %v9425_v4 = vld [vmem:[#allocation10 + $0xbb0] sm:$0xff]  ;;  %v19450_v62 = vcombine.high %v9420_v13, %v9424_v40  ;;  %v19449_v24 = vcombine.low %v9420_v13, %v9424_v40 }
 0x67c   : > { %v19452_v44 = vcombine.high %v9421_v12, %v9425_v4  ;;  %v19451_v21 = vcombine.low %v9421_v12, %v9425_v4 }
 0x67d   : > { %12003 = vmatpush1.bf16.msra.mxu0 %v19377_v36  ;;  %v9412_v36 = vld [vmem:[#allocation10 + $0xb48] sm:$0xff] }
 0x67e   : > { %12175 = vmatpush1.bf16.msra.mxu1 %v19379_v33  ;;  %12004 = vmatprep.subr.bf16.mxu0 %v19370_v61  ;;  %v9416_v33 = vld [vmem:[#allocation10 + $0xb68] sm:$0xff]  ;;  %v9413_v61 = vld [vmem:[#allocation10 + $0xb50] sm:$0xff] }
 0x67f   : > { %12176 = vmatprep.subr.bf16.mxu1 %v19372_v29  ;;  %v9417_v29 = vld [vmem:[#allocation10 + $0xb70] sm:$0xff]  ;;  %v19442_v54 = vcombine.high %v9412_v36, %v9416_v33  ;;  %v19441_v59 = vcombine.low %v9412_v36, %v9416_v33 }
 0x680   : > { %v19444_v63 = vcombine.high %v9413_v61, %v9417_v29  ;;  %v19443_v25 = vcombine.low %v9413_v61, %v9417_v29 }
 0x681   : > { %12005 = vmatpush1.bf16.msra.mxu0 %v19369_v37  ;;  %v9404_v37 = vld [vmem:[#allocation10 + $0xb08] sm:$0xff] }
 0x682   : > { %12177 = vmatpush1.bf16.msra.mxu1 %v19371_v7  ;;  %12006 = vmatprep.subr.bf16.mxu0 %v19362_v39  ;;  %v9408_v7 = vld [vmem:[#allocation10 + $0xb28] sm:$0xff]  ;;  %v9405_v39 = vld [vmem:[#allocation10 + $0xb10] sm:$0xff] }
 0x683   : > { %12178 = vmatprep.subr.bf16.mxu1 %v19364_v20  ;;  %v9409_v20 = vld [vmem:[#allocation10 + $0xb30] sm:$0xff]  ;;  %v19434_v0 = vcombine.high %v9404_v37, %v9408_v7  ;;  %v19433_v17 = vcombine.low %v9404_v37, %v9408_v7  ;;  %v9234_v37 = vld [vmem:[#allocation10 + $0x5b8] sm:$0xff] }
 0x684   : > { %v19436_v50 = vcombine.high %v9405_v39, %v9409_v20  ;;  %v19435_v49 = vcombine.low %v9405_v39, %v9409_v20  ;;  %v9221_v20 = vld [vmem:[#allocation10 + $0x550] sm:$0xff] }
 0x685   : > { %12007 = vmatpush1.bf16.msra.mxu0 %v19361_v9  ;;  %v9396_v9 = vld [vmem:[#allocation10 + $0xac8] sm:$0xff] }
 0x686   : > { %12179 = vmatpush1.bf16.msra.mxu1 %v19363_v2  ;;  %12008 = vmatprep.subr.bf16.mxu0 %v19354_v5  ;;  %v9400_v2 = vld [vmem:[#allocation10 + $0xae8] sm:$0xff]  ;;  %v9397_v5 = vld [vmem:[#allocation10 + $0xad0] sm:$0xff] }
 0x687   : > { %12180 = vmatprep.subr.bf16.mxu1 %v19356_v6  ;;  %v9401_v6 = vld [vmem:[#allocation10 + $0xaf0] sm:$0xff]  ;;  %v19426_v27 = vcombine.high %v9396_v9, %v9400_v2  ;;  %v19425_v53 = vcombine.low %v9396_v9, %v9400_v2 }
 0x688   : > { %v19428_v38 = vcombine.high %v9397_v5, %v9401_v6  ;;  %v19427_v41 = vcombine.low %v9397_v5, %v9401_v6 }
 0x689   : > { %12009 = vmatpush1.bf16.msra.mxu0 %v19353_v26  ;;  %v9388_v26 = vld [vmem:[#allocation10 + $0xa88] sm:$0xff] }
 0x68a   : > { %12181 = vmatpush1.bf16.msra.mxu1 %v19355_v56  ;;  %12010 = vmatprep.subr.bf16.mxu0 %v19346_v19  ;;  %v9392_v56 = vld [vmem:[#allocation10 + $0xaa8] sm:$0xff]  ;;  %v9389_v19 = vld [vmem:[#allocation10 + $0xa90] sm:$0xff] }
 0x68b   : > { %12182 = vmatprep.subr.bf16.mxu1 %v19348_v46  ;;  %v9393_v46 = vld [vmem:[#allocation10 + $0xab0] sm:$0xff]  ;;  %v19418_v57 = vcombine.high %v9388_v26, %v9392_v56  ;;  %v19417_v48 = vcombine.low %v9388_v26, %v9392_v56 }
 0x68c   : > { %v19420_v35 = vcombine.high %v9389_v19, %v9393_v46  ;;  %v19419_v52 = vcombine.low %v9389_v19, %v9393_v46 }
 0x68d   : > { %12011 = vmatpush1.bf16.msra.mxu0 %v19345_v1  ;;  %v9380_v1 = vld [vmem:[#allocation10 + $0xa48] sm:$0xff] }
 0x68e   : > { %12183 = vmatpush1.bf16.msra.mxu1 %v19347_v15  ;;  %12012 = vmatprep.subr.bf16.mxu0 %v19338_v10  ;;  %v9384_v15 = vld [vmem:[#allocation10 + $0xa68] sm:$0xff]  ;;  %v9381_v10 = vld [vmem:[#allocation10 + $0xa50] sm:$0xff] }
 0x68f   : > { %12184 = vmatprep.subr.bf16.mxu1 %v19340_v45  ;;  %v9385_v45 = vld [vmem:[#allocation10 + $0xa70] sm:$0xff]  ;;  %v19410_v28 = vcombine.high %v9380_v1, %v9384_v15  ;;  %v19409_v13 = vcombine.low %v9380_v1, %v9384_v15 }
 0x690   : > { %v19412_v30 = vcombine.high %v9381_v10, %v9385_v45  ;;  %v19411_v40 = vcombine.low %v9381_v10, %v9385_v45  ;;  %v9197_v45 = vld [vmem:[#allocation10 + $0x490] sm:$0xff] }
 0x691   : > { %12013 = vmatpush1.bf16.msra.mxu0 %v19337_v43  ;;  %v9372_v43 = vld [vmem:[#allocation10 + $0xa08] sm:$0xff] }
 0x692   : > { %12185 = vmatpush1.bf16.msra.mxu1 %v19339_v58  ;;  %12014 = vmatprep.subr.bf16.mxu0 %v19458_v23  ;;  %v9376_v58 = vld [vmem:[#allocation10 + $0xa28] sm:$0xff]  ;;  %v9373_v23 = vld [vmem:[#allocation10 + $0xa10] sm:$0xff] }
 0x693   : > { %12186 = vmatprep.subr.bf16.mxu1 %v19460_v16  ;;  %v9377_v16 = vld [vmem:[#allocation10 + $0xa30] sm:$0xff]  ;;  %v19402_v12 = vcombine.high %v9372_v43, %v9376_v58  ;;  %v19401_v36 = vcombine.low %v9372_v43, %v9376_v58 }
 0x694   : > { %v19404_v4 = vcombine.high %v9373_v23, %v9377_v16  ;;  %v19403_v33 = vcombine.low %v9373_v23, %v9377_v16  ;;  %v9189_v16 = vld [vmem:[#allocation10 + $0x450] sm:$0xff] }
 0x695   : > { %12015 = vmatpush2.bf16.msra.mxu0 %v19457_v22  ;;  %v9237_v22 = vld [vmem:[#allocation10 + $0x5d0] sm:$0xff] }
 0x696   : > { %12187 = vmatpush2.bf16.msra.mxu1 %v19459_v14  ;;  %12016 = vmatprep.subr.bf16.mxu0 %v19450_v62  ;;  %v9241_v14 = vld [vmem:[#allocation10 + $0x5f0] sm:$0xff]  ;;  %v9238_v62 = vld [vmem:[#allocation10 + $0x5d8] sm:$0xff] }
 0x697   : > { %12188 = vmatprep.subr.bf16.mxu1 %v19452_v44  ;;  %v9242_v44 = vld [vmem:[#allocation10 + $0x5f8] sm:$0xff]  ;;  %v19268_v61 = vcombine.high %v9237_v22, %v9241_v14 }
 0x698   : > { %v19270_v29 = vcombine.high %v9238_v62, %v9242_v44  ;;  %v19269_v7 = vcombine.low %v9238_v62, %v9242_v44  ;;  %v9181_v44 = vld [vmem:[#allocation10 + $0x410] sm:$0xff] }
 0x699   : > { %12017 = vmatpush2.bf16.msra.mxu0 %v19449_v24  ;;  %v9229_v24 = vld [vmem:[#allocation10 + $0x590] sm:$0xff] }
 0x69a   : > { %12189 = vmatpush2.bf16.msra.mxu1 %v19451_v21  ;;  %12018 = vmatprep.subr.bf16.mxu0 %v19442_v54  ;;  %v9233_v21 = vld [vmem:[#allocation10 + $0x5b0] sm:$0xff]  ;;  %v19267_v54 = vcombine.low %v9237_v22, %v9241_v14 }
 0x69b   : > { %12190 = vmatprep.subr.bf16.mxu1 %v19444_v63  ;;  %v9230_v63 = vld [vmem:[#allocation10 + $0x598] sm:$0xff]  ;;  %v19260_v39 = vcombine.high %v9229_v24, %v9233_v21  ;;  %v19259_v9 = vcombine.low %v9229_v24, %v9233_v21 }
 0x69c   : > { %v19261_v2 = vcombine.low %v9230_v63, %v9234_v37 }
 0x69d   : > { %12019 = vmatpush2.bf16.msra.mxu0 %v19441_v59  ;;  %v9225_v59 = vld [vmem:[#allocation10 + $0x570] sm:$0xff] }
 0x69e   : > { %12191 = vmatpush2.bf16.msra.mxu1 %v19443_v25  ;;  %12020 = vmatprep.subr.bf16.mxu0 %v19434_v0  ;;  %v19262_v25 = vcombine.high %v9230_v63, %v9234_v37  ;;  %v9222_v0 = vld [vmem:[#allocation10 + $0x558] sm:$0xff]  ;;  %v19252_v5 = vcombine.high %v9221_v20, %v9225_v59  ;;  %v19251_v26 = vcombine.low %v9221_v20, %v9225_v59  ;;  %v9301_v63 = vld [vmem:[#allocation10 + $0x7d0] sm:$0xff] }
 0x69f   : > { %12192 = vmatprep.subr.bf16.mxu1 %v19436_v50  ;;  %v9226_v50 = vld [vmem:[#allocation10 + $0x578] sm:$0xff]  ;;  %v9305_v37 = vld [vmem:[#allocation10 + $0x7f0] sm:$0xff] }
 0x6a0   : > { %v19254_v6 = vcombine.high %v9222_v0, %v9226_v50  ;;  %v19253_v56 = vcombine.low %v9222_v0, %v9226_v50  ;;  %v9293_v50 = vld [vmem:[#allocation10 + $0x790] sm:$0xff] }
 0x6a1   : > { %12021 = vmatpush2.bf16.msra.mxu0 %v19433_v17  ;;  %v9213_v17 = vld [vmem:[#allocation10 + $0x510] sm:$0xff] }
 0x6a2   : > { %12193 = vmatpush2.bf16.msra.mxu1 %v19435_v49  ;;  %12022 = vmatprep.subr.bf16.mxu0 %v19426_v27  ;;  %v9217_v49 = vld [vmem:[#allocation10 + $0x530] sm:$0xff]  ;;  %v9214_v27 = vld [vmem:[#allocation10 + $0x518] sm:$0xff] }
 0x6a3   : > { %12194 = vmatprep.subr.bf16.mxu1 %v19428_v38  ;;  %v9218_v38 = vld [vmem:[#allocation10 + $0x538] sm:$0xff]  ;;  %v19244_v19 = vcombine.high %v9213_v17, %v9217_v49 }
 0x6a4   : > { %v19246_v46 = vcombine.high %v9214_v27, %v9218_v38  ;;  %v19245_v1 = vcombine.low %v9214_v27, %v9218_v38  ;;  %v9285_v38 = vld [vmem:[#allocation10 + $0x750] sm:$0xff] }
 0x6a5   : > { %12023 = vmatpush2.bf16.msra.mxu0 %v19425_v53  ;;  %v9205_v53 = vld [vmem:[#allocation10 + $0x4d0] sm:$0xff] }
 0x6a6   : > { %12195 = vmatpush2.bf16.msra.mxu1 %v19427_v41  ;;  %12024 = vmatprep.subr.bf16.mxu0 %v19418_v57  ;;  %v9209_v41 = vld [vmem:[#allocation10 + $0x4f0] sm:$0xff]  ;;  %v9206_v57 = vld [vmem:[#allocation10 + $0x4d8] sm:$0xff] }
 0x6a7   : > { %12196 = vmatprep.subr.bf16.mxu1 %v19420_v35  ;;  %v9210_v35 = vld [vmem:[#allocation10 + $0x4f8] sm:$0xff]  ;;  %v19236_v15 = vcombine.high %v9205_v53, %v9209_v41 }
 0x6a8   : > { %v19238_v10 = vcombine.high %v9206_v57, %v9210_v35  ;;  %v19237_v43 = vcombine.low %v9206_v57, %v9210_v35  ;;  %v9277_v35 = vld [vmem:[#allocation10 + $0x710] sm:$0xff] }
 0x6a9   : > { %12025 = vmatpush2.bf16.msra.mxu0 %v19417_v48  ;;  %v9201_v48 = vld [vmem:[#allocation10 + $0x4b0] sm:$0xff] }
 0x6aa   : > { %12197 = vmatpush2.bf16.msra.mxu1 %v19419_v52  ;;  %12026 = vmatprep.subr.bf16.mxu0 %v19410_v28  ;;  %v9198_v52 = vld [vmem:[#allocation10 + $0x498] sm:$0xff]  ;;  %v19228_v58 = vcombine.high %v9197_v45, %v9201_v48 }
 0x6ab   : > { %12198 = vmatprep.subr.bf16.mxu1 %v19412_v30  ;;  %v9202_v28 = vld [vmem:[#allocation10 + $0x4b8] sm:$0xff]  ;;  %v19235_v30 = vcombine.low %v9205_v53, %v9209_v41 }
 0x6ac   : > { %v19230_v23 = vcombine.high %v9198_v52, %v9202_v28  ;;  %v19229_v22 = vcombine.low %v9198_v52, %v9202_v28  ;;  %v9269_v28 = vld [vmem:[#allocation10 + $0x6d0] sm:$0xff] }
 0x6ad   : > { %12027 = vmatpush2.bf16.msra.mxu0 %v19409_v13  ;;  %v9193_v13 = vld [vmem:[#allocation10 + $0x470] sm:$0xff] }
 0x6ae   : > { %12199 = vmatpush2.bf16.msra.mxu1 %v19411_v40  ;;  %12028 = vmatprep.subr.bf16.mxu0 %v19402_v12  ;;  %v9190_v40 = vld [vmem:[#allocation10 + $0x458] sm:$0xff]  ;;  %v19220_v14 = vcombine.high %v9189_v16, %v9193_v13 }
 0x6af   : > { %12200 = vmatprep.subr.bf16.mxu1 %v19404_v4  ;;  %v9194_v12 = vld [vmem:[#allocation10 + $0x478] sm:$0xff]  ;;  %v19227_v4 = vcombine.low %v9197_v45, %v9201_v48 }
 0x6b0   : > { %v19222_v62 = vcombine.high %v9190_v40, %v9194_v12  ;;  %v19221_v24 = vcombine.low %v9190_v40, %v9194_v12  ;;  %v9261_v12 = vld [vmem:[#allocation10 + $0x690] sm:$0xff] }
 0x6b1   : > { %12029 = vmatpush2.bf16.msra.mxu0 %v19401_v36  ;;  %v9185_v36 = vld [vmem:[#allocation10 + $0x430] sm:$0xff] }
 0x6b2   : > { %12201 = vmatpush2.bf16.msra.mxu1 %v19403_v33  ;;  %12127 = vmatprep.subr.bf16.mxu0 %v19268_v61  ;;  %v9182_v33 = vld [vmem:[#allocation10 + $0x418] sm:$0xff]  ;;  %v19212_v21 = vcombine.high %v9181_v44, %v9185_v36  ;;  %v19211_v20 = vcombine.low %v9181_v44, %v9185_v36 }
 0x6b3   : > { %12299 = vmatprep.subr.bf16.mxu1 %v19270_v29  ;;  %v9186_v61 = vld [vmem:[#allocation10 + $0x438] sm:$0xff]  ;;  %v19219_v29 = vcombine.low %v9189_v16, %v9193_v13 }
 0x6b4   : > { %12031 = vmatmul.mubr.bf16.vlgmr.msra.gmra.mxu0 %v24525_v11  ;;  %v19213_v59 = vcombine.low %v9182_v33, %v9186_v61 }
 0x6b5   : > { %12203 = vmatmul.mubr.bf16.vlgmr.msra.gmra.mxu1 %v24525_v11  ;;  %12128 = vmatpush1.bf16.msra.mxu0 %v19267_v54  ;;  %v19214_v54 = vcombine.high %v9182_v33, %v9186_v61 }
 0x6b6   : > { %12159 = vmatprep.mubr.bf16.mxu0 %v24426_v60  ;;  %12300 = vmatpush1.bf16.msra.mxu1 %v19269_v7  ;;  %v9302_v7 = vld [vmem:[#allocation10 + $0x7d8] sm:$0xff] }
 0x6b7   : > { %12331 = vmatprep.mubr.bf16.mxu1 %v24426_v60  ;;  %12129 = vmatprep.subr.bf16.mxu0 %v19260_v39  ;;  %v19243_v60 = vcombine.low %v9213_v17, %v9217_v49  ;;  %v9306_v39 = vld [vmem:[#allocation10 + $0x7f8] sm:$0xff] }
 0x6b8   : > { %12301 = vmatprep.subr.bf16.mxu1 %v19262_v25  ;;  %v19332_v25 = vcombine.high %v9301_v63, %v9305_v37  ;;  %v19334_v0 = vcombine.high %v9302_v7, %v9306_v39  ;;  %v19333_v17 = vcombine.low %v9302_v7, %v9306_v39 }
 0x6b9   : > { %12130 = vmatpush1.bf16.msra.mxu0 %v19259_v9  ;;  %v9297_v9 = vld [vmem:[#allocation10 + $0x7b0] sm:$0xff] }
 0x6ba   : > { %12302 = vmatpush1.bf16.msra.mxu1 %v19261_v2  ;;  %12131 = vmatprep.subr.bf16.mxu0 %v19252_v5  ;;  %v9294_v2 = vld [vmem:[#allocation10 + $0x798] sm:$0xff]  ;;  %v19324_v49 = vcombine.high %v9293_v50, %v9297_v9 }
 0x6bb   : > { %12303 = vmatprep.subr.bf16.mxu1 %v19254_v6  ;;  %v9298_v5 = vld [vmem:[#allocation10 + $0x7b8] sm:$0xff]  ;;  %v19331_v6 = vcombine.low %v9301_v63, %v9305_v37 }
 0x6bc   : > { %v19326_v27 = vcombine.high %v9294_v2, %v9298_v5  ;;  %v19325_v53 = vcombine.low %v9294_v2, %v9298_v5  ;;  %v9258_v63 = vld [vmem:[#allocation10 + $0x678] sm:$0xff]  ;;  %v24582_v2 = vld.sshfl [vmem:[#allocation12] sm:$0xff pattern:$0x75316420] }
 0x6bd   : > { %12132 = vmatpush1.bf16.msra.mxu0 %v19251_v26  ;;  %v9289_v26 = vld [vmem:[#allocation10 + $0x770] sm:$0xff] }
 0x6be   : > { %12304 = vmatpush1.bf16.msra.mxu1 %v19253_v56  ;;  %12133 = vmatprep.subr.bf16.mxu0 %v19244_v19  ;;  %v9286_v56 = vld [vmem:[#allocation10 + $0x758] sm:$0xff]  ;;  %v19316_v41 = vcombine.high %v9285_v38, %v9289_v26 }
 0x6bf   : > { %12305 = vmatprep.subr.bf16.mxu1 %v19246_v46  ;;  %v9290_v19 = vld [vmem:[#allocation10 + $0x778] sm:$0xff]  ;;  %v19323_v46 = vcombine.low %v9293_v50, %v9297_v9 }
 0x6c0   : > { %v19318_v57 = vcombine.high %v9286_v56, %v9290_v19  ;;  %v19317_v45 = vcombine.low %v9286_v56, %v9290_v19  ;;  %v9246_v50 = vld [vmem:[#allocation10 + $0x618] sm:$0xff]  ;;  %v9497_v56 = vld [vmem:[#allocation10 + $0xdf0] sm:$0xff] }
 0x6c1   : > { %12134 = vmatpush1.bf16.msra.mxu0 %v19243_v60  ;;  %v9281_v60 = vld [vmem:[#allocation10 + $0x730] sm:$0xff]  ;;  %v9250_v9 = vld [vmem:[#allocation10 + $0x638] sm:$0xff] }
 0x6c2   : > { %12306 = vmatpush1.bf16.msra.mxu1 %v19245_v1  ;;  %12135 = vmatprep.subr.bf16.mxu0 %v19236_v15  ;;  %v9278_v1 = vld [vmem:[#allocation10 + $0x718] sm:$0xff]  ;;  %v19308_v48 = vcombine.high %v9277_v35, %v9281_v60 }
 0x6c3   : > { %12307 = vmatprep.subr.bf16.mxu1 %v19238_v10  ;;  %v9282_v15 = vld [vmem:[#allocation10 + $0x738] sm:$0xff]  ;;  %v19315_v10 = vcombine.low %v9285_v38, %v9289_v26  ;;  %v19278_v38 = vcombine.high %v9246_v50, %v9250_v9  ;;  %v9493_v26 = vld [vmem:[#allocation10 + $0xdd0] sm:$0xff] }
 0x6c4   : > { %v19310_v52 = vcombine.high %v9278_v1, %v9282_v15  ;;  %v19309_v16 = vcombine.low %v9278_v1, %v9282_v15  ;;  %v9494_v19 = vld [vmem:[#allocation10 + $0xdd8] sm:$0xff]  ;;  %v9485_v15 = vld [vmem:[#allocation10 + $0xd90] sm:$0xff] }
 0x6c5   : > { %12136 = vmatpush1.bf16.msra.mxu0 %v19235_v30  ;;  %v9273_v30 = vld [vmem:[#allocation10 + $0x6f0] sm:$0xff] }
 0x6c6   : > { %12308 = vmatpush1.bf16.msra.mxu1 %v19237_v43  ;;  %12137 = vmatprep.subr.bf16.mxu0 %v19228_v58  ;;  %v9270_v43 = vld [vmem:[#allocation10 + $0x6d8] sm:$0xff]  ;;  %v19300_v13 = vcombine.high %v9269_v28, %v9273_v30  ;;  %v19299_v44 = vcombine.low %v9269_v28, %v9273_v30  ;;  %v19523_v28 = vcombine.low %v9493_v26, %v9497_v56 }
 0x6c7   : > { %12309 = vmatprep.subr.bf16.mxu1 %v19230_v23  ;;  %v9274_v58 = vld [vmem:[#allocation10 + $0x6f8] sm:$0xff]  ;;  %v19307_v23 = vcombine.low %v9277_v35, %v9281_v60  ;;  %v19277_v35 = vcombine.low %v9246_v50, %v9250_v9  ;;  %v19524_v60 = vcombine.high %v9493_v26, %v9497_v56  ;;  %v9461_v26 = vld [vmem:[#allocation10 + $0xcd0] sm:$0xff] }
 0x6c8   : > { %v19302_v40 = vcombine.high %v9270_v43, %v9274_v58  ;;  %v19301_v36 = vcombine.low %v9270_v43, %v9274_v58  ;;  %v9465_v56 = vld [vmem:[#allocation10 + $0xcf0] sm:$0xff] }
 0x6c9   : > { %12138 = vmatpush1.bf16.msra.mxu0 %v19227_v4  ;;  %v9265_v4 = vld [vmem:[#allocation10 + $0x6b0] sm:$0xff] }
 0x6ca   : > { %12310 = vmatpush1.bf16.msra.mxu1 %v19229_v22  ;;  %12139 = vmatprep.subr.bf16.mxu0 %v19220_v14  ;;  %v24578_v22 = vpop.f32.mrf.mxu1  ;;  %v9262_v14 = vld [vmem:[#allocation10 + $0x698] sm:$0xff]  ;;  %v19292_v33 = vcombine.high %v9261_v12, %v9265_v4  ;;  %v19291_v37 = vcombine.low %v9261_v12, %v9265_v4  ;;  %v9481_v12 = vld [vmem:[#allocation10 + $0xd70] sm:$0xff] }
 0x6cb   : > { %12311 = vmatprep.subr.bf16.mxu1 %v19222_v62  ;;  %v9266_v62 = vld [vmem:[#allocation10 + $0x6b8] sm:$0xff] }
 0x6cc   : > { %v19294_v61 = vcombine.high %v9262_v14, %v9266_v62  ;;  %v19293_v7 = vcombine.low %v9262_v14, %v9266_v62  ;;  %v9478_v14 = vld [vmem:[#allocation10 + $0xd58] sm:$0xff] }
 0x6cd   : > { %12140 = vmatpush1.bf16.msra.mxu0 %v19219_v29  ;;  %v9253_v29 = vld [vmem:[#allocation10 + $0x650] sm:$0xff]  ;;  %v9482_v62 = vld [vmem:[#allocation10 + $0xd78] sm:$0xff] }
 0x6ce   : > { %12312 = vmatpush1.bf16.msra.mxu1 %v19221_v24  ;;  %12141 = vmatprep.subr.bf16.mxu0 %v19212_v21  ;;  %v9257_v24 = vld [vmem:[#allocation10 + $0x670] sm:$0xff]  ;;  %v24580_v21 = vpop.f32.mrf.mxu1  ;;  %v19509_v9 = vcombine.low %v9478_v14, %v9482_v62 }
 0x6cf   : > { %12313 = vmatprep.subr.bf16.mxu1 %v19214_v54  ;;  %v9254_v54 = vld [vmem:[#allocation10 + $0x658] sm:$0xff]  ;;  %v19284_v39 = vcombine.high %v9253_v29, %v9257_v24  ;;  %v19283_v5 = vcombine.low %v9253_v29, %v9257_v24 }
 0x6d1   : > { %12142 = vmatpush1.bf16.msra.mxu0 %v19211_v20  ;;  %v19286_v20 = vcombine.high %v9254_v54, %v9258_v63 }
 0x6d2   : > { %12314 = vmatpush1.bf16.msra.mxu1 %v19213_v59  ;;  %12143 = vmatprep.subr.bf16.mxu0 %v19332_v25  ;;  %v9245_v59 = vld [vmem:[#allocation10 + $0x610] sm:$0xff] }
 0x6d3   : > { %12315 = vmatprep.subr.bf16.mxu1 %v19334_v0  ;;  %v9249_v25 = vld [vmem:[#allocation10 + $0x630] sm:$0xff]  ;;  %v11780_v0 = vpop.f32.mrf.mxu1 }
 0x6d5   : > { %12144 = vmatpush2.bf16.msra.mxu0 %v19331_v6  ;;  %v11819_v6 = vpop.f32.mrf.mxu0 }
 0x6d6   : > { %12316 = vmatpush2.bf16.msra.mxu1 %v19333_v17  ;;  %12145 = vmatprep.subr.bf16.mxu0 %v19324_v49  ;;  %v24584_v17 = vpop.f32.mrf.mxu1  ;;  %v19285_v49 = vcombine.low %v9254_v54, %v9258_v63 }
 0x6d7   : > { %12317 = vmatprep.subr.bf16.mxu1 %v19326_v27  ;;  %v19276_v27 = vcombine.high %v9245_v59, %v9249_v25 }
 0x6d9   : > { %12146 = vmatpush2.bf16.msra.mxu0 %v19323_v46  ;;  %v9498_v46 = vld [vmem:[#allocation10 + $0xdf8] sm:$0xff] }
 0x6da   : > { %12318 = vmatpush2.bf16.msra.mxu1 %v19325_v53  ;;  %12147 = vmatprep.subr.bf16.mxu0 %v19316_v41  ;;  %v19275_v53 = vcombine.low %v9245_v59, %v9249_v25  ;;  %v24586_v41 = vpop.f32.mrf.mxu0  ;;  %v19526_v1 = vcombine.high %v9494_v19, %v9498_v46  ;;  %v19525_v58 = vcombine.low %v9494_v19, %v9498_v46  ;;  %v9462_v19 = vld [vmem:[#allocation10 + $0xcd8] sm:$0xff] }
 0x6db   : > { %12319 = vmatprep.subr.bf16.mxu1 %v19318_v57  ;;  %v11862_v57 = vpop.f32.mrf.mxu1  ;;  %v9466_v46 = vld [vmem:[#allocation10 + $0xcf8] sm:$0xff] }
 0x6dc   : > { %v11823_v30 = vpop.f32.mrf.mxu0 }
 0x6dd   : > { %12148 = vmatpush2.bf16.msra.mxu0 %v19315_v10  ;;  %v9489_v10 = vld [vmem:[#allocation10 + $0xdb0] sm:$0xff]  ;;  %v24590_v43 = vpop.f32.mrf.mxu1  ;;  %v11824_v54 = vadd.f32 %v11823_v30, %v11780_v0  ;;  %v19491_v30 = vcombine.low %v9461_v26, %v9465_v56 }
 0x6de   : > { %12320 = vmatpush2.bf16.msra.mxu1 %v19317_v45  ;;  %12149 = vmatprep.subr.bf16.mxu0 %v19308_v48  ;;  %v12452_v45 = vcombine.high %v24582_v2, %v24582_v2  ;;  %v9486_v48 = vld [vmem:[#allocation10 + $0xd98] sm:$0xff] }
 0x6df   : > { %12321 = vmatprep.subr.bf16.mxu1 %v19310_v52  ;;  %v9490_v52 = vld [vmem:[#allocation10 + $0xdb8] sm:$0xff] }
 0x6e0   : > { %v19517_v29 = vcombine.low %v9486_v48, %v9490_v52 }
 0x6e1   : > { %12150 = vmatpush2.bf16.msra.mxu0 %v19307_v23  ;;  %v19516_v23 = vcombine.high %v9485_v15, %v9489_v10 }
 0x6e2   : > { %12322 = vmatpush2.bf16.msra.mxu1 %v19309_v16  ;;  %12151 = vmatprep.subr.bf16.mxu0 %v19300_v13  ;;  %v19518_v16 = vcombine.high %v9486_v48, %v9490_v52  ;;  %v24593_v13 = vrot.slane %v12452_v45, %v23974_v8  ;;  %v9457_v45 = vld [vmem:[#allocation10 + $0xcb0] sm:$0xff]  ;;  %v9454_v48 = vld [vmem:[#allocation10 + $0xc98] sm:$0xff] }
 0x6e3   : > { %12323 = vmatprep.subr.bf16.mxu1 %v19302_v40  ;;  %v9477_v40 = vld [vmem:[#allocation10 + $0xd50] sm:$0xff]  ;;  %v9458_v52 = vld [vmem:[#allocation10 + $0xcb8] sm:$0xff] }
 0x6e4   : > { %v19508_v24 = vcombine.high %v9477_v40, %v9481_v12  ;;  %v12494_v63 = vpack.i.b16 %v24593_v13, %v24593_v13  ;;  %v19507_v50 = vcombine.low %v9477_v40, %v9481_v12  ;;  %v19486_v40 = vcombine.high %v9454_v48, %v9458_v52  ;;  %v9445_v12 = vld [vmem:[#allocation10 + $0xc50] sm:$0xff] }
 0x6e5   : > { %12152 = vmatpush2.bf16.msra.mxu0 %v19299_v44  ;;  %v19515_v44 = vcombine.low %v9485_v15, %v9489_v10  ;;  %v19494_v15 = vcombine.high %v9462_v19, %v9466_v46  ;;  %v9453_v10 = vld [vmem:[#allocation10 + $0xc90] sm:$0xff] }
 0x6e6   : > { %12324 = vmatpush2.bf16.msra.mxu1 %v19301_v36  ;;  %12153 = vmatprep.subr.bf16.mxu0 %v19292_v33  ;;  %v11820_v36 = vadd.f32 %v11819_v6, %v24578_v22  ;;  %v11866_v33 = vpop.f32.mrf.mxu1  ;;  %v9474_v22 = vld [vmem:[#allocation10 + $0xd38] sm:$0xff] }
 0x6e7   : > { %12325 = vmatprep.subr.bf16.mxu1 %v19294_v61  ;;  %v11867_v25 = vadd.f32 %v11866_v33, %v11824_v54  ;;  %v19483_v33 = vcombine.low %v9453_v10, %v9457_v45 }
 0x6e8   : > { %v11863_v59 = vadd.f32 %v11862_v57, %v11820_v36 }
 0x6e9   : > { %12154 = vmatpush2.bf16.msra.mxu0 %v19291_v37  ;;  %v19510_v37 = vcombine.high %v9478_v14, %v9482_v62  ;;  %v9449_v14 = vld [vmem:[#allocation10 + $0xc70] sm:$0xff]  ;;  %v9446_v62 = vld [vmem:[#allocation10 + $0xc58] sm:$0xff] }
 0x6ea   : > { %12326 = vmatpush2.bf16.msra.mxu1 %v19293_v7  ;;  %12155 = vmatprep.subr.bf16.mxu0 %v19284_v39  ;;  %v9469_v7 = vld [vmem:[#allocation10 + $0xd10] sm:$0xff] }
 0x6eb   : > { %12327 = vmatprep.subr.bf16.mxu1 %v19286_v20  ;;  %v9473_v39 = vld [vmem:[#allocation10 + $0xd30] sm:$0xff]  ;;  %v9470_v20 = vld [vmem:[#allocation10 + $0xd18] sm:$0xff] }
 0x6ec   : > { %v19499_v57 = vcombine.low %v9469_v7, %v9473_v39 }
 0x6ed   : > { %12156 = vmatpush2.bf16.msra.mxu0 %v19283_v5  ;;  %v19500_v5 = vcombine.high %v9469_v7, %v9473_v39  ;;  %v9438_v7 = vld [vmem:[#allocation10 + $0xc18] sm:$0xff] }
 0x6ee   : > { %12328 = vmatpush2.bf16.msra.mxu1 %v19285_v49  ;;  %12157 = vmatprep.subr.bf16.mxu0 %v19276_v27  ;;  %v12499_v27 = vrot.slane %v12494_v63, %v23979_v34  ;;  %v9437_v63 = vld [vmem:[#allocation10 + $0xc10] sm:$0xff]  ;;  %v9442_v39 = vld [vmem:[#allocation10 + $0xc38] sm:$0xff] }
 0x6ef   : > { %12329 = vmatprep.subr.bf16.mxu1 %v19278_v38  ;;  %v19502_v38 = vcombine.high %v9470_v20, %v9474_v22 }
 0x6f1   : > { %12158 = vmatpush2.bf16.msra.mxu0 %v19275_v53 }
 0x6f2   : > { %12330 = vmatpush2.bf16.msra.mxu1 %v19277_v35  ;;  %12213 = vmatprep.subr.bf16.mxu0 %v19524_v60  ;;  %v19501_v35 = vcombine.low %v9470_v20, %v9474_v22  ;;  %v19492_v60 = vcombine.high %v9461_v26, %v9465_v56  ;;  %v19475_v22 = vcombine.low %v9445_v12, %v9449_v14  ;;  %v9106_v26 = vld [vmem:[#allocation10 + $0x1b8] sm:$0xff] }
 0x6f3   : > { %12385 = vmatprep.subr.bf16.mxu1 %v19526_v1 }
 0x6f4   : > { %12160 = vmatmul.mubr.bf16.vlgmr.msra.gmra.mxu0 %v24486_v47  ;;  %v24596_v4 = vpop.f32.mrf.mxu0 }
 0x6f5   : > { %12332 = vmatmul.mubr.bf16.vlgmr.msra.gmra.mxu1 %v24486_v47  ;;  %12214 = vmatpush1.bf16.msra.mxu0 %v19523_v28 }
 0x6f6   : > { %12386 = vmatpush1.bf16.msra.mxu1 %v19525_v58  ;;  %v11905_v61 = vpop.f32.mrf.mxu0  ;;  %12215 = vmatprep.subr.bf16.mxu0 %v19516_v23  ;;  %v19493_v58 = vcombine.low %v9462_v19, %v9466_v46  ;;  %v19484_v23 = vcombine.high %v9453_v10, %v9457_v45  ;;  %v22156_v19 = vld [vmem:[#allocation13 + $0x188] ss:$28 sps:$4 sm:$0xff]   ;;  %v22164_v45 = vld [vmem:[#allocation13 + $0x11c] ss:$28 sps:$4 sm:$0xff]  }
 0x6f7   : > { %12387 = vmatprep.subr.bf16.mxu1 %v19518_v16  ;;  %12245 = vmatprep.mubr.bf16.mxu0 %v24997_v18  ;;  %v11906_v6 = vadd.f32 %v11905_v61, %v11863_v59  ;;  %v19485_v61 = vcombine.low %v9454_v48, %v9458_v52  ;;  %v9086_v48 = vld [vmem:[#allocation10 + $0x118] sm:$0xff] }
 0x6f8   : > { %v24603_v47 = vpop.f32.mrf.mxu0  ;;  %12417 = vmatprep.mubr.bf16.mxu1 %v24997_v18  ;;  %v9090_v52 = vld [vmem:[#allocation10 + $0x138] sm:$0xff] }
 0x6f9   : > { %12216 = vmatpush1.bf16.msra.mxu0 %v19515_v44  ;;  %v9450_v44 = vld [vmem:[#allocation10 + $0xc78] sm:$0xff] }
 0x6fa   : > { %12388 = vmatpush1.bf16.msra.mxu1 %v19517_v29  ;;  %v11909_v0 = vpop.f32.mrf.mxu0  ;;  %12217 = vmatprep.subr.bf16.mxu0 %v19508_v24  ;;  %v19476_v29 = vcombine.high %v9445_v12, %v9449_v14  ;;  %v19478_v54 = vcombine.high %v9446_v62, %v9450_v44  ;;  %v19477_v59 = vcombine.low %v9446_v62, %v9450_v44  ;;  %v22167_v12 = vld [vmem:[#allocation13 + $0xe4] ss:$28 sps:$4 sm:$0xff]   ;;  %v9078_v14 = vld [vmem:[#allocation10 + $0xd8] sm:$0xff] }
 0x6fb   : > { %v11910_v49 = vadd.f32 %v11909_v0, %v11867_v25  ;;  %12389 = vmatprep.subr.bf16.mxu1 %v19510_v37  ;;  %v9441_v37 = vld [vmem:[#allocation10 + $0xc30] sm:$0xff]  ;;  %v9110_v0 = vld [vmem:[#allocation10 + $0x1d8] sm:$0xff] }
 0x6fc   : > { %v19468_v25 = vcombine.high %v9437_v63, %v9441_v37  ;;  %v9082_v62 = vld [vmem:[#allocation10 + $0xf8] sm:$0xff] }
 0x6fd   : > { %v12429_v53 = vpack.c.bf16 %v11910_v49, %v11906_v6  ;;  %12218 = vmatpush1.bf16.msra.mxu0 %v19507_v50  ;;  %v19470_v50 = vcombine.high %v9438_v7, %v9442_v39  ;;  %v19469_v6 = vcombine.low %v9438_v7, %v9442_v39  ;;  %v22173_v7 = vld [vmem:[#allocation13 + $0x74] ss:$28 sps:$4 sm:$0xff]  }
 0x6fe   : > { %12390 = vmatpush1.bf16.msra.mxu1 %v19509_v9  ;;  %12219 = vmatprep.subr.bf16.mxu0 %v19500_v5  ;;  %v9114_v9 = vld [vmem:[#allocation10 + $0x1f8] sm:$0xff]  ;;  %v19467_v5 = vcombine.low %v9437_v63, %v9441_v37  ;;  %v22168_v63 = vld [vmem:[#allocation13 + $0xa8] ss:$28 sps:$4 sm:$0xff]  }
 0x6ff   : > { %v24607_v1 = vadd.bf16 %v12499_v27, %v12429_v53  ;;  %12391 = vmatprep.subr.bf16.mxu1 %v19502_v38  ;;  %v19142_v49 = vcombine.high %v9110_v0, %v9114_v9  ;;  %v22158_v27 = vld [vmem:[#allocation13 + $0x18c] ss:$28 sps:$4 sm:$0xff]   ;;  %v9102_v38 = vld [vmem:[#allocation10 + $0x198] sm:$0xff]  ;;  %v19141_v56 = vcombine.low %v9110_v0, %v9114_v9 }
 0x700   : > { %v19134_v46 = vcombine.high %v9102_v38, %v9106_v26  ;;  %v22161_v53 = vld [vmem:[#allocation13 + $0x154] ss:$28 sps:$4 sm:$0xff]  }
 0x701   : > { %v12559_v28 = vmul.bf16 %v24607_v1, %v24607_v1  ;;  %12220 = vmatpush1.bf16.msra.mxu0 %v19499_v57  ;;  %v9094_v57 = vld [vmem:[#allocation10 + $0x158] sm:$0xff] }
 0x702   : > { %12392 = vmatpush1.bf16.msra.mxu1 %v19501_v35  ;;  %12221 = vmatprep.subr.bf16.mxu0 %v19492_v60  ;;  %v9098_v35 = vld [vmem:[#allocation10 + $0x178] sm:$0xff]  ;;  %v19133_v60 = vcombine.low %v9102_v38, %v9106_v26  ;;  %v22179_v38 = vld [vmem:[#allocation13 + $0x4] ss:$28 sps:$4 sm:$0xff]  }
 0x703   : > { %v12567_v16 = vmul.bf16 %v12559_v28, %v24607_v1  ;;  %12393 = vmatprep.subr.bf16.mxu1 %v19494_v15  ;;  %v22159_v15 = vld [vmem:[#allocation13 + $0x150] ss:$28 sps:$4 sm:$0xff]   ;;  %v19126_v10 = vcombine.high %v9094_v57, %v9098_v35 }
 0x704   : > { %v9062_v39 = vld [vmem:[#allocation10 + $0x58] sm:$0xff] }
 0x705   : > { %v12575_v36 = vmul.bf16 1027030327, %v12567_v16  ;;  %12222 = vmatpush1.bf16.msra.mxu0 %v19491_v30  ;;  %v19125_v30 = vcombine.low %v9094_v57, %v9098_v35  ;;  %v9054_v0 = vld [vmem:[#allocation10 + $0x18] sm:$0xff]  ;;  %v22182_v35 = vld [vmem:[#allocation13 + $0x34c] ss:$28 sps:$4 sm:$0xff]  }
 0x706   : > { %12394 = vmatpush1.bf16.msra.mxu1 %v19493_v58  ;;  %12223 = vmatprep.subr.bf16.mxu0 %v19484_v23  ;;  %v11822_v58 = vadd.f32 %v24586_v41, %v24580_v21  ;;  %v12551_v23 = vmul.bf16 1056980736, %v24607_v1  ;;  %v11861_v21 = vadd.f32 %v24584_v17, %v24568_v3  ;;  %v19109_v3 = vcombine.low %v9078_v14, %v9082_v62  ;;  %v9058_v9 = vld [vmem:[#allocation10 + $0x38] sm:$0xff] }
 0x707   : > { %v12583_v24 = vadd.bf16 %v12575_v36, %v24607_v1  ;;  %12395 = vmatprep.subr.bf16.mxu1 %v19486_v40  ;;  %v19118_v40 = vcombine.high %v9086_v48, %v9090_v52  ;;  %v9174_v26 = vld [vmem:[#allocation10 + $0x3d8] sm:$0xff] }
 0x708   : > { %v11865_v44 = vadd.f32 %v24590_v43, %v11822_v58  ;;  %v22170_v43 = vld [vmem:[#allocation13 + $0xac] ss:$28 sps:$4 sm:$0xff]   ;;  %v9162_v58 = vld [vmem:[#allocation10 + $0x378] sm:$0xff] }
 0x709   : > { %v12591_v20 = vmul.bf16 1061961548, %v12583_v24  ;;  %12224 = vmatpush1.bf16.msra.mxu0 %v19483_v33  ;;  %v22165_v33 = vld [vmem:[#allocation13 + $0xe0] ss:$28 sps:$4 sm:$0xff]   ;;  %v9074_v24 = vld [vmem:[#allocation10 + $0xb8] sm:$0xff] }
 0x70a   : > { %12396 = vmatpush1.bf16.msra.mxu1 %v19485_v61  ;;  %12225 = vmatprep.subr.bf16.mxu0 %v19476_v29  ;;  %v11908_v41 = vadd.f32 %v24603_v47, %v11865_v44  ;;  %v19110_v61 = vcombine.high %v9078_v14, %v9082_v62  ;;  %v9070_v29 = vld [vmem:[#allocation10 + $0x98] sm:$0xff] }
 0x70b   : > { %12397 = vmatprep.subr.bf16.mxu1 %v19478_v54  ;;  %23018 = vtanh.bf16 %v12591_v20  ;;  %v11904_v54 = vadd.f32 %v24596_v4, %v11861_v21  ;;  %v19102_v37 = vcombine.high %v9070_v29, %v9074_v24  ;;  %v9066_v20 = vld [vmem:[#allocation10 + $0x78] sm:$0xff] }
 0x70c   : > { %v22171_v4 = vld [vmem:[#allocation13 + $0x70] ss:$28 sps:$4 sm:$0xff]  }
 0x70d   : > { %12226 = vmatpush1.bf16.msra.mxu0 %v19475_v22  ;;  %v12428_v17 = vpack.c.bf16 %v11908_v41, %v11904_v54  ;;  %v19101_v22 = vcombine.low %v9070_v29, %v9074_v24  ;;  %v9150_v14 = vld [vmem:[#allocation10 + $0x318] sm:$0xff]  ;;  %v22189_v29 = vld [vmem:[#allocation13 + $0x2a0] ss:$28 sps:$4 sm:$0xff]   ;;  %v22194_v54 = vld [vmem:[#allocation13 + $0x26c] ss:$28 sps:$4 sm:$0xff]  }
 0x70e   : > { %12398 = vmatpush1.bf16.msra.mxu1 %v19477_v59  ;;  %12227 = vmatprep.subr.bf16.mxu0 %v19468_v25  ;;  %v19094_v25 = vcombine.high %v9062_v39, %v9066_v20  ;;  %v9154_v62 = vld [vmem:[#allocation10 + $0x338] sm:$0xff] }
 0x70f   : > { %12399 = vmatprep.subr.bf16.mxu1 %v19470_v50  ;;  %v22176_v50 = vld [vmem:[#allocation13 + $0x3c] ss:$28 sps:$4 sm:$0xff]   ;;  %v19182_v41 = vcombine.high %v9150_v14, %v9154_v62 }
 0x711   : > { %12228 = vmatpush1.bf16.msra.mxu0 %v19467_v5  ;;  %v19093_v5 = vcombine.low %v9062_v39, %v9066_v20  ;;  %v9126_v39 = vld [vmem:[#allocation10 + $0x258] sm:$0xff] }
 0x712   : > { %12400 = vmatpush1.bf16.msra.mxu1 %v19469_v6  ;;  %12256 = vmatprep.subr.bf16.mxu0 %v19142_v49  ;;  %v22174_v49 = vld [vmem:[#allocation13 + $0x38] ss:$28 sps:$4 sm:$0xff]  }
 0x713   : > { %15439 = vmatprep.subr.bf16.mxu1 %v22158_v27  ;;  %v19086_v27 = vcombine.high %v9054_v0, %v9058_v9  ;;  %v9130_v20 = vld [vmem:[#allocation10 + $0x278] sm:$0xff] }
 0x714   : > { %12246 = vmatmul.mubr.bf16.vlgmr.msra.gmra.mxu0 %v24559_v42 }
 0x715   : > { %12418 = vmatmul.mubr.bf16.vlgmr.msra.gmra.mxu1 %v24559_v42  ;;  %12257 = vmatpush1.bf16.msra.mxu0 %v19141_v56  ;;  %v24620_v42 = vrot.slane %v24582_v2, %v23974_v8  ;;  %v19117_v2 = vcombine.low %v9086_v48, %v9090_v52  ;;  %v9178_v56 = vld [vmem:[#allocation10 + $0x3f8] sm:$0xff]  ;;  %v22180_v48 = vld [vmem:[#allocation13 + $0x348] ss:$28 sps:$4 sm:$0xff]  }
 0x716   : > { %12288 = vmatprep.mubr.bf16.mxu0 %v24408_v51  ;;  %15440 = vmatpush1.bf16.msra.mxu1 %v22156_v19  ;;  %v22162_v51 = vld [vmem:[#allocation13 + $0x118] ss:$28 sps:$4 sm:$0xff]   ;;  %v19085_v19 = vcombine.low %v9054_v0, %v9058_v9  ;;  %v19206_v57 = vcombine.high %v9174_v26, %v9178_v56 }
 0x717   : > { %12258 = vmatprep.subr.bf16.mxu0 %v19134_v46  ;;  %15441 = vmatprep.subr.bf16.mxu1 %v22161_v53  ;;  %v12487_v1 = vpack.i.b16 %v24620_v42, %v24620_v42  ;;  %v22177_v53 = vld [vmem:[#allocation13] ss:$28 sps:$4 sm:$0xff]   ;;  %v9118_v0 = vld [vmem:[#allocation10 + $0x218] sm:$0xff] }
 0x718   : > { %v9122_v9 = vld [vmem:[#allocation10 + $0x238] sm:$0xff] }
 0x719   : > { %v23019_v28 = vpop.eup %23018  ;;  %12259 = vmatpush1.bf16.msra.mxu0 %v19133_v60  ;;  %v12492_v47 = vrot.slane %v12487_v1, %v23979_v34  ;;  %v9166_v60 = vld [vmem:[#allocation10 + $0x398] sm:$0xff]  ;;  %v22191_v1 = vld [vmem:[#allocation13 + $0x2a4] ss:$28 sps:$4 sm:$0xff]  }
 0x71a   : > { %15442 = vmatpush1.bf16.msra.mxu1 %v22159_v15  ;;  %12260 = vmatprep.subr.bf16.mxu0 %v19126_v10  ;;  %v12607_v16 = vadd.bf16 1065369472, %v23019_v28  ;;  %v9170_v15 = vld [vmem:[#allocation10 + $0x3b8] sm:$0xff]  ;;  %v19205_v10 = vcombine.low %v9174_v26, %v9178_v56 }
 0x71b   : > { %15443 = vmatprep.subr.bf16.mxu1 %v22164_v45  ;;  %v24634_v59 = vadd.bf16 %v12492_v47, %v12428_v17  ;;  %v19198_v52 = vcombine.high %v9166_v60, %v9170_v15  ;;  %v22185_v28 = vld [vmem:[#allocation13 + $0x314] ss:$28 sps:$4 sm:$0xff]  }
 0x71c   : > { %v24624_v36 = vmul.bf16 %v12607_v16, %v12551_v23  ;;  %v22183_v16 = vld [vmem:[#allocation13 + $0x310] ss:$28 sps:$4 sm:$0xff]  }
 0x71d   : > { %12261 = vmatpush1.bf16.msra.mxu0 %v19125_v30  ;;  %v12558_v6 = vmul.bf16 %v24634_v59, %v24634_v59  ;;  %v9158_v30 = vld [vmem:[#allocation10 + $0x358] sm:$0xff] }
 0x71e   : > { %15444 = vmatpush1.bf16.msra.mxu1 %v22162_v51  ;;  %15471 = vmatprep.mubr.bf16.mxu1 %v24624_v36  ;;  %v19197_v51 = vcombine.low %v9166_v60, %v9170_v15  ;;  %v19189_v44 = vcombine.low %v9158_v30, %v9162_v58  ;;  %v9138_v17 = vld [vmem:[#allocation10 + $0x2b8] sm:$0xff]  ;;  %v22239_v15 = vld [vmem:[#allocation13 + $0x88c] ss:$28 sps:$4 sm:$0xff]  }
 0x71f   : > { %12262 = vmatprep.subr.bf16.mxu0 %v19118_v40  ;;  %15445 = vmatprep.subr.bf16.mxu1 %v22167_v12  ;;  %v12566_v46 = vmul.bf16 %v12558_v6, %v24634_v59  ;;  %v19190_v40 = vcombine.high %v9158_v30, %v9162_v58  ;;  %v22188_v12 = vld [vmem:[#allocation13 + $0x2dc] ss:$28 sps:$4 sm:$0xff]   ;;  %v9370_v26 = vld [vmem:[#allocation10 + $0x9f8] sm:$0xff]  ;;  %v22237_v58 = vld [vmem:[#allocation13 + $0x888] ss:$28 sps:$4 sm:$0xff]  }
 0x720   : > { %v22198_v6 = vld [vmem:[#allocation13 + $0x1f8] ss:$28 sps:$4 sm:$0xff]  }
 0x721   : > { %12263 = vmatpush1.bf16.msra.mxu0 %v19117_v2  ;;  %v12574_v45 = vmul.bf16 1027030327, %v12566_v46  ;;  %v22186_v2 = vld [vmem:[#allocation13 + $0x2d8] ss:$28 sps:$4 sm:$0xff]   ;;  %v22201_v46 = vld [vmem:[#allocation13 + $0x1c0] ss:$28 sps:$4 sm:$0xff]  }
 0x722   : > { %15446 = vmatpush1.bf16.msra.mxu1 %v22165_v33  ;;  %12264 = vmatprep.subr.bf16.mxu0 %v19110_v61  ;;  %v9142_v33 = vld [vmem:[#allocation10 + $0x2d8] sm:$0xff] }
 0x723   : > { %15447 = vmatprep.subr.bf16.mxu1 %v22170_v43  ;;  %v12582_v23 = vadd.bf16 %v12574_v45, %v24634_v59  ;;  %v9146_v61 = vld [vmem:[#allocation10 + $0x2f8] sm:$0xff]  ;;  %v19181_v43 = vcombine.low %v9150_v14, %v9154_v62  ;;  %v22251_v14 = vld [vmem:[#allocation13 + $0x81c] ss:$28 sps:$4 sm:$0xff]  }
 0x724   : > { %v19174_v24 = vcombine.high %v9142_v33, %v9146_v61  ;;  %v19173_v47 = vcombine.low %v9142_v33, %v9146_v61  ;;  %v9362_v60 = vld [vmem:[#allocation10 + $0x9b8] sm:$0xff] }
 0x725   : > { %12265 = vmatpush1.bf16.msra.mxu0 %v19109_v3  ;;  %v12590_v21 = vmul.bf16 1061961548, %v12582_v23  ;;  %v9134_v3 = vld [vmem:[#allocation10 + $0x298] sm:$0xff] }
 0x726   : > { %15448 = vmatpush1.bf16.msra.mxu1 %v22168_v63  ;;  %12266 = vmatprep.subr.bf16.mxu0 %v19102_v37  ;;  %v22192_v63 = vld [vmem:[#allocation13 + $0x268] ss:$28 sps:$4 sm:$0xff]   ;;  %v19166_v37 = vcombine.high %v9134_v3, %v9138_v17  ;;  %v9354_v30 = vld [vmem:[#allocation10 + $0x978] sm:$0xff] }
 0x727   : > { %15449 = vmatprep.subr.bf16.mxu1 %v22173_v7  ;;  %23020 = vtanh.bf16 %v12590_v21  ;;  %v22197_v7 = vld [vmem:[#allocation13 + $0x234] ss:$28 sps:$4 sm:$0xff]  }
 0x728   : > { %v9338_v21 = vld [vmem:[#allocation10 + $0x8f8] sm:$0xff] }
 0x729   : > { %12267 = vmatpush1.bf16.msra.mxu0 %v19101_v22  ;;  %v19165_v22 = vcombine.low %v9134_v3, %v9138_v17  ;;  %v9326_v33 = vld [vmem:[#allocation10 + $0x898] sm:$0xff] }
 0x72a   : > { %15450 = vmatpush1.bf16.msra.mxu1 %v22171_v4  ;;  %12268 = vmatprep.subr.bf16.mxu0 %v19094_v25  ;;  %v22195_v4 = vld [vmem:[#allocation13 + $0x230] ss:$28 sps:$4 sm:$0xff]   ;;  %v19158_v25 = vcombine.high %v9126_v39, %v9130_v20 }
 0x72b   : > { %15451 = vmatprep.subr.bf16.mxu1 %v22176_v50  ;;  %v22200_v50 = vld [vmem:[#allocation13 + $0x1fc] ss:$28 sps:$4 sm:$0xff]   ;;  %v9330_v61 = vld [vmem:[#allocation10 + $0x8b8] sm:$0xff] }
 0x72c   : > { %v19358_v3 = vcombine.high %v9326_v33, %v9330_v61  ;;  %v9318_v17 = vld [vmem:[#allocation10 + $0x858] sm:$0xff] }
 0x72d   : > { %12269 = vmatpush1.bf16.msra.mxu0 %v19093_v5  ;;  %v19157_v5 = vcombine.low %v9126_v39, %v9130_v20 }
 0x72e   : > { %15452 = vmatpush1.bf16.msra.mxu1 %v22174_v49  ;;  %12270 = vmatprep.subr.bf16.mxu0 %v19086_v27  ;;  %v19150_v49 = vcombine.high %v9118_v0, %v9122_v9  ;;  %v22203_v27 = vld [vmem:[#allocation13 + $0x1c4] ss:$28 sps:$4 sm:$0xff]  }
 0x72f   : > { %15453 = vmatprep.subr.bf16.mxu1 %v22179_v38  ;;  %v9366_v38 = vld [vmem:[#allocation10 + $0x9d8] sm:$0xff] }
 0x730   : > { %v19397_v45 = vcombine.low %v9366_v38, %v9370_v26 }
 0x731   : > { %12271 = vmatpush1.bf16.msra.mxu0 %v19085_v19  ;;  %v19149_v19 = vcombine.low %v9118_v0, %v9122_v9  ;;  %v22272_v0 = vld [vmem:[#allocation13 + $0x73c] ss:$28 sps:$4 sm:$0xff]  }
 0x732   : > { %15454 = vmatpush1.bf16.msra.mxu1 %v22177_v53  ;;  %12272 = vmatprep.subr.bf16.mxu0 %v19206_v57  ;;  %v19398_v53 = vcombine.high %v9366_v38, %v9370_v26  ;;  %v9434_v38 = vld [vmem:[#allocation10 + $0xbf8] sm:$0xff] }
 0x733   : > { %15455 = vmatprep.subr.bf16.mxu1 %v22182_v35  ;;  %v9358_v35 = vld [vmem:[#allocation10 + $0x998] sm:$0xff] }
 0x734   : > { %v19389_v23 = vcombine.low %v9358_v35, %v9362_v60  ;;  %v24648_v20 = vpop.f32.mrf.mxu0  ;;  %v22270_v26 = vld [vmem:[#allocation13 + $0x738] ss:$28 sps:$4 sm:$0xff]  }
 0x735   : > { %12273 = vmatpush2.bf16.msra.mxu0 %v19205_v10  ;;  %v23021_v56 = vpop.eup %23020  ;;  %v12550_v10 = vmul.bf16 1056980736, %v24634_v59 }
 0x736   : > { %15456 = vmatpush2.bf16.msra.mxu1 %v22180_v48  ;;  %12274 = vmatprep.subr.bf16.mxu0 %v19198_v52  ;;  %v12606_v57 = vadd.bf16 1065369472, %v23021_v56  ;;  %v19390_v48 = vcombine.high %v9358_v35, %v9362_v60  ;;  %v22276_v56 = vld [vmem:[#allocation13 + $0x704] ss:$28 sps:$4 sm:$0xff]   ;;  %v9422_v35 = vld [vmem:[#allocation10 + $0xb98] sm:$0xff] }
 0x737   : > { %15457 = vmatprep.subr.bf16.mxu1 %v22185_v28  ;;  %v9350_v28 = vld [vmem:[#allocation10 + $0x958] sm:$0xff] }
 0x738   : > { %v24641_v52 = vmul.bf16 %v12606_v57, %v12550_v10  ;;  %v19382_v59 = vcombine.high %v9350_v28, %v9354_v30  ;;  %v19381_v62 = vcombine.low %v9350_v28, %v9354_v30  ;;  %v9426_v60 = vld [vmem:[#allocation10 + $0xbb8] sm:$0xff] }
 0x739   : > { %12275 = vmatpush2.bf16.msra.mxu0 %v19197_v51  ;;  %v22245_v51 = vld [vmem:[#allocation13 + $0x854] ss:$28 sps:$4 sm:$0xff]   ;;  %v19454_v30 = vcombine.high %v9422_v35, %v9426_v60 }
 0x73a   : > { %15458 = vmatpush2.bf16.msra.mxu1 %v22183_v16  ;;  %12276 = vmatprep.subr.bf16.mxu0 %v19190_v40  ;;  %v9342_v16 = vld [vmem:[#allocation10 + $0x918] sm:$0xff] }
 0x73b   : > { %15459 = vmatprep.subr.bf16.mxu1 %v22188_v12  ;;  %v9346_v40 = vld [vmem:[#allocation10 + $0x938] sm:$0xff] }
 0x73c   : > { %v22243_v12 = vld [vmem:[#allocation13 + $0x850] ss:$28 sps:$4 sm:$0xff]  }
 0x73d   : > { %12277 = vmatpush2.bf16.msra.mxu0 %v19189_v44  ;;  %v19374_v44 = vcombine.high %v9342_v16, %v9346_v40 }
 0x73e   : > { %15460 = vmatpush2.bf16.msra.mxu1 %v22186_v2  ;;  %12278 = vmatprep.subr.bf16.mxu0 %v19182_v41  ;;  %v22249_v2 = vld [vmem:[#allocation13 + $0x818] ss:$28 sps:$4 sm:$0xff]   ;;  %v22257_v41 = vld [vmem:[#allocation13 + $0x7e4] ss:$28 sps:$4 sm:$0xff]  }
 0x73f   : > { %15461 = vmatprep.subr.bf16.mxu1 %v22191_v1 }
 0x741   : > { %12279 = vmatpush2.bf16.msra.mxu0 %v19181_v43  ;;  %v22255_v43 = vld [vmem:[#allocation13 + $0x7e0] ss:$28 sps:$4 sm:$0xff]  }
 0x742   : > { %15462 = vmatpush2.bf16.msra.mxu1 %v22189_v29  ;;  %12280 = vmatprep.subr.bf16.mxu0 %v19174_v24  ;;  %v22263_v29 = vld [vmem:[#allocation13 + $0x7ac] ss:$28 sps:$4 sm:$0xff]  }
 0x743   : > { %15463 = vmatprep.subr.bf16.mxu1 %v22194_v54  ;;  %v24646_v54 = vpop.f32.mrf.mxu1 }
 0x745   : > { %12281 = vmatpush2.bf16.msra.mxu0 %v19173_v47  ;;  %v9322_v47 = vld [vmem:[#allocation10 + $0x878] sm:$0xff]  ;;  %v11991_v39 = vpop.f32.mrf.mxu1 }
 0x746   : > { %15464 = vmatpush2.bf16.msra.mxu1 %v22192_v63  ;;  %12282 = vmatprep.subr.bf16.mxu0 %v19166_v37  ;;  %v22261_v63 = vld [vmem:[#allocation13 + $0x7a8] ss:$28 sps:$4 sm:$0xff]   ;;  %v22269_v37 = vld [vmem:[#allocation13 + $0x774] ss:$28 sps:$4 sm:$0xff]   ;;  %v19349_v9 = vcombine.low %v9318_v17, %v9322_v47 }
 0x747   : > { %15465 = vmatprep.subr.bf16.mxu1 %v22197_v7  ;;  %v19357_v7 = vcombine.low %v9326_v33, %v9330_v61  ;;  %v22285_v33 = vld [vmem:[#allocation13 + $0x9dc] ss:$28 sps:$4 sm:$0xff]  }
 0x749   : > { %12283 = vmatpush2.bf16.msra.mxu0 %v19165_v22  ;;  %v19350_v22 = vcombine.high %v9318_v17, %v9322_v47  ;;  %v9398_v47 = vld [vmem:[#allocation10 + $0xad8] sm:$0xff] }
 0x74a   : > { %15466 = vmatpush2.bf16.msra.mxu1 %v22195_v4  ;;  %12284 = vmatprep.subr.bf16.mxu0 %v19158_v25  ;;  %v9310_v4 = vld [vmem:[#allocation10 + $0x818] sm:$0xff] }
 0x74b   : > { %15467 = vmatprep.subr.bf16.mxu1 %v22200_v50  ;;  %v9314_v25 = vld [vmem:[#allocation10 + $0x838] sm:$0xff] }
 0x74c   : > { %v22267_v50 = vld [vmem:[#allocation13 + $0x770] ss:$28 sps:$4 sm:$0xff]  }
 0x74d   : > { %12285 = vmatpush2.bf16.msra.mxu0 %v19157_v5  ;;  %v24650_v5 = vpop.f32.mrf.mxu1 }
 0x74e   : > { %15468 = vmatpush2.bf16.msra.mxu1 %v22198_v6  ;;  %12286 = vmatprep.subr.bf16.mxu0 %v19150_v49  ;;  %v11948_v6 = vpop.f32.mrf.mxu0  ;;  %v19342_v49 = vcombine.high %v9310_v4, %v9314_v25 }
 0x74f   : > { %15469 = vmatprep.subr.bf16.mxu1 %v22203_v27  ;;  %v9430_v27 = vld [vmem:[#allocation10 + $0xbd8] sm:$0xff] }
 0x750   : > { %v19462_v57 = vcombine.high %v9430_v27, %v9434_v38 }
 0x751   : > { %12287 = vmatpush2.bf16.msra.mxu0 %v19149_v19  ;;  %v19341_v19 = vcombine.low %v9310_v4, %v9314_v25 }
 0x752   : > { %15470 = vmatpush2.bf16.msra.mxu1 %v22201_v46  ;;  %12342 = vmatprep.subr.bf16.mxu0 %v19398_v53  ;;  %v11995_v46 = vpop.f32.mrf.mxu1  ;;  %v24652_v53 = vpop.f32.mrf.mxu0 }
 0x753   : > { %15525 = vmatprep.subr.bf16.mxu1 %v22239_v15  ;;  %v22274_v15 = vld [vmem:[#allocation13 + $0x700] ss:$28 sps:$4 sm:$0xff]  }
 0x754   : > { %12289 = vmatmul.mubr.bf16.vlgmr.msra.gmra.mxu0 %v24449_v31  ;;  %v9334_v31 = vld [vmem:[#allocation10 + $0x8d8] sm:$0xff]  ;;  %v24654_v10 = vpop.f32.mrf.mxu1  ;;  %v11952_v28 = vpop.f32.mrf.mxu0 }
 0x755   : > { %15472 = vmatmul.mubr.bf16.vlgmr.msra.gmra.mxu1 %v24641_v52  ;;  %12343 = vmatpush1.bf16.msra.mxu0 %v19397_v45  ;;  %v19366_v1 = vcombine.high %v9334_v31, %v9338_v21  ;;  %v19365_v24 = vcombine.low %v9334_v31, %v9338_v21  ;;  %v22279_v45 = vld [vmem:[#allocation13 + $0xa4c] ss:$28 sps:$4 sm:$0xff]   ;;  %v11992_v31 = vadd.f32 %v11991_v39, %v11948_v6  ;;  %v9406_v21 = vld [vmem:[#allocation10 + $0xb18] sm:$0xff]  ;;  %v22288_v39 = vld [vmem:[#allocation13 + $0x9a4] ss:$28 sps:$4 sm:$0xff]  }
 0x756   : > { %12374 = vmatprep.mubr.bf16.mxu0 %v24523_v55  ;;  %12344 = vmatprep.subr.bf16.mxu0 %v19390_v48  ;;  %v19373_v55 = vcombine.low %v9342_v16, %v9346_v40  ;;  %v19461_v48 = vcombine.low %v9430_v27, %v9434_v38  ;;  %v22282_v40 = vld [vmem:[#allocation13 + $0xa14] ss:$28 sps:$4 sm:$0xff]   ;;  %v11996_v61 = vadd.f32 %v11995_v46, %v11952_v28  ;;  %v22286_v27 = vld [vmem:[#allocation13 + $0x9a0] ss:$28 sps:$4 sm:$0xff]   ;;  %v22291_v38 = vld [vmem:[#allocation13 + $0x96c] ss:$28 sps:$4 sm:$0xff]  }
 0x757   : > { %15526 = vmatpush1.bf16.msra.mxu1 %v22237_v58  ;;  %v9414_v58 = vld [vmem:[#allocation10 + $0xb58] sm:$0xff] }
 0x758   : > { %15527 = vmatprep.subr.bf16.mxu1 %v22245_v51  ;;  %v9418_v51 = vld [vmem:[#allocation10 + $0xb78] sm:$0xff] }
 0x759   : > { %12345 = vmatpush1.bf16.msra.mxu0 %v19389_v23  ;;  %v22277_v23 = vld [vmem:[#allocation13 + $0xa48] ss:$28 sps:$4 sm:$0xff]   ;;  %v9390_v6 = vld [vmem:[#allocation10 + $0xa98] sm:$0xff] }
 0x75a   : > { %12346 = vmatprep.subr.bf16.mxu0 %v19382_v59  ;;  %v12077_v59 = vpop.f32.mrf.mxu1 }
 0x75b   : > { %15528 = vmatpush1.bf16.msra.mxu1 %v22243_v12  ;;  %v19453_v12 = vcombine.low %v9422_v35, %v9426_v60  ;;  %v9386_v35 = vld [vmem:[#allocation10 + $0xa78] sm:$0xff]  ;;  %v22289_v60 = vld [vmem:[#allocation13 + $0x968] ss:$28 sps:$4 sm:$0xff]  }
 0x75c   : > { %15529 = vmatprep.subr.bf16.mxu1 %v22251_v14  ;;  %v12484_v14 = vcombine.high %v24593_v13, %v24593_v13 }
 0x75d   : > { %12347 = vmatpush1.bf16.msra.mxu0 %v19381_v62 }
 0x75e   : > { %12348 = vmatprep.subr.bf16.mxu0 %v19374_v44  ;;  %v19446_v44 = vcombine.high %v9414_v58, %v9418_v51 }
 0x75f   : > { %15530 = vmatpush1.bf16.msra.mxu1 %v22249_v2  ;;  %v9410_v2 = vld [vmem:[#allocation10 + $0xb38] sm:$0xff] }
 0x760   : > { %15531 = vmatprep.subr.bf16.mxu1 %v22257_v41  ;;  %v22280_v41 = vld [vmem:[#allocation13 + $0xa10] ss:$28 sps:$4 sm:$0xff]  }
 0x761   : > { %12349 = vmatpush1.bf16.msra.mxu0 %v19373_v55  ;;  %v24660_v55 = vpop.f32.mrf.mxu1 }
 0x762   : > { %12350 = vmatprep.subr.bf16.mxu0 %v19366_v1 }
 0x763   : > { %15532 = vmatpush1.bf16.msra.mxu1 %v22255_v43 }
 0x764   : > { %15533 = vmatprep.subr.bf16.mxu1 %v22263_v29  ;;  %v12508_v29 = vpack.i.b16 %v12484_v14, %v12484_v14 }
 0x765   : > { %12351 = vmatpush1.bf16.msra.mxu0 %v19365_v24  ;;  %v19445_v24 = vcombine.low %v9414_v58, %v9418_v51  ;;  %v9374_v58 = vld [vmem:[#allocation10 + $0xa18] sm:$0xff] }
 0x766   : > { %12352 = vmatprep.subr.bf16.mxu0 %v19358_v3  ;;  %v19438_v3 = vcombine.high %v9406_v21, %v9410_v2  ;;  %v12513_v25 = vrot.slane %v12508_v29, %v23979_v34  ;;  %v9378_v51 = vld [vmem:[#allocation10 + $0xa38] sm:$0xff] }
 0x767   : > { %15534 = vmatpush1.bf16.msra.mxu1 %v22261_v63  ;;  %v9402_v63 = vld [vmem:[#allocation10 + $0xaf8] sm:$0xff]  ;;  %v19406_v14 = vcombine.high %v9374_v58, %v9378_v51 }
 0x768   : > { %15535 = vmatprep.subr.bf16.mxu1 %v22269_v37  ;;  %v22283_v37 = vld [vmem:[#allocation13 + $0x9d8] ss:$28 sps:$4 sm:$0xff]   ;;  %v22207_v29 = vld [vmem:[#allocation13 + $0x4d0] ss:$28 sps:$4 sm:$0xff]  }
 0x769   : > { %12353 = vmatpush1.bf16.msra.mxu0 %v19357_v7  ;;  %v12081_v7 = vpop.f32.mrf.mxu1 }
 0x76a   : > { %12354 = vmatprep.subr.bf16.mxu0 %v19350_v22 }
 0x76b   : > { %15536 = vmatpush1.bf16.msra.mxu1 %v22267_v50  ;;  %v19437_v50 = vcombine.low %v9406_v21, %v9410_v2  ;;  %v19405_v21 = vcombine.low %v9374_v58, %v9378_v51  ;;  %v22206_v2 = vld [vmem:[#allocation13 + $0x50c] ss:$28 sps:$4 sm:$0xff]  }
 0x76c   : > { %15537 = vmatprep.subr.bf16.mxu1 %v22272_v0  ;;  %v19430_v0 = vcombine.high %v9398_v47, %v9402_v63  ;;  %v22248_v58 = vld [vmem:[#allocation13 + $0x5ec] ss:$28 sps:$4 sm:$0xff]  }
 0x76d   : > { %12355 = vmatpush1.bf16.msra.mxu0 %v19349_v9  ;;  %v22246_v51 = vld [vmem:[#allocation13 + $0x5e8] ss:$28 sps:$4 sm:$0xff]  }
 0x76e   : > { %12356 = vmatprep.subr.bf16.mxu0 %v19342_v49  ;;  %v9394_v49 = vld [vmem:[#allocation10 + $0xab8] sm:$0xff] }
 0x76f   : > { %15538 = vmatpush1.bf16.msra.mxu1 %v22270_v26 }
 0x770   : > { %15539 = vmatprep.subr.bf16.mxu1 %v22276_v56  ;;  %v19429_v56 = vcombine.low %v9398_v47, %v9402_v63  ;;  %v12482_v47 = vcombine.high %v24620_v42, %v24620_v42  ;;  %v22210_v63 = vld [vmem:[#allocation13 + $0x498] ss:$28 sps:$4 sm:$0xff]  }
 0x771   : > { %12357 = vmatpush1.bf16.msra.mxu0 %v19341_v19  ;;  %v19422_v19 = vcombine.high %v9390_v6, %v9394_v49 }
 0x772   : > { %12358 = vmatprep.subr.bf16.mxu0 %v19462_v57  ;;  %v9382_v57 = vld [vmem:[#allocation10 + $0xa58] sm:$0xff] }
 0x773   : > { %15540 = vmatpush1.bf16.msra.mxu1 %v22274_v15  ;;  %v22294_v15 = vld [vmem:[#allocation13 + $0x934] ss:$28 sps:$4 sm:$0xff]   ;;  %v19414_v28 = vcombine.high %v9382_v57, %v9386_v35 }
 0x774   : > { %v24656_v16 = vpop.f32.mrf.mxu0  ;;  %15541 = vmatprep.subr.bf16.mxu1 %v22279_v45 }
 0x775   : > { %12359 = vmatpush2.bf16.msra.mxu0 %v19461_v48  ;;  %v19421_v48 = vcombine.low %v9390_v6, %v9394_v49  ;;  %v22227_v49 = vld [vmem:[#allocation13 + $0x384] ss:$28 sps:$4 sm:$0xff]  }
 0x776   : > { %v12034_v62 = vpop.f32.mrf.mxu0  ;;  %12360 = vmatprep.subr.bf16.mxu0 %v19454_v30 }
 0x777   : > { %15542 = vmatpush2.bf16.msra.mxu1 %v22277_v23  ;;  %v12035_v43 = vadd.f32 %v12034_v62, %v11992_v31  ;;  %v22292_v23 = vld [vmem:[#allocation13 + $0x930] ss:$28 sps:$4 sm:$0xff]   ;;  %v22300_v31 = vld [vmem:[#allocation13 + $0x8c4] ss:$28 sps:$4 sm:$0xff]  }
 0x778   : > { %v24662_v1 = vpop.f32.mrf.mxu0  ;;  %15543 = vmatprep.subr.bf16.mxu1 %v22282_v40  ;;  %v19413_v40 = vcombine.low %v9382_v57, %v9386_v35  ;;  %v22231_v35 = vld [vmem:[#allocation13 + $0x690] ss:$28 sps:$4 sm:$0xff]  }
 0x779   : > { %12361 = vmatpush2.bf16.msra.mxu0 %v19453_v12  ;;  %v12078_v22 = vadd.f32 %v12077_v59, %v12035_v43  ;;  %v22297_v59 = vld [vmem:[#allocation13 + $0x8fc] ss:$28 sps:$4 sm:$0xff]   ;;  %v22209_v43 = vld [vmem:[#allocation13 + $0x4d4] ss:$28 sps:$4 sm:$0xff]  }
 0x77a   : > { %v12038_v13 = vpop.f32.mrf.mxu0  ;;  %12362 = vmatprep.subr.bf16.mxu0 %v19446_v44  ;;  %v22295_v44 = vld [vmem:[#allocation13 + $0x8f8] ss:$28 sps:$4 sm:$0xff]  }
 0x77b   : > { %v12039_v17 = vadd.f32 %v12038_v13, %v11996_v61  ;;  %15544 = vmatpush2.bf16.msra.mxu1 %v22280_v41  ;;  %v22298_v41 = vld [vmem:[#allocation13 + $0x8c0] ss:$28 sps:$4 sm:$0xff]   ;;  %v22204_v61 = vld [vmem:[#allocation13 + $0x508] ss:$28 sps:$4 sm:$0xff]   ;;  %v11994_v13 = vadd.f32 %v24650_v5, %v24652_v53  ;;  %v12501_v53 = vpack.i.b16 %v12482_v47, %v12482_v47 }
 0x77c   : > { %15545 = vmatprep.subr.bf16.mxu1 %v22285_v33  ;;  %v22303_v33 = vld [vmem:[#allocation13 + $0x194] ss:$28 sps:$4 sm:$0xff]  }
 0x77d   : > { %v12082_v4 = vadd.f32 %v12081_v7, %v12039_v17  ;;  %12363 = vmatpush2.bf16.msra.mxu0 %v19445_v24  ;;  %v22212_v24 = vld [vmem:[#allocation13 + $0x49c] ss:$28 sps:$4 sm:$0xff]   ;;  %v12037_v17 = vadd.f32 %v24662_v1, %v11994_v13  ;;  %v22218_v1 = vld [vmem:[#allocation13 + $0x42c] ss:$28 sps:$4 sm:$0xff]  }
 0x77e   : > { %12364 = vmatprep.subr.bf16.mxu0 %v19438_v3  ;;  %v11990_v3 = vadd.f32 %v24646_v54, %v24648_v20  ;;  %v22213_v54 = vld [vmem:[#allocation13 + $0x460] ss:$28 sps:$4 sm:$0xff]  }
 0x77f   : > { %v12431_v9 = vpack.c.bf16 %v12082_v4, %v12078_v22  ;;  %15546 = vmatpush2.bf16.msra.mxu1 %v22283_v37  ;;  %v12080_v5 = vadd.f32 %v24660_v55, %v12037_v17  ;;  %v22219_v55 = vld [vmem:[#allocation13 + $0x3f0] ss:$28 sps:$4 sm:$0xff]  }
 0x780   : > { %15547 = vmatprep.subr.bf16.mxu1 %v22288_v39  ;;  %v12033_v7 = vadd.f32 %v24656_v16, %v11990_v3  ;;  %v22216_v16 = vld [vmem:[#allocation13 + $0x428] ss:$28 sps:$4 sm:$0xff]  }
 0x781   : > { %v24665_v26 = vadd.bf16 %v12513_v25, %v12431_v9  ;;  %12365 = vmatpush2.bf16.msra.mxu0 %v19437_v50  ;;  %v12506_v25 = vrot.slane %v12501_v53, %v23979_v34  ;;  %v22221_v50 = vld [vmem:[#allocation13 + $0x3f4] ss:$28 sps:$4 sm:$0xff]   ;;  %v22224_v9 = vld [vmem:[#allocation13 + $0x3bc] ss:$28 sps:$4 sm:$0xff]   ;;  %v22354_v17 = vld [vmem:[#allocation13 + $0xc0c] ss:$28 sps:$4 sm:$0xff]  }
 0x782   : > { %12366 = vmatprep.subr.bf16.mxu0 %v19430_v0  ;;  %v12076_v42 = vadd.f32 %v24654_v10, %v12033_v7  ;;  %v22222_v10 = vld [vmem:[#allocation13 + $0x3b8] ss:$28 sps:$4 sm:$0xff]   ;;  %v22352_v7 = vld [vmem:[#allocation13 + $0xc08] ss:$28 sps:$4 sm:$0xff]  }
 0x783   : > { %v12561_v46 = vmul.bf16 %v24665_v26, %v24665_v26  ;;  %15548 = vmatpush2.bf16.msra.mxu1 %v22286_v27  ;;  %v12553_v39 = vmul.bf16 1056980736, %v24665_v26 }
 0x784   : > { %15549 = vmatprep.subr.bf16.mxu1 %v22291_v38  ;;  %v12430_v4 = vpack.c.bf16 %v12080_v5, %v12076_v42  ;;  %v22225_v38 = vld [vmem:[#allocation13 + $0x380] ss:$28 sps:$4 sm:$0xff]   ;;  %v22360_v5 = vld [vmem:[#allocation13 + $0xbd4] ss:$28 sps:$4 sm:$0xff]  }
 0x785   : > { %v12569_v45 = vmul.bf16 %v12561_v46, %v24665_v26  ;;  %12367 = vmatpush2.bf16.msra.mxu0 %v19429_v56  ;;  %v22233_v46 = vld [vmem:[#allocation13 + $0x694] ss:$28 sps:$4 sm:$0xff]  }
 0x786   : > { %12368 = vmatprep.subr.bf16.mxu0 %v19422_v19  ;;  %v24687_v0 = vadd.bf16 %v12506_v25, %v12430_v4  ;;  %v22228_v19 = vld [vmem:[#allocation13 + $0x6c8] ss:$28 sps:$4 sm:$0xff]  }
 0x787   : > { %v12577_v30 = vmul.bf16 1027030327, %v12569_v45  ;;  %15550 = vmatpush2.bf16.msra.mxu1 %v22289_v60  ;;  %v22236_v60 = vld [vmem:[#allocation13 + $0x65c] ss:$28 sps:$4 sm:$0xff]  }
 0x788   : > { %15551 = vmatprep.subr.bf16.mxu1 %v22294_v15  ;;  %v12560_v6 = vmul.bf16 %v24687_v0, %v24687_v0  ;;  %v22234_v45 = vld [vmem:[#allocation13 + $0x658] ss:$28 sps:$4 sm:$0xff]  }
 0x789   : > { %12369 = vmatpush2.bf16.msra.mxu0 %v19421_v48  ;;  %v12585_v12 = vadd.bf16 %v12577_v30, %v24665_v26  ;;  %v22230_v26 = vld [vmem:[#allocation13 + $0x6cc] ss:$28 sps:$4 sm:$0xff]   ;;  %v22242_v48 = vld [vmem:[#allocation13 + $0x624] ss:$28 sps:$4 sm:$0xff]   ;;  %v12118_v30 = vpop.f32.mrf.mxu1 }
 0x78a   : > { %12370 = vmatprep.subr.bf16.mxu0 %v19414_v28  ;;  %v12568_v27 = vmul.bf16 %v12560_v6, %v24687_v0  ;;  %v22240_v28 = vld [vmem:[#allocation13 + $0x620] ss:$28 sps:$4 sm:$0xff]  }
 0x78b   : > { %v12593_v62 = vmul.bf16 1061961548, %v12585_v12  ;;  %15552 = vmatpush2.bf16.msra.mxu1 %v22292_v23  ;;  %v12120_v23 = vpop.f32.mrf.mxu1 }
 0x78c   : > { %15553 = vmatprep.subr.bf16.mxu1 %v22297_v59  ;;  %v12576_v56 = vmul.bf16 1027030327, %v12568_v27  ;;  %v22254_v59 = vld [vmem:[#allocation13 + $0x5b4] ss:$28 sps:$4 sm:$0xff]  }
 0x78d   : > { %12371 = vmatpush2.bf16.msra.mxu0 %v19413_v40  ;;  %23022 = vtanh.bf16 %v12593_v62  ;;  %v22252_v40 = vld [vmem:[#allocation13 + $0x5b0] ss:$28 sps:$4 sm:$0xff]   ;;  %v12122_v12 = vpop.f32.mrf.mxu1  ;;  %v22260_v62 = vld [vmem:[#allocation13 + $0x57c] ss:$28 sps:$4 sm:$0xff]  }
 0x78e   : > { %12372 = vmatprep.subr.bf16.mxu0 %v19406_v14  ;;  %v12584_v57 = vadd.bf16 %v12576_v56, %v24687_v0 }
 0x78f   : > { %15554 = vmatpush2.bf16.msra.mxu1 %v22295_v44  ;;  %v23063_v44 = vld [vmem:[#allocation12] sm:$0xff] }
 0x790   : > { %15555 = vmatprep.subr.bf16.mxu1 %v22300_v31  ;;  %v12592_v15 = vmul.bf16 1061961548, %v12584_v57  ;;  %v12437_v31 = vcombine.high %v23063_v44, %v23063_v44  ;;  %v22376_v44 = vld [vmem:[#allocation13 + $0xb28] ss:$28 sps:$4 sm:$0xff]  }
 0x791   : > { %12373 = vmatpush2.bf16.msra.mxu0 %v19405_v21  ;;  %v22258_v21 = vld [vmem:[#allocation13 + $0x578] ss:$28 sps:$4 sm:$0xff]  }
 0x792   : > { %15482 = vmatprep.subr.bf16.mxu0 %v22206_v2  ;;  %23024 = vtanh.bf16 %v12592_v15  ;;  %v12124_v2 = vpop.f32.mrf.mxu1  ;;  %v22372_v15 = vld [vmem:[#allocation13 + $0xb64] ss:$28 sps:$4 sm:$0xff]  }
 0x793   : > { %15556 = vmatpush2.bf16.msra.mxu1 %v22298_v41 }
 0x794   : > { %12375 = vmatmul.mubr.bf16.vlgmr.msra.gmra.mxu0 %v24525_v11  ;;  %15611 = vmatprep.subr.bf16.mxu1 %v22303_v33  ;;  %v22215_v11 = vld [vmem:[#allocation13 + $0x464] ss:$28 sps:$4 sm:$0xff]  }
 0x795   : > { %15483 = vmatpush1.bf16.msra.mxu0 %v22204_v61  ;;  %v22266_v33 = vld [vmem:[#allocation13 + $0x544] ss:$28 sps:$4 sm:$0xff]  }
 0x796   : > { %15484 = vmatprep.subr.bf16.mxu0 %v22209_v43  ;;  %v12451_v43 = vrot.slane %v12437_v31, %v23974_v8  ;;  %v22384_v31 = vld [vmem:[#allocation13 + $0xaf4] ss:$28 sps:$4 sm:$0xff]  }
 0x798   : > { %v12453_v47 = vcombine.high %v12451_v43, %v12451_v43 }
 0x799   : > { %15485 = vmatpush1.bf16.msra.mxu0 %v22207_v29  ;;  %v12204_v29 = vpop.f32.mrf.mxu1 }
 0x79a   : > { %15486 = vmatprep.subr.bf16.mxu0 %v22212_v24  ;;  %v22264_v24 = vld [vmem:[#allocation13 + $0x540] ss:$28 sps:$4 sm:$0xff]  }
 0x79b   : > { %v23023_v37 = vpop.eup %23022 }
 0x79c   : > { %v12609_v22 = vadd.bf16 1065369472, %v23023_v37  ;;  %v24696_v37 = vrot.slane %v12451_v43, %v23974_v8  ;;  %v22390_v43 = vld [vmem:[#allocation13 + $0xabc] ss:$28 sps:$4 sm:$0xff]  }
 0x79d   : > { %15487 = vmatpush1.bf16.msra.mxu0 %v22210_v63  ;;  %v12206_v63 = vpop.f32.mrf.mxu1 }
 0x79e   : > { %15488 = vmatprep.subr.bf16.mxu0 %v22215_v11  ;;  %v24682_v20 = vmul.bf16 %v12609_v22, %v12553_v39  ;;  %v12552_v11 = vmul.bf16 1056980736, %v24687_v0  ;;  %v12515_v25 = vpack.i.b16 %v24696_v37, %v24696_v37  ;;  %v22358_v0 = vld [vmem:[#allocation13 + $0xbd0] ss:$28 sps:$4 sm:$0xff]  }
 0x79f   : > { %v12208_v42 = vpop.f32.mrf.mxu1 }
 0x7a0   : > { %15514 = vmatprep.mubr.bf16.mxu0 %v24682_v20  ;;  %v23025_v61 = vpop.eup %23024 }
 0x7a1   : > { %15489 = vmatpush1.bf16.msra.mxu0 %v22213_v54  ;;  %v12608_v3 = vadd.bf16 1065369472, %v23025_v61  ;;  %v12210_v27 = vpop.f32.mrf.mxu1  ;;  %v22382_v61 = vld [vmem:[#allocation13 + $0xaf0] ss:$28 sps:$4 sm:$0xff]  }
 0x7a2   : > { %15490 = vmatprep.subr.bf16.mxu0 %v22218_v1  ;;  %v24701_v1 = vrot.slane %v12453_v47, %v23974_v8  ;;  %v22394_v47 = vld [vmem:[#allocation13 + $0xa80] ss:$28 sps:$4 sm:$0xff]  }
 0x7a3   : > { %v24698_v22 = vmul.bf16 %v12608_v3, %v12552_v11  ;;  %v22388_v3 = vld [vmem:[#allocation13 + $0xab8] ss:$28 sps:$4 sm:$0xff]   ;;  %v22400_v11 = vld [vmem:[#allocation13 + $0xdc8] ss:$28 sps:$4 sm:$0xff]  }
 0x7a5   : > { %15491 = vmatpush1.bf16.msra.mxu0 %v22216_v16 }
 0x7a6   : > { %15492 = vmatprep.subr.bf16.mxu0 %v22221_v50 }
 0x7a9   : > { %15493 = vmatpush1.bf16.msra.mxu0 %v22219_v55 }
 0x7aa   : > { %15494 = vmatprep.subr.bf16.mxu0 %v22224_v9  ;;  %v22366_v9 = vld [vmem:[#allocation13 + $0xb9c] ss:$28 sps:$4 sm:$0xff]  }
 0x7ad   : > { %15495 = vmatpush1.bf16.msra.mxu0 %v22222_v10 }
 0x7ae   : > { %15496 = vmatprep.subr.bf16.mxu0 %v22227_v49  ;;  %v12522_v49 = vpack.i.b16 %v24701_v1, %v24701_v1 }
 0x7b1   : > { %15497 = vmatpush1.bf16.msra.mxu0 %v22225_v38 }
 0x7b2   : > { %15498 = vmatprep.subr.bf16.mxu0 %v22230_v26  ;;  %v12520_v26 = vrot.slane %v12515_v25, %v23979_v34 }
 0x7b4   : > { %v12161_v14 = vpop.f32.mrf.mxu0 }
 0x7b5   : > { %15499 = vmatpush2.bf16.msra.mxu0 %v22228_v19  ;;  %v12162_v53 = vadd.f32 %v12161_v14, %v12118_v30  ;;  %v12527_v30 = vrot.slane %v12522_v49, %v23979_v34  ;;  %v22418_v49 = vld [vmem:[#allocation13 + $0xd20] ss:$28 sps:$4 sm:$0xff]  }
 0x7b6   : > { %15500 = vmatprep.subr.bf16.mxu0 %v22233_v46  ;;  %v12163_v41 = vpop.f32.mrf.mxu0 }
 0x7b7   : > { %v12164_v16 = vadd.f32 %v12163_v41, %v12120_v23  ;;  %v12205_v6 = vadd.f32 %v12204_v29, %v12162_v53  ;;  %v22370_v23 = vld [vmem:[#allocation13 + $0xb60] ss:$28 sps:$4 sm:$0xff]  }
 0x7b8   : > { %v12165_v13 = vpop.f32.mrf.mxu0 }
 0x7b9   : > { %15501 = vmatpush2.bf16.msra.mxu0 %v22231_v35  ;;  %v12166_v54 = vadd.f32 %v12165_v13, %v12122_v12  ;;  %v12207_v19 = vadd.f32 %v12206_v63, %v12164_v16  ;;  %v22364_v35 = vld [vmem:[#allocation13 + $0xb98] ss:$28 sps:$4 sm:$0xff]   ;;  %v22402_v63 = vld [vmem:[#allocation13 + $0xdcc] ss:$28 sps:$4 sm:$0xff]  }
 0x7ba   : > { %15502 = vmatprep.subr.bf16.mxu0 %v22236_v60  ;;  %v12167_v39 = vpop.f32.mrf.mxu0 }
 0x7bb   : > { %v12168_v50 = vadd.f32 %v12167_v39, %v12124_v2  ;;  %v12209_v10 = vadd.f32 %v12208_v42, %v12166_v54  ;;  %v22406_v39 = vld [vmem:[#allocation13 + $0xd90] ss:$28 sps:$4 sm:$0xff]  }
 0x7bd   : > { %15503 = vmatpush2.bf16.msra.mxu0 %v22234_v45  ;;  %v12211_v57 = vadd.f32 %v12210_v27, %v12168_v50  ;;  %v22420_v50 = vld [vmem:[#allocation13 + $0xd24] ss:$28 sps:$4 sm:$0xff]   ;;  %v22426_v27 = vld [vmem:[#allocation13 + $0xcec] ss:$28 sps:$4 sm:$0xff]  }
 0x7be   : > { %15504 = vmatprep.subr.bf16.mxu0 %v22242_v48 }
 0x7c1   : > { %15505 = vmatpush2.bf16.msra.mxu0 %v22240_v28 }
 0x7c2   : > { %15506 = vmatprep.subr.bf16.mxu0 %v22248_v58 }
 0x7c5   : > { %15507 = vmatpush2.bf16.msra.mxu0 %v22246_v51 }
 0x7c6   : > { %15508 = vmatprep.subr.bf16.mxu0 %v22254_v59  ;;  %v22378_v59 = vld [vmem:[#allocation13 + $0xb2c] ss:$28 sps:$4 sm:$0xff]  }
 0x7c9   : > { %15509 = vmatpush2.bf16.msra.mxu0 %v22252_v40 }
 0x7ca   : > { %15510 = vmatprep.subr.bf16.mxu0 %v22260_v62 }
 0x7cd   : > { %15511 = vmatpush2.bf16.msra.mxu0 %v22258_v21 }
 0x7ce   : > { %15512 = vmatprep.subr.bf16.mxu0 %v22266_v33 }
 0x7d1   : > { %15513 = vmatpush2.bf16.msra.mxu0 %v22264_v24 }
 0x7d2   : > { %15568 = vmatprep.subr.bf16.mxu0 %v22354_v17  ;;  %v22396_v17 = vld [vmem:[#allocation13 + $0xa84] ss:$28 sps:$4 sm:$0xff]  }
 0x7d4   : > { %v12247_v4 = vpop.f32.mrf.mxu0  ;;  %15515 = vmatmul.mubr.bf16.vlgmr.msra.gmra.mxu0 %v24698_v22 }
 0x7d5   : > { %15569 = vmatpush1.bf16.msra.mxu0 %v22352_v7  ;;  %v12248_v56 = vadd.f32 %v12247_v4, %v12205_v6  ;;  %v22408_v7 = vld [vmem:[#allocation13 + $0xd94] ss:$28 sps:$4 sm:$0xff]  }
 0x7d6   : > { %v12249_v55 = vpop.f32.mrf.mxu0  ;;  %15570 = vmatprep.subr.bf16.mxu0 %v22360_v5  ;;  %v22414_v5 = vld [vmem:[#allocation13 + $0xd5c] ss:$28 sps:$4 sm:$0xff]  }
 0x7d7   : > { %v12250_v45 = vadd.f32 %v12249_v55, %v12207_v19  ;;  %v22412_v4 = vld [vmem:[#allocation13 + $0xd58] ss:$28 sps:$4 sm:$0xff]  }
 0x7d8   : > { %v12251_v38 = vpop.f32.mrf.mxu0  ;;  %v22432_v19 = vld [vmem:[#allocation13 + $0xcb4] ss:$28 sps:$4 sm:$0xff]  }
 0x7d9   : > { %v12252_v46 = vadd.f32 %v12251_v38, %v12209_v10  ;;  %15571 = vmatpush1.bf16.msra.mxu0 %v22358_v0  ;;  %v22306_v10 = vld [vmem:[#allocation13 + $0x15c] ss:$28 sps:$4 sm:$0xff]  }
 0x7da   : > { %v12253_v60 = vpop.f32.mrf.mxu0  ;;  %15572 = vmatprep.subr.bf16.mxu0 %v22366_v9  ;;  %v22301_v9 = vld [vmem:[#allocation13 + $0x190] ss:$28 sps:$4 sm:$0xff]   ;;  %v22304_v38 = vld [vmem:[#allocation13 + $0x158] ss:$28 sps:$4 sm:$0xff]  }
 0x7db   : > { %v12432_v48 = vpack.c.bf16 %v12252_v46, %v12248_v56  ;;  %v12254_v28 = vadd.f32 %v12253_v60, %v12211_v57  ;;  %v22424_v56 = vld [vmem:[#allocation13 + $0xce8] ss:$28 sps:$4 sm:$0xff]   ;;  %v22307_v46 = vld [vmem:[#allocation13 + $0x120] ss:$28 sps:$4 sm:$0xff]  }
 0x7dc   : > { %v22312_v57 = vld [vmem:[#allocation13 + $0xec] ss:$28 sps:$4 sm:$0xff]   ;;  %v22438_v60 = vld [vmem:[#allocation13 + $0xc7c] ss:$28 sps:$4 sm:$0xff]  }
 0x7dd   : > { %v12546_v58 = vadd.bf16 %v12520_v26, %v12432_v48  ;;  %v12433_v51 = vpack.c.bf16 %v12254_v28, %v12250_v45  ;;  %15573 = vmatpush1.bf16.msra.mxu0 %v22364_v35  ;;  %v22309_v26 = vld [vmem:[#allocation13 + $0x124] ss:$28 sps:$4 sm:$0xff]   ;;  %v22430_v35 = vld [vmem:[#allocation13 + $0xcb0] ss:$28 sps:$4 sm:$0xff]   ;;  %v22436_v48 = vld [vmem:[#allocation13 + $0xc78] ss:$28 sps:$4 sm:$0xff]  }
 0x7de   : > { %15574 = vmatprep.subr.bf16.mxu0 %v22372_v15  ;;  %v22310_v15 = vld [vmem:[#allocation13 + $0xe8] ss:$28 sps:$4 sm:$0xff]   ;;  %v22315_v45 = vld [vmem:[#allocation13 + $0xb4] ss:$28 sps:$4 sm:$0xff]  }
 0x7df   : > { %v12562_v40 = vmul.bf16 %v12546_v58, %v12546_v58  ;;  %v12547_v12 = vadd.bf16 %v12527_v30, %v12433_v51  ;;  %v12554_v0 = vmul.bf16 1056980736, %v12546_v58  ;;  %v22444_v28 = vld [vmem:[#allocation13 + $0xc44] ss:$28 sps:$4 sm:$0xff]   ;;  %v22313_v30 = vld [vmem:[#allocation13 + $0xb0] ss:$28 sps:$4 sm:$0xff]  }
 0x7e0   : > { %v22442_v51 = vld [vmem:[#allocation13 + $0xc40] ss:$28 sps:$4 sm:$0xff]  }
 0x7e1   : > { %v12570_v14 = vmul.bf16 %v12562_v40, %v12546_v58  ;;  %v12563_v62 = vmul.bf16 %v12547_v12, %v12547_v12  ;;  %15575 = vmatpush1.bf16.msra.mxu0 %v22370_v23  ;;  %v12555_v25 = vmul.bf16 1056980736, %v12547_v12  ;;  %v22450_v23 = vld [vmem:[#allocation13 + $0x514] ss:$28 sps:$4 sm:$0xff]   ;;  %v22321_v40 = vld [vmem:[#allocation13 + $0x44] ss:$28 sps:$4 sm:$0xff]  }
 0x7e2   : > { %15576 = vmatprep.subr.bf16.mxu0 %v22378_v59  ;;  %v22316_v59 = vld [vmem:[#allocation13 + $0x78] ss:$28 sps:$4 sm:$0xff]  }
 0x7e3   : > { %v12578_v21 = vmul.bf16 1027030327, %v12570_v14  ;;  %v12571_v2 = vmul.bf16 %v12563_v62, %v12547_v12  ;;  %v22324_v14 = vld [vmem:[#allocation13 + $0xc] ss:$28 sps:$4 sm:$0xff]  }
 0x7e4   : > { %v22322_v62 = vld [vmem:[#allocation13 + $0x8] ss:$28 sps:$4 sm:$0xff]  }
 0x7e5   : > { %v12586_v41 = vadd.bf16 %v12578_v21, %v12546_v58  ;;  %v12579_v33 = vmul.bf16 1027030327, %v12571_v2  ;;  %15577 = vmatpush1.bf16.msra.mxu0 %v22376_v44  ;;  %v22318_v58 = vld [vmem:[#allocation13 + $0x7c] ss:$28 sps:$4 sm:$0xff]   ;;  %v22327_v44 = vld [vmem:[#allocation13 + $0x354] ss:$28 sps:$4 sm:$0xff]  }
 0x7e6   : > { %15578 = vmatprep.subr.bf16.mxu0 %v22384_v31  ;;  %v22325_v31 = vld [vmem:[#allocation13 + $0x350] ss:$28 sps:$4 sm:$0xff]   ;;  %v22330_v21 = vld [vmem:[#allocation13 + $0x31c] ss:$28 sps:$4 sm:$0xff]  }
 0x7e7   : > { %v12594_v29 = vmul.bf16 1061961548, %v12586_v41  ;;  %v12587_v24 = vadd.bf16 %v12579_v33, %v12547_v12  ;;  %v22319_v12 = vld [vmem:[#allocation13 + $0x40] ss:$28 sps:$4 sm:$0xff]   ;;  %v22328_v2 = vld [vmem:[#allocation13 + $0x318] ss:$28 sps:$4 sm:$0xff]  }
 0x7e8   : > { %v22333_v41 = vld [vmem:[#allocation13 + $0x2e4] ss:$28 sps:$4 sm:$0xff]  }
 0x7e9   : > { %23026 = vtanh.bf16 %v12594_v29  ;;  %v12595_v13 = vmul.bf16 1061961548, %v12587_v24  ;;  %15579 = vmatpush1.bf16.msra.mxu0 %v22382_v61  ;;  %v22331_v33 = vld [vmem:[#allocation13 + $0x2e0] ss:$28 sps:$4 sm:$0xff]   ;;  %v22336_v61 = vld [vmem:[#allocation13 + $0x2ac] ss:$28 sps:$4 sm:$0xff]  }
 0x7ea   : > { %15580 = vmatprep.subr.bf16.mxu0 %v22390_v43  ;;  %v22334_v43 = vld [vmem:[#allocation13 + $0x2a8] ss:$28 sps:$4 sm:$0xff]   ;;  %v22339_v29 = vld [vmem:[#allocation13 + $0x274] ss:$28 sps:$4 sm:$0xff]  }
 0x7eb   : > { %23028 = vtanh.bf16 %v12595_v13  ;;  %v22337_v24 = vld [vmem:[#allocation13 + $0x270] ss:$28 sps:$4 sm:$0xff]   ;;  %v22342_v13 = vld [vmem:[#allocation13 + $0x23c] ss:$28 sps:$4 sm:$0xff]  }
 0x7ed   : > { %15581 = vmatpush1.bf16.msra.mxu0 %v22388_v3  ;;  %v22340_v3 = vld [vmem:[#allocation13 + $0x238] ss:$28 sps:$4 sm:$0xff]  }
 0x7ee   : > { %15582 = vmatprep.subr.bf16.mxu0 %v22396_v17  ;;  %v22345_v17 = vld [vmem:[#allocation13 + $0x204] ss:$28 sps:$4 sm:$0xff]  }
 0x7f1   : > { %15583 = vmatpush1.bf16.msra.mxu0 %v22394_v47  ;;  %v22343_v47 = vld [vmem:[#allocation13 + $0x200] ss:$28 sps:$4 sm:$0xff]  }
 0x7f2   : > { %15584 = vmatprep.subr.bf16.mxu0 %v22402_v63  ;;  %v22348_v63 = vld [vmem:[#allocation13 + $0x1cc] ss:$28 sps:$4 sm:$0xff]  }
 0x7f5   : > { %15585 = vmatpush2.bf16.msra.mxu0 %v22400_v11  ;;  %v22346_v11 = vld [vmem:[#allocation13 + $0x1c8] ss:$28 sps:$4 sm:$0xff]  }
 0x7f6   : > { %15586 = vmatprep.subr.bf16.mxu0 %v22408_v7  ;;  %v22351_v7 = vld [vmem:[#allocation13 + $0x894] ss:$28 sps:$4 sm:$0xff]  }
 0x7f7   : > { %v23027_v53 = vpop.eup %23026 }
 0x7f8   : > { %v12610_v42 = vadd.bf16 1065369472, %v23027_v53  ;;  %v22355_v53 = vld [vmem:[#allocation13 + $0x858] ss:$28 sps:$4 sm:$0xff]  }
 0x7f9   : > { %v23029_v54 = vpop.eup %23028  ;;  %15587 = vmatpush2.bf16.msra.mxu0 %v22406_v39  ;;  %v22349_v39 = vld [vmem:[#allocation13 + $0x890] ss:$28 sps:$4 sm:$0xff]  }
 0x7fa   : > { %v12611_v16 = vadd.bf16 1065369472, %v23029_v54  ;;  %15588 = vmatprep.subr.bf16.mxu0 %v22414_v5  ;;  %v24712_v6 = vmul.bf16 %v12610_v42, %v12554_v0  ;;  %v22357_v5 = vld [vmem:[#allocation13 + $0x85c] ss:$28 sps:$4 sm:$0xff]   ;;  %v22363_v54 = vld [vmem:[#allocation13 + $0x824] ss:$28 sps:$4 sm:$0xff]   ;;  %v12333_v42 = vpop.f32.mrf.mxu1 }
 0x7fb   : > { %v22367_v0 = vld [vmem:[#allocation13 + $0x7e8] ss:$28 sps:$4 sm:$0xff]  }
 0x7fc   : > { %v24710_v55 = vmul.bf16 %v12611_v16, %v12555_v25  ;;  %v22369_v25 = vld [vmem:[#allocation13 + $0x7ec] ss:$28 sps:$4 sm:$0xff]   ;;  %v12335_v16 = vpop.f32.mrf.mxu1 }
 0x7fd   : > { %15589 = vmatpush2.bf16.msra.mxu0 %v22412_v4  ;;  %v22361_v4 = vld [vmem:[#allocation13 + $0x820] ss:$28 sps:$4 sm:$0xff]  }
 0x7fe   : > { %15557 = vmatprep.mubr.bf16.mxu1 %v24710_v55  ;;  %15590 = vmatprep.subr.bf16.mxu0 %v22420_v50 }
 0x7ff   : > { %15558 = vmatmul.mubr.bf16.vlgmr.msra.gmra.mxu1 %v24712_v6 }
 0x800   : > { %15612 = vmatpush1.bf16.msra.mxu1 %v22301_v9  ;;  %15643 = vmatprep.mubr.bf16.mxu1 %v24624_v36  ;;  %v22375_v9 = vld [vmem:[#allocation13 + $0x7b4] ss:$28 sps:$4 sm:$0xff]  }
 0x801   : > { %15613 = vmatprep.subr.bf16.mxu1 %v22306_v10  ;;  %15591 = vmatpush2.bf16.msra.mxu0 %v22418_v49  ;;  %v12337_v10 = vpop.f32.mrf.mxu1 }
 0x802   : > { %15592 = vmatprep.subr.bf16.mxu0 %v22426_v27  ;;  %v22373_v27 = vld [vmem:[#allocation13 + $0x7b0] ss:$28 sps:$4 sm:$0xff]  }
 0x804   : > { %15614 = vmatpush1.bf16.msra.mxu1 %v22304_v38  ;;  %v22381_v38 = vld [vmem:[#allocation13 + $0x77c] ss:$28 sps:$4 sm:$0xff]  }
 0x805   : > { %15615 = vmatprep.subr.bf16.mxu1 %v22309_v26  ;;  %15593 = vmatpush2.bf16.msra.mxu0 %v22424_v56  ;;  %v12339_v26 = vpop.f32.mrf.mxu1 }
 0x806   : > { %15594 = vmatprep.subr.bf16.mxu0 %v22432_v19 }
 0x807   : > { %v12419_v19 = vpop.f32.mrf.mxu1 }
 0x808   : > { %15616 = vmatpush1.bf16.msra.mxu1 %v22307_v46  ;;  %v22379_v46 = vld [vmem:[#allocation13 + $0x778] ss:$28 sps:$4 sm:$0xff]  }
 0x809   : > { %15617 = vmatprep.subr.bf16.mxu1 %v22312_v57  ;;  %15595 = vmatpush2.bf16.msra.mxu0 %v22430_v35  ;;  %v22387_v57 = vld [vmem:[#allocation13 + $0x744] ss:$28 sps:$4 sm:$0xff]  }
 0x80a   : > { %15596 = vmatprep.subr.bf16.mxu0 %v22438_v60  ;;  %v12483_v60 = vcombine.high %v24696_v37, %v24696_v37 }
 0x80c   : > { %15618 = vmatpush1.bf16.msra.mxu1 %v22310_v15  ;;  %v12421_v15 = vpop.f32.mrf.mxu1 }
 0x80d   : > { %15619 = vmatprep.subr.bf16.mxu1 %v22315_v45  ;;  %15597 = vmatpush2.bf16.msra.mxu0 %v22436_v48  ;;  %v22385_v48 = vld [vmem:[#allocation13 + $0x740] ss:$28 sps:$4 sm:$0xff]  }
 0x80e   : > { %15598 = vmatprep.subr.bf16.mxu0 %v22444_v28 }
 0x810   : > { %15620 = vmatpush1.bf16.msra.mxu1 %v22313_v30  ;;  %v12485_v30 = vcombine.high %v24701_v1, %v24701_v1 }
 0x811   : > { %15621 = vmatprep.subr.bf16.mxu1 %v22318_v58  ;;  %15599 = vmatpush2.bf16.msra.mxu0 %v22442_v51  ;;  %v22393_v58 = vld [vmem:[#allocation13 + $0x70c] ss:$28 sps:$4 sm:$0xff]  }
 0x812   : > { %15654 = vmatprep.subr.bf16.mxu0 %v22450_v23 }
 0x814   : > { %15622 = vmatpush1.bf16.msra.mxu1 %v22316_v59  ;;  %v12290_v50 = vpop.f32.mrf.mxu0 }
 0x815   : > { %15623 = vmatprep.subr.bf16.mxu1 %v22321_v40  ;;  %v12334_v28 = vadd.f32 %v12333_v42, %v12290_v50  ;;  %v22411_v42 = vld [vmem:[#allocation13 + $0x9e4] ss:$28 sps:$4 sm:$0xff]  }
 0x816   : > { %v12292_v49 = vpop.f32.mrf.mxu0 }
 0x817   : > { %v12336_v23 = vadd.f32 %v12335_v16, %v12292_v49  ;;  %v22409_v16 = vld [vmem:[#allocation13 + $0x9e0] ss:$28 sps:$4 sm:$0xff]  }
 0x818   : > { %15624 = vmatpush1.bf16.msra.mxu1 %v22319_v12  ;;  %v12294_v56 = vpop.f32.mrf.mxu0  ;;  %v12529_v12 = vpack.i.b16 %v12483_v60, %v12483_v60  ;;  %v22435_v60 = vld [vmem:[#allocation13 + $0x904] ss:$28 sps:$4 sm:$0xff]  }
 0x819   : > { %15625 = vmatprep.subr.bf16.mxu1 %v22324_v14  ;;  %v12338_v59 = vadd.f32 %v12337_v10, %v12294_v56  ;;  %v12423_v14 = vpop.f32.mrf.mxu1 }
 0x81a   : > { %v12296_v35 = vpop.f32.mrf.mxu0  ;;  %v12534_v1 = vrot.slane %v12529_v12, %v23979_v34  ;;  %v22453_v12 = vld [vmem:[#allocation13 + $0x164] ss:$28 sps:$4 sm:$0xff]  }
 0x81b   : > { %v12340_v37 = vadd.f32 %v12339_v26, %v12296_v35  ;;  %v22423_v26 = vld [vmem:[#allocation13 + $0x974] ss:$28 sps:$4 sm:$0xff]  }
 0x81c   : > { %15626 = vmatpush1.bf16.msra.mxu1 %v22322_v62  ;;  %v22427_v35 = vld [vmem:[#allocation13 + $0x938] ss:$28 sps:$4 sm:$0xff]  }
 0x81d   : > { %15627 = vmatprep.subr.bf16.mxu1 %v22327_v44  ;;  %v22391_v44 = vld [vmem:[#allocation13 + $0x708] ss:$28 sps:$4 sm:$0xff]  }
 0x820   : > { %15628 = vmatpush2.bf16.msra.mxu1 %v22325_v31 }
 0x821   : > { %15629 = vmatprep.subr.bf16.mxu1 %v22330_v21 }
 0x824   : > { %15630 = vmatpush2.bf16.msra.mxu1 %v22328_v2  ;;  %v12536_v2 = vpack.i.b16 %v12485_v30, %v12485_v30  ;;  %v22447_v30 = vld [vmem:[#allocation13 + $0x19c] ss:$28 sps:$4 sm:$0xff]  }
 0x825   : > { %15631 = vmatprep.subr.bf16.mxu1 %v22333_v41  ;;  %v22399_v41 = vld [vmem:[#allocation13 + $0xa54] ss:$28 sps:$4 sm:$0xff]  }
 0x828   : > { %15632 = vmatpush2.bf16.msra.mxu1 %v22331_v33 }
 0x829   : > { %15633 = vmatprep.subr.bf16.mxu1 %v22336_v61 }
 0x82c   : > { %15634 = vmatpush2.bf16.msra.mxu1 %v22334_v43 }
 0x82d   : > { %15635 = vmatprep.subr.bf16.mxu1 %v22339_v29 }
 0x830   : > { %15636 = vmatpush2.bf16.msra.mxu1 %v22337_v24  ;;  %v12425_v24 = vpop.f32.mrf.mxu1 }
 0x831   : > { %15637 = vmatprep.subr.bf16.mxu1 %v22342_v13  ;;  %v22397_v13 = vld [vmem:[#allocation13 + $0xa50] ss:$28 sps:$4 sm:$0xff]  }
 0x834   : > { %15638 = vmatpush2.bf16.msra.mxu1 %v22340_v3 }
 0x835   : > { %15639 = vmatprep.subr.bf16.mxu1 %v22345_v17 }
 0x838   : > { %15640 = vmatpush2.bf16.msra.mxu1 %v22343_v47 }
 0x839   : > { %15641 = vmatprep.subr.bf16.mxu1 %v22348_v63  ;;  %v12541_v63 = vrot.slane %v12536_v2, %v23979_v34  ;;  %v22459_v2 = vld [vmem:[#allocation13 + $0x12c] ss:$28 sps:$4 sm:$0xff]  }
 0x83c   : > { %15642 = vmatpush2.bf16.msra.mxu1 %v22346_v11  ;;  %v22405_v11 = vld [vmem:[#allocation13 + $0xa1c] ss:$28 sps:$4 sm:$0xff]  }
 0x83d   : > { %15697 = vmatprep.subr.bf16.mxu1 %v22351_v7 }
 0x83f   : > { %15644 = vmatmul.mubr.bf16.vlgmr.msra.gmra.mxu1 %v24641_v52 }
 0x840   : > { %15698 = vmatpush1.bf16.msra.mxu1 %v22349_v39  ;;  %15729 = vmatprep.mubr.bf16.mxu1 %v24710_v55 }
 0x841   : > { %15699 = vmatprep.subr.bf16.mxu1 %v22357_v5  ;;  %v22403_v5 = vld [vmem:[#allocation13 + $0xa18] ss:$28 sps:$4 sm:$0xff]  }
 0x844   : > { %15700 = vmatpush1.bf16.msra.mxu1 %v22355_v53 }
 0x845   : > { %15701 = vmatprep.subr.bf16.mxu1 %v22363_v54 }
 0x848   : > { %15702 = vmatpush1.bf16.msra.mxu1 %v22361_v4 }
 0x849   : > { %15703 = vmatprep.subr.bf16.mxu1 %v22369_v25 }
 0x84c   : > { %15704 = vmatpush1.bf16.msra.mxu1 %v22367_v0 }
 0x84d   : > { %15705 = vmatprep.subr.bf16.mxu1 %v22375_v9  ;;  %v22417_v9 = vld [vmem:[#allocation13 + $0x9ac] ss:$28 sps:$4 sm:$0xff]  }
 0x850   : > { %15706 = vmatpush1.bf16.msra.mxu1 %v22373_v27  ;;  %v22415_v27 = vld [vmem:[#allocation13 + $0x9a8] ss:$28 sps:$4 sm:$0xff]  }
 0x851   : > { %15707 = vmatprep.subr.bf16.mxu1 %v22381_v38 }
 0x854   : > { %15708 = vmatpush1.bf16.msra.mxu1 %v22379_v46  ;;  %v12376_v45 = vpop.f32.mrf.mxu0  ;;  %v22421_v46 = vld [vmem:[#allocation13 + $0x970] ss:$28 sps:$4 sm:$0xff]  }
 0x855   : > { %15709 = vmatprep.subr.bf16.mxu1 %v22387_v57  ;;  %v12377_v40 = vadd.f32 %v12376_v45, %v12334_v28  ;;  %v22429_v57 = vld [vmem:[#allocation13 + $0x93c] ss:$28 sps:$4 sm:$0xff]   ;;  %v22441_v45 = vld [vmem:[#allocation13 + $0x8cc] ss:$28 sps:$4 sm:$0xff]  }
 0x856   : > { %v12378_v51 = vpop.f32.mrf.mxu0 }
 0x857   : > { %v12379_v31 = vadd.f32 %v12378_v51, %v12336_v23  ;;  %v12420_v61 = vadd.f32 %v12419_v19, %v12377_v40  ;;  %v22445_v51 = vld [vmem:[#allocation13 + $0x198] ss:$28 sps:$4 sm:$0xff]  }
 0x858   : > { %15710 = vmatpush1.bf16.msra.mxu1 %v22385_v48  ;;  %v12380_v62 = vpop.f32.mrf.mxu0  ;;  %v22439_v48 = vld [vmem:[#allocation13 + $0x8c8] ss:$28 sps:$4 sm:$0xff]  }
 0x859   : > { %v12381_v21 = vadd.f32 %v12380_v62, %v12338_v59  ;;  %15711 = vmatprep.subr.bf16.mxu1 %v22393_v58  ;;  %v12422_v3 = vadd.f32 %v12421_v15, %v12379_v31  ;;  %v22433_v15 = vld [vmem:[#allocation13 + $0x900] ss:$28 sps:$4 sm:$0xff]  }
 0x85a   : > { %v12382_v33 = vpop.f32.mrf.mxu0  ;;  %v22451_v31 = vld [vmem:[#allocation13 + $0x160] ss:$28 sps:$4 sm:$0xff]  }
 0x85b   : > { %v12424_v43 = vadd.f32 %v12423_v14, %v12381_v21  ;;  %v12383_v29 = vadd.f32 %v12382_v33, %v12340_v37  ;;  %v22456_v21 = vld [vmem:[#allocation13 + $0x4dc] ss:$28 sps:$4 sm:$0xff]   ;;  %v22457_v33 = vld [vmem:[#allocation13 + $0x128] ss:$28 sps:$4 sm:$0xff]  }
 0x85c   : > { %15712 = vmatpush1.bf16.msra.mxu1 %v22391_v44  ;;  %v22448_v44 = vld [vmem:[#allocation13 + $0x510] ss:$28 sps:$4 sm:$0xff]  }
 0x85d   : > { %v12434_v17 = vpack.c.bf16 %v12424_v43, %v12420_v61  ;;  %v12426_v47 = vadd.f32 %v12425_v24, %v12383_v29  ;;  %15713 = vmatprep.subr.bf16.mxu1 %v22399_v41  ;;  %v22454_v41 = vld [vmem:[#allocation13 + $0x4d8] ss:$28 sps:$4 sm:$0xff]   ;;  %v22462_v61 = vld [vmem:[#allocation13 + $0x4a4] ss:$28 sps:$4 sm:$0xff]   ;;  %v22463_v29 = vld [vmem:[#allocation13 + $0xf0] ss:$28 sps:$4 sm:$0xff]  }
 0x85e   : > { %v22465_v43 = vld [vmem:[#allocation13 + $0xf4] ss:$28 sps:$4 sm:$0xff]   ;;  %v22468_v24 = vld [vmem:[#allocation13 + $0x46c] ss:$28 sps:$4 sm:$0xff]  }
 0x85f   : > { %v12548_v7 = vadd.bf16 %v12534_v1, %v12434_v17  ;;  %v12435_v39 = vpack.c.bf16 %v12426_v47, %v12422_v3  ;;  %v22460_v1 = vld [vmem:[#allocation13 + $0x4a0] ss:$28 sps:$4 sm:$0xff]   ;;  %v22466_v3 = vld [vmem:[#allocation13 + $0x468] ss:$28 sps:$4 sm:$0xff]   ;;  %v22469_v17 = vld [vmem:[#allocation13 + $0xb8] ss:$28 sps:$4 sm:$0xff]  }
 0x860   : > { %15714 = vmatpush2.bf16.msra.mxu1 %v22397_v13  ;;  %v22471_v13 = vld [vmem:[#allocation13 + $0xbc] ss:$28 sps:$4 sm:$0xff]   ;;  %v22474_v47 = vld [vmem:[#allocation13 + $0x434] ss:$28 sps:$4 sm:$0xff]  }
 0x861   : > { %v12564_v53 = vmul.bf16 %v12548_v7, %v12548_v7  ;;  %v12549_v54 = vadd.bf16 %v12541_v63, %v12435_v39  ;;  %15715 = vmatprep.subr.bf16.mxu1 %v22405_v11  ;;  %v12556_v62 = vmul.bf16 1056980736, %v12548_v7  ;;  %v22477_v63 = vld [vmem:[#allocation13 + $0x84] ss:$28 sps:$4 sm:$0xff]   ;;  %v22472_v11 = vld [vmem:[#allocation13 + $0x430] ss:$28 sps:$4 sm:$0xff]  }
 0x862   : > { %v22480_v39 = vld [vmem:[#allocation13 + $0x3fc] ss:$28 sps:$4 sm:$0xff]  }
 0x863   : > { %v12572_v4 = vmul.bf16 %v12564_v53, %v12548_v7  ;;  %v12565_v25 = vmul.bf16 %v12549_v54, %v12549_v54  ;;  %v12557_v23 = vmul.bf16 1056980736, %v12549_v54  ;;  %v22478_v53 = vld [vmem:[#allocation13 + $0x3f8] ss:$28 sps:$4 sm:$0xff]  }
 0x864   : > { %15716 = vmatpush2.bf16.msra.mxu1 %v22403_v5  ;;  %v22483_v5 = vld [vmem:[#allocation13 + $0x4c] ss:$28 sps:$4 sm:$0xff]  }
 0x865   : > { %v12580_v50 = vmul.bf16 1027030327, %v12572_v4  ;;  %v12573_v0 = vmul.bf16 %v12565_v25, %v12549_v54  ;;  %15717 = vmatprep.subr.bf16.mxu1 %v22411_v42  ;;  %v22486_v42 = vld [vmem:[#allocation13 + $0x3c4] ss:$28 sps:$4 sm:$0xff]   ;;  %v22489_v4 = vld [vmem:[#allocation13 + $0x14] ss:$28 sps:$4 sm:$0xff]  }
 0x866   : > { %v22484_v25 = vld [vmem:[#allocation13 + $0x3c0] ss:$28 sps:$4 sm:$0xff]  }
 0x867   : > { %v12588_v10 = vadd.bf16 %v12580_v50, %v12548_v7  ;;  %v12581_v49 = vmul.bf16 1027030327, %v12573_v0  ;;  %v22475_v7 = vld [vmem:[#allocation13 + $0x80] ss:$28 sps:$4 sm:$0xff]   ;;  %v22492_v50 = vld [vmem:[#allocation13 + $0x38c] ss:$28 sps:$4 sm:$0xff]  }
 0x868   : > { %15718 = vmatpush2.bf16.msra.mxu1 %v22409_v16  ;;  %v22487_v16 = vld [vmem:[#allocation13 + $0x10] ss:$28 sps:$4 sm:$0xff]   ;;  %v22495_v0 = vld [vmem:[#allocation13 + $0x35c] ss:$28 sps:$4 sm:$0xff]  }
 0x869   : > { %v12596_v38 = vmul.bf16 1061961548, %v12588_v10  ;;  %15719 = vmatprep.subr.bf16.mxu1 %v22417_v9  ;;  %v12589_v56 = vadd.bf16 %v12581_v49, %v12549_v54  ;;  %v22481_v54 = vld [vmem:[#allocation13 + $0x48] ss:$28 sps:$4 sm:$0xff]   ;;  %v22493_v10 = vld [vmem:[#allocation13 + $0x358] ss:$28 sps:$4 sm:$0xff]  }
 0x86a   : > { %v22490_v9 = vld [vmem:[#allocation13 + $0x388] ss:$28 sps:$4 sm:$0xff]   ;;  %v22498_v49 = vld [vmem:[#allocation13 + $0x6d4] ss:$28 sps:$4 sm:$0xff]  }
 0x86b   : > { %23030 = vtanh.bf16 %v12596_v38  ;;  %v12597_v19 = vmul.bf16 1061961548, %v12589_v56  ;;  %v22496_v38 = vld [vmem:[#allocation13 + $0x6d0] ss:$28 sps:$4 sm:$0xff]   ;;  %v22504_v56 = vld [vmem:[#allocation13 + $0x69c] ss:$28 sps:$4 sm:$0xff]  }
 0x86c   : > { %15720 = vmatpush2.bf16.msra.mxu1 %v22415_v27  ;;  %v22501_v27 = vld [vmem:[#allocation13 + $0x324] ss:$28 sps:$4 sm:$0xff]  }
 0x86d   : > { %15721 = vmatprep.subr.bf16.mxu1 %v22423_v26  ;;  %23032 = vtanh.bf16 %v12597_v19  ;;  %v22499_v26 = vld [vmem:[#allocation13 + $0x320] ss:$28 sps:$4 sm:$0xff]   ;;  %v22507_v19 = vld [vmem:[#allocation13 + $0x2ec] ss:$28 sps:$4 sm:$0xff]  }
 0x870   : > { %15722 = vmatpush2.bf16.msra.mxu1 %v22421_v46  ;;  %v22502_v46 = vld [vmem:[#allocation13 + $0x698] ss:$28 sps:$4 sm:$0xff]  }
 0x871   : > { %15723 = vmatprep.subr.bf16.mxu1 %v22429_v57  ;;  %v22505_v57 = vld [vmem:[#allocation13 + $0x2e8] ss:$28 sps:$4 sm:$0xff]  }
 0x874   : > { %15724 = vmatpush2.bf16.msra.mxu1 %v22427_v35  ;;  %v22510_v35 = vld [vmem:[#allocation13 + $0x664] ss:$28 sps:$4 sm:$0xff]  }
 0x875   : > { %15725 = vmatprep.subr.bf16.mxu1 %v22435_v60  ;;  %v22513_v60 = vld [vmem:[#allocation13 + $0x2b4] ss:$28 sps:$4 sm:$0xff]  }
 0x878   : > { %15726 = vmatpush2.bf16.msra.mxu1 %v22433_v15  ;;  %v22508_v15 = vld [vmem:[#allocation13 + $0x660] ss:$28 sps:$4 sm:$0xff]  }
 0x879   : > { %v23031_v28 = vpop.eup %23030  ;;  %15727 = vmatprep.subr.bf16.mxu1 %v22441_v45  ;;  %v22511_v45 = vld [vmem:[#allocation13 + $0x2b0] ss:$28 sps:$4 sm:$0xff]  }
 0x87a   : > { %v12612_v40 = vadd.bf16 1065369472, %v23031_v28  ;;  %v22519_v28 = vld [vmem:[#allocation13 + $0x27c] ss:$28 sps:$4 sm:$0xff]  }
 0x87b   : > { %v23033_v58 = vpop.eup %23032 }
 0x87c   : > { %15728 = vmatpush2.bf16.msra.mxu1 %v22439_v48  ;;  %v12613_v59 = vadd.bf16 1065369472, %v23033_v58  ;;  %v24729_v37 = vmul.bf16 %v12612_v40, %v12556_v62  ;;  %v22516_v48 = vld [vmem:[#allocation13 + $0x62c] ss:$28 sps:$4 sm:$0xff]   ;;  %v22517_v58 = vld [vmem:[#allocation13 + $0x278] ss:$28 sps:$4 sm:$0xff]  }
 0x87d   : > { %15783 = vmatprep.subr.bf16.mxu1 %v22447_v30  ;;  %v22514_v30 = vld [vmem:[#allocation13 + $0x628] ss:$28 sps:$4 sm:$0xff]   ;;  %v22523_v40 = vld [vmem:[#allocation13 + $0x240] ss:$28 sps:$4 sm:$0xff]  }
 0x87e   : > { %v24725_v14 = vmul.bf16 %v12613_v59, %v12557_v23  ;;  %v22525_v23 = vld [vmem:[#allocation13 + $0x244] ss:$28 sps:$4 sm:$0xff]   ;;  %v22520_v59 = vld [vmem:[#allocation13 + $0x5f0] ss:$28 sps:$4 sm:$0xff]  }
 0x87f   : > { %15730 = vmatmul.mubr.bf16.vlgmr.msra.gmra.mxu1 %v24712_v6  ;;  %v22531_v62 = vld [vmem:[#allocation13 + $0x20c] ss:$28 sps:$4 sm:$0xff]  }
 0x880   : > { %15784 = vmatpush1.bf16.msra.mxu1 %v22445_v51  ;;  %15815 = vmatprep.mubr.bf16.mxu1 %v24624_v36  ;;  %v22522_v51 = vld [vmem:[#allocation13 + $0x5f4] ss:$28 sps:$4 sm:$0xff]  }
 0x881   : > { %15600 = vmatprep.mubr.bf16.mxu0 %v24725_v14  ;;  %15785 = vmatprep.subr.bf16.mxu1 %v22453_v12  ;;  %v22528_v12 = vld [vmem:[#allocation13 + $0x5bc] ss:$28 sps:$4 sm:$0xff]  }
 0x882   : > { %15601 = vmatmul.mubr.bf16.vlgmr.msra.gmra.mxu0 %v24729_v37 }
 0x883   : > { %15655 = vmatpush1.bf16.msra.mxu0 %v22448_v44  ;;  %15686 = vmatprep.mubr.bf16.mxu0 %v24682_v20  ;;  %v22526_v44 = vld [vmem:[#allocation13 + $0x5b8] ss:$28 sps:$4 sm:$0xff]  }
 0x884   : > { %15786 = vmatpush1.bf16.msra.mxu1 %v22451_v31  ;;  %15656 = vmatprep.subr.bf16.mxu0 %v22456_v21  ;;  %v22529_v31 = vld [vmem:[#allocation13 + $0x208] ss:$28 sps:$4 sm:$0xff]  }
 0x885   : > { %15787 = vmatprep.subr.bf16.mxu1 %v22459_v2  ;;  %v22534_v21 = vld [vmem:[#allocation13 + $0x584] ss:$28 sps:$4 sm:$0xff]   ;;  %v22537_v2 = vld [vmem:[#allocation13 + $0x1d4] ss:$28 sps:$4 sm:$0xff]  }
 0x887   : > { %15657 = vmatpush1.bf16.msra.mxu0 %v22454_v41  ;;  %v22532_v41 = vld [vmem:[#allocation13 + $0x580] ss:$28 sps:$4 sm:$0xff]  }
 0x888   : > { %15788 = vmatpush1.bf16.msra.mxu1 %v22457_v33  ;;  %15658 = vmatprep.subr.bf16.mxu0 %v22462_v61  ;;  %v22535_v33 = vld [vmem:[#allocation13 + $0x1d0] ss:$28 sps:$4 sm:$0xff]  }
 0x889   : > { %15789 = vmatprep.subr.bf16.mxu1 %v22465_v43  ;;  %v22540_v61 = vld [vmem:[#allocation13 + $0x54c] ss:$28 sps:$4 sm:$0xff]   ;;  %v22543_v43 = vld [vmem:[#allocation13 + $0x89c] ss:$28 sps:$4 sm:$0xff]  }
 0x88b   : > { %15659 = vmatpush1.bf16.msra.mxu0 %v22460_v1  ;;  %v22538_v1 = vld [vmem:[#allocation13 + $0x548] ss:$28 sps:$4 sm:$0xff]  }
 0x88c   : > { %15790 = vmatpush1.bf16.msra.mxu1 %v22463_v29  ;;  %15660 = vmatprep.subr.bf16.mxu0 %v22468_v24  ;;  %v22541_v29 = vld [vmem:[#allocation13 + $0x898] ss:$28 sps:$4 sm:$0xff]  }
 0x88d   : > { %15791 = vmatprep.subr.bf16.mxu1 %v22471_v13  ;;  %v22546_v24 = vld [vmem:[#allocation13 + $0xc14] ss:$28 sps:$4 sm:$0xff]   ;;  %v22549_v13 = vld [vmem:[#allocation13 + $0x864] ss:$28 sps:$4 sm:$0xff]  }
 0x88f   : > { %15661 = vmatpush1.bf16.msra.mxu0 %v22466_v3  ;;  %v22544_v3 = vld [vmem:[#allocation13 + $0xc10] ss:$28 sps:$4 sm:$0xff]  }
 0x890   : > { %15792 = vmatpush1.bf16.msra.mxu1 %v22469_v17  ;;  %15662 = vmatprep.subr.bf16.mxu0 %v22474_v47  ;;  %v22547_v17 = vld [vmem:[#allocation13 + $0x860] ss:$28 sps:$4 sm:$0xff]  }
 0x891   : > { %15793 = vmatprep.subr.bf16.mxu1 %v22477_v63  ;;  %v22552_v47 = vld [vmem:[#allocation13 + $0xbdc] ss:$28 sps:$4 sm:$0xff]   ;;  %v22555_v63 = vld [vmem:[#allocation13 + $0x82c] ss:$28 sps:$4 sm:$0xff]  }
 0x893   : > { %15663 = vmatpush1.bf16.msra.mxu0 %v22472_v11  ;;  %v22550_v11 = vld [vmem:[#allocation13 + $0xbd8] ss:$28 sps:$4 sm:$0xff]  }
 0x894   : > { %15794 = vmatpush1.bf16.msra.mxu1 %v22475_v7  ;;  %15664 = vmatprep.subr.bf16.mxu0 %v22480_v39  ;;  %v22553_v7 = vld [vmem:[#allocation13 + $0x828] ss:$28 sps:$4 sm:$0xff]  }
 0x895   : > { %15795 = vmatprep.subr.bf16.mxu1 %v22483_v5  ;;  %v22558_v39 = vld [vmem:[#allocation13 + $0xba4] ss:$28 sps:$4 sm:$0xff]   ;;  %v22561_v5 = vld [vmem:[#allocation13 + $0x7f4] ss:$28 sps:$4 sm:$0xff]  }
 0x897   : > { %15665 = vmatpush1.bf16.msra.mxu0 %v22478_v53  ;;  %v22556_v53 = vld [vmem:[#allocation13 + $0xba0] ss:$28 sps:$4 sm:$0xff]  }
 0x898   : > { %15796 = vmatpush1.bf16.msra.mxu1 %v22481_v54  ;;  %15666 = vmatprep.subr.bf16.mxu0 %v22486_v42  ;;  %v22559_v54 = vld [vmem:[#allocation13 + $0x7f0] ss:$28 sps:$4 sm:$0xff]  }
 0x899   : > { %15797 = vmatprep.subr.bf16.mxu1 %v22489_v4  ;;  %v22564_v42 = vld [vmem:[#allocation13 + $0xb6c] ss:$28 sps:$4 sm:$0xff]   ;;  %v22567_v4 = vld [vmem:[#allocation13 + $0x7bc] ss:$28 sps:$4 sm:$0xff]  }
 0x89b   : > { %15667 = vmatpush1.bf16.msra.mxu0 %v22484_v25  ;;  %v22562_v25 = vld [vmem:[#allocation13 + $0xb68] ss:$28 sps:$4 sm:$0xff]  }
 0x89c   : > { %15798 = vmatpush1.bf16.msra.mxu1 %v22487_v16  ;;  %15668 = vmatprep.subr.bf16.mxu0 %v22492_v50  ;;  %v22565_v16 = vld [vmem:[#allocation13 + $0x7b8] ss:$28 sps:$4 sm:$0xff]  }
 0x89d   : > { %15799 = vmatprep.subr.bf16.mxu1 %v22495_v0  ;;  %v22570_v50 = vld [vmem:[#allocation13 + $0xb34] ss:$28 sps:$4 sm:$0xff]   ;;  %v22573_v0 = vld [vmem:[#allocation13 + $0x784] ss:$28 sps:$4 sm:$0xff]  }
 0x89f   : > { %15669 = vmatpush1.bf16.msra.mxu0 %v22490_v9  ;;  %v22568_v9 = vld [vmem:[#allocation13 + $0xb30] ss:$28 sps:$4 sm:$0xff]  }
 0x8a0   : > { %15800 = vmatpush2.bf16.msra.mxu1 %v22493_v10  ;;  %15670 = vmatprep.subr.bf16.mxu0 %v22498_v49  ;;  %v22571_v10 = vld [vmem:[#allocation13 + $0x780] ss:$28 sps:$4 sm:$0xff]  }
 0x8a1   : > { %15801 = vmatprep.subr.bf16.mxu1 %v22501_v27  ;;  %v22576_v49 = vld [vmem:[#allocation13 + $0xafc] ss:$28 sps:$4 sm:$0xff]   ;;  %v22579_v27 = vld [vmem:[#allocation13 + $0x74c] ss:$28 sps:$4 sm:$0xff]  }
 0x8a3   : > { %15671 = vmatpush2.bf16.msra.mxu0 %v22496_v38  ;;  %v22574_v38 = vld [vmem:[#allocation13 + $0xaf8] ss:$28 sps:$4 sm:$0xff]  }
 0x8a4   : > { %15802 = vmatpush2.bf16.msra.mxu1 %v22499_v26  ;;  %15672 = vmatprep.subr.bf16.mxu0 %v22504_v56  ;;  %v22577_v26 = vld [vmem:[#allocation13 + $0x748] ss:$28 sps:$4 sm:$0xff]  }
 0x8a5   : > { %15803 = vmatprep.subr.bf16.mxu1 %v22507_v19  ;;  %v22582_v56 = vld [vmem:[#allocation13 + $0xac4] ss:$28 sps:$4 sm:$0xff]   ;;  %v22585_v19 = vld [vmem:[#allocation13 + $0x714] ss:$28 sps:$4 sm:$0xff]  }
 0x8a7   : > { %15673 = vmatpush2.bf16.msra.mxu0 %v22502_v46  ;;  %v22580_v46 = vld [vmem:[#allocation13 + $0xac0] ss:$28 sps:$4 sm:$0xff]  }
 0x8a8   : > { %15804 = vmatpush2.bf16.msra.mxu1 %v22505_v57  ;;  %15674 = vmatprep.subr.bf16.mxu0 %v22510_v35  ;;  %v22583_v57 = vld [vmem:[#allocation13 + $0x710] ss:$28 sps:$4 sm:$0xff]  }
 0x8a9   : > { %15805 = vmatprep.subr.bf16.mxu1 %v22513_v60  ;;  %v22588_v35 = vld [vmem:[#allocation13 + $0xa8c] ss:$28 sps:$4 sm:$0xff]   ;;  %v22591_v60 = vld [vmem:[#allocation13 + $0xa5c] ss:$28 sps:$4 sm:$0xff]  }
 0x8ab   : > { %15675 = vmatpush2.bf16.msra.mxu0 %v22508_v15  ;;  %v22586_v15 = vld [vmem:[#allocation13 + $0xa88] ss:$28 sps:$4 sm:$0xff]  }
 0x8ac   : > { %15806 = vmatpush2.bf16.msra.mxu1 %v22511_v45  ;;  %15676 = vmatprep.subr.bf16.mxu0 %v22516_v48  ;;  %v22589_v45 = vld [vmem:[#allocation13 + $0xa58] ss:$28 sps:$4 sm:$0xff]  }
 0x8ad   : > { %15807 = vmatprep.subr.bf16.mxu1 %v22519_v28  ;;  %v22594_v48 = vld [vmem:[#allocation13 + $0xdd4] ss:$28 sps:$4 sm:$0xff]   ;;  %v22597_v28 = vld [vmem:[#allocation13 + $0xa24] ss:$28 sps:$4 sm:$0xff]  }
 0x8af   : > { %15677 = vmatpush2.bf16.msra.mxu0 %v22514_v30  ;;  %v22592_v30 = vld [vmem:[#allocation13 + $0xdd0] ss:$28 sps:$4 sm:$0xff]  }
 0x8b0   : > { %15808 = vmatpush2.bf16.msra.mxu1 %v22517_v58  ;;  %15678 = vmatprep.subr.bf16.mxu0 %v22522_v51  ;;  %v22595_v58 = vld [vmem:[#allocation13 + $0xa20] ss:$28 sps:$4 sm:$0xff]  }
 0x8b1   : > { %15809 = vmatprep.subr.bf16.mxu1 %v22525_v23  ;;  %v22600_v51 = vld [vmem:[#allocation13 + $0xd9c] ss:$28 sps:$4 sm:$0xff]   ;;  %v22603_v23 = vld [vmem:[#allocation13 + $0x9ec] ss:$28 sps:$4 sm:$0xff]  }
 0x8b3   : > { %15679 = vmatpush2.bf16.msra.mxu0 %v22520_v59  ;;  %v22598_v59 = vld [vmem:[#allocation13 + $0xd98] ss:$28 sps:$4 sm:$0xff]  }
 0x8b4   : > { %15810 = vmatpush2.bf16.msra.mxu1 %v22523_v40  ;;  %15680 = vmatprep.subr.bf16.mxu0 %v22528_v12  ;;  %v22601_v40 = vld [vmem:[#allocation13 + $0x9e8] ss:$28 sps:$4 sm:$0xff]  }
 0x8b5   : > { %15811 = vmatprep.subr.bf16.mxu1 %v22531_v62  ;;  %v22606_v12 = vld [vmem:[#allocation13 + $0xd64] ss:$28 sps:$4 sm:$0xff]   ;;  %v22609_v62 = vld [vmem:[#allocation13 + $0x9b4] ss:$28 sps:$4 sm:$0xff]  }
 0x8b7   : > { %15681 = vmatpush2.bf16.msra.mxu0 %v22526_v44  ;;  %v22604_v44 = vld [vmem:[#allocation13 + $0xd60] ss:$28 sps:$4 sm:$0xff]  }
 0x8b8   : > { %15812 = vmatpush2.bf16.msra.mxu1 %v22529_v31  ;;  %15682 = vmatprep.subr.bf16.mxu0 %v22534_v21  ;;  %v22607_v31 = vld [vmem:[#allocation13 + $0x9b0] ss:$28 sps:$4 sm:$0xff]  }
 0x8b9   : > { %15813 = vmatprep.subr.bf16.mxu1 %v22537_v2  ;;  %v22612_v21 = vld [vmem:[#allocation13 + $0xd2c] ss:$28 sps:$4 sm:$0xff]   ;;  %v22615_v2 = vld [vmem:[#allocation13 + $0x97c] ss:$28 sps:$4 sm:$0xff]  }
 0x8bb   : > { %15683 = vmatpush2.bf16.msra.mxu0 %v22532_v41  ;;  %v22610_v41 = vld [vmem:[#allocation13 + $0xd28] ss:$28 sps:$4 sm:$0xff]  }
 0x8bc   : > { %15814 = vmatpush2.bf16.msra.mxu1 %v22535_v33  ;;  %15684 = vmatprep.subr.bf16.mxu0 %v22540_v61  ;;  %v22613_v33 = vld [vmem:[#allocation13 + $0x978] ss:$28 sps:$4 sm:$0xff]  }
 0x8bd   : > { %15869 = vmatprep.subr.bf16.mxu1 %v22543_v43  ;;  %v22618_v61 = vld [vmem:[#allocation13 + $0xcf4] ss:$28 sps:$4 sm:$0xff]   ;;  %v22621_v43 = vld [vmem:[#allocation13 + $0x944] ss:$28 sps:$4 sm:$0xff]  }
 0x8bf   : > { %15685 = vmatpush2.bf16.msra.mxu0 %v22538_v1  ;;  %15816 = vmatmul.mubr.bf16.vlgmr.msra.gmra.mxu1 %v24641_v52  ;;  %v22616_v1 = vld [vmem:[#allocation13 + $0xcf0] ss:$28 sps:$4 sm:$0xff]  }
 0x8c0   : > { %15870 = vmatpush1.bf16.msra.mxu1 %v22541_v29  ;;  %15901 = vmatprep.mubr.bf16.mxu1 %v24710_v55  ;;  %v22619_v29 = vld [vmem:[#allocation13 + $0x940] ss:$28 sps:$4 sm:$0xff]  }
 0x8c1   : > { %15740 = vmatprep.subr.bf16.mxu0 %v22546_v24  ;;  %15871 = vmatprep.subr.bf16.mxu1 %v22549_v13  ;;  %v22624_v24 = vld [vmem:[#allocation13 + $0xcbc] ss:$28 sps:$4 sm:$0xff]   ;;  %v22627_v13 = vld [vmem:[#allocation13 + $0x90c] ss:$28 sps:$4 sm:$0xff]  }
 0x8c2   : > { %15687 = vmatmul.mubr.bf16.vlgmr.msra.gmra.mxu0 %v24698_v22 }
 0x8c3   : > { %15741 = vmatpush1.bf16.msra.mxu0 %v22544_v3  ;;  %15772 = vmatprep.mubr.bf16.mxu0 %v24725_v14  ;;  %v22622_v3 = vld [vmem:[#allocation13 + $0xcb8] ss:$28 sps:$4 sm:$0xff]  }
 0x8c4   : > { %15872 = vmatpush1.bf16.msra.mxu1 %v22547_v17  ;;  %15742 = vmatprep.subr.bf16.mxu0 %v22552_v47  ;;  %v22625_v17 = vld [vmem:[#allocation13 + $0x908] ss:$28 sps:$4 sm:$0xff]  }
 0x8c5   : > { %15873 = vmatprep.subr.bf16.mxu1 %v22555_v63  ;;  %v22630_v47 = vld [vmem:[#allocation13 + $0xc84] ss:$28 sps:$4 sm:$0xff]   ;;  %v22633_v63 = vld [vmem:[#allocation13 + $0x8d4] ss:$28 sps:$4 sm:$0xff]  }
 0x8c7   : > { %15743 = vmatpush1.bf16.msra.mxu0 %v22550_v11  ;;  %v22628_v11 = vld [vmem:[#allocation13 + $0xc80] ss:$28 sps:$4 sm:$0xff]  }
 0x8c8   : > { %15874 = vmatpush1.bf16.msra.mxu1 %v22553_v7  ;;  %15744 = vmatprep.subr.bf16.mxu0 %v22558_v39  ;;  %v22631_v7 = vld [vmem:[#allocation13 + $0x8d0] ss:$28 sps:$4 sm:$0xff]  }
 0x8c9   : > { %15875 = vmatprep.subr.bf16.mxu1 %v22561_v5  ;;  %v22636_v39 = vld [vmem:[#allocation13 + $0xc4c] ss:$28 sps:$4 sm:$0xff]   ;;  %v22637_v5 = vld [vmem:[#allocation13 + $0x360] ss:$28 sps:$4 sm:$0xff]  }
 0x8cb   : > { %15745 = vmatpush1.bf16.msra.mxu0 %v22556_v53  ;;  %v22634_v53 = vld [vmem:[#allocation13 + $0xc48] ss:$28 sps:$4 sm:$0xff]  }
 0x8cc   : > { %15876 = vmatpush1.bf16.msra.mxu1 %v22559_v54  ;;  %15746 = vmatprep.subr.bf16.mxu0 %v22564_v42  ;;  %v22638_v54 = vld [vmem:[#allocation13 + $0x1a0] ss:$28 sps:$4 sm:$0xff]  }
 0x8cd   : > { %15877 = vmatprep.subr.bf16.mxu1 %v22567_v4  ;;  %v22641_v42 = vld [vmem:[#allocation13 + $0x51c] ss:$28 sps:$4 sm:$0xff]   ;;  %v22642_v4 = vld [vmem:[#allocation13 + $0x328] ss:$28 sps:$4 sm:$0xff]  }
 0x8cf   : > { %15747 = vmatpush1.bf16.msra.mxu0 %v22562_v25  ;;  %v22639_v25 = vld [vmem:[#allocation13 + $0x518] ss:$28 sps:$4 sm:$0xff]  }
 0x8d0   : > { %15878 = vmatpush1.bf16.msra.mxu1 %v22565_v16  ;;  %15748 = vmatprep.subr.bf16.mxu0 %v22570_v50  ;;  %v22643_v16 = vld [vmem:[#allocation13 + $0x168] ss:$28 sps:$4 sm:$0xff]  }
 0x8d1   : > { %15879 = vmatprep.subr.bf16.mxu1 %v22573_v0  ;;  %v22646_v50 = vld [vmem:[#allocation13 + $0x4e4] ss:$28 sps:$4 sm:$0xff]   ;;  %v22647_v0 = vld [vmem:[#allocation13 + $0x2f0] ss:$28 sps:$4 sm:$0xff]  }
 0x8d3   : > { %15749 = vmatpush1.bf16.msra.mxu0 %v22568_v9  ;;  %v22644_v9 = vld [vmem:[#allocation13 + $0x4e0] ss:$28 sps:$4 sm:$0xff]  }
 0x8d4   : > { %15880 = vmatpush1.bf16.msra.mxu1 %v22571_v10  ;;  %15750 = vmatprep.subr.bf16.mxu0 %v22576_v49  ;;  %v22648_v10 = vld [vmem:[#allocation13 + $0x130] ss:$28 sps:$4 sm:$0xff]  }
 0x8d5   : > { %15881 = vmatprep.subr.bf16.mxu1 %v22579_v27  ;;  %v22651_v49 = vld [vmem:[#allocation13 + $0x4ac] ss:$28 sps:$4 sm:$0xff]   ;;  %v22652_v27 = vld [vmem:[#allocation13 + $0x2b8] ss:$28 sps:$4 sm:$0xff]  }
 0x8d7   : > { %15751 = vmatpush1.bf16.msra.mxu0 %v22574_v38  ;;  %v22649_v38 = vld [vmem:[#allocation13 + $0x4a8] ss:$28 sps:$4 sm:$0xff]  }
 0x8d8   : > { %15882 = vmatpush1.bf16.msra.mxu1 %v22577_v26  ;;  %15752 = vmatprep.subr.bf16.mxu0 %v22582_v56  ;;  %v22656_v26 = vld [vmem:[#allocation13 + $0x474] ss:$28 sps:$4 sm:$0xff]   ;;  %v22657_v56 = vld [vmem:[#allocation13 + $0x280] ss:$28 sps:$4 sm:$0xff]  }
 0x8d9   : > { %15883 = vmatprep.subr.bf16.mxu1 %v22585_v19  ;;  %v22654_v19 = vld [vmem:[#allocation13 + $0x470] ss:$28 sps:$4 sm:$0xff]  }
 0x8db   : > { %15753 = vmatpush1.bf16.msra.mxu0 %v22580_v46  ;;  %v22658_v46 = vld [vmem:[#allocation13 + $0xc0] ss:$28 sps:$4 sm:$0xff]  }
 0x8dc   : > { %15884 = vmatpush1.bf16.msra.mxu1 %v22583_v57  ;;  %15754 = vmatprep.subr.bf16.mxu0 %v22588_v35  ;;  %v22661_v57 = vld [vmem:[#allocation13 + $0x43c] ss:$28 sps:$4 sm:$0xff]   ;;  %v22662_v35 = vld [vmem:[#allocation13 + $0x248] ss:$28 sps:$4 sm:$0xff]  }
 0x8dd   : > { %15885 = vmatprep.subr.bf16.mxu1 %v22591_v60  ;;  %v22659_v60 = vld [vmem:[#allocation13 + $0x438] ss:$28 sps:$4 sm:$0xff]  }
 0x8df   : > { %15755 = vmatpush1.bf16.msra.mxu0 %v22586_v15  ;;  %v22663_v15 = vld [vmem:[#allocation13 + $0x88] ss:$28 sps:$4 sm:$0xff]  }
 0x8e0   : > { %15886 = vmatpush2.bf16.msra.mxu1 %v22589_v45  ;;  %15756 = vmatprep.subr.bf16.mxu0 %v22594_v48  ;;  %v22666_v45 = vld [vmem:[#allocation13 + $0x404] ss:$28 sps:$4 sm:$0xff]   ;;  %v22667_v48 = vld [vmem:[#allocation13 + $0x210] ss:$28 sps:$4 sm:$0xff]  }
 0x8e1   : > { %15887 = vmatprep.subr.bf16.mxu1 %v22597_v28  ;;  %v22664_v28 = vld [vmem:[#allocation13 + $0x400] ss:$28 sps:$4 sm:$0xff]  }
 0x8e3   : > { %15757 = vmatpush2.bf16.msra.mxu0 %v22592_v30  ;;  %v22668_v30 = vld [vmem:[#allocation13 + $0x50] ss:$28 sps:$4 sm:$0xff]  }
 0x8e4   : > { %15888 = vmatpush2.bf16.msra.mxu1 %v22595_v58  ;;  %15758 = vmatprep.subr.bf16.mxu0 %v22600_v51  ;;  %v22671_v58 = vld [vmem:[#allocation13 + $0x3cc] ss:$28 sps:$4 sm:$0xff]   ;;  %v22672_v51 = vld [vmem:[#allocation13 + $0x1d8] ss:$28 sps:$4 sm:$0xff]  }
 0x8e5   : > { %15889 = vmatprep.subr.bf16.mxu1 %v22603_v23  ;;  %v22669_v23 = vld [vmem:[#allocation13 + $0x3c8] ss:$28 sps:$4 sm:$0xff]  }
 0x8e7   : > { %15759 = vmatpush2.bf16.msra.mxu0 %v22598_v59  ;;  %v22673_v59 = vld [vmem:[#allocation13 + $0x18] ss:$28 sps:$4 sm:$0xff]  }
 0x8e8   : > { %15890 = vmatpush2.bf16.msra.mxu1 %v22601_v40  ;;  %15760 = vmatprep.subr.bf16.mxu0 %v22606_v12  ;;  %v22676_v40 = vld [vmem:[#allocation13 + $0x394] ss:$28 sps:$4 sm:$0xff]   ;;  %v22677_v12 = vld [vmem:[#allocation13 + $0xa60] ss:$28 sps:$4 sm:$0xff]  }
 0x8e9   : > { %15891 = vmatprep.subr.bf16.mxu1 %v22609_v62  ;;  %v22674_v62 = vld [vmem:[#allocation13 + $0x390] ss:$28 sps:$4 sm:$0xff]  }
 0x8eb   : > { %15761 = vmatpush2.bf16.msra.mxu0 %v22604_v44  ;;  %v22678_v44 = vld [vmem:[#allocation13 + $0x8a0] ss:$28 sps:$4 sm:$0xff]  }
 0x8ec   : > { %15892 = vmatpush2.bf16.msra.mxu1 %v22607_v31  ;;  %15762 = vmatprep.subr.bf16.mxu0 %v22612_v21  ;;  %v22681_v31 = vld [vmem:[#allocation13 + $0x6dc] ss:$28 sps:$4 sm:$0xff]   ;;  %v22682_v21 = vld [vmem:[#allocation13 + $0xa28] ss:$28 sps:$4 sm:$0xff]  }
 0x8ed   : > { %15893 = vmatprep.subr.bf16.mxu1 %v22615_v2  ;;  %v22679_v2 = vld [vmem:[#allocation13 + $0x6d8] ss:$28 sps:$4 sm:$0xff]  }
 0x8ef   : > { %15763 = vmatpush2.bf16.msra.mxu0 %v22610_v41  ;;  %v22683_v41 = vld [vmem:[#allocation13 + $0x868] ss:$28 sps:$4 sm:$0xff]  }
 0x8f0   : > { %15894 = vmatpush2.bf16.msra.mxu1 %v22613_v33  ;;  %15764 = vmatprep.subr.bf16.mxu0 %v22618_v61  ;;  %v22686_v33 = vld [vmem:[#allocation13 + $0x6a4] ss:$28 sps:$4 sm:$0xff]   ;;  %v22687_v61 = vld [vmem:[#allocation13 + $0x9f0] ss:$28 sps:$4 sm:$0xff]  }
 0x8f1   : > { %15895 = vmatprep.subr.bf16.mxu1 %v22621_v43  ;;  %v22684_v43 = vld [vmem:[#allocation13 + $0x6a0] ss:$28 sps:$4 sm:$0xff]  }
 0x8f3   : > { %15765 = vmatpush2.bf16.msra.mxu0 %v22616_v1  ;;  %v22688_v1 = vld [vmem:[#allocation13 + $0x830] ss:$28 sps:$4 sm:$0xff]  }
 0x8f4   : > { %15896 = vmatpush2.bf16.msra.mxu1 %v22619_v29  ;;  %15766 = vmatprep.subr.bf16.mxu0 %v22624_v24  ;;  %v22691_v29 = vld [vmem:[#allocation13 + $0x66c] ss:$28 sps:$4 sm:$0xff]   ;;  %v22692_v24 = vld [vmem:[#allocation13 + $0x9b8] ss:$28 sps:$4 sm:$0xff]  }
 0x8f5   : > { %15897 = vmatprep.subr.bf16.mxu1 %v22627_v13  ;;  %v22689_v13 = vld [vmem:[#allocation13 + $0x668] ss:$28 sps:$4 sm:$0xff]  }
 0x8f7   : > { %15767 = vmatpush2.bf16.msra.mxu0 %v22622_v3  ;;  %v22696_v3 = vld [vmem:[#allocation13 + $0x634] ss:$28 sps:$4 sm:$0xff]  }
 0x8f8   : > { %15898 = vmatpush2.bf16.msra.mxu1 %v22625_v17  ;;  %15768 = vmatprep.subr.bf16.mxu0 %v22630_v47  ;;  %v24744_v17 = vpop.f32.mrf.mxu1  ;;  %v22694_v47 = vld [vmem:[#allocation13 + $0x630] ss:$28 sps:$4 sm:$0xff]  }
 0x8f9   : > { %15899 = vmatprep.subr.bf16.mxu1 %v22633_v63  ;;  %v22698_v63 = vld [vmem:[#allocation13 + $0x7c0] ss:$28 sps:$4 sm:$0xff]  }
 0x8fb   : > { %15769 = vmatpush2.bf16.msra.mxu0 %v22628_v11  ;;  %v22701_v11 = vld [vmem:[#allocation13 + $0x5fc] ss:$28 sps:$4 sm:$0xff]  }
 0x8fc   : > { %15900 = vmatpush2.bf16.msra.mxu1 %v22631_v7  ;;  %15770 = vmatprep.subr.bf16.mxu0 %v22636_v39  ;;  %v22702_v7 = vld [vmem:[#allocation13 + $0x948] ss:$28 sps:$4 sm:$0xff]   ;;  %v24746_v39 = vpop.f32.mrf.mxu1 }
 0x8fd   : > { %20296 = vmatprep.subr.bf16.mxu1 %v22637_v5  ;;  %v22699_v5 = vld [vmem:[#allocation13 + $0x5f8] ss:$28 sps:$4 sm:$0xff]  }
 0x8ff   : > { %15771 = vmatpush2.bf16.msra.mxu0 %v22634_v53  ;;  %15902 = vmatmul.mubr.bf16.vlgmr.msra.gmra.mxu1 %v24712_v6  ;;  %v22703_v53 = vld [vmem:[#allocation13 + $0x788] ss:$28 sps:$4 sm:$0xff]  }
 0x900   : > { %20297 = vmatpush3.bf16.msra.mxu1 %v22638_v54  ;;  %15987 = vmatprep.mubr.bf16.mxu1 %v24624_v36  ;;  %v22653_v36 = vld [vmem:[#allocation13 + $0xf8] ss:$28 sps:$4 sm:$0xff]   ;;  %v22706_v54 = vld [vmem:[#allocation13 + $0x5c4] ss:$28 sps:$4 sm:$0xff]  }
 0x901   : > { %15826 = vmatprep.subr.bf16.mxu0 %v22641_v42  ;;  %20298 = vmatprep.subr.bf16.mxu1 %v22642_v4  ;;  %v22707_v42 = vld [vmem:[#allocation13 + $0x910] ss:$28 sps:$4 sm:$0xff]   ;;  %v15477_v4 = vpop.f32.mrf.mxu1 }
 0x902   : > { %15773 = vmatmul.mubr.bf16.vlgmr.msra.gmra.mxu0 %v24729_v37 }
 0x903   : > { %15827 = vmatpush1.bf16.msra.mxu0 %v22639_v25  ;;  %15858 = vmatprep.mubr.bf16.mxu0 %v24682_v20  ;;  %v22704_v25 = vld [vmem:[#allocation13 + $0x5c0] ss:$28 sps:$4 sm:$0xff]  }
 0x904   : > { %20299 = vmatpush3.bf16.msra.mxu1 %v22643_v16  ;;  %15828 = vmatprep.subr.bf16.mxu0 %v22646_v50  ;;  %v15516_v16 = vpop.f32.mrf.mxu0  ;;  %v22708_v50 = vld [vmem:[#allocation13 + $0x750] ss:$28 sps:$4 sm:$0xff]  }
 0x905   : > { %20300 = vmatprep.subr.bf16.mxu1 %v22647_v0  ;;  %v22711_v0 = vld [vmem:[#allocation13 + $0x58c] ss:$28 sps:$4 sm:$0xff]  }
 0x907   : > { %15829 = vmatpush1.bf16.msra.mxu0 %v22644_v9  ;;  %v22712_v9 = vld [vmem:[#allocation13 + $0x8d8] ss:$28 sps:$4 sm:$0xff]  }
 0x908   : > { %20301 = vmatpush3.bf16.msra.mxu1 %v22648_v10  ;;  %15830 = vmatprep.subr.bf16.mxu0 %v22651_v49  ;;  %v15479_v10 = vpop.f32.mrf.mxu1  ;;  %v24748_v49 = vld [vmem:[#allocation15] sm:$0x7f] }
 0x909   : > { %20302 = vmatprep.subr.bf16.mxu1 %v22652_v27  ;;  %v22709_v27 = vld [vmem:[#allocation13 + $0x588] ss:$28 sps:$4 sm:$0xff]  }
 0x90b   : > { %15831 = vmatpush1.bf16.msra.mxu0 %v22649_v38  ;;  %v15518_v38 = vpop.f32.mrf.mxu0 }
 0x90c   : > { %20303 = vmatpush3.bf16.msra.mxu1 %v22653_v36  ;;  %15832 = vmatprep.subr.bf16.mxu0 %v22656_v26  ;;  %v15559_v36 = vpop.f32.mrf.mxu1  ;;  %v22713_v26 = vld [vmem:[#allocation13 + $0x718] ss:$28 sps:$4 sm:$0xff]  }
 0x90d   : > { %20304 = vmatprep.subr.bf16.mxu1 %v22657_v56  ;;  %v22716_v56 = vld [vmem:[#allocation13 + $0x554] ss:$28 sps:$4 sm:$0xff]  }
 0x90f   : > { %15833 = vmatpush1.bf16.msra.mxu0 %v22654_v19  ;;  %v16134_v19 = vrot.slane %v24748_v49, %v23974_v8 }
 0x910   : > { %20305 = vmatpush3.bf16.msra.mxu1 %v22658_v46  ;;  %15834 = vmatprep.subr.bf16.mxu0 %v22661_v57  ;;  %v22729_v46 = vld [vmem:[#allocation16 + $0x78] sm:$0xff]   ;;  %v22714_v57 = vld [vmem:[#allocation13 + $0x550] ss:$28 sps:$4 sm:$0xff]  }
 0x911   : > { %20306 = vmatprep.subr.bf16.mxu1 %v22662_v35  ;;  %v15520_v35 = vpop.f32.mrf.mxu0 }
 0x913   : > { %15835 = vmatpush1.bf16.msra.mxu0 %v22659_v60  ;;  %v15561_v60 = vpop.f32.mrf.mxu1 }
 0x914   : > { %20307 = vmatpush3.bf16.msra.mxu1 %v22663_v15  ;;  %15836 = vmatprep.subr.bf16.mxu0 %v22666_v45  ;;  %v22719_v15 = vld [vmem:[#allocation13 + $0xc1c] ss:$28 sps:$4 sm:$0xff]   ;;  %v22730_v45 = vld [vmem:[#allocation16 + $0x38] sm:$0xff]  }
 0x915   : > { %20308 = vmatprep.subr.bf16.mxu1 %v22667_v48  ;;  %v16142_v48 = vcombine.high %v16134_v19, %v16134_v19 }
 0x917   : > { %15837 = vmatpush1.bf16.msra.mxu0 %v22664_v28  ;;  %v22734_v28 = vld [vmem:[#allocation16 + $0x70] sm:$0xff]  }
 0x918   : > { %20309 = vmatpush3.bf16.msra.mxu1 %v22668_v30  ;;  %15838 = vmatprep.subr.bf16.mxu0 %v22671_v58  ;;  %v22717_v30 = vld [vmem:[#allocation13 + $0xc18] ss:$28 sps:$4 sm:$0xff]   ;;  %v24754_v58 = vrot.slane %v16134_v19, %v23974_v8 }
 0x919   : > { %20310 = vmatprep.subr.bf16.mxu1 %v22672_v51  ;;  %v15522_v51 = vpop.f32.mrf.mxu0 }
 0x91b   : > { %15839 = vmatpush1.bf16.msra.mxu0 %v22669_v23  ;;  %v15563_v23 = vpop.f32.mrf.mxu1 }
 0x91c   : > { %20311 = vmatpush3.bf16.msra.mxu1 %v22673_v59  ;;  %15840 = vmatprep.subr.bf16.mxu0 %v22676_v40  ;;  %v22722_v59 = vld [vmem:[#allocation13 + $0xbe4] ss:$28 sps:$4 sm:$0xff]   ;;  %v22735_v40 = vld [vmem:[#allocation16 + $0x30] sm:$0xff]  }
 0x91d   : > { %20340 = vmatprep.subr.bf16.mxu1 %v22677_v12  ;;  %v24757_v12 = vrot.slane %v16142_v48, %v23974_v8  ;;  %v22759_v48 = vld [vmem:[#allocation16 + $0x48] sm:$0xff]  }
 0x91f   : > { %15841 = vmatpush1.bf16.msra.mxu0 %v22674_v62  ;;  %15988 = vmatmul.mubr.bf16.vlgmr.msra.gmra.mxu1 %v24641_v52  ;;  %v22693_v52 = vld [vmem:[#allocation13 + $0x7f8] ss:$28 sps:$4 sm:$0xff]  }
 0x920   : > { %20341 = vmatpush3.bf16.msra.mxu1 %v22678_v44  ;;  %16069 = vmatprep.mubr.bf16.mxu1 %v24710_v55  ;;  %v22697_v55 = vld [vmem:[#allocation13 + $0x980] ss:$28 sps:$4 sm:$0xff]   ;;  %v22739_v62 = vld [vmem:[#allocation16 + $0x68] sm:$0xff]  }
 0x921   : > { %15842 = vmatprep.subr.bf16.mxu0 %v22681_v31  ;;  %20342 = vmatprep.subr.bf16.mxu1 %v22682_v21  ;;  %v15521_v31 = vadd.f32 %v15520_v35, %v15477_v4  ;;  %v22720_v21 = vld [vmem:[#allocation13 + $0xbe0] ss:$28 sps:$4 sm:$0xff]  }
 0x922   : > { %v22738_v35 = vld [vmem:[#allocation13 + $0xb04] ss:$28 sps:$4 sm:$0xff]  }
 0x923   : > { %15843 = vmatpush2.bf16.msra.mxu0 %v22679_v2  ;;  %v16176_v2 = vpack.i.b16 %v24754_v58, %v24754_v58 }
 0x924   : > { %20343 = vmatpush3.bf16.msra.mxu1 %v22683_v41  ;;  %15844 = vmatprep.subr.bf16.mxu0 %v22686_v33  ;;  %v15519_v41 = vadd.f32 %v15518_v38, %v24746_v39  ;;  %v15565_v33 = vpop.f32.mrf.mxu1  ;;  %v22723_v39 = vld [vmem:[#allocation13 + $0xba8] ss:$28 sps:$4 sm:$0xff]  }
 0x925   : > { %20344 = vmatprep.subr.bf16.mxu1 %v22687_v61  ;;  %v22750_v38 = vld [vmem:[#allocation16 + $0x18] sm:$0xff]  }
 0x927   : > { %15845 = vmatpush2.bf16.msra.mxu0 %v22684_v43  ;;  %v22725_v43 = vld [vmem:[#allocation13 + $0xbac] ss:$28 sps:$4 sm:$0xff]  }
 0x928   : > { %20345 = vmatpush3.bf16.msra.mxu1 %v22688_v1  ;;  %15846 = vmatprep.subr.bf16.mxu0 %v22691_v29  ;;  %v22740_v1 = vld [vmem:[#allocation16 + $0x28] sm:$0xff]   ;;  %v15523_v29 = vadd.f32 %v15522_v51, %v15479_v10 }
 0x929   : > { %20346 = vmatprep.subr.bf16.mxu1 %v22692_v24  ;;  %v22726_v10 = vld [vmem:[#allocation13 + $0xb70] ss:$28 sps:$4 sm:$0xff]  }
 0x92b   : > { %15847 = vmatpush2.bf16.msra.mxu0 %v22689_v13  ;;  %v15564_v13 = vadd.f32 %v15563_v23, %v15521_v31  ;;  %v22743_v23 = vld [vmem:[#allocation13 + $0xacc] ss:$28 sps:$4 sm:$0xff]  }
 0x92c   : > { %20347 = vmatpush3.bf16.msra.mxu1 %v22693_v52  ;;  %15848 = vmatprep.subr.bf16.mxu0 %v22696_v3  ;;  %v16183_v52 = vpack.i.b16 %v24757_v12, %v24757_v12  ;;  %v22744_v3 = vld [vmem:[#allocation16 + $0x60] sm:$0xff]  }
 0x92d   : > { %20348 = vmatprep.subr.bf16.mxu1 %v22697_v55  ;;  %v15562_v55 = vadd.f32 %v15561_v60, %v15519_v41  ;;  %v22755_v60 = vld [vmem:[#allocation16 + $0x10] sm:$0xff]   ;;  %v22746_v41 = vld [vmem:[#allocation13 + $0xa90] ss:$28 sps:$4 sm:$0xff]  }
 0x92f   : > { %15849 = vmatpush2.bf16.msra.mxu0 %v22694_v47  ;;  %v15566_v47 = vadd.f32 %v15565_v33, %v15523_v29  ;;  %v22753_v33 = vld [vmem:[#allocation13 + $0xddc] ss:$28 sps:$4 sm:$0xff]   ;;  %v22763_v29 = vld [vmem:[#allocation13 + $0xd6c] ss:$28 sps:$4 sm:$0xff]  }
 0x930   : > { %20349 = vmatpush3.bf16.msra.mxu1 %v22698_v63  ;;  %15850 = vmatprep.subr.bf16.mxu0 %v22701_v11 }
 0x931   : > { %20350 = vmatprep.subr.bf16.mxu1 %v22702_v7  ;;  %v16181_v7 = vrot.slane %v16176_v2, %v23979_v34  ;;  %v22765_v2 = vld [vmem:[#allocation16] sm:$0xff]  }
 0x933   : > { %15851 = vmatpush2.bf16.msra.mxu0 %v22699_v5 }
 0x934   : > { %20351 = vmatpush3.bf16.msra.mxu1 %v22703_v53  ;;  %15852 = vmatprep.subr.bf16.mxu0 %v22706_v54  ;;  %v22728_v53 = vld [vmem:[#allocation13 + $0xb74] ss:$28 sps:$4 sm:$0xff]   ;;  %v22745_v54 = vld [vmem:[#allocation16 + $0x20] sm:$0xff]  }
 0x935   : > { %20352 = vmatprep.subr.bf16.mxu1 %v22707_v42 }
 0x937   : > { %15853 = vmatpush2.bf16.msra.mxu0 %v22704_v25 }
 0x938   : > { %20353 = vmatpush3.bf16.msra.mxu1 %v22708_v50  ;;  %15854 = vmatprep.subr.bf16.mxu0 %v22711_v0  ;;  %v22749_v50 = vld [vmem:[#allocation16 + $0x58] sm:$0xff]  }
 0x939   : > { %20354 = vmatprep.subr.bf16.mxu1 %v22712_v9 }
 0x93b   : > { %15855 = vmatpush2.bf16.msra.mxu0 %v22709_v27  ;;  %v22733_v27 = vld [vmem:[#allocation13 + $0xb3c] ss:$28 sps:$4 sm:$0xff]  }
 0x93c   : > { %20355 = vmatpush3.bf16.msra.mxu1 %v22713_v26  ;;  %15856 = vmatprep.subr.bf16.mxu0 %v22716_v56  ;;  %v22754_v56 = vld [vmem:[#allocation16 + $0x50] sm:$0xff]  }
 0x93d   : > { %20384 = vmatprep.subr.bf16.mxu1 %v22729_v46 }
 0x93f   : > { %15857 = vmatpush2.bf16.msra.mxu0 %v22714_v57  ;;  %16070 = vmatmul.mubr.bf16.vlgmr.msra.gmra.mxu1 %v24712_v6  ;;  %v15517_v6 = vadd.f32 %v15516_v16, %v24744_v17  ;;  %v16188_v16 = vrot.slane %v16183_v52, %v23979_v34  ;;  %v22731_v57 = vld [vmem:[#allocation13 + $0xb38] ss:$28 sps:$4 sm:$0xff]   ;;  %v22761_v52 = vld [vmem:[#allocation13 + $0xd68] ss:$28 sps:$4 sm:$0xff]  }
 0x940   : > { %15912 = vmatprep.subr.bf16.mxu0 %v22719_v15  ;;  %20385 = vmatpush3.bf16.msra.mxu1 %v22730_v45 }
 0x941   : > { %20386 = vmatprep.subr.bf16.mxu1 %v22734_v28  ;;  %v15560_v24 = vadd.f32 %v15559_v36, %v15517_v6  ;;  %v22741_v6 = vld [vmem:[#allocation13 + $0xac8] ss:$28 sps:$4 sm:$0xff]  }
 0x942   : > { %15859 = vmatmul.mubr.bf16.vlgmr.msra.gmra.mxu0 %v24698_v22  ;;  %v15602_v44 = vpop.f32.mrf.mxu0 }
 0x943   : > { %15913 = vmatpush1.bf16.msra.mxu0 %v22717_v30  ;;  %15944 = vmatprep.mubr.bf16.mxu0 %v24725_v14  ;;  %v15603_v63 = vadd.f32 %v15602_v44, %v15560_v24  ;;  %v22736_v30 = vld [vmem:[#allocation13 + $0xb00] ss:$28 sps:$4 sm:$0xff]  }
 0x944   : > { %v15604_v61 = vpop.f32.mrf.mxu0  ;;  %15914 = vmatprep.subr.bf16.mxu0 %v22722_v59  ;;  %20387 = vmatpush3.bf16.msra.mxu1 %v22735_v40  ;;  %v22760_v59 = vld [vmem:[#allocation16 + $0x8] sm:$0xff]  }
 0x945   : > { %20388 = vmatprep.subr.bf16.mxu1 %v22739_v62  ;;  %v15605_v42 = vadd.f32 %v15604_v61, %v15562_v55  ;;  %v22764_v62 = vld [vmem:[#allocation16 + $0x40] sm:$0xff]   ;;  %v22751_v61 = vld [vmem:[#allocation13 + $0xdd8] ss:$28 sps:$4 sm:$0xff]  }
 0x946   : > { %v15606_v17 = vpop.f32.mrf.mxu0 }
 0x947   : > { %v15607_v11 = vadd.f32 %v15606_v17, %v15564_v13  ;;  %15915 = vmatpush1.bf16.msra.mxu0 %v22720_v21  ;;  %v22748_v21 = vld [vmem:[#allocation13 + $0xa94] ss:$28 sps:$4 sm:$0xff]  }
 0x948   : > { %v15608_v5 = vpop.f32.mrf.mxu0  ;;  %15916 = vmatprep.subr.bf16.mxu0 %v22725_v43  ;;  %20389 = vmatpush3.bf16.msra.mxu1 %v22740_v1  ;;  %v22758_v43 = vld [vmem:[#allocation13 + $0xda4] ss:$28 sps:$4 sm:$0xff]  }
 0x949   : > { %v16119_v4 = vpack.c.bf16 %v15607_v11, %v15603_v63  ;;  %v15609_v25 = vadd.f32 %v15608_v5, %v15566_v47  ;;  %20390 = vmatprep.subr.bf16.mxu1 %v22744_v3  ;;  %v22756_v1 = vld [vmem:[#allocation13 + $0xda0] ss:$28 sps:$4 sm:$0xff]   ;;  %v22768_v47 = vld [vmem:[#allocation13 + $0xd34] ss:$28 sps:$4 sm:$0xff]  }
 0x94a   : > { %v22771_v5 = vld [vmem:[#allocation13 + $0xcfc] ss:$28 sps:$4 sm:$0xff]  }
 0x94b   : > { %v24769_v0 = vadd.bf16 %v16181_v7, %v16119_v4  ;;  %v16120_v9 = vpack.c.bf16 %v15609_v25, %v15605_v42  ;;  %15917 = vmatpush1.bf16.msra.mxu0 %v22723_v39  ;;  %v22766_v7 = vld [vmem:[#allocation13 + $0xd30] ss:$28 sps:$4 sm:$0xff]   ;;  %v22772_v42 = vld [vmem:[#allocation13 + $0xcc0] ss:$28 sps:$4 sm:$0xff]   ;;  %v22775_v25 = vld [vmem:[#allocation13 + $0xc88] ss:$28 sps:$4 sm:$0xff]  }
 0x94c   : > { %15918 = vmatprep.subr.bf16.mxu0 %v22728_v53  ;;  %20391 = vmatpush3.bf16.msra.mxu1 %v22745_v54  ;;  %v22769_v53 = vld [vmem:[#allocation13 + $0xcf8] ss:$28 sps:$4 sm:$0xff]   ;;  %v22774_v54 = vld [vmem:[#allocation13 + $0xcc4] ss:$28 sps:$4 sm:$0xff]   ;;  %v22777_v4 = vld [vmem:[#allocation13 + $0xc8c] ss:$28 sps:$4 sm:$0xff]  }
 0x94d   : > { %v16238_v36 = vmul.bf16 %v24769_v0, %v24769_v0  ;;  %v16225_v26 = vadd.bf16 %v16188_v16, %v16120_v9  ;;  %20392 = vmatprep.subr.bf16.mxu1 %v22749_v50  ;;  %v16231_v63 = vmul.bf16 1056980736, %v24769_v0  ;;  %v22780_v16 = vld [vmem:[#allocation13 + $0xc54] ss:$28 sps:$4 sm:$0xff]   ;;  %v22782_v9 = vld [vmem:[#allocation13 + $0x520] ss:$28 sps:$4 sm:$0xff]  }
 0x94e   : > { %v22778_v50 = vld [vmem:[#allocation13 + $0xc50] ss:$28 sps:$4 sm:$0xff]  }
 0x94f   : > { %v16245_v19 = vmul.bf16 %v16238_v36, %v24769_v0  ;;  %v16239_v46 = vmul.bf16 %v16225_v26, %v16225_v26  ;;  %15919 = vmatpush1.bf16.msra.mxu0 %v22726_v10  ;;  %v16232_v55 = vmul.bf16 1056980736, %v16225_v26  ;;  %v22783_v10 = vld [vmem:[#allocation13 + $0x6a8] ss:$28 sps:$4 sm:$0xff]   ;;  %v22786_v36 = vld [vmem:[#allocation13 + $0x4b0] ss:$28 sps:$4 sm:$0xff]  }
 0x950   : > { %15920 = vmatprep.subr.bf16.mxu0 %v22733_v27  ;;  %20393 = vmatpush3.bf16.msra.mxu1 %v22750_v38  ;;  %v22784_v27 = vld [vmem:[#allocation13 + $0x4e8] ss:$28 sps:$4 sm:$0xff]   ;;  %v22785_v38 = vld [vmem:[#allocation13 + $0x670] ss:$28 sps:$4 sm:$0xff]  }
 0x951   : > { %v16252_v15 = vmul.bf16 1027030327, %v16245_v19  ;;  %v16246_v45 = vmul.bf16 %v16239_v46, %v16225_v26  ;;  %20394 = vmatprep.subr.bf16.mxu1 %v22754_v56  ;;  %v22788_v56 = vld [vmem:[#allocation13 + $0x478] ss:$28 sps:$4 sm:$0xff]   ;;  %v22789_v19 = vld [vmem:[#allocation13 + $0x600] ss:$28 sps:$4 sm:$0xff]  }
 0x952   : > { %v22790_v46 = vld [vmem:[#allocation13 + $0x440] ss:$28 sps:$4 sm:$0xff]  }
 0x953   : > { %v16259_v28 = vadd.bf16 %v16252_v15, %v24769_v0  ;;  %15921 = vmatpush1.bf16.msra.mxu0 %v22731_v57  ;;  %v16253_v51 = vmul.bf16 1027030327, %v16246_v45  ;;  %v22781_v0 = vld [vmem:[#allocation13 + $0x6e0] ss:$28 sps:$4 sm:$0xff]   ;;  %v22791_v57 = vld [vmem:[#allocation13 + $0x5c8] ss:$28 sps:$4 sm:$0xff]  }
 0x954   : > { %15922 = vmatprep.subr.bf16.mxu0 %v22738_v35  ;;  %20395 = vmatpush3.bf16.msra.mxu1 %v22755_v60  ;;  %v22792_v35 = vld [vmem:[#allocation13 + $0x408] ss:$28 sps:$4 sm:$0xff]   ;;  %v22793_v60 = vld [vmem:[#allocation13 + $0x590] ss:$28 sps:$4 sm:$0xff]   ;;  %v22795_v15 = vld [vmem:[#allocation13 + $0x558] ss:$28 sps:$4 sm:$0xff]  }
 0x955   : > { %v16266_v40 = vmul.bf16 1061961548, %v16259_v28  ;;  %20396 = vmatprep.subr.bf16.mxu1 %v22759_v48  ;;  %v16260_v44 = vadd.bf16 %v16253_v51, %v16225_v26  ;;  %v22787_v26 = vld [vmem:[#allocation13 + $0x638] ss:$28 sps:$4 sm:$0xff]   ;;  %v22797_v48 = vld [vmem:[#allocation13 + $0xde0] ss:$28 sps:$4 sm:$0xff]  }
 0x956   : > { %v22796_v45 = vld [vmem:[#allocation13 + $0x398] ss:$28 sps:$4 sm:$0xff]   ;;  %v22798_v28 = vld [vmem:[#allocation13 + $0xc20] ss:$28 sps:$4 sm:$0xff]   ;;  %v22800_v51 = vld [vmem:[#allocation13 + $0xbe8] ss:$28 sps:$4 sm:$0xff]  }
 0x957   : > { %23034 = vtanh.bf16 %v16266_v40  ;;  %15923 = vmatpush1.bf16.msra.mxu0 %v22736_v30  ;;  %v16267_v31 = vmul.bf16 1061961548, %v16260_v44  ;;  %v22799_v30 = vld [vmem:[#allocation13 + $0xda8] ss:$28 sps:$4 sm:$0xff]   ;;  %v22803_v40 = vld [vmem:[#allocation13 + $0xd38] ss:$28 sps:$4 sm:$0xff]   ;;  %v15645_v44 = vpop.f32.mrf.mxu1 }
 0x958   : > { %15924 = vmatprep.subr.bf16.mxu0 %v22743_v23  ;;  %20397 = vmatpush3.bf16.msra.mxu1 %v22760_v59  ;;  %v22801_v23 = vld [vmem:[#allocation13 + $0xd70] ss:$28 sps:$4 sm:$0xff]  }
 0x959   : > { %20398 = vmatprep.subr.bf16.mxu1 %v22764_v62  ;;  %23036 = vtanh.bf16 %v16267_v31  ;;  %v22802_v59 = vld [vmem:[#allocation13 + $0xbb0] ss:$28 sps:$4 sm:$0xff]   ;;  %v22804_v62 = vld [vmem:[#allocation13 + $0xb78] ss:$28 sps:$4 sm:$0xff]   ;;  %v22806_v31 = vld [vmem:[#allocation13 + $0xb40] ss:$28 sps:$4 sm:$0xff]  }
 0x95b   : > { %15925 = vmatpush1.bf16.msra.mxu0 %v22741_v6  ;;  %v22805_v6 = vld [vmem:[#allocation13 + $0xd00] ss:$28 sps:$4 sm:$0xff]  }
 0x95c   : > { %15926 = vmatprep.subr.bf16.mxu0 %v22748_v21  ;;  %20399 = vmatpush3.bf16.msra.mxu1 %v22765_v2  ;;  %v15647_v21 = vpop.f32.mrf.mxu1  ;;  %v22808_v2 = vld [vmem:[#allocation13 + $0xb08] ss:$28 sps:$4 sm:$0xff]  }
 0x95f   : > { %15927 = vmatpush1.bf16.msra.mxu0 %v22746_v41 }
 0x960   : > { %15928 = vmatprep.subr.bf16.mxu0 %v22753_v33  ;;  %v22809_v33 = vld [vmem:[#allocation13 + $0xc90] ss:$28 sps:$4 sm:$0xff]  }
 0x963   : > { %15929 = vmatpush2.bf16.msra.mxu0 %v22751_v61  ;;  %v22810_v61 = vld [vmem:[#allocation13 + $0xad0] ss:$28 sps:$4 sm:$0xff]  }
 0x964   : > { %15930 = vmatprep.subr.bf16.mxu0 %v22758_v43 }
 0x965   : > { %v23035_v24 = vpop.eup %23034 }
 0x966   : > { %v16280_v3 = vadd.bf16 1065369472, %v23035_v24 }
 0x967   : > { %v23037_v13 = vpop.eup %23036  ;;  %15931 = vmatpush2.bf16.msra.mxu0 %v22756_v1 }
 0x968   : > { %15932 = vmatprep.subr.bf16.mxu0 %v22763_v29  ;;  %v16281_v17 = vadd.bf16 1065369472, %v23037_v13  ;;  %v16287_v39 = vmul.bf16 %v16280_v3, %v16231_v63  ;;  %v22811_v29 = vld [vmem:[#allocation13 + $0xc58] ss:$28 sps:$4 sm:$0xff]   ;;  %v22813_v3 = vld [vmem:[#allocation16 + $0xf8] sm:$0xff]  }
 0x969   : > { %v22812_v13 = vld [vmem:[#allocation13 + $0xa98] ss:$28 sps:$4 sm:$0xff]  }
 0x96a   : > { %v16288_v11 = vmul.bf16 %v16281_v17, %v16232_v55  ;;  %v16172_v17 = vcombine.high %v24754_v58, %v24754_v58 }
 0x96b   : > { %15933 = vmatpush2.bf16.msra.mxu0 %v22761_v52 }
 0x96c   : > { %16775 = vmatprep.mubr.bf16.mxu1 %v16288_v11  ;;  %15934 = vmatprep.subr.bf16.mxu0 %v22768_v47  ;;  %v22814_v47 = vld [vmem:[#allocation16 + $0xb8] sm:$0xff]   ;;  %v22815_v11 = vld [vmem:[#allocation16 + $0xf0] sm:$0xff]  }
 0x96d   : > { %16776 = vmatmul.mubr.bf16.vlgmr.msra.gmra.mxu1 %v16287_v39 }
 0x96f   : > { %15935 = vmatpush2.bf16.msra.mxu0 %v22766_v7 }
 0x970   : > { %15936 = vmatprep.subr.bf16.mxu0 %v22771_v5  ;;  %v16174_v5 = vcombine.high %v24757_v12, %v24757_v12 }
 0x973   : > { %15937 = vmatpush2.bf16.msra.mxu0 %v22769_v53 }
 0x974   : > { %15938 = vmatprep.subr.bf16.mxu0 %v22774_v54 }
 0x977   : > { %15939 = vmatpush2.bf16.msra.mxu0 %v22772_v42  ;;  %v16190_v42 = vpack.i.b16 %v16172_v17, %v16172_v17  ;;  %v22837_v17 = vld [vmem:[#allocation16 + $0x120] sm:$0xff]  }
 0x978   : > { %15940 = vmatprep.subr.bf16.mxu0 %v22777_v4 }
 0x97b   : > { %15941 = vmatpush2.bf16.msra.mxu0 %v22775_v25 }
 0x97c   : > { %15942 = vmatprep.subr.bf16.mxu0 %v22780_v16  ;;  %v22816_v16 = vld [vmem:[#allocation16 + $0xb0] sm:$0xff]  }
 0x97f   : > { %15943 = vmatpush2.bf16.msra.mxu0 %v22778_v50  ;;  %v22817_v50 = vld [vmem:[#allocation16 + $0xe8] sm:$0xff]  }
 0x980   : > { %20318 = vmatprep.subr.bf16.mxu0 %v22781_v0 }
 0x982   : > { %15945 = vmatmul.mubr.bf16.vlgmr.msra.gmra.mxu0 %v24729_v37  ;;  %v15688_v41 = vpop.f32.mrf.mxu0 }
 0x983   : > { %20319 = vmatpush3.bf16.msra.mxu0 %v22782_v9  ;;  %16028 = vmatprep.mubr.bf16.mxu0 %v24682_v20  ;;  %v22794_v20 = vld [vmem:[#allocation13 + $0x3d0] ss:$28 sps:$4 sm:$0xff]   ;;  %v15689_v7 = vadd.f32 %v15688_v41, %v15645_v44 }
 0x984   : > { %20320 = vmatprep.subr.bf16.mxu0 %v22783_v10  ;;  %v15690_v1 = vpop.f32.mrf.mxu0  ;;  %v16197_v10 = vpack.i.b16 %v16174_v5, %v16174_v5  ;;  %v22841_v5 = vld [vmem:[#allocation16 + $0x110] sm:$0xff]  }
 0x985   : > { %v15691_v4 = vadd.f32 %v15690_v1, %v15647_v21  ;;  %v22823_v21 = vld [vmem:[#allocation16 + $0xd0] sm:$0xff]   ;;  %v22825_v1 = vld [vmem:[#allocation16 + $0xc8] sm:$0xff]  }
 0x986   : > { %v15692_v52 = vpop.f32.mrf.mxu0 }
 0x987   : > { %20321 = vmatpush3.bf16.msra.mxu0 %v22784_v27 }
 0x988   : > { %20322 = vmatprep.subr.bf16.mxu0 %v22785_v38  ;;  %v15694_v63 = vpop.f32.mrf.mxu0 }
 0x98b   : > { %20323 = vmatpush3.bf16.msra.mxu0 %v22786_v36  ;;  %v16195_v36 = vrot.slane %v16190_v42, %v23979_v34 }
 0x98c   : > { %20324 = vmatprep.subr.bf16.mxu0 %v22787_v26 }
 0x98f   : > { %20325 = vmatpush3.bf16.msra.mxu0 %v22788_v56 }
 0x990   : > { %20326 = vmatprep.subr.bf16.mxu0 %v22789_v19 }
 0x993   : > { %20327 = vmatpush3.bf16.msra.mxu0 %v22790_v46 }
 0x994   : > { %20328 = vmatprep.subr.bf16.mxu0 %v22791_v57  ;;  %v22819_v57 = vld [vmem:[#allocation16 + $0xe0] sm:$0xff]  }
 0x997   : > { %20329 = vmatpush3.bf16.msra.mxu0 %v22792_v35 }
 0x998   : > { %20330 = vmatprep.subr.bf16.mxu0 %v22793_v60 }
 0x99b   : > { %20331 = vmatpush3.bf16.msra.mxu0 %v22794_v20 }
 0x99c   : > { %20332 = vmatprep.subr.bf16.mxu0 %v22795_v15  ;;  %v16202_v15 = vrot.slane %v16197_v10, %v23979_v34 }
 0x99f   : > { %20333 = vmatpush3.bf16.msra.mxu0 %v22796_v45 }
 0x9a0   : > { %20362 = vmatprep.subr.bf16.mxu0 %v22797_v48 }
 0x9a2   : > { %16029 = vmatmul.mubr.bf16.vlgmr.msra.gmra.mxu0 %v24698_v22  ;;  %v22807_v22 = vld [vmem:[#allocation13 + $0xcc8] ss:$28 sps:$4 sm:$0xff]  }
 0x9a3   : > { %20363 = vmatpush3.bf16.msra.mxu0 %v22798_v28  ;;  %16110 = vmatprep.mubr.bf16.mxu0 %v24725_v14  ;;  %v15649_v14 = vpop.f32.mrf.mxu1  ;;  %v22820_v28 = vld [vmem:[#allocation16 + $0xa0] sm:$0xff]  }
 0x9a4   : > { %20364 = vmatprep.subr.bf16.mxu0 %v22799_v30  ;;  %v15693_v39 = vadd.f32 %v15692_v52, %v15649_v14  ;;  %v22830_v30 = vld [vmem:[#allocation16 + $0x178] sm:$0xff]   ;;  %v22826_v52 = vld [vmem:[#allocation16 + $0x88] sm:$0xff]  }
 0x9a5   : > { %v15651_v43 = vpop.f32.mrf.mxu1  ;;  %20428 = vmatprep.subr.bf16.mxu1 %v22830_v30 }
 0x9a6   : > { %v15695_v25 = vadd.f32 %v15694_v63, %v15651_v43  ;;  %v22834_v43 = vld [vmem:[#allocation16 + $0x168] sm:$0xff]   ;;  %v22827_v63 = vld [vmem:[#allocation16 + $0xc0] sm:$0xff]  }
 0x9a7   : > { %20365 = vmatpush3.bf16.msra.mxu0 %v22800_v51  ;;  %v15731_v24 = vpop.f32.mrf.mxu1  ;;  %v22821_v51 = vld [vmem:[#allocation16 + $0xd8] sm:$0xff]  }
 0x9a8   : > { %20366 = vmatprep.subr.bf16.mxu0 %v22801_v23  ;;  %v15732_v0 = vadd.f32 %v15731_v24, %v15689_v7  ;;  %v22831_v23 = vld [vmem:[#allocation16 + $0x138] sm:$0xff]   ;;  %v22828_v7 = vld [vmem:[#allocation16 + $0x80] sm:$0xff]  }
 0x9a9   : > { %v15733_v55 = vpop.f32.mrf.mxu1  ;;  %20429 = vmatpush3.bf16.msra.mxu1 %v22831_v23 }
 0x9aa   : > { %v15734_v26 = vadd.f32 %v15733_v55, %v15691_v4  ;;  %v22836_v55 = vld [vmem:[#allocation16 + $0x160] sm:$0xff]  }
 0x9ab   : > { %20367 = vmatpush3.bf16.msra.mxu0 %v22802_v59  ;;  %v15735_v53 = vpop.f32.mrf.mxu1 }
 0x9ac   : > { %20368 = vmatprep.subr.bf16.mxu0 %v22803_v40  ;;  %v15736_v9 = vadd.f32 %v15735_v53, %v15693_v39  ;;  %v22840_v39 = vld [vmem:[#allocation16 + $0x150] sm:$0xff]   ;;  %v22842_v53 = vld [vmem:[#allocation16 + $0x148] sm:$0xff]  }
 0x9ad   : > { %v15737_v27 = vpop.f32.mrf.mxu1 }
 0x9ae   : > { %v15738_v19 = vadd.f32 %v15737_v27, %v15695_v25 }
 0x9af   : > { %20369 = vmatpush3.bf16.msra.mxu0 %v22804_v62 }
 0x9b0   : > { %20370 = vmatprep.subr.bf16.mxu0 %v22805_v6  ;;  %v22822_v6 = vld [vmem:[#allocation16 + $0x98] sm:$0xff]  }
 0x9b3   : > { %20371 = vmatpush3.bf16.msra.mxu0 %v22806_v31  ;;  %v22832_v31 = vld [vmem:[#allocation16 + $0x170] sm:$0xff]  }
 0x9b4   : > { %20372 = vmatprep.subr.bf16.mxu0 %v22807_v22  ;;  %v22833_v22 = vld [vmem:[#allocation16 + $0x130] sm:$0xff]   ;;  %20430 = vmatprep.subr.bf16.mxu1 %v22832_v31 }
 0x9b5   : > { %20431 = vmatpush3.bf16.msra.mxu1 %v22833_v22 }
 0x9b6   : > { %20432 = vmatprep.subr.bf16.mxu1 %v22834_v43 }
 0x9b7   : > { %20373 = vmatpush3.bf16.msra.mxu0 %v22808_v2 }
 0x9b8   : > { %20374 = vmatprep.subr.bf16.mxu0 %v22809_v33  ;;  %v22824_v33 = vld [vmem:[#allocation16 + $0x90] sm:$0xff]  }
 0x9bb   : > { %20375 = vmatpush3.bf16.msra.mxu0 %v22810_v61 }
 0x9bc   : > { %20376 = vmatprep.subr.bf16.mxu0 %v22811_v29  ;;  %v22835_v29 = vld [vmem:[#allocation16 + $0x128] sm:$0xff]  }
 0x9bd   : > { %20433 = vmatpush3.bf16.msra.mxu1 %v22835_v29 }
 0x9be   : > { %20434 = vmatprep.subr.bf16.mxu1 %v22836_v55 }
 0x9bf   : > { %20377 = vmatpush3.bf16.msra.mxu0 %v22812_v13 }
 0x9c0   : > { %20406 = vmatprep.subr.bf16.mxu0 %v22813_v3 }
 0x9c1   : > { %20435 = vmatpush3.bf16.msra.mxu1 %v22837_v17 }
 0x9c2   : > { %v15774_v54 = vpop.f32.mrf.mxu0  ;;  %16111 = vmatmul.mubr.bf16.vlgmr.msra.gmra.mxu0 %v24729_v37  ;;  %v22818_v37 = vld [vmem:[#allocation16 + $0xa8] sm:$0xff]  }
 0x9c3   : > { %20407 = vmatpush3.bf16.msra.mxu0 %v22814_v47  ;;  %v15775_v12 = vadd.f32 %v15774_v54, %v15732_v0  ;;  %v22838_v47 = vld [vmem:[#allocation16 + $0x158] sm:$0xff]   ;;  %v22843_v54 = vld [vmem:[#allocation16 + $0x108] sm:$0xff]   ;;  %v22845_v0 = vld [vmem:[#allocation16 + $0x100] sm:$0xff]  }
 0x9c4   : > { %v15776_v58 = vpop.f32.mrf.mxu0  ;;  %20408 = vmatprep.subr.bf16.mxu0 %v22815_v11  ;;  %v22839_v11 = vld [vmem:[#allocation16 + $0x118] sm:$0xff]   ;;  %20436 = vmatprep.subr.bf16.mxu1 %v22838_v47 }
 0x9c5   : > { %v15777_v35 = vadd.f32 %v15776_v58, %v15734_v26  ;;  %20437 = vmatpush3.bf16.msra.mxu1 %v22839_v11  ;;  %v22849_v26 = vld [vmem:[#allocation16 + $0x1a0] sm:$0xff]  }
 0x9c6   : > { %v15778_v38 = vpop.f32.mrf.mxu0  ;;  %20438 = vmatprep.subr.bf16.mxu1 %v22840_v39 }
 0x9c7   : > { %v15779_v56 = vadd.f32 %v15778_v38, %v15736_v9  ;;  %20409 = vmatpush3.bf16.msra.mxu0 %v22816_v16  ;;  %v22844_v16 = vld [vmem:[#allocation16 + $0x140] sm:$0xff]   ;;  %v22846_v38 = vld [vmem:[#allocation16 + $0x1b8] sm:$0xff]  }
 0x9c8   : > { %v15780_v46 = vpop.f32.mrf.mxu0  ;;  %20410 = vmatprep.subr.bf16.mxu0 %v22817_v50 }
 0x9c9   : > { %v16121_v60 = vpack.c.bf16 %v15779_v56, %v15775_v12  ;;  %v15781_v20 = vadd.f32 %v15780_v46, %v15738_v19  ;;  %20439 = vmatpush3.bf16.msra.mxu1 %v22841_v5  ;;  %v22848_v12 = vld [vmem:[#allocation16 + $0x1a8] sm:$0xff]   ;;  %v22850_v56 = vld [vmem:[#allocation16 + $0x198] sm:$0xff]   ;;  %v22851_v19 = vld [vmem:[#allocation16 + $0x190] sm:$0xff]  }
 0x9ca   : > { %20440 = vmatprep.subr.bf16.mxu1 %v22842_v53  ;;  %v22853_v46 = vld [vmem:[#allocation16 + $0x180] sm:$0xff]  }
 0x9cb   : > { %v24787_v45 = vadd.bf16 %v16195_v36, %v16121_v60  ;;  %v16122_v48 = vpack.c.bf16 %v15781_v20, %v15777_v35  ;;  %20411 = vmatpush3.bf16.msra.mxu0 %v22818_v37  ;;  %v22847_v36 = vld [vmem:[#allocation16 + $0x1b0] sm:$0xff]   ;;  %v22852_v37 = vld [vmem:[#allocation16 + $0x188] sm:$0xff]  }
 0x9cc   : > { %20412 = vmatprep.subr.bf16.mxu0 %v22819_v57  ;;  %v15817_v57 = vpop.f32.mrf.mxu1 }
 0x9cd   : > { %v16240_v59 = vmul.bf16 %v24787_v45, %v24787_v45  ;;  %v24791_v40 = vadd.bf16 %v16202_v15, %v16122_v48  ;;  %20441 = vmatpush3.bf16.msra.mxu1 %v22843_v54  ;;  %v16233_v9 = vmul.bf16 1056980736, %v24787_v45  ;;  %v16127_v15 = vcombine.high %v24748_v49, %v24748_v49 }
 0x9ce   : > { %20442 = vmatprep.subr.bf16.mxu1 %v22844_v16  ;;  %v15819_v35 = vpop.f32.mrf.mxu1 }
 0x9cf   : > { %v16247_v62 = vmul.bf16 %v16240_v59, %v24787_v45  ;;  %v16241_v44 = vmul.bf16 %v24791_v40, %v24791_v40  ;;  %20413 = vmatpush3.bf16.msra.mxu0 %v22820_v28  ;;  %v16234_v58 = vmul.bf16 1056980736, %v24791_v40  ;;  %v16141_v28 = vrot.slane %v16127_v15, %v23974_v8 }
 0x9d0   : > { %20414 = vmatprep.subr.bf16.mxu0 %v22821_v51  ;;  %v15821_v60 = vpop.f32.mrf.mxu1 }
 0x9d1   : > { %v16254_v2 = vmul.bf16 1027030327, %v16247_v62  ;;  %v16248_v14 = vmul.bf16 %v16241_v44, %v24791_v40  ;;  %20443 = vmatpush3.bf16.msra.mxu1 %v22845_v0  ;;  %v16143_v23 = vcombine.high %v16141_v28, %v16141_v28 }
 0x9d3   : > { %v16261_v41 = vadd.bf16 %v16254_v2, %v24787_v45  ;;  %20415 = vmatpush3.bf16.msra.mxu0 %v22822_v6  ;;  %v16255_v61 = vmul.bf16 1027030327, %v16248_v14  ;;  %v15823_v45 = vpop.f32.mrf.mxu1  ;;  %v16171_v31 = vrot.slane %v16143_v23, %v23974_v8 }
 0x9d4   : > { %20416 = vmatprep.subr.bf16.mxu0 %v22823_v21 }
 0x9d5   : > { %v16268_v24 = vmul.bf16 1061961548, %v16261_v41  ;;  %v16262_v13 = vadd.bf16 %v16255_v61, %v24791_v40  ;;  %v15903_v30 = vpop.f32.mrf.mxu1  ;;  %v24816_v40 = vrot.slane %v16141_v28, %v23974_v8  ;;  %v16211_v43 = vpack.i.b16 %v16171_v31, %v16171_v31 }
 0x9d7   : > { %23038 = vtanh.bf16 %v16268_v24  ;;  %20417 = vmatpush3.bf16.msra.mxu0 %v22824_v33  ;;  %v16269_v3 = vmul.bf16 1061961548, %v16262_v13  ;;  %v15905_v59 = vpop.f32.mrf.mxu1  ;;  %v16204_v49 = vpack.i.b16 %v24816_v40, %v24816_v40  ;;  %v16173_v31 = vcombine.high %v24816_v40, %v24816_v40 }
 0x9d8   : > { %20418 = vmatprep.subr.bf16.mxu0 %v22825_v1 }
 0x9d9   : > { %23040 = vtanh.bf16 %v16269_v3  ;;  %v15907_v21 = vpop.f32.mrf.mxu1  ;;  %v16209_v24 = vrot.slane %v16204_v49, %v23979_v34 }
 0x9db   : > { %20419 = vmatpush3.bf16.msra.mxu0 %v22826_v52  ;;  %v15909_v1 = vpop.f32.mrf.mxu1 }
 0x9dc   : > { %20420 = vmatprep.subr.bf16.mxu0 %v22827_v63 }
 0x9df   : > { %20421 = vmatpush3.bf16.msra.mxu0 %v22828_v7  ;;  %v16216_v7 = vrot.slane %v16211_v43, %v23979_v34  ;;  %v16218_v43 = vpack.i.b16 %v16173_v31, %v16173_v31 }
 0x9e0   : > { %20530 = vmatprep.subr.bf16.mxu0 %v24994_v32 }
 0x9e5   : > { %v23039_v42 = vpop.eup %23038 }
 0x9e6   : > { %v16282_v25 = vadd.bf16 1065369472, %v23039_v42 }
 0x9e7   : > { %v23041_v4 = vpop.eup %23040 }
 0x9e8   : > { %v16283_v50 = vadd.bf16 1065369472, %v23041_v4  ;;  %v16289_v27 = vmul.bf16 %v16282_v25, %v16233_v9 }
 0x9ea   : > { %v16290_v10 = vmul.bf16 %v16283_v50, %v16234_v58 }
 0x9ec   : > { %16816 = vmatprep.mubr.bf16.mxu0 %v16290_v10 }
 0x9ed   : > { %16817 = vmatmul.mubr.bf16.vlgmr.msra.gmra.mxu0 %v16289_v27 }
 0x9ee   : > { %20546 = vmatprep.mubr.msk.bf16.mxu0 %vm23582_vm0, %v24994_v32  ;;  %20531 = vmatpush3.bf16.msra.mxu0 %v22846_v38 }
 0x9ef   : > { %20532 = vmatprep.subr.bf16.mxu0 %v24994_v32 }
 0x9f2   : > { %20533 = vmatpush3.bf16.msra.mxu0 %v22847_v36 }
 0x9f3   : > { %20534 = vmatprep.subr.bf16.mxu0 %v24994_v32 }
 0x9f6   : > { %20535 = vmatpush3.bf16.msra.mxu0 %v22848_v12 }
 0x9f7   : > { %20536 = vmatprep.subr.bf16.mxu0 %v24994_v32 }
 0x9fa   : > { %20537 = vmatpush3.bf16.msra.mxu0 %v22849_v26 }
 0x9fb   : > { %20538 = vmatprep.subr.bf16.mxu0 %v24994_v32 }
 0x9fe   : > { %20539 = vmatpush3.bf16.msra.mxu0 %v22850_v56 }
 0x9ff   : > { %20540 = vmatprep.subr.bf16.mxu0 %v24994_v32 }
 0xa02   : > { %20541 = vmatpush3.bf16.msra.mxu0 %v22851_v19  ;;  %v15860_v20 = vpop.f32.mrf.mxu0  ;;  %v20312_v19 = vpop.f32.mrf.mxu1 }
 0xa03   : > { %20542 = vmatprep.subr.bf16.mxu0 %v24994_v32  ;;  %v15861_v44 = vadd.f32 %v15860_v20, %v15817_v57 }
 0xa04   : > { %v15862_v48 = vpop.f32.mrf.mxu0  ;;  %v20313_v57 = vpop.f32.mrf.mxu1 }
 0xa05   : > { %v15863_v2 = vadd.f32 %v15862_v48, %v15819_v35  ;;  %v15904_v33 = vadd.f32 %v15903_v30, %v15861_v44  ;;  %v20314_v44 = vadd.f32 %v20313_v57, %v20312_v19  ;;  %v22873_v19 = vld [vmem:[#allocation19 + $0x50] ss:$12 sps:$4 sm:$0xff]   ;;  %v22877_v57 = vld [vmem:[#allocation19 + $0x38] ss:$12 sps:$4 sm:$0xff]  }
 0xa06   : > { %20543 = vmatpush3.bf16.msra.mxu0 %v22852_v37  ;;  %v15864_v51 = vpop.f32.mrf.mxu0  ;;  %v20315_v35 = vpop.f32.mrf.mxu1 }
 0xa07   : > { %20544 = vmatprep.subr.bf16.mxu0 %v24994_v32  ;;  %v15865_v6 = vadd.f32 %v15864_v51, %v15821_v60  ;;  %v15906_v52 = vadd.f32 %v15905_v59, %v15863_v2 }
 0xa08   : > { %v15866_v62 = vpop.f32.mrf.mxu0  ;;  %v20316_v20 = vpop.f32.mrf.mxu1 }
 0xa09   : > { %v15867_v14 = vadd.f32 %v15866_v62, %v15823_v45  ;;  %v15908_v61 = vadd.f32 %v15907_v21, %v15865_v6  ;;  %v20317_v6 = vadd.f32 %v20316_v20, %v20315_v35  ;;  %v22880_v35 = vld [vmem:[#allocation19 + $0x1c] ss:$12 sps:$4 sm:$0xff]   ;;  %v22881_v20 = vld [vmem:[#allocation19 + $0x20] ss:$12 sps:$4 sm:$0xff]  }
 0xa0a   : > { %20545 = vmatpush3.bf16.msra.mxu0 %v22853_v46  ;;  %v20356_v45 = vpop.f32.mrf.mxu1 }
 0xa0b   : > { %20550 = vmatprep.subr.bf16.mxu0 %v24994_v32  ;;  %v15910_v55 = vadd.f32 %v15909_v1, %v15867_v14 }
 0xa0c   : > { %v20357_v28 = vpop.f32.mrf.mxu1 }
 0xa0e   : > { %v20359_v51 = vpop.f32.mrf.mxu1 }
 0xa10   : > { %v20360_v21 = vpop.f32.mrf.mxu1 }
 0xa42   : > { %v15946_v22 = vpop.f32.mrf.mxu0 }
 0xa43   : > { %v15947_v13 = vadd.f32 %v15946_v22, %v15904_v33  ;;  %v20361_v33 = vadd.f32 %v20360_v21, %v20359_v51 }
 0xa44   : > { %v15948_v41 = vpop.f32.mrf.mxu0 }
 0xa45   : > { %v15949_v47 = vadd.f32 %v15948_v41, %v15906_v52  ;;  %v20358_v41 = vadd.f32 %v20357_v28, %v20356_v45  ;;  %v22882_v45 = vld [vmem:[#allocation19] ss:$12 sps:$4 sm:$0xff]  }
 0xa46   : > { %v15950_v29 = vpop.f32.mrf.mxu0  ;;  %v22888_v28 = vld [vmem:[#allocation22 + $0x74] ss:$8 sps:$4 sm:$0xff]  }
 0xa47   : > { %v15951_v3 = vadd.f32 %v15950_v29, %v15908_v61 }
 0xa48   : > { %v15952_v17 = vpop.f32.mrf.mxu0 }
 0xa49   : > { %v16123_v63 = vpack.c.bf16 %v15951_v3, %v15947_v13  ;;  %v15953_v11 = vadd.f32 %v15952_v17, %v15910_v55  ;;  %v16223_v55 = vrot.slane %v16218_v43, %v23979_v34 }
 0xa4b   : > { %v16228_v39 = vadd.bf16 %v16209_v24, %v16123_v63  ;;  %v16124_v5 = vpack.c.bf16 %v15953_v11, %v15949_v47 }
 0xa4d   : > { %v16242_v53 = vmul.bf16 %v16228_v39, %v16228_v39  ;;  %v16229_v54 = vadd.bf16 %v16216_v7, %v16124_v5  ;;  %v16235_v56 = vmul.bf16 1056980736, %v16228_v39 }
 0xa4f   : > { %v16249_v42 = vmul.bf16 %v16242_v53, %v16228_v39  ;;  %v16243_v4 = vmul.bf16 %v16229_v54, %v16229_v54  ;;  %v16236_v12 = vmul.bf16 1056980736, %v16229_v54 }
 0xa51   : > { %v16256_v25 = vmul.bf16 1027030327, %v16249_v42  ;;  %v16250_v16 = vmul.bf16 %v16243_v4, %v16229_v54  ;;  %v22856_v4 = vld [vmem:[#allocation19 + $0xac] ss:$12 sps:$4 sm:$0xff]  }
 0xa52   : > { %17086 = vmatprep.subr.bf16.mxu1 %v22856_v4 }
 0xa53   : > { %v16263_v58 = vadd.bf16 %v16256_v25, %v16228_v39  ;;  %v16257_v50 = vmul.bf16 1027030327, %v16250_v16  ;;  %v22854_v25 = vld [vmem:[#allocation19 + $0xa8] ss:$12 sps:$4 sm:$0xff]   ;;  %v22857_v16 = vld [vmem:[#allocation19 + $0xb0] ss:$12 sps:$4 sm:$0xff]  }
 0xa55   : > { %v16270_v0 = vmul.bf16 1061961548, %v16263_v58  ;;  %v16264_v9 = vadd.bf16 %v16257_v50, %v16229_v54  ;;  %v22860_v58 = vld [vmem:[#allocation19 + $0x94] ss:$12 sps:$4 sm:$0xff]   ;;  %v22858_v50 = vld [vmem:[#allocation19 + $0x90] ss:$12 sps:$4 sm:$0xff]  }
 0xa57   : > { %23042 = vtanh.bf16 %v16270_v0  ;;  %v16271_v10 = vmul.bf16 1061961548, %v16264_v9  ;;  %v22861_v0 = vld [vmem:[#allocation19 + $0x98] ss:$12 sps:$4 sm:$0xff]   ;;  %v22864_v9 = vld [vmem:[#allocation19 + $0x7c] ss:$12 sps:$4 sm:$0xff]  }
 0xa59   : > { %23044 = vtanh.bf16 %v16271_v10  ;;  %v22862_v10 = vld [vmem:[#allocation19 + $0x78] ss:$12 sps:$4 sm:$0xff]  }
 0xa62   : > { %v20334_v60 = vpop.f32.mrf.mxu0 }
 0xa64   : > { %v20335_v15 = vpop.f32.mrf.mxu0 }
 0xa65   : > { %v23043_v27 = vpop.eup %23042  ;;  %v20336_v23 = vadd.f32 %v20335_v15, %v20334_v60  ;;  %v22878_v60 = vld [vmem:[#allocation19 + $0x18] ss:$12 sps:$4 sm:$0xff]  }
 0xa66   : > { %v16284_v36 = vadd.bf16 1065369472, %v23043_v27  ;;  %v20337_v48 = vpop.f32.mrf.mxu0  ;;  %v22865_v27 = vld [vmem:[#allocation19 + $0x80] ss:$12 sps:$4 sm:$0xff]   ;;  %v22884_v15 = vld [vmem:[#allocation19 + $0x4] ss:$12 sps:$4 sm:$0xff]  }
 0xa67   : > { %v23045_v38 = vpop.eup %23044  ;;  %v16031_v49 = vadd.f32 %v20336_v23, %v20314_v44 }
 0xa68   : > { %v16285_v26 = vadd.bf16 1065369472, %v23045_v38  ;;  %v16291_v46 = vmul.bf16 %v16284_v36, %v16235_v56  ;;  %v20338_v30 = vpop.f32.mrf.mxu0  ;;  %v22868_v38 = vld [vmem:[#allocation19 + $0x64] ss:$12 sps:$4 sm:$0xff]   ;;  %v22866_v36 = vld [vmem:[#allocation19 + $0x60] ss:$12 sps:$4 sm:$0xff]  }
 0xa69   : > { %v20339_v59 = vadd.f32 %v20338_v30, %v20337_v48  ;;  %v16072_v29 = vadd.f32 %v20358_v41, %v16031_v49  ;;  %v22872_v56 = vld [vmem:[#allocation19 + $0x4c] ss:$12 sps:$4 sm:$0xff]   ;;  %v22885_v48 = vld [vmem:[#allocation19 + $0x8] ss:$12 sps:$4 sm:$0xff]   ;;  %v20400_v30 = vpop.f32.mrf.mxu1 }
 0xa6a   : > { %v16292_v37 = vmul.bf16 %v16285_v26, %v16236_v12  ;;  %v22869_v12 = vld [vmem:[#allocation19 + $0x68] ss:$12 sps:$4 sm:$0xff]  }
 0xa6b   : > { %v16034_v2 = vadd.f32 %v20339_v59, %v20317_v6  ;;  %v22870_v26 = vld [vmem:[#allocation19 + $0x48] ss:$12 sps:$4 sm:$0xff]   ;;  %v20401_v51 = vpop.f32.mrf.mxu1 }
 0xa6c   : > { %16857 = vmatprep.mubr.bf16.mxu1 %v16292_v37  ;;  %v22876_v37 = vld [vmem:[#allocation19 + $0x34] ss:$12 sps:$4 sm:$0xff]  }
 0xa6d   : > { %16858 = vmatmul.mubr.bf16.vlgmr.msra.gmra.mxu1 %v16291_v46  ;;  %v16075_v24 = vadd.f32 %v20361_v33, %v16034_v2  ;;  %v22874_v46 = vld [vmem:[#allocation19 + $0x30] ss:$12 sps:$4 sm:$0xff]   ;;  %v20403_v23 = vpop.f32.mrf.mxu1 }
 0xa6e   : > { %17118 = vmatprep.mubr.bf16.mxu1 %v24997_v18  ;;  %17087 = vmatpush1.bf16.msra.mxu1 %v22854_v25  ;;  %v16406_v33 = vld [vmem:[#allocation18] sm:$0x1] }
 0xa6f   : > { %17088 = vmatprep.subr.bf16.mxu1 %v22860_v58  ;;  %v20404_v59 = vpop.f32.mrf.mxu1 }
 0xa72   : > { %17089 = vmatpush1.bf16.msra.mxu1 %v22858_v50 }
 0xa73   : > { %17090 = vmatprep.subr.bf16.mxu1 %v22864_v9 }
 0xa76   : > { %17091 = vmatpush1.bf16.msra.mxu1 %v22862_v10  ;;  %v22891_v10 = vld [vmem:[#allocation22 + $0x64] ss:$8 sps:$4 sm:$0xff]  }
 0xa77   : > { %17092 = vmatprep.subr.bf16.mxu1 %v22868_v38  ;;  %v22894_v38 = vld [vmem:[#allocation22 + $0x54] ss:$8 sps:$4 sm:$0xff]  }
 0xa7a   : > { %17093 = vmatpush1.bf16.msra.mxu1 %v22866_v36  ;;  %v22892_v36 = vld [vmem:[#allocation22 + $0x50] ss:$8 sps:$4 sm:$0xff]  }
 0xa7b   : > { %17094 = vmatprep.subr.bf16.mxu1 %v22872_v56  ;;  %v22900_v56 = vld [vmem:[#allocation22 + $0x34] ss:$8 sps:$4 sm:$0xff]  }
 0xa7e   : > { %17095 = vmatpush1.bf16.msra.mxu1 %v22870_v26  ;;  %v22895_v26 = vld [vmem:[#allocation22 + $0x40] ss:$8 sps:$4 sm:$0xff]  }
 0xa7f   : > { %17096 = vmatprep.subr.bf16.mxu1 %v22876_v37  ;;  %v22903_v37 = vld [vmem:[#allocation22 + $0x24] ss:$8 sps:$4 sm:$0xff]  }
 0xa82   : > { %v20378_v62 = vpop.f32.mrf.mxu0  ;;  %17097 = vmatpush1.bf16.msra.mxu1 %v22874_v46  ;;  %v22901_v46 = vld [vmem:[#allocation22 + $0x20] ss:$8 sps:$4 sm:$0xff]  }
 0xa83   : > { %17098 = vmatprep.subr.bf16.mxu1 %v22880_v35  ;;  %v22909_v35 = vld [vmem:[#allocation22 + $0x4] ss:$8 sps:$4 sm:$0xff]  }
 0xa84   : > { %v20379_v22 = vpop.f32.mrf.mxu0 }
 0xa85   : > { %v20380_v61 = vadd.f32 %v20379_v22, %v20378_v62 }
 0xa86   : > { %v20381_v14 = vpop.f32.mrf.mxu0  ;;  %17099 = vmatpush1.bf16.msra.mxu1 %v22878_v60  ;;  %v22907_v60 = vld [vmem:[#allocation22] ss:$8 sps:$4 sm:$0xff]  }
 0xa87   : > { %v16113_v52 = vadd.f32 %v20380_v61, %v16072_v29  ;;  %17100 = vmatprep.subr.bf16.mxu1 %v22884_v15  ;;  %v20405_v61 = vadd.f32 %v20404_v59, %v20403_v23  ;;  %v22910_v15 = vld [vmem:[#allocation22 + $0x170] ss:$8 sps:$4 sm:$0xff]   ;;  %v22919_v23 = vld [vmem:[#allocation22 + $0xe0] ss:$8 sps:$4 sm:$0xff]   ;;  %v22924_v59 = vld [vmem:[#allocation22 + $0x154] ss:$8 sps:$4 sm:$0xff]  }
 0xa88   : > { %v20382_v1 = vpop.f32.mrf.mxu0 }
 0xa89   : > { %v20383_v13 = vadd.f32 %v20382_v1, %v20381_v14 }
 0xa8a   : > { %17101 = vmatpush1.bf16.msra.mxu1 %v22882_v45  ;;  %v22915_v45 = vld [vmem:[#allocation22 + $0xf4] ss:$8 sps:$4 sm:$0xff]  }
 0xa8b   : > { %v16116_v3 = vadd.f32 %v20383_v13, %v16075_v24  ;;  %17537 = vmatprep.subr.bf16.mxu1 %v22888_v28  ;;  %v22918_v28 = vld [vmem:[#allocation22 + $0x164] ss:$8 sps:$4 sm:$0xff]  }
 0xa8d   : > { %v16125_v17 = vpack.c.bf16 %v16116_v3, %v16113_v52  ;;  %v16909_v52 = vpack.i.b16 %v16406_v33, %v16406_v33  ;;  %v22942_v33 = vld [vmem:[#allocation22 + $0x124] ss:$8 sps:$4 sm:$0xff]  }
 0xa8f   : > { %v16230_v47 = vadd.bf16 %v16223_v55, %v16125_v17 }
 0xa91   : > { %v16244_v40 = vmul.bf16 %v16230_v47, %v16230_v47  ;;  %v16237_v53 = vmul.bf16 1056980736, %v16230_v47 }
 0xa93   : > { %v16251_v63 = vmul.bf16 %v16244_v40, %v16230_v47 }
 0xa95   : > { %v16258_v11 = vmul.bf16 1027030327, %v16251_v63 }
 0xa97   : > { %v16265_v7 = vadd.bf16 %v16258_v11, %v16230_v47  ;;  %v16914_v11 = vrot.slane %v16909_v52, %v23979_v34  ;;  %v22954_v52 = vld [vmem:[#allocation22 + $0x104] ss:$8 sps:$4 sm:$0xff]  }
 0xa99   : > { %v16272_v39 = vmul.bf16 1061961548, %v16265_v7 }
 0xa9b   : > { %23046 = vtanh.bf16 %v16272_v39 }
 0xaa9   : > { %v23047_v5 = vpop.eup %23046 }
 0xaaa   : > { %v16286_v54 = vadd.bf16 1065369472, %v23047_v5 }
 0xaac   : > { %v16293_v42 = vmul.bf16 %v16286_v54, %v16237_v53 }
 0xaad   : > { %v20422_v62 = vpop.f32.mrf.mxu0 }
 0xaae   : > { %20547 = vmatmul.mubr.bf16.vlgmr.msra.gmra.mxu0 %v16293_v42 }
 0xaaf   : > { %20566 = vmatprep.mubr.msk.bf16.mxu0 %vm23582_vm0, %v24994_v32  ;;  %20551 = vmatpush3.bf16.msra.mxu0 %v22857_v16  ;;  %v20423_v6 = vpop.f32.mrf.mxu0 }
 0xab0   : > { %20552 = vmatprep.subr.bf16.mxu0 %v24994_v32  ;;  %v20424_v14 = vadd.f32 %v20423_v6, %v20422_v62  ;;  %v22922_v62 = vld [vmem:[#allocation22 + $0x150] ss:$8 sps:$4 sm:$0xff]  }
 0xab1   : > { %v20425_v21 = vpop.f32.mrf.mxu0  ;;  %v22925_v6 = vld [vmem:[#allocation22 + $0xd0] ss:$8 sps:$4 sm:$0xff]  }
 0xab3   : > { %20553 = vmatpush3.bf16.msra.mxu0 %v22861_v0  ;;  %v20426_v49 = vpop.f32.mrf.mxu0  ;;  %v22886_v0 = vld [vmem:[#allocation22 + $0x70] ss:$8 sps:$4 sm:$0xff]  }
 0xab4   : > { %20554 = vmatprep.subr.bf16.mxu0 %v24994_v32  ;;  %v20427_v41 = vadd.f32 %v20426_v49, %v20425_v21  ;;  %v22928_v21 = vld [vmem:[#allocation22 + $0x140] ss:$8 sps:$4 sm:$0xff]   ;;  %v22933_v49 = vld [vmem:[#allocation22 + $0xc4] ss:$8 sps:$4 sm:$0xff]  }
 0xab6   : > { %v16822_v13 = vadd.f32 %v20427_v41, %v20405_v61  ;;  %v22939_v41 = vld [vmem:[#allocation22 + $0xb4] ss:$8 sps:$4 sm:$0xff]   ;;  %v22940_v61 = vld [vmem:[#allocation22 + $0x120] ss:$8 sps:$4 sm:$0xff]  }
 0xab7   : > { %20555 = vmatpush3.bf16.msra.mxu0 %v22865_v27  ;;  %v22889_v27 = vld [vmem:[#allocation22 + $0x60] ss:$8 sps:$4 sm:$0xff]  }
 0xab8   : > { %20556 = vmatprep.subr.bf16.mxu0 %v24994_v32 }
 0xabb   : > { %20557 = vmatpush3.bf16.msra.mxu0 %v22869_v12  ;;  %v22897_v12 = vld [vmem:[#allocation22 + $0x44] ss:$8 sps:$4 sm:$0xff]  }
 0xabc   : > { %20558 = vmatprep.subr.bf16.mxu0 %v24994_v32 }
 0xabf   : > { %20559 = vmatpush3.bf16.msra.mxu0 %v22873_v19  ;;  %v22898_v19 = vld [vmem:[#allocation22 + $0x30] ss:$8 sps:$4 sm:$0xff]  }
 0xac0   : > { %20560 = vmatprep.subr.bf16.mxu0 %v24994_v32 }
 0xac3   : > { %20561 = vmatpush3.bf16.msra.mxu0 %v22877_v57  ;;  %v22906_v57 = vld [vmem:[#allocation22 + $0x14] ss:$8 sps:$4 sm:$0xff]  }
 0xac4   : > { %20562 = vmatprep.subr.bf16.mxu0 %v24994_v32 }
 0xac7   : > { %20563 = vmatpush3.bf16.msra.mxu0 %v22881_v20  ;;  %v22912_v20 = vld [vmem:[#allocation22 + $0x174] ss:$8 sps:$4 sm:$0xff]  }
 0xac8   : > { %20564 = vmatprep.subr.bf16.mxu0 %v24994_v32  ;;  %v20402_v32 = vadd.f32 %v20401_v51, %v20400_v30  ;;  %v22916_v30 = vld [vmem:[#allocation22 + $0x160] ss:$8 sps:$4 sm:$0xff]   ;;  %v22921_v51 = vld [vmem:[#allocation22 + $0xe4] ss:$8 sps:$4 sm:$0xff]  }
 0xaca   : > { %v16819_v24 = vadd.f32 %v20424_v14, %v20402_v32  ;;  %v22936_v14 = vld [vmem:[#allocation22 + $0x134] ss:$8 sps:$4 sm:$0xff]   ;;  %v22937_v32 = vld [vmem:[#allocation22 + $0xb0] ss:$8 sps:$4 sm:$0xff]  }
 0xacb   : > { %20565 = vmatpush3.bf16.msra.mxu0 %v22885_v48  ;;  %v22913_v48 = vld [vmem:[#allocation22 + $0xf0] ss:$8 sps:$4 sm:$0xff]  }
 0xacc   : > { %17580 = vmatprep.subr.bf16.mxu0 %v22912_v20 }
 0xb2d   : > { %v20444_v44 = vpop.f32.mrf.mxu1 }
 0xb2f   : > { %v20445_v31 = vpop.f32.mrf.mxu1 }
 0xb30   : > { %v20446_v43 = vadd.f32 %v20445_v31, %v20444_v44  ;;  %v22927_v44 = vld [vmem:[#allocation22 + $0xd4] ss:$8 sps:$4 sm:$0xff]   ;;  %v22930_v31 = vld [vmem:[#allocation22 + $0x144] ss:$8 sps:$4 sm:$0xff]  }
 0xb31   : > { %v20447_v22 = vpop.f32.mrf.mxu1 }
 0xb32   : > { %v16860_v55 = vadd.f32 %v20446_v43, %v16819_v24  ;;  %v22945_v43 = vld [vmem:[#allocation22 + $0xa4] ss:$8 sps:$4 sm:$0xff]   ;;  %v22946_v24 = vld [vmem:[#allocation22 + $0x110] ss:$8 sps:$4 sm:$0xff]  }
 0xb33   : > { %v20448_v2 = vpop.f32.mrf.mxu1 }
 0xb34   : > { %v20449_v1 = vadd.f32 %v20448_v2, %v20447_v22  ;;  %v22931_v22 = vld [vmem:[#allocation22 + $0xc0] ss:$8 sps:$4 sm:$0xff]   ;;  %v22934_v2 = vld [vmem:[#allocation22 + $0x130] ss:$8 sps:$4 sm:$0xff]  }
 0xb36   : > { %v16863_v17 = vadd.f32 %v20449_v1, %v16822_v13  ;;  %v22948_v1 = vld [vmem:[#allocation22 + $0x114] ss:$8 sps:$4 sm:$0xff]  }
 0xb37   : > { %v22951_v13 = vld [vmem:[#allocation22 + $0x94] ss:$8 sps:$4 sm:$0xff]  }
 0xb6e   : > { %v16900_v29 = vpop.f32.mrf.mxu0 }
 0xb6f   : > { %v16901_v40 = vadd.f32 %v16900_v29, %v16860_v55  ;;  %v22943_v29 = vld [vmem:[#allocation22 + $0xa0] ss:$8 sps:$4 sm:$0xff]  }
 0xb70   : > { %v20548_v3 = vpop.f32.mrf.mxu0  ;;  %v22952_v55 = vld [vmem:[#allocation22 + $0x100] ss:$8 sps:$4 sm:$0xff]  }
 0xb71   : > { %v22949_v3 = vld [vmem:[#allocation22 + $0x90] ss:$8 sps:$4 sm:$0xff]  }
 0xb72   : > { %v16903_v47 = vpop.f32.mrf.mxu0 }
 0xb73   : > { %v16904_v63 = vadd.f32 %v16903_v47, %v16863_v17  ;;  %v22957_v17 = vld [vmem:[#allocation22 + $0x84] ss:$8 sps:$4 sm:$0xff]   ;;  %v22955_v47 = vld [vmem:[#allocation22 + $0x80] ss:$8 sps:$4 sm:$0xff]  }
 0xb74   : > { %v20549_v7 = vpop.f32.mrf.mxu0 }
 0xb75   : > { %v16907_v39 = vpack.c.bf16 %v16904_v63, %v16901_v40  ;;  %v20055_v40 = vld.sshfl [vmem:[#allocation21] sm:$0x13 pattern:$0x75316420] }
 0xb76   : > { %v17188_v63 = vrot.slane %v20055_v40, %v23974_v8 }
 0xb77   : > { %v16915_v5 = vadd.bf16 %v16914_v11, %v16907_v39  ;;  %v17181_v11 = vcombine.high %v20055_v40, %v20055_v40  ;;  %v22968_v40 = vld [vmem:[%s24998_s20 + $0x50] sm:$0xff]  }
 0xb78   : > { %v17196_v7 = vcombine.high %v17188_v63, %v17188_v63 }
 0xb79   : > { %v16917_v53 = vmul.bf16 %v16915_v5, %v16915_v5  ;;  %v16916_v58 = vmul.bf16 1056980736, %v16915_v5  ;;  %v17195_v39 = vrot.slane %v17181_v11, %v23974_v8  ;;  %v22970_v11 = vld [vmem:[%s24998_s20 + $0x48] sm:$0xff]  }
 0xb7b   : > { %v16918_v54 = vmul.bf16 %v16917_v53, %v16915_v5  ;;  %v17212_v53 = vpack.i.b16 %v17196_v7, %v17196_v7  ;;  %v22971_v7 = vld [vmem:[%s24998_s20 + $0x8] sm:$0xff]  }
 0xb7d   : > { %v16919_v42 = vmul.bf16 1027030327, %v16918_v54 }
 0xb7f   : > { %v16920_v4 = vadd.bf16 %v16919_v42, %v16915_v5  ;;  %v17198_v5 = vpack.i.b16 %v17188_v63, %v17188_v63  ;;  %v22969_v63 = vld [vmem:[%s24998_s20 + $0x10] sm:$0xff]  }
 0xb81   : > { %v16921_v25 = vmul.bf16 1061961548, %v16920_v4 }
 0xb83   : > { %23048 = vtanh.bf16 %v16921_v25 }
 0xb91   : > { %v23049_v16 = vpop.eup %23048 }
 0xb92   : > { %v16923_v50 = vadd.bf16 1065369472, %v23049_v16  ;;  %v17205_v16 = vpack.i.b16 %v17195_v39, %v17195_v39  ;;  %v22972_v39 = vld [vmem:[%s24998_s20 + $0x40] sm:$0xff]  }
 0xb94   : > { %v16924_v9 = vmul.bf16 %v16923_v50, %v16916_v58  ;;  %v17203_v58 = vrot.slane %v17198_v5, %v23979_v34  ;;  %v17217_v50 = vrot.slane %v17212_v53, %v23979_v34  ;;  %v22973_v5 = vld [vmem:[%s24998_s20] sm:$0xff]   ;;  %v20104_v53 = vld.sshfl [vmem:[#allocation24] sm:$0x11 pattern:$0x75316420] }
 0xb96   : > { %17119 = vmatmul.mubr.bf16.vlgmr.msra.gmra.mxu1 %v16924_v9  ;;  %20567 = vmatmul.mubr.bf16.vlgmr.msra.gmra.mxu0 %v16924_v9 }
 0xb97   : > { %17538 = vmatpush1.bf16.msra.mxu1 %v22886_v0  ;;  %17612 = vmatprep.mubr.bf16.mxu0 %v24997_v18  ;;  %v22904_v18 = vld [vmem:[#allocation22 + $0x10] ss:$8 sps:$4 sm:$0xff]  }
 0xb98   : > { %17539 = vmatprep.subr.bf16.mxu1 %v22891_v10  ;;  %17581 = vmatpush1.bf16.msra.mxu0 %v22910_v15 }
 0xb99   : > { %17582 = vmatprep.subr.bf16.mxu0 %v22918_v28 }
 0xb9b   : > { %17540 = vmatpush1.bf16.msra.mxu1 %v22889_v27 }
 0xb9c   : > { %17541 = vmatprep.subr.bf16.mxu1 %v22894_v38  ;;  %17583 = vmatpush1.bf16.msra.mxu0 %v22916_v30 }
 0xb9d   : > { %17584 = vmatprep.subr.bf16.mxu0 %v22924_v59 }
 0xb9f   : > { %17542 = vmatpush1.bf16.msra.mxu1 %v22892_v36  ;;  %v17210_v36 = vrot.slane %v17205_v16, %v23979_v34 }
 0xba0   : > { %17543 = vmatprep.subr.bf16.mxu1 %v22897_v12  ;;  %17585 = vmatpush1.bf16.msra.mxu0 %v22922_v62 }
 0xba1   : > { %17586 = vmatprep.subr.bf16.mxu0 %v22930_v31 }
 0xba3   : > { %17544 = vmatpush1.bf16.msra.mxu1 %v22895_v26 }
 0xba4   : > { %17545 = vmatprep.subr.bf16.mxu1 %v22900_v56  ;;  %17587 = vmatpush1.bf16.msra.mxu0 %v22928_v21 }
 0xba5   : > { %17588 = vmatprep.subr.bf16.mxu0 %v22936_v14 }
 0xba7   : > { %17546 = vmatpush1.bf16.msra.mxu1 %v22898_v19 }
 0xba8   : > { %17547 = vmatprep.subr.bf16.mxu1 %v22903_v37  ;;  %17589 = vmatpush1.bf16.msra.mxu0 %v22934_v2 }
 0xba9   : > { %17590 = vmatprep.subr.bf16.mxu0 %v22942_v33 }
 0xbab   : > { %17548 = vmatpush1.bf16.msra.mxu1 %v22901_v46 }
 0xbac   : > { %17549 = vmatprep.subr.bf16.mxu1 %v22906_v57  ;;  %17591 = vmatpush1.bf16.msra.mxu0 %v22940_v61 }
 0xbad   : > { %17592 = vmatprep.subr.bf16.mxu0 %v22948_v1  ;;  %v22959_v1 = vld [vmem:[%s24998_s20 + $0x38] sm:$0xff]  }
 0xbaf   : > { %17550 = vmatpush1.bf16.msra.mxu1 %v22904_v18 }
 0xbb0   : > { %17551 = vmatprep.subr.bf16.mxu1 %v22909_v35  ;;  %17593 = vmatpush1.bf16.msra.mxu0 %v22946_v24  ;;  %v22961_v24 = vld [vmem:[%s24998_s20 + $0x30] sm:$0xff]  }
 0xbb1   : > { %17594 = vmatprep.subr.bf16.mxu0 %v22954_v52  ;;  %v22963_v52 = vld [vmem:[%s24998_s20 + $0x28] sm:$0xff]  }
 0xbb3   : > { %17552 = vmatpush1.bf16.msra.mxu1 %v22907_v60 }
 0xbb4   : > { %17553 = vmatprep.subr.bf16.mxu1 %v22915_v45  ;;  %17595 = vmatpush1.bf16.msra.mxu0 %v22952_v55  ;;  %v22965_v55 = vld [vmem:[%s24998_s20 + $0x20] sm:$0xff]  }
 0xbb7   : > { %17554 = vmatpush2.bf16.msra.mxu1 %v22913_v48 }
 0xbb8   : > { %17555 = vmatprep.subr.bf16.mxu1 %v22921_v51 }
 0xbbb   : > { %17556 = vmatpush2.bf16.msra.mxu1 %v22919_v23 }
 0xbbc   : > { %17557 = vmatprep.subr.bf16.mxu1 %v22927_v44 }
 0xbbf   : > { %17558 = vmatpush2.bf16.msra.mxu1 %v22925_v6 }
 0xbc0   : > { %17559 = vmatprep.subr.bf16.mxu1 %v22933_v49 }
 0xbc3   : > { %17560 = vmatpush2.bf16.msra.mxu1 %v22931_v22 }
 0xbc4   : > { %17561 = vmatprep.subr.bf16.mxu1 %v22939_v41 }
 0xbc7   : > { %17562 = vmatpush2.bf16.msra.mxu1 %v22937_v32 }
 0xbc8   : > { %17563 = vmatprep.subr.bf16.mxu1 %v22945_v43  ;;  %v22958_v43 = vld [vmem:[%s24998_s20 + $0x78] sm:$0xff]  }
 0xbc9   : > { %20468 = vmatprep.subr.bf16.mxu0 %v22958_v43 }
 0xbcb   : > { %17564 = vmatpush2.bf16.msra.mxu1 %v22943_v29  ;;  %v22960_v29 = vld [vmem:[%s24998_s20 + $0x70] sm:$0xff]  }
 0xbcc   : > { %17565 = vmatprep.subr.bf16.mxu1 %v22951_v13  ;;  %v22962_v13 = vld [vmem:[%s24998_s20 + $0x68] sm:$0xff]  }
 0xbcf   : > { %17566 = vmatpush2.bf16.msra.mxu1 %v22949_v3  ;;  %v22964_v3 = vld [vmem:[%s24998_s20 + $0x60] sm:$0xff]  }
 0xbd0   : > { %17567 = vmatprep.subr.bf16.mxu1 %v22957_v17  ;;  %v22966_v17 = vld [vmem:[%s24998_s20 + $0x58] sm:$0xff]  }
 0xbd3   : > { %17568 = vmatpush2.bf16.msra.mxu1 %v22955_v47  ;;  %v22967_v47 = vld [vmem:[%s24998_s20 + $0x18] sm:$0xff]  }
 0xc56   : > { %v17120_v54 = vpop.f32.mrf.mxu1  ;;  %v17163_v42 = vpop.f32.mrf.mxu0 }
 0xc58   : > { %v17122_v4 = vpop.f32.mrf.mxu1  ;;  %v20568_v25 = vpop.f32.mrf.mxu0 }
 0xc5a   : > { %v17124_v0 = vpop.f32.mrf.mxu1  ;;  %v17166_v9 = vpop.f32.mrf.mxu0 }
 0xc5b   : > { %v17170_v10 = vpack.c.bf16 %v17124_v0, %v17120_v54  ;;  %v17172_v27 = vpack.c.bf16 %v17166_v9, %v17163_v42  ;;  %v17633_v54 = vcombine.high %v20104_v53, %v20104_v53 }
 0xc5c   : > { %v17126_v38 = vpop.f32.mrf.mxu1  ;;  %v20569_v12 = vpop.f32.mrf.mxu0 }
 0xc5d   : > { %v17218_v26 = vadd.bf16 %v17203_v58, %v17170_v10  ;;  %v17220_v56 = vadd.bf16 %v17217_v50, %v17172_v27  ;;  %v17171_v19 = vpack.c.bf16 %v17126_v38, %v17122_v4  ;;  %v17640_v4 = vrot.slane %v20104_v53, %v23974_v8 }
 0xc5e   : > { %v17647_v16 = vrot.slane %v17633_v54, %v23974_v8 }
 0xc5f   : > { %v17224_v37 = vmul.bf16 %v17218_v26, %v17218_v26  ;;  %v17226_v46 = vmul.bf16 %v17220_v56, %v17220_v56  ;;  %v17219_v57 = vadd.bf16 %v17210_v36, %v17171_v19  ;;  %v17223_v31 = vmul.bf16 1056980736, %v17220_v56 }
 0xc60   : > { %v17221_v33 = vmul.bf16 1056980736, %v17218_v26  ;;  %v17649_v50 = vpack.i.b16 %v17640_v4, %v17640_v4  ;;  %v17656_v10 = vpack.i.b16 %v17647_v16, %v17647_v16 }
 0xc61   : > { %v17227_v18 = vmul.bf16 %v17224_v37, %v17218_v26  ;;  %v17229_v35 = vmul.bf16 %v17226_v46, %v17220_v56  ;;  %v17225_v60 = vmul.bf16 %v17219_v57, %v17219_v57  ;;  %v17222_v14 = vmul.bf16 1056980736, %v17219_v57 }
 0xc62   : > { %v17654_v12 = vrot.slane %v17649_v50, %v23979_v34 }
 0xc63   : > { %v17230_v20 = vmul.bf16 1027030327, %v17227_v18  ;;  %v17232_v15 = vmul.bf16 1027030327, %v17229_v35  ;;  %v17228_v45 = vmul.bf16 %v17225_v60, %v17219_v57 }
 0xc65   : > { %v17233_v48 = vadd.bf16 %v17230_v20, %v17218_v26  ;;  %v17235_v28 = vadd.bf16 %v17232_v15, %v17220_v56  ;;  %v17231_v30 = vmul.bf16 1027030327, %v17228_v45 }
 0xc67   : > { %v17236_v51 = vmul.bf16 1061961548, %v17233_v48  ;;  %v17238_v23 = vmul.bf16 1061961548, %v17235_v28  ;;  %v17234_v59 = vadd.bf16 %v17231_v30, %v17219_v57  ;;  %v17661_v57 = vrot.slane %v17656_v10, %v23979_v34 }
 0xc69   : > { %23050 = vtanh.bf16 %v17236_v51  ;;  %v17237_v62 = vmul.bf16 1061961548, %v17234_v59 }
 0xc6a   : > { %23052 = vtanh.bf16 %v17238_v23 }
 0xc6b   : > { %23054 = vtanh.bf16 %v17237_v62 }
 0xc77   : > { %v23051_v44 = vpop.eup %23050 }
 0xc78   : > { %v23053_v6 = vpop.eup %23052  ;;  %v17242_v49 = vadd.bf16 1065369472, %v23051_v44 }
 0xc79   : > { %v17244_v21 = vadd.bf16 1065369472, %v23053_v6  ;;  %v23055_v22 = vpop.eup %23054 }
 0xc7a   : > { %v17243_v41 = vadd.bf16 1065369472, %v23055_v22  ;;  %v17245_v61 = vmul.bf16 %v17242_v49, %v17221_v33 }
 0xc7b   : > { %v17247_v2 = vmul.bf16 %v17244_v21, %v17223_v31 }
 0xc7c   : > { %v17246_v32 = vmul.bf16 %v17243_v41, %v17222_v14  ;;  %v17714_v41 = vld [vmem:[#allocation25] sm:$0x1] }
 0xc7d   : > { %17613 = vmatmul.mubr.bf16.vlgmr.msra.gmra.mxu0 %v17247_v2 }
 0xc7e   : > { %17569 = vmatprep.mubr.bf16.mxu1 %v17246_v32  ;;  %20469 = vmatpush3.bf16.msra.mxu0 %v22959_v1  ;;  %v17854_v32 = vpack.i.b16 %v17714_v41, %v17714_v41 }
 0xc7f   : > { %17570 = vmatmul.mubr.bf16.vlgmr.msra.gmra.mxu1 %v17245_v61  ;;  %20470 = vmatprep.subr.bf16.mxu0 %v22960_v29 }
 0xc82   : > { %20471 = vmatpush3.bf16.msra.mxu0 %v22961_v24  ;;  %v17859_v24 = vrot.slane %v17854_v32, %v23979_v34 }
 0xc83   : > { %20472 = vmatprep.subr.bf16.mxu0 %v22962_v13 }
 0xc86   : > { %20473 = vmatpush3.bf16.msra.mxu0 %v22963_v52 }
 0xc87   : > { %20474 = vmatprep.subr.bf16.mxu0 %v22964_v3 }
 0xc8a   : > { %20475 = vmatpush3.bf16.msra.mxu0 %v22965_v55 }
 0xc8b   : > { %20476 = vmatprep.subr.bf16.mxu0 %v22966_v17 }
 0xc8e   : > { %20477 = vmatpush3.bf16.msra.mxu0 %v22967_v47 }
 0xc8f   : > { %20478 = vmatprep.subr.bf16.mxu0 %v22968_v40 }
 0xc92   : > { %20479 = vmatpush3.bf16.msra.mxu0 %v22969_v63 }
 0xc93   : > { %20480 = vmatprep.subr.bf16.mxu0 %v22970_v11 }
 0xc96   : > { %20481 = vmatpush3.bf16.msra.mxu0 %v22971_v7 }
 0xc97   : > { %20482 = vmatprep.subr.bf16.mxu0 %v22972_v39 }
 0xc9a   : > { %20483 = vmatpush3.bf16.msra.mxu0 %v22973_v5 }
 0xd3d   : > { %v17614_v42 = vpop.f32.mrf.mxu0 }
 0xd3f   : > { %v17616_v25 = vpop.f32.mrf.mxu0  ;;  %v17571_v58 = vpop.f32.mrf.mxu1 }
 0xd40   : > { %v17615_v38 = vadd.f32 %v17614_v42, %v17571_v58 }
 0xd41   : > { %v17618_v0 = vpop.f32.mrf.mxu0  ;;  %v17573_v9 = vpop.f32.mrf.mxu1 }
 0xd42   : > { %v17617_v19 = vadd.f32 %v17616_v25, %v17573_v9 }
 0xd43   : > { %v17575_v27 = vpop.f32.mrf.mxu1  ;;  %v17620_v26 = vpop.f32.mrf.mxu0 }
 0xd44   : > { %v17619_v36 = vadd.f32 %v17618_v0, %v17575_v27 }
 0xd45   : > { %v17577_v56 = vpop.f32.mrf.mxu1 }
 0xd46   : > { %v17623_v37 = vpack.c.bf16 %v17619_v36, %v17615_v38  ;;  %v17621_v46 = vadd.f32 %v17620_v26, %v17577_v56 }
 0xd48   : > { %v17662_v18 = vadd.bf16 %v17654_v12, %v17623_v37  ;;  %v17624_v35 = vpack.c.bf16 %v17621_v46, %v17617_v19 }
 0xd4a   : > { %v17666_v8 = vmul.bf16 %v17662_v18, %v17662_v18  ;;  %v17663_v60 = vadd.bf16 %v17661_v57, %v17624_v35  ;;  %v17664_v22 = vmul.bf16 1056980736, %v17662_v18 }
 0xd4c   : > { %v17668_v20 = vmul.bf16 %v17666_v8, %v17662_v18  ;;  %v17667_v15 = vmul.bf16 %v17663_v60, %v17663_v60  ;;  %v17665_v31 = vmul.bf16 1056980736, %v17663_v60 }
 0xd4e   : > { %v17670_v45 = vmul.bf16 1027030327, %v17668_v20  ;;  %v17669_v48 = vmul.bf16 %v17667_v15, %v17663_v60 }
 0xd50   : > { %v17672_v28 = vadd.bf16 %v17670_v45, %v17662_v18  ;;  %v17671_v30 = vmul.bf16 1027030327, %v17669_v48 }
 0xd52   : > { %v17674_v51 = vmul.bf16 1061961548, %v17672_v28  ;;  %v17673_v23 = vadd.bf16 %v17671_v30, %v17663_v60 }
 0xd54   : > { %23056 = vtanh.bf16 %v17674_v51  ;;  %v17675_v59 = vmul.bf16 1061961548, %v17673_v23 }
 0xd56   : > { %23058 = vtanh.bf16 %v17675_v59 }
 0xd62   : > { %v23057_v62 = vpop.eup %23056 }
 0xd63   : > { %v17678_v6 = vadd.bf16 1065369472, %v23057_v62 }
 0xd64   : > { %v23059_v44 = vpop.eup %23058 }
 0xd65   : > { %v17679_v21 = vadd.bf16 1065369472, %v23059_v44  ;;  %v17680_v2 = vmul.bf16 %v17678_v6, %v17664_v22 }
 0xd67   : > { %v17681_v49 = vmul.bf16 %v17679_v21, %v17665_v31 }
 0xd69   : > { %17843 = vmatprep.mubr.bf16.mxu0 %v17681_v49 }
 0xd6a   : > { %17844 = vmatmul.mubr.bf16.vlgmr.msra.gmra.mxu0 %v17680_v2 }
 0xe2a   : > { %v20484_v14 = vpop.f32.mrf.mxu0 }
 0xe2c   : > { %v20485_v33 = vpop.f32.mrf.mxu0 }
 0xe2d   : > { %v20486_v1 = vadd.f32 %v20485_v33, %v20484_v14 }
 0xe2e   : > { %v20487_v61 = vpop.f32.mrf.mxu0 }
 0xe30   : > { %v20488_v43 = vpop.f32.mrf.mxu0 }
 0xe31   : > { %v20489_v29 = vadd.f32 %v20488_v43, %v20487_v61 }
 0xe33   : > { %v17852_v13 = vpack.c.bf16 %v20489_v29, %v20486_v1 }
 0xe35   : > { %v17860_v52 = vadd.bf16 %v17859_v24, %v17852_v13 }
 0xe37   : > { %23060 = vtanh.bf16 %v17860_v52 }
 0xe45   : > { %v23061_v3 = vpop.eup %23060 }
 0xe46   : > { %v17862_v55 = vunpack.c.l.bf16 %v23061_v3  ;;  %v17863_v17 = vunpack.c.h.bf16 %v23061_v3 }
 0xe48   : > { %17865 = vst.msk [vmem:[%s771_s23] sm:$0xff] %vm17864_vm1, %v17862_v55  ;;  %17866 = vst.msk [vmem:[%s771_s23 + $0x8] sm:$0xff] %vm17864_vm1, %v17863_v17 }
 0xe49 PF: > { %p35_p2 = scmp.ge.s32.totalorder %s23846_s0, 5   ;;  %s25001_s24 = smov %s23542_s25 }
 0xe4a   : > { %s25002_s25 = smov %s23546_s26  ;;  %s25003_s26 = smov %s23857_s30 }
 0xe4b   : > { %s25004_s27 = smov %s23846_s0  ;;  %37 = sbr.rel (!%p35_p2) target bundleno = 19 (0x13), region = 188 }
 0xe50   :  { %17889 = vsyncpa [#allocation3], 1 }
 0xe51   :  { %17891 = vsyncpa [#allocation3 + $0x1], 1 }
 0xe52   :  { %17892 = vsyncpa [#allocation5], 1 }
 0xe53   :  { %17893 = vsyncpa [#allocation8], 1 }
 0xe54   :  { %17894 = vsyncpa [#allocation11], 1 }
 0xe55   :  { %17895 = vsyncpa [#allocation14], 1 }
 0xe56   :  { %17896 = vsyncpa [#allocation17], 1 }
 0xe57   :  { %17897 = vsyncpa [#allocation20], 1 }
 0xe58   :  { %17898 = vsyncpa [#allocation23], 1 }
 0xe59   :  { %17899 = vsyncpa [#allocation26], 1 }

</bundles_post_ra>
